<compile_context>
chip_gen: v5e
topology: v5e:2x2
jax: 0.10.0
libtpu: 0.0.40
codegen_flags: <defaults>
</compile_context>

<pallas_src>
import functools
import math

import jax
import jax.numpy as jnp
import numpy as np
from jax.experimental import pallas as pl
from jax.experimental.pallas import tpu as pltpu


# ------------------------------- utilities ----------------------------------

def _pick_tile(dim, cap, align):
    """Largest multiple of `align` that divides `dim` and is <= cap; else `dim`
    (a full-extent block is always legal for the (8,128) BlockSpec rule)."""
    t = min(cap, dim)
    t -= t % align
    while t >= align:
        if dim % t == 0:
            return t
        t -= align
    return dim


@functools.lru_cache(maxsize=1)
def _vmem_limit_bytes():
    """Generation-aware scoped-VMEM limit (~75% of physical VMEM, capped)."""
    cap = 64 * 1024 * 1024          # conservative fallback (fits v7x per-TC VMEM)
    try:
        info_cap = int(pltpu.get_tpu_info().vmem_capacity_bytes)
        if info_cap >= 32 * 1024 * 1024:
            cap = info_cap
    except Exception:
        pass
    return int(min(cap * 3 // 4, 100 * 1024 * 1024))


# --------------------------- tiled GEMM kernels ------------------------------

def qkv_gemm_kernel(x_ref, w_ref, b_ref, o_ref, acc_ref):
    """out[m, n] += x[m, k] @ w[k, n]; bias added once on the last K step."""
    k = pl.program_id(2)

    @pl.when(k == 0)
    def _():
        acc_ref[...] = jnp.zeros_like(acc_ref)

    acc_ref[...] += jnp.dot(x_ref[...], w_ref[...],
                            preferred_element_type=jnp.float32)

    @pl.when(k == pl.num_programs(2) - 1)
    def _():
        o_ref[...] = (acc_ref[...] + b_ref[...]).astype(o_ref.dtype)


def oproj_gemm_kernel(a_ref, w_ref, o_ref, acc_ref):
    """o_proj GEMM: LHS is the head-major (nH, M, D) attention output; the K
    grid axis walks over heads (no bias in o_proj)."""
    h = pl.program_id(2)

    @pl.when(h == 0)
    def _():
        acc_ref[...] = jnp.zeros_like(acc_ref)

    acc_ref[...] += jnp.dot(a_ref[0], w_ref[0],
                            preferred_element_type=jnp.float32)

    @pl.when(h == pl.num_programs(2) - 1)
    def _():
        o_ref[...] = acc_ref[...].astype(o_ref.dtype)


def fused_qkv_projection(x2d, w_qkv_t, b_qkv):
    M, K = x2d.shape
    N = w_qkv_t.shape[1]
    tm = _pick_tile(M, 512, 8)
    tn = _pick_tile(N, 512, 128)
    tk = _pick_tile(K, 1024, 128)
    grid = (M // tm, N // tn, K // tk)
    return pl.pallas_call(
        qkv_gemm_kernel,
        out_shape=jax.ShapeDtypeStruct((M, N), x2d.dtype),
        grid=grid,
        in_specs=[
            pl.BlockSpec((tm, tk), lambda m, n, k: (m, k)),
            pl.BlockSpec((tk, tn), lambda m, n, k: (k, n)),
            pl.BlockSpec((1, tn), lambda m, n, k: (0, n)),
        ],
        out_specs=pl.BlockSpec((tm, tn), lambda m, n, k: (m, n)),
        scratch_shapes=[pltpu.VMEM((tm, tn), jnp.float32)],
        compiler_params=pltpu.CompilerParams(
            dimension_semantics=("parallel", "parallel", "arbitrary"),
            vmem_limit_bytes=_vmem_limit_bytes()),
    )(x2d, w_qkv_t, b_qkv)


def output_projection(attn_hm, wo_hm):
    """attn_hm: (nH, M, D) head-major attention output.
    wo_hm: (nH, D, H) = o_proj weight transposed and split per head."""
    nH, M, D = attn_hm.shape
    N = wo_hm.shape[2]
    tm = _pick_tile(M, 512, 8)
    tn = _pick_tile(N, 512, 128)
    grid = (M // tm, N // tn, nH)
    return pl.pallas_call(
        oproj_gemm_kernel,
        out_shape=jax.ShapeDtypeStruct((M, N), attn_hm.dtype),
        grid=grid,
        in_specs=[
            pl.BlockSpec((1, tm, D), lambda m, n, h: (h, m, 0)),
            pl.BlockSpec((1, D, tn), lambda m, n, h: (h, 0, n)),
        ],
        out_specs=pl.BlockSpec((tm, tn), lambda m, n, h: (m, n)),
        scratch_shapes=[pltpu.VMEM((tm, tn), jnp.float32)],
        compiler_params=pltpu.CompilerParams(
            dimension_semantics=("parallel", "parallel", "arbitrary"),
            vmem_limit_bytes=_vmem_limit_bytes()),
    )(attn_hm, wo_hm)


# ------------------------- RoPE + head-major relayout ------------------------

def rope_kernel(x_ref, c_ref, s_ref, o_ref):
    """Apply rotary embedding to one (rows, D) head slice; write head-major."""
    x = x_ref[...].astype(jnp.float32)
    half = x.shape[-1] // 2
    # rotate_half(x) = concat(-x[..., half:], x[..., :half])
    rot = jnp.concatenate([-x[:, half:], x[:, :half]], axis=-1)
    o_ref[0] = (x * c_ref[...] + rot * s_ref[...]).astype(o_ref.dtype)


def apply_rope_heads(qkv2d, cos2d, sin2d, n_heads, head_block_offset, head_dim):
    """Read `n_heads` heads (of width D) starting at column block
    `head_block_offset` of the fused QKV output, RoPE them, and emit a
    head-major (n_heads, M, D) buffer."""
    M = qkv2d.shape[0]
    D = head_dim
    tr = _pick_tile(M, 512, 8)
    grid = (M // tr, n_heads)
    return pl.pallas_call(
        rope_kernel,
        out_shape=jax.ShapeDtypeStruct((n_heads, M, D), qkv2d.dtype),
        grid=grid,
        in_specs=[
            pl.BlockSpec((tr, D), lambda m, h: (m, head_block_offset + h)),
            # cos/sin block index does not depend on h -> DMA'd once per row tile
            pl.BlockSpec((tr, D), lambda m, h: (m, 0)),
            pl.BlockSpec((tr, D), lambda m, h: (m, 0)),
        ],
        out_specs=pl.BlockSpec((1, tr, D), lambda m, h: (h, m, 0)),
        compiler_params=pltpu.CompilerParams(
            dimension_semantics=("parallel", "arbitrary"),
            vmem_limit_bytes=_vmem_limit_bytes()),
    )(qkv2d, cos2d, sin2d)


# ----------------------- flash attention (GQA-grouped) -----------------------

def flash_attention_kernel(q_ref, k_ref, v_ref, o_ref, m_scr, l_scr, acc_scr,
                           *, n_rep, q_tile, kv_tile, head_dim, scale):
    qi = pl.program_id(2)
    ki = pl.program_id(3)
    rows = n_rep * q_tile
    D = head_dim

    @pl.when(ki == 0)
    def _init():
        m_scr[...] = jnp.full_like(m_scr, -jnp.inf)
        l_scr[...] = jnp.zeros_like(l_scr)
        acc_scr[...] = jnp.zeros_like(acc_scr)

    # Skip kv tiles that are entirely in the causal future of this q tile.
    @pl.when(ki * kv_tile < (qi + 1) * q_tile)
    def _compute():
        q = q_ref[...].reshape(rows, D)        # (n_rep*TQ, D), head-major rows
        k = k_ref[0]                           # (TK, D), already RoPE'd
        v = v_ref[...]                         # (TK, D)

        # One batched QK^T for all n_rep heads of this KV group.
        s = jax.lax.dot_general(q, k, (((1,), (1,)), ((), ())),
                                preferred_element_type=jnp.float32) * scale

        # In-kernel causal mask (row r*TQ + t has query position qi*TQ + t).
        q_pos = qi * q_tile + jax.lax.broadcasted_iota(
            jnp.int32, (n_rep, q_tile, kv_tile), 1).reshape(rows, kv_tile)
        k_pos = ki * kv_tile + jax.lax.broadcasted_iota(
            jnp.int32, (rows, kv_tile), 1)
        s = jnp.where(q_pos >= k_pos, s, -1e30)

        m_prev = m_scr[...]
        m_new = jnp.maximum(m_prev, jnp.max(s, axis=-1, keepdims=True))
        alpha = jnp.exp(m_prev - m_new)
        p = jnp.exp(s - m_new)
        l_scr[...] = alpha * l_scr[...] + jnp.sum(p, axis=-1, keepdims=True)
        acc_scr[...] = alpha * acc_scr[...] + jnp.dot(
            p.astype(v.dtype), v, preferred_element_type=jnp.float32)
        m_scr[...] = m_new

    @pl.when(ki == pl.num_programs(3) - 1)
    def _finalize():
        out = acc_scr[...] / l_scr[...]
        o_ref[...] = out.reshape(n_rep, q_tile, D).astype(o_ref.dtype)


def attention_core(q_hm, k_hm, qkv2d, B, S, num_heads, num_kv_heads, head_dim):
    """q_hm: (nH, B*S, D) RoPE'd queries (head-major; heads of KV group g are
    the contiguous range [g*n_rep, (g+1)*n_rep) — standard Qwen2 ordering).
    k_hm: (nKV, B*S, D) RoPE'd keys.  qkv2d: fused QKV output (V is read from
    its V section).  Returns head-major attention output (nH, B*S, D)."""
    n_rep = num_heads // num_kv_heads
    D = head_dim
    nH, nKV = num_heads, num_kv_heads

    TQ = _pick_tile(S, 256, 8)
    TK = _pick_tile(S, 256, 8)
    qt, kt = S // TQ, S // TK
    scale = 1.0 / math.sqrt(D)

    kernel = functools.partial(flash_attention_kernel, n_rep=n_rep,
                               q_tile=TQ, kv_tile=TK, head_dim=D, scale=scale)

    def kv_blk(qi, ki):
        # Clamp to the last causally-valid kv block so dead tiles repeat the
        # previous block index and Pallas elides their DMA.
        return jnp.minimum(ki, ((qi + 1) * TQ - 1) // TK)

    grid = (B, nKV, qt, kt)
    return pl.pallas_call(
        kernel,
        out_shape=jax.ShapeDtypeStruct((nH, B * S, D), q_hm.dtype),
        grid=grid,
        in_specs=[
            # n_rep query heads of this KV group (head-major -> contiguous)
            pl.BlockSpec((n_rep, TQ, D),
                         lambda b, g, qi, ki: (g, b * qt + qi, 0)),
            # K (pre-RoPE'd), clamped along the kv axis
            pl.BlockSpec((1, TK, D),
                         lambda b, g, qi, ki: (g, b * kt + kv_blk(qi, ki), 0)),
            # V straight out of the fused QKV GEMM output, clamped likewise
            pl.BlockSpec((TK, D),
                         lambda b, g, qi, ki: (b * kt + kv_blk(qi, ki),
                                               nH + nKV + g)),
        ],
        out_specs=pl.BlockSpec((n_rep, TQ, D),
                               lambda b, g, qi, ki: (g, b * qt + qi, 0)),
        scratch_shapes=[
            pltpu.VMEM((n_rep * TQ, 1), jnp.float32),   # running max
            pltpu.VMEM((n_rep * TQ, 1), jnp.float32),   # running sum
            pltpu.VMEM((n_rep * TQ, D), jnp.float32),   # output accumulator
        ],
        compiler_params=pltpu.CompilerParams(
            dimension_semantics=("parallel", "parallel", "parallel", "arbitrary"),
            vmem_limit_bytes=_vmem_limit_bytes()),
    )(q_hm, k_hm, qkv2d)


# -------------------------- one-time parameter prep --------------------------

def prepare_qwen2_params(params, num_heads, num_kv_heads, head_dim, dtype):
    """Hoisted out of the forward: fused QKV weight/bias, per-head o_proj."""
    w_qkv_t = jnp.concatenate(
        [params["wq"].T, params["wk"].T, params["wv"].T], axis=1).astype(dtype)
    b_qkv = jnp.concatenate(
        [params["bq"], params["bk"], params["bv"]])[None, :].astype(jnp.float32)
    wo_t = params["wo"].T.astype(dtype)                 # (nH*D, H)
    wo_hm = wo_t.reshape(num_heads, head_dim, wo_t.shape[1])
    return {"w_qkv_t": w_qkv_t, "b_qkv": b_qkv, "wo_hm": wo_hm}


def prepare_rope(cos, sin):
    """Hoisted out of the forward: f32 cast + (B*S, D) flatten."""
    B, S, D = cos.shape
    cos2d = cos.astype(jnp.float32).reshape(B * S, D)
    sin2d = sin.astype(jnp.float32).reshape(B * S, D)
    return cos2d, sin2d


# ------------------------------- full forward --------------------------------

def qwen2_attention_forward(hidden_states, attention_mask, cos2d, sin2d,
                            prepared, num_heads, num_kv_heads):
    # TODO(synk): attention_mask is assumed to be the standard causal mask; it
    # is rebuilt in-kernel from iota (arbitrary padding masks are not DMA'd).
    # TODO(synk): attention_dropout not applied (eval mode / p = 0.0).
    del attention_mask
    B, S, H = hidden_states.shape
    D = H // num_heads
    nH, nKV = num_heads, num_kv_heads
    assert nH % nKV == 0, "GQA requires num_heads % num_kv_heads == 0"

    x2d = hidden_states.reshape(B * S, H)
    qkv = fused_qkv_projection(x2d, prepared["w_qkv_t"], prepared["b_qkv"])

    # RoPE Q and K once; emit head-major layouts consumed by the attention
    # kernel (q heads of KV group g are heads g*n_rep .. g*n_rep+n_rep-1,
    # matching the standard Qwen2 / repeat_kv ordering).
    q_hm = apply_rope_heads(qkv, cos2d, sin2d, nH, 0, D)        # (nH,  B*S, D)
    k_hm = apply_rope_heads(qkv, cos2d, sin2d, nKV, nH, D)      # (nKV, B*S, D)

    attn = attention_core(q_hm, k_hm, qkv, B, S, nH, nKV, D)    # (nH, B*S, D)
    out = output_projection(attn, prepared["wo_hm"])            # (B*S, H)
    return out.reshape(B, S, H)


# ----------------------------- pure-JAX reference ----------------------------

def reference_forward(hidden_states, attention_mask, cos, sin, params,
                      num_heads, num_kv_heads):
    B, S, H = hidden_states.shape
    D = H // num_heads
    n_rep = num_heads // num_kv_heads

    q = hidden_states @ params["wq"].T + params["bq"]
    k = hidden_states @ params["wk"].T + params["bk"]
    v = hidden_states @ params["wv"].T + params["bv"]
    q = q.reshape(B, S, num_heads, D).transpose(0, 2, 1, 3)
    k = k.reshape(B, S, num_kv_heads, D).transpose(0, 2, 1, 3)
    v = v.reshape(B, S, num_kv_heads, D).transpose(0, 2, 1, 3)

    def rot_half(x):
        x1, x2 = x[..., :D // 2], x[..., D // 2:]
        return jnp.concatenate([-x2, x1], axis=-1)

    c = cos[:, None, :, :]
    s = sin[:, None, :, :]
    q = q * c + rot_half(q) * s
    k = k * c + rot_half(k) * s
    k = jnp.repeat(k, n_rep, axis=1)
    v = jnp.repeat(v, n_rep, axis=1)

    w = jnp.einsum("bhqd,bhkd->bhqk", q, k) / math.sqrt(D)
    w = w + attention_mask
    w = jax.nn.softmax(w.astype(jnp.float32), axis=-1)
    o = jnp.einsum("bhqk,bhkd->bhqd", w, v)
    o = o.transpose(0, 2, 1, 3).reshape(B, S, H)
    return o @ params["wo"].T


# ----------------------------------- main ------------------------------------

if __name__ == "__main__":
    # Small Qwen2-style config with the native head_dim=128 so tiling / layout
    # paths match real shapes (still only a few MB of data).
    B, S = 2, 256
    hidden_size = 512
    num_heads = 4
    num_kv_heads = 2
    head_dim = hidden_size // num_heads        # 128
    rope_theta = 10000.0

    key = jax.random.PRNGKey(0)
    ks = jax.random.split(key, 8)
    w_scale = 0.05
    params = {
        "wq": w_scale * jax.random.normal(ks[0], (num_heads * head_dim, hidden_size), jnp.float32),
        "bq": w_scale * jax.random.normal(ks[1], (num_heads * head_dim,), jnp.float32),
        "wk": w_scale * jax.random.normal(ks[2], (num_kv_heads * head_dim, hidden_size), jnp.float32),
        "bk": w_scale * jax.random.normal(ks[3], (num_kv_heads * head_dim,), jnp.float32),
        "wv": w_scale * jax.random.normal(ks[4], (num_kv_heads * head_dim, hidden_size), jnp.float32),
        "bv": w_scale * jax.random.normal(ks[5], (num_kv_heads * head_dim,), jnp.float32),
        "wo": w_scale * jax.random.normal(ks[6], (hidden_size, num_heads * head_dim), jnp.float32),
    }

    hidden_states = jax.random.normal(ks[7], (B, S, hidden_size), jnp.float32)

    # Rotary position embeddings (cos/sin), positions 0..S-1 for each batch.
    positions = jnp.broadcast_to(jnp.arange(S, dtype=jnp.float32)[None, :], (B, S))
    inv_freq = 1.0 / (rope_theta ** (jnp.arange(0, head_dim, 2, dtype=jnp.float32) / head_dim))
    freqs = positions[..., None] * inv_freq[None, None, :]            # (B, S, Dh/2)
    emb = jnp.concatenate([freqs, freqs], axis=-1)                    # (B, S, Dh)
    cos, sin = jnp.cos(emb), jnp.sin(emb)

    # Additive causal mask (reference only; the kernel builds it from iota).
    neg = jnp.finfo(jnp.float32).min
    causal = jnp.tril(jnp.ones((S, S), dtype=bool))
    attention_mask = jnp.where(causal, 0.0, neg)[None, None, :, :]
    attention_mask = jnp.broadcast_to(attention_mask, (B, 1, S, S)).astype(jnp.float32)

    # One-time parameter / RoPE-table preparation (hoisted out of the forward).
    prepared = prepare_qwen2_params(params, num_heads, num_kv_heads, head_dim,
                                    hidden_states.dtype)
    cos2d, sin2d = prepare_rope(cos, sin)

    out = qwen2_attention_forward(hidden_states, attention_mask, cos2d, sin2d,
                                  prepared, num_heads, num_kv_heads)
    out = jax.block_until_ready(out)

    ref = reference_forward(hidden_states, attention_mask, cos, sin,
                            params, num_heads, num_kv_heads)
    ref = jax.block_until_ready(ref)

    np.testing.assert_allclose(np.asarray(out), np.asarray(ref),
                               rtol=2e-3, atol=2e-3)
    print("KERNEL_OK")
</pallas_src>

<mosaic_0001>
module attributes {stable_mosaic.version = 11 : i64} {
  func.func @qkv_gemm_kernel(%arg0: i32, %arg1: i32, %arg2: i32, %arg3: memref<512x512xf32, #tpu.memory_space<vmem>>, %arg4: memref<512x512xf32, #tpu.memory_space<vmem>>, %arg5: memref<1x512xf32, #tpu.memory_space<vmem>>, %arg6: memref<512x512xf32, #tpu.memory_space<vmem>>, %arg7: memref<512x512xf32, #tpu.memory_space<vmem>>) attributes {dimension_semantics = [#tpu.dimension_semantics<parallel>, #tpu.dimension_semantics<parallel>, #tpu.dimension_semantics<arbitrary>], iteration_bounds = array<i64: 1, 2, 1>, scalar_prefetch = 0 : i64, scratch_operands = 1 : i64, tpu.core_type = #tpu.core_type<tc>, window_params = [{transform_indices = @transform_0, window_bounds = array<i64: 512, 512>}, {transform_indices = @transform_1, window_bounds = array<i64: 512, 512>}, {transform_indices = @transform_2, window_bounds = array<i64: 1, 512>}, {transform_indices = @transform_3, window_bounds = array<i64: 512, 512>}]} {
    %c0_i32 = arith.constant 0 : i32
    %0 = arith.cmpi eq, %arg2, %c0_i32 : i32
    %1 = arith.extui %0 : i1 to i32
    %c0_i32_0 = arith.constant 0 : i32
    %2 = arith.cmpi ne, %1, %c0_i32_0 : i32
    scf.if %2 {
      %cst_10 = arith.constant 0.000000e+00 : f32
      %12 = vector.broadcast %cst_10 : f32 to vector<512x512xf32>
      %c0_11 = arith.constant 0 : index
      %c0_12 = arith.constant 0 : index
      %13 = vector.load %arg7[%c0_11, %c0_12] : memref<512x512xf32, #tpu.memory_space<vmem>>, vector<512x512xf32>
      tpu.vector_store %arg7[%c0_11, %c0_12], %12 {strides = array<i32>} : memref<512x512xf32, #tpu.memory_space<vmem>>, vector<512x512xf32>,
    } else {
    }
    %c0 = arith.constant 0 : index
    %c0_1 = arith.constant 0 : index
    %3 = vector.load %arg7[%c0, %c0_1] : memref<512x512xf32, #tpu.memory_space<vmem>>, vector<512x512xf32>
    %c0_2 = arith.constant 0 : index
    %c0_3 = arith.constant 0 : index
    %4 = vector.load %arg3[%c0_2, %c0_3] : memref<512x512xf32, #tpu.memory_space<vmem>>, vector<512x512xf32>
    %c0_4 = arith.constant 0 : index
    %c0_5 = arith.constant 0 : index
    %5 = vector.load %arg4[%c0_4, %c0_5] : memref<512x512xf32, #tpu.memory_space<vmem>>, vector<512x512xf32>
    %cst = arith.constant dense<0.000000e+00> : vector<512x512xf32>
    %6 = tpu.matmul %4, %5, %cst {dimension_numbers = #tpu.dot_dimension_numbers<[1], [0], [0], [1], [0, 0, 1, 1], [], []>} : vector<512x512xf32>, vector<512x512xf32>, vector<512x512xf32> -> vector<512x512xf32>
    %7 = arith.addf %3, %6 : vector<512x512xf32>
    %c0_6 = arith.constant 0 : index
    %c0_7 = arith.constant 0 : index
    %8 = vector.load %arg7[%c0_6, %c0_7] : memref<512x512xf32, #tpu.memory_space<vmem>>, vector<512x512xf32>
    tpu.vector_store %arg7[%c0_6, %c0_7], %7 {strides = array<i32>} : memref<512x512xf32, #tpu.memory_space<vmem>>, vector<512x512xf32>,
    %c0_i32_8 = arith.constant 0 : i32
    %9 = arith.cmpi eq, %arg2, %c0_i32_8 : i32
    %10 = arith.extui %9 : i1 to i32
    %c0_i32_9 = arith.constant 0 : i32
    %11 = arith.cmpi ne, %10, %c0_i32_9 : i32
    scf.if %11 {
      %c0_10 = arith.constant 0 : index
      %c0_11 = arith.constant 0 : index
      %12 = vector.load %arg7[%c0_10, %c0_11] : memref<512x512xf32, #tpu.memory_space<vmem>>, vector<512x512xf32>
      %c0_12 = arith.constant 0 : index
      %c0_13 = arith.constant 0 : index
      %13 = vector.load %arg5[%c0_12, %c0_13] : memref<1x512xf32, #tpu.memory_space<vmem>>, vector<1x512xf32>
      %14 = vector.broadcast %13 : vector<1x512xf32> to vector<512x512xf32>
      %15 = arith.addf %12, %14 : vector<512x512xf32>
      %c0_14 = arith.constant 0 : index
      %c0_15 = arith.constant 0 : index
      %16 = vector.load %arg6[%c0_14, %c0_15] : memref<512x512xf32, #tpu.memory_space<vmem>>, vector<512x512xf32>
      tpu.vector_store %arg6[%c0_14, %c0_15], %15 {strides = array<i32>} : memref<512x512xf32, #tpu.memory_space<vmem>>, vector<512x512xf32>,
    } else {
    }
    return
  }
  func.func @transform_0(%arg0: i32, %arg1: i32, %arg2: i32) -> (i32, i32) {
    %c0_i32 = arith.constant 0 : i32
    return %arg0, %arg2 : i32, i32
  }
  func.func @transform_1(%arg0: i32, %arg1: i32, %arg2: i32) -> (i32, i32) {
    %c0_i32 = arith.constant 0 : i32
    return %arg2, %arg1 : i32, i32
  }
  func.func @transform_2(%arg0: i32, %arg1: i32, %arg2: i32) -> (i32, i32) {
    %c0_i32 = arith.constant 0 : i32
    %c0_i32_0 = arith.constant 0 : i32
    return %c0_i32, %arg1 : i32, i32
  }
  func.func @transform_3(%arg0: i32, %arg1: i32, %arg2: i32) -> (i32, i32) {
    %c0_i32 = arith.constant 0 : i32
    return %arg0, %arg1 : i32, i32
  }
}

</mosaic_0001>

<bundles_post_ra>
// kernel: tpu_custom_call.1
= control target key start
LH: loop header
LB: loop body
LE: loop exit
PB: predicated region body
PF: predicated region fallthrough
CT: control target
= control target key end

     0   :  { %s8150_s0 = inlined_call_operand.hbm [shape: f32[512,512], index: 0, kind: input, shape index: {}]   ;;  %s8151_s1 = inlined_call_operand.hbm [shape: f32[512,1024], index: 1, kind: input, shape index: {}]   ;;  %s8152_s2 = inlined_call_operand.hbm [shape: f32[1,1024], index: 2, kind: input, shape index: {}]   ;;  %s8153_s3 = inlined_call_operand.hbm [shape: f32[512,1024], index: 3, kind: output, shape index: {}]  }
   0x1   :  { %8156 = sst [smem:[#allocation13_spill]] %s8150_s0 }
   0x2   :  { %8157 = sst [smem:[#allocation14_spill]] %s8151_s1 }
   0x3   :  { %8 = vsyncpa [#allocation4], 0 }
   0x4   :  { %9 = vsyncpa [#allocation7], 0 }
   0x5   :  { %11 = vsyncpa [#allocation7 + $0x1], 0 }
   0x6   :  { %12 = vsyncpa [#allocation5], 0 }
   0x7   :  { %14 = vsyncpa [#allocation5 + $0x1], 0  ;;  %s7183_s12 = smov 0   ;;  %s7185_s13 = smov 0  }
   0x8   :  { %s7187_s14 = smov 0   ;;  %s7189_s15 = smov 0  }
   0x9   :  { %s7191_s16 = smov 0   ;;  %s7193_s17 = smov 0  }
   0xa LB: > { %s35_s18 = sadd.s32 1, %s7150_s16  ;;  %s76_s19 = sadd.s32 1, %s7142_s14  ;;  %s7154_s17 = sphi %s7193_s17, %s20_s17   ;;  %s7150_s16 = sphi %s7191_s16, %s8172_s16   ;;  %s7146_s15 = sphi %s7189_s15, %s8171_s15   ;;  %s7142_s14 = sphi %s7187_s14, %s8170_s14   ;;  %s7138_s13 = sphi %s7185_s13, %s8169_s13   ;;  %s7134_s12 = sphi %s7183_s12, %s8168_s12  }
   0xb   : > { %p37_p0 = scmp.ge.s32.totalorder %s35_s18, 2  ;;  %p83_p1 = scmp.ne.s32.totalorder %s7142_s14, %s7138_s13 }
   0xc   : > { %p84_p2 = scmp.eq.s32.totalorder %s7154_s17, 0  ;;  %p6105_p4 = scmp.ge.s32.totalorder %s7154_s17, 2 }
   0xd   : > { %s8174_s18 = smov (%p37_p0, %s35_s18), 0  ;;  %p6149_p6 = scmp.lt.s32.totalorder %s7154_s17, 2 }
   0xe   : > { %p7223_p3 = por %p84_p2, %p83_p1  ;;  %s72_s21 = ssub.s32 %s7150_s16, %s8174_s18 }
   0xf   : > { %p74_p5 = scmp.eq.s32.totalorder %s72_s21, 0  ;;  %s187_s22 = sand.u32 1, %s7154_s17  }
  0x10   : > { %s189_s23 = sand.u32 1, %s7142_s14   ;;  %s6121_s26 = sshll.u32 %s7150_s16, 5 }
  0x11   : > { %s7234_s24 = scalar_select %p74_p5, %s7142_s14, %s76_s19  }
  0x12   : > { %s6106_s25 = sshll.u32 %s189_s23, 11  ;;  %s8159_s1 = sld [smem:[#allocation14_spill]] }
  0x13   : > { %s191_s30 = scalar_lea.vmem [#allocation6], %s6106_s25  ;;  %p7244_p7 = pnand %p6149_p6, %p7223_p3 }
  0x14   : > { %s202_s4 = sshll.u32 %s191_s30, 4  ;;  %s7248_s7 = scalar_lea.sflag [#allocation7], %s187_s22  ;;  %s203_s4 = int_to_ptr.vmem [resolvable:$true] %s202_s4 }
  0x15   : > { %s7156_s8 = smov 1024   ;;  %s8154_s9 = smov 512  }
  0x16   : > { %s8155_s10 = smov 32   ;;  %s7256_s11 = sadd.s32 4294967295, %s7154_s17  }
  0x17   : > { %s6102_s19 = sadd.s32 4294967294, %s7154_s17   ;;  %p89_p8 = scmp.ne.s32.totalorder %s7138_s13, %s7134_s12 }
  0x18   : > { %s199_s29 = scalar_lea.hbm %s8159_s1, %s6121_s26  ;;  %p90_p9 = scmp.eq.s32.totalorder %s7256_s11, 0 }
  0x19   : > { %s200_s5 = sshll.u32 %s199_s29, 4  ;;  %p141_p10 = scmp.eq.s32.totalorder %s7256_s11, 1  ;;  %s201_s5 = int_to_ptr.hbm [resolvable:$true] %s200_s5 }
  0x1a   : > { %6140 = dma.hbm_to_vmem [thread:$0]  (!%p7244_p7), %s201_s5, 32768, %s203_s4, %s7248_s7, %s7156_s8, %s8154_s9, %s8155_s10  }
  0x1b   : > { %p147_p11 = scmp.eq.s32.totalorder %s6102_s19, 1  ;;  %p7265_p12 = por %p90_p9, %p89_p8 }
  0x1c   : > { %p6103_p13 = scmp.ge.s32.totalorder %s7154_s17, 1  ;;  %p7273_p0 = por %p141_p10, %p83_p1 }
  0x1d   : > { %p7277_p2 = por %p147_p11, %p89_p8  ;;  %p154_p3 = scmp.lt.s32.totalorder %s7154_s17, 3 }
  0x1e   : > { %s8164_s0 = sld [smem:[#allocation13_spill]]  ;;  %s7159_s29 = smov [#allocation3]  }
  0x1f   : > { %p7285_p5 = pnand %p6103_p13, %p154_p3  ;;  %s173_s30 = sshll.u32 %s7159_s29, 4  ;;  %s174_s30 = int_to_ptr.vmem [resolvable:$true] %s173_s30 }
  0x20   : > { %s6109_s4 = sshll.u32 %s189_s23, 2  ;;  %s6110_s5 = sshll.u32 %s7150_s16, 2 }
  0x21   : > { %p6133_p1 = pneg %p7285_p5  ;;  %s220_s25 = scalar_lea.hbm %s8152_s2, %s6110_s5 }
  0x22   : > { %s222_s26 = sshll.u32 %s220_s25, 4  ;;  %s216_s9 = scalar_lea.vmem [#allocation8], %s6109_s4  ;;  %s223_s26 = int_to_ptr.hbm [resolvable:$true] %s222_s26 }
  0x23   : > { %p6134_p6 = pnand %p6133_p1, %p90_p9  ;;  %s224_s10 = sshll.u32 %s216_s9, 4  ;;  %s225_s10 = int_to_ptr.vmem [resolvable:$true] %s224_s10 }
  0x24   : > { %s171_s27 = sshll.u32 %s8164_s0, 4  ;;  %s8166_s0 = smov 32   ;;  %s172_s27 = int_to_ptr.hbm [resolvable:$true] %s171_s27 }
  0x25   : > { %s8167_s1 = smov 512   ;;  %233 = sbr.rel (%p7285_p5) target bundleno = 2292 (0x8f4), region = 32 }
  0x26   : > { %6136 = dma.hbm_to_vmem [thread:$0]  (!%p6134_p6), %s172_s27, 32768, %s174_s30, [#allocation4], %s8167_s1, %s8167_s1, %s8166_s0  }
  0x27   : > { %6143 = dma.hbm_to_vmem [thread:$0]  (!%p7244_p7), %s223_s26, 64, %s225_s10, %s7248_s7  }
  0x2a   : > { %7121 = dma.done.wait (%p90_p9), [#allocation4], 32768  }
  0x2b   : > { %7123 = vsyncadd (%p90_p9), [#allocation4], 4294934528  ;;  %s240_s23 = sand.u32 1, %s7256_s11   ;;  %s7313_s9 = sand.u32 1, %s7138_s13  }
  0x2c   : > { %s6113_s0 = sshll.u32 %s7313_s9, 11  ;;  %s241_s1 = scalar_lea.sflag [#allocation7], %s240_s23 }
  0x2d   : > { %s7318_s6 = scalar_lea.vmem [#allocation6], %s6113_s0 }
  0x2e   : > { %7125 = dma.done.wait (%p7265_p12), %s241_s1, 32832  }
  0x2f   : > { %7127 = vsyncadd (%p7265_p12), %s241_s1, 4294934464  ;;  %v1250_v0 = vld [vmem:[%s7318_s6 + $0x5e0] sm:$0xff]  ;;  %v808_v62 = vld [vmem:[#allocation3 + $0x10] sm:$0xff]  ;;  %s6114_s7 = sshll.u32 %s7313_s9, 2  ;;  %s7421_s11 = scalar_lea.vmem [#allocation9], %s6113_s0 }
  0x30   : > { %v1246_v1 = vld [vmem:[%s7318_s6 + $0x5c0] sm:$0xff]  ;;  %1736 = vmatpush.msra.mxu2 %v1250_v0  ;;  %v809_v63 = vld [vmem:[#allocation3 + $0x18] sm:$0xff]  ;;  %v1251_v0 = vld [vmem:[%s7318_s6 + $0x5e8] sm:$0xff]  ;;  %s7409_s10 = scalar_lea.vmem [#allocation8], %s6114_s7  ;;  %s6122_s20 = sshll.u32 %s7146_s15, 5 }
  0x31   : > { %v1314_v2 = vld [vmem:[%s7318_s6 + $0x7e0] sm:$0xff]  ;;  %s5970_s29 = scalar_lea.hbm %s8153_s3, %s6122_s20  ;;  %s5971_s30 = sshll.u32 %s7421_s11, 4  ;;  %s5972_s30 = int_to_ptr.vmem [resolvable:$true] %s5971_s30 }
  0x32   : > { %1945 = vmatpush.msra.mxu3 %v1314_v2  ;;  %v1122_v3 = vld [vmem:[%s7318_s6 + $0x1e0] sm:$0xff]  ;;  %1737 = vmatpush.msra.mxu2 %v1246_v1  ;;  %v1315_v1 = vld [vmem:[%s7318_s6 + $0x7e8] sm:$0xff]  ;;  %s5973_s4 = sshll.u32 %s5970_s29, 4  ;;  %s5956_s15 = scalar_lea.sflag [#allocation5], %s7313_s9  ;;  %s5974_s4 = int_to_ptr.hbm [resolvable:$true] %s5973_s4 }
  0x33   : > { %v1186_v4 = vld [vmem:[%s7318_s6 + $0x3e0] sm:$0xff]  ;;  %1318 = vmatpush.msra.mxu0 %v1122_v3  ;;  %s7082_s5 = sshra.s32 %s5974_s4, 4  ;;  %s7088_s26 = scalar_lea.hbm %s8153_s3, 4096  ;;  %s7083_s5 = int_to_ptr.hbm [resolvable:$true] %s7082_s5 }
  0x34   : > { %v1242_v5 = vld [vmem:[%s7318_s6 + $0x5a0] sm:$0xff]  ;;  %1527 = vmatpush.msra.mxu1 %v1186_v4  ;;  %s7084_s8 = scalar_lea.hbm %s7083_s5, 2048  ;;  %p7089_p10 = scmp.lt.s32.totalorder %s7083_s5, %s8153_s3 }
  0x35   : > { %v1310_v6 = vld [vmem:[%s7318_s6 + $0x7c0] sm:$0xff]  ;;  %1738 = vmatpush.msra.mxu2 %v1242_v5  ;;  %v807_v5 = vld [vmem:[#allocation3 + $0x8] sm:$0xff]  ;;  %p7085_p7 = scmp.ne.s32.totalorder %s7083_s5, %s7084_s8  ;;  %p7090_p11 = scmp.lt.s32.totalorder %s7088_s26, %s7084_s8 }
  0x36   : > { %v1118_v7 = vld [vmem:[%s7318_s6 + $0x1c0] sm:$0xff]  ;;  %1946 = vmatpush.msra.mxu3 %v1310_v6  ;;  %v1123_v6 = vld [vmem:[%s7318_s6 + $0x1e8] sm:$0xff] }
  0x37   : > { %v1182_v8 = vld [vmem:[%s7318_s6 + $0x3c0] sm:$0xff]  ;;  %1319 = vmatpush.msra.mxu0 %v1118_v7  ;;  %v1187_v7 = vld [vmem:[%s7318_s6 + $0x3e8] sm:$0xff]  ;;  %p7086_p8 = pnand %p7085_p7, %p7273_p0  ;;  %p7091_p12 = por %p7090_p11, %p7089_p10 }
  0x38   : > { %v1306_v9 = vld [vmem:[%s7318_s6 + $0x7a0] sm:$0xff]  ;;  %1528 = vmatpush.msra.mxu1 %v1182_v8  ;;  %v1247_v8 = vld [vmem:[%s7318_s6 + $0x5c8] sm:$0xff] }
  0x39   : > { %v1114_v10 = vld [vmem:[%s7318_s6 + $0x1a0] sm:$0xff]  ;;  %1947 = vmatpush.msra.mxu3 %v1306_v9  ;;  %v1311_v9 = vld [vmem:[%s7318_s6 + $0x7c8] sm:$0xff]  ;;  %p7087_p9 = pneg %p7086_p8 }
  0x3a   : > { %v1238_v11 = vld [vmem:[%s7318_s6 + $0x580] sm:$0xff]  ;;  %1320 = vmatpush.msra.mxu0 %v1114_v10  ;;  %v1119_v10 = vld [vmem:[%s7318_s6 + $0x1c8] sm:$0xff] }
  0x3b   : > { %v1178_v12 = vld [vmem:[%s7318_s6 + $0x3a0] sm:$0xff]  ;;  %1739 = vmatpush.msra.mxu2 %v1238_v11  ;;  %v1183_v11 = vld [vmem:[%s7318_s6 + $0x3c8] sm:$0xff]  ;;  %p7092_p13 = pnand %p7091_p12, %p7087_p9 }
  0x3c   : > { %v1302_v13 = vld [vmem:[%s7318_s6 + $0x780] sm:$0xff]  ;;  %1529 = vmatpush.msra.mxu1 %v1178_v12  ;;  %v812_v12 = vld [vmem:[#allocation3 + $0x30] sm:$0xff] }
  0x3d   : > { %v1110_v14 = vld [vmem:[%s7318_s6 + $0x180] sm:$0xff]  ;;  %1948 = vmatpush.msra.mxu3 %v1302_v13  ;;  %v813_v13 = vld [vmem:[#allocation3 + $0x38] sm:$0xff] }
  0x3e   : > { %v1174_v15 = vld [vmem:[%s7318_s6 + $0x380] sm:$0xff]  ;;  %1321 = vmatpush.msra.mxu0 %v1110_v14 }
  0x3f   : > { %v1234_v16 = vld [vmem:[%s7318_s6 + $0x560] sm:$0xff]  ;;  %1530 = vmatpush.msra.mxu1 %v1174_v15  ;;  %v811_v15 = vld [vmem:[#allocation3 + $0x28] sm:$0xff] }
  0x40   : > { %v1298_v17 = vld [vmem:[%s7318_s6 + $0x760] sm:$0xff]  ;;  %1740 = vmatpush.msra.mxu2 %v1234_v16  ;;  %v816_v16 = vld [vmem:[#allocation3 + $0x50] sm:$0xff] }
  0x41   : > { %v1106_v18 = vld [vmem:[%s7318_s6 + $0x160] sm:$0xff]  ;;  %1949 = vmatpush.msra.mxu3 %v1298_v17  ;;  %v817_v17 = vld [vmem:[#allocation3 + $0x58] sm:$0xff] }
  0x42   : > { %v1170_v19 = vld [vmem:[%s7318_s6 + $0x360] sm:$0xff]  ;;  %1322 = vmatpush.msra.mxu0 %v1106_v18 }
  0x43   : > { %v1230_v20 = vld [vmem:[%s7318_s6 + $0x540] sm:$0xff]  ;;  %1531 = vmatpush.msra.mxu1 %v1170_v19  ;;  %v815_v19 = vld [vmem:[#allocation3 + $0x48] sm:$0xff] }
  0x44   : > { %v1294_v21 = vld [vmem:[%s7318_s6 + $0x740] sm:$0xff]  ;;  %1741 = vmatpush.msra.mxu2 %v1230_v20  ;;  %v820_v20 = vld [vmem:[#allocation3 + $0x70] sm:$0xff] }
  0x45   : > { %v1102_v22 = vld [vmem:[%s7318_s6 + $0x140] sm:$0xff]  ;;  %1950 = vmatpush.msra.mxu3 %v1294_v21  ;;  %v821_v21 = vld [vmem:[#allocation3 + $0x78] sm:$0xff] }
  0x46   : > { %v1166_v23 = vld [vmem:[%s7318_s6 + $0x340] sm:$0xff]  ;;  %1323 = vmatpush.msra.mxu0 %v1102_v22 }
  0x47   : > { %v1226_v24 = vld [vmem:[%s7318_s6 + $0x520] sm:$0xff]  ;;  %1532 = vmatpush.msra.mxu1 %v1166_v23  ;;  %v819_v23 = vld [vmem:[#allocation3 + $0x68] sm:$0xff] }
  0x48   : > { %v1290_v25 = vld [vmem:[%s7318_s6 + $0x720] sm:$0xff]  ;;  %1742 = vmatpush.msra.mxu2 %v1226_v24  ;;  %v824_v24 = vld [vmem:[#allocation3 + $0x90] sm:$0xff] }
  0x49   : > { %v1098_v26 = vld [vmem:[%s7318_s6 + $0x120] sm:$0xff]  ;;  %1951 = vmatpush.msra.mxu3 %v1290_v25  ;;  %v825_v25 = vld [vmem:[#allocation3 + $0x98] sm:$0xff] }
  0x4a   : > { %v1162_v27 = vld [vmem:[%s7318_s6 + $0x320] sm:$0xff]  ;;  %1324 = vmatpush.msra.mxu0 %v1098_v26 }
  0x4b   : > { %v1222_v28 = vld [vmem:[%s7318_s6 + $0x500] sm:$0xff]  ;;  %1533 = vmatpush.msra.mxu1 %v1162_v27  ;;  %v823_v27 = vld [vmem:[#allocation3 + $0x88] sm:$0xff] }
  0x4c   : > { %v1286_v29 = vld [vmem:[%s7318_s6 + $0x700] sm:$0xff]  ;;  %1743 = vmatpush.msra.mxu2 %v1222_v28  ;;  %v1243_v28 = vld [vmem:[%s7318_s6 + $0x5a8] sm:$0xff] }
  0x4d   : > { %v1094_v30 = vld [vmem:[%s7318_s6 + $0x100] sm:$0xff]  ;;  %1952 = vmatpush.msra.mxu3 %v1286_v29  ;;  %v1307_v29 = vld [vmem:[%s7318_s6 + $0x7a8] sm:$0xff] }
  0x4e   : > { %v1158_v31 = vld [vmem:[%s7318_s6 + $0x300] sm:$0xff]  ;;  %1325 = vmatpush.msra.mxu0 %v1094_v30  ;;  %v1115_v30 = vld [vmem:[%s7318_s6 + $0x1a8] sm:$0xff] }
  0x4f   : > { %v1218_v32 = vld [vmem:[%s7318_s6 + $0x4e0] sm:$0xff]  ;;  %1534 = vmatpush.msra.mxu1 %v1158_v31  ;;  %v1179_v31 = vld [vmem:[%s7318_s6 + $0x3a8] sm:$0xff] }
  0x50   : > { %v1282_v33 = vld [vmem:[%s7318_s6 + $0x6e0] sm:$0xff]  ;;  %1744 = vmatpush.msra.mxu2 %v1218_v32  ;;  %v828_v32 = vld [vmem:[#allocation3 + $0xb0] sm:$0xff] }
  0x51   : > { %v1090_v34 = vld [vmem:[%s7318_s6 + $0xe0] sm:$0xff]  ;;  %1953 = vmatpush.msra.mxu3 %v1282_v33  ;;  %v829_v33 = vld [vmem:[#allocation3 + $0xb8] sm:$0xff] }
  0x52   : > { %v1154_v35 = vld [vmem:[%s7318_s6 + $0x2e0] sm:$0xff]  ;;  %1326 = vmatpush.msra.mxu0 %v1090_v34 }
  0x53   : > { %v1214_v36 = vld [vmem:[%s7318_s6 + $0x4c0] sm:$0xff]  ;;  %1535 = vmatpush.msra.mxu1 %v1154_v35  ;;  %v827_v35 = vld [vmem:[#allocation3 + $0xa8] sm:$0xff] }
  0x54   : > { %v1278_v37 = vld [vmem:[%s7318_s6 + $0x6c0] sm:$0xff]  ;;  %1745 = vmatpush.msra.mxu2 %v1214_v36  ;;  %v832_v36 = vld [vmem:[#allocation3 + $0xd0] sm:$0xff] }
  0x55   : > { %v1086_v38 = vld [vmem:[%s7318_s6 + $0xc0] sm:$0xff]  ;;  %1954 = vmatpush.msra.mxu3 %v1278_v37  ;;  %v833_v37 = vld [vmem:[#allocation3 + $0xd8] sm:$0xff] }
  0x56   : > { %v1150_v39 = vld [vmem:[%s7318_s6 + $0x2c0] sm:$0xff]  ;;  %1327 = vmatpush.msra.mxu0 %v1086_v38 }
  0x57   : > { %v1210_v40 = vld [vmem:[%s7318_s6 + $0x4a0] sm:$0xff]  ;;  %1536 = vmatpush.msra.mxu1 %v1150_v39  ;;  %v831_v39 = vld [vmem:[#allocation3 + $0xc8] sm:$0xff] }
  0x58   : > { %v1274_v41 = vld [vmem:[%s7318_s6 + $0x6a0] sm:$0xff]  ;;  %1746 = vmatpush.msra.mxu2 %v1210_v40  ;;  %v836_v40 = vld [vmem:[#allocation3 + $0xf0] sm:$0xff] }
  0x59   : > { %v1082_v42 = vld [vmem:[%s7318_s6 + $0xa0] sm:$0xff]  ;;  %1955 = vmatpush.msra.mxu3 %v1274_v41  ;;  %v837_v41 = vld [vmem:[#allocation3 + $0xf8] sm:$0xff] }
  0x5a   : > { %v1146_v43 = vld [vmem:[%s7318_s6 + $0x2a0] sm:$0xff]  ;;  %1328 = vmatpush.msra.mxu0 %v1082_v42 }
  0x5b   : > { %v1206_v44 = vld [vmem:[%s7318_s6 + $0x480] sm:$0xff]  ;;  %1537 = vmatpush.msra.mxu1 %v1146_v43  ;;  %v835_v43 = vld [vmem:[#allocation3 + $0xe8] sm:$0xff] }
  0x5c   : > { %v1270_v45 = vld [vmem:[%s7318_s6 + $0x680] sm:$0xff]  ;;  %1747 = vmatpush.msra.mxu2 %v1206_v44  ;;  %v840_v44 = vld [vmem:[#allocation3 + $0x110] sm:$0xff] }
  0x5d   : > { %v1078_v46 = vld [vmem:[%s7318_s6 + $0x80] sm:$0xff]  ;;  %1956 = vmatpush.msra.mxu3 %v1270_v45  ;;  %v841_v45 = vld [vmem:[#allocation3 + $0x118] sm:$0xff] }
  0x5e   : > { %v1142_v47 = vld [vmem:[%s7318_s6 + $0x280] sm:$0xff]  ;;  %1329 = vmatpush.msra.mxu0 %v1078_v46 }
  0x5f   : > { %v1202_v48 = vld [vmem:[%s7318_s6 + $0x460] sm:$0xff]  ;;  %1538 = vmatpush.msra.mxu1 %v1142_v47  ;;  %v839_v47 = vld [vmem:[#allocation3 + $0x108] sm:$0xff] }
  0x60   : > { %v1266_v49 = vld [vmem:[%s7318_s6 + $0x660] sm:$0xff]  ;;  %1748 = vmatpush.msra.mxu2 %v1202_v48  ;;  %v1239_v48 = vld [vmem:[%s7318_s6 + $0x588] sm:$0xff] }
  0x61   : > { %v1074_v50 = vld [vmem:[%s7318_s6 + $0x60] sm:$0xff]  ;;  %1957 = vmatpush.msra.mxu3 %v1266_v49  ;;  %v1303_v49 = vld [vmem:[%s7318_s6 + $0x788] sm:$0xff] }
  0x62   : > { %v1138_v51 = vld [vmem:[%s7318_s6 + $0x260] sm:$0xff]  ;;  %1330 = vmatpush.msra.mxu0 %v1074_v50  ;;  %v1111_v50 = vld [vmem:[%s7318_s6 + $0x188] sm:$0xff] }
  0x63   : > { %v1198_v52 = vld [vmem:[%s7318_s6 + $0x440] sm:$0xff]  ;;  %1539 = vmatpush.msra.mxu1 %v1138_v51  ;;  %v1175_v51 = vld [vmem:[%s7318_s6 + $0x388] sm:$0xff] }
  0x64   : > { %v1262_v53 = vld [vmem:[%s7318_s6 + $0x640] sm:$0xff]  ;;  %1749 = vmatpush.msra.mxu2 %v1198_v52  ;;  %v844_v52 = vld [vmem:[#allocation3 + $0x130] sm:$0xff] }
  0x65   : > { %v1070_v54 = vld [vmem:[%s7318_s6 + $0x40] sm:$0xff]  ;;  %1958 = vmatpush.msra.mxu3 %v1262_v53  ;;  %v845_v53 = vld [vmem:[#allocation3 + $0x138] sm:$0xff] }
  0x66   : > { %v1134_v55 = vld [vmem:[%s7318_s6 + $0x240] sm:$0xff]  ;;  %1331 = vmatpush.msra.mxu0 %v1070_v54 }
  0x67   : > { %v1194_v56 = vld [vmem:[%s7318_s6 + $0x420] sm:$0xff]  ;;  %1540 = vmatpush.msra.mxu1 %v1134_v55  ;;  %v843_v55 = vld [vmem:[#allocation3 + $0x128] sm:$0xff] }
  0x68   : > { %v1258_v57 = vld [vmem:[%s7318_s6 + $0x620] sm:$0xff]  ;;  %1750 = vmatpush.msra.mxu2 %v1194_v56  ;;  %v848_v56 = vld [vmem:[#allocation3 + $0x150] sm:$0xff] }
  0x69   : > { %v1066_v58 = vld [vmem:[%s7318_s6 + $0x20] sm:$0xff]  ;;  %1959 = vmatpush.msra.mxu3 %v1258_v57  ;;  %v849_v57 = vld [vmem:[#allocation3 + $0x158] sm:$0xff] }
  0x6a   : > { %v1130_v59 = vld [vmem:[%s7318_s6 + $0x220] sm:$0xff]  ;;  %1332 = vmatpush.msra.mxu0 %v1066_v58 }
  0x6b   : > { %v1190_v60 = vld [vmem:[%s7318_s6 + $0x400] sm:$0xff]  ;;  %1541 = vmatpush.msra.mxu1 %v1130_v59  ;;  %v847_v59 = vld [vmem:[#allocation3 + $0x148] sm:$0xff] }
  0x6c   : > { %v1254_v61 = vld [vmem:[%s7318_s6 + $0x600] sm:$0xff]  ;;  %1751 = vmatpush.msra.mxu2 %v1190_v60  ;;  %v852_v60 = vld [vmem:[#allocation3 + $0x170] sm:$0xff] }
  0x6d   : > { %1960 = vmatpush.msra.mxu3 %v1254_v61  ;;  %v1062_v2 = vld [vmem:[%s7318_s6] sm:$0xff]  ;;  %1752 = vmatmul.f32.vlgmr.msra.gmra.mxu2 %v808_v62  ;;  %v853_v61 = vld [vmem:[#allocation3 + $0x178] sm:$0xff] }
  0x6e   : > { %v1126_v3 = vld [vmem:[%s7318_s6 + $0x200] sm:$0xff]  ;;  %1961 = vmatmul.f32.vlgmr.msra.gmra.mxu3 %v809_v63  ;;  %2572 = vmatpush.msrb.mxu2 %v1251_v0  ;;  %v851_v63 = vld [vmem:[#allocation3 + $0x168] sm:$0xff]  ;;  %v856_v0 = vld [vmem:[#allocation3 + $0x190] sm:$0xff] }
  0x6f   : > { %v806_v4 = vld [vmem:[#allocation3] sm:$0xff]  ;;  %2781 = vmatpush.msrb.mxu3 %v1315_v1  ;;  %1333 = vmatpush.msra.mxu0 %v1062_v2  ;;  %v857_v1 = vld [vmem:[#allocation3 + $0x198] sm:$0xff] }
  0x70   : > { %1542 = vmatpush.msra.mxu1 %v1126_v3  ;;  %1334 = vmatmul.f32.vlgmr.msra.gmra.mxu0 %v806_v4  ;;  %v810_v14 = vld [vmem:[#allocation3 + $0x20] sm:$0xff]  ;;  %v855_v3 = vld [vmem:[#allocation3 + $0x188] sm:$0xff] }
  0x71   : > { %1543 = vmatmul.f32.vlgmr.msra.gmra.mxu1 %v807_v5  ;;  %2154 = vmatpush.msrb.mxu0 %v1123_v6  ;;  %v814_v18 = vld [vmem:[#allocation3 + $0x40] sm:$0xff]  ;;  %v1235_v4 = vld [vmem:[%s7318_s6 + $0x568] sm:$0xff] }
  0x72   : > { %2363 = vmatpush.msrb.mxu1 %v1187_v7  ;;  %2573 = vmatpush.msrb.mxu2 %v1247_v8  ;;  %v818_v22 = vld [vmem:[#allocation3 + $0x60] sm:$0xff]  ;;  %v1299_v5 = vld [vmem:[%s7318_s6 + $0x768] sm:$0xff]  ;;  %v860_v8 = vld [vmem:[#allocation3 + $0x1b0] sm:$0xff] }
  0x73   : > { %2782 = vmatpush.msrb.mxu3 %v1311_v9  ;;  %2155 = vmatpush.msrb.mxu0 %v1119_v10  ;;  %v822_v26 = vld [vmem:[#allocation3 + $0x80] sm:$0xff]  ;;  %v1107_v6 = vld [vmem:[%s7318_s6 + $0x168] sm:$0xff]  ;;  %v861_v9 = vld [vmem:[#allocation3 + $0x1b8] sm:$0xff] }
  0x74   : > { %2364 = vmatpush.msrb.mxu1 %v1183_v11  ;;  %2574 = vmatpush.msrb.mxu2 %v1243_v28  ;;  %v826_v34 = vld [vmem:[#allocation3 + $0xa0] sm:$0xff]  ;;  %v1171_v7 = vld [vmem:[%s7318_s6 + $0x368] sm:$0xff] }
  0x75   : > { %1755 = vmatmul.f32.gmra.mxu2 %v812_v12  ;;  %2783 = vmatpush.msrb.mxu3 %v1307_v29  ;;  %v830_v38 = vld [vmem:[#allocation3 + $0xc0] sm:$0xff]  ;;  %v859_v11 = vld [vmem:[#allocation3 + $0x1a8] sm:$0xff]  ;;  %v864_v12 = vld [vmem:[#allocation3 + $0x1d0] sm:$0xff] }
  0x76   : > { %1964 = vmatmul.f32.gmra.mxu3 %v813_v13  ;;  %2156 = vmatpush.msrb.mxu0 %v1115_v30  ;;  %v834_v42 = vld [vmem:[#allocation3 + $0xe0] sm:$0xff]  ;;  %v865_v13 = vld [vmem:[#allocation3 + $0x1d8] sm:$0xff]  ;;  %v1231_v28 = vld [vmem:[%s7318_s6 + $0x548] sm:$0xff] }
  0x77   : > { %2365 = vmatpush.msrb.mxu1 %v1179_v31  ;;  %v838_v46 = vld [vmem:[#allocation3 + $0x100] sm:$0xff]  ;;  %2575 = vmatpush.msrb.mxu2 %v1239_v48  ;;  %v1295_v29 = vld [vmem:[%s7318_s6 + $0x748] sm:$0xff]  ;;  %v880_v48 = vld [vmem:[#allocation3 + $0x250] sm:$0xff] }
  0x78   : > { %1337 = vmatmul.f32.gmra.mxu0 %v810_v14  ;;  %2784 = vmatpush.msrb.mxu3 %v1303_v49  ;;  %v842_v54 = vld [vmem:[#allocation3 + $0x120] sm:$0xff]  ;;  %v881_v49 = vld [vmem:[#allocation3 + $0x258] sm:$0xff] }
  0x79   : > { %1546 = vmatmul.f32.gmra.mxu1 %v811_v15  ;;  %2157 = vmatpush.msrb.mxu0 %v1111_v50  ;;  %v846_v58 = vld [vmem:[#allocation3 + $0x140] sm:$0xff]  ;;  %v863_v15 = vld [vmem:[#allocation3 + $0x1c8] sm:$0xff] }
  0x7a   : > { %2366 = vmatpush.msrb.mxu1 %v1175_v51  ;;  %v850_v62 = vld [vmem:[#allocation3 + $0x160] sm:$0xff]  ;;  %2576 = vmatpush.msrb.mxu2 %v1235_v4 }
  0x7b   : > { %v854_v2 = vld [vmem:[#allocation3 + $0x180] sm:$0xff]  ;;  %2785 = vmatpush.msrb.mxu3 %v1299_v5  ;;  %2158 = vmatpush.msrb.mxu0 %v1107_v6 }
  0x7c   : > { %2367 = vmatpush.msrb.mxu1 %v1171_v7  ;;  %v858_v10 = vld [vmem:[#allocation3 + $0x1a0] sm:$0xff]  ;;  %2577 = vmatpush.msrb.mxu2 %v1231_v28 }
  0x7d   : > { %1758 = vmatmul.f32.gmra.mxu2 %v816_v16  ;;  %v862_v14 = vld [vmem:[#allocation3 + $0x1c0] sm:$0xff]  ;;  %v868_v16 = vld [vmem:[#allocation3 + $0x1f0] sm:$0xff]  ;;  %2786 = vmatpush.msrb.mxu3 %v1295_v29 }
  0x7e   : > { %1967 = vmatmul.f32.gmra.mxu3 %v817_v17  ;;  %v869_v17 = vld [vmem:[#allocation3 + $0x1f8] sm:$0xff] }
  0x80   : > { %1340 = vmatmul.f32.gmra.mxu0 %v814_v18  ;;  %v866_v18 = vld [vmem:[#allocation3 + $0x1e0] sm:$0xff] }
  0x81   : > { %1549 = vmatmul.f32.gmra.mxu1 %v815_v19  ;;  %v867_v19 = vld [vmem:[#allocation3 + $0x1e8] sm:$0xff] }
  0x85   : > { %1761 = vmatmul.f32.gmra.mxu2 %v820_v20  ;;  %v872_v20 = vld [vmem:[#allocation3 + $0x210] sm:$0xff] }
  0x86   : > { %1970 = vmatmul.f32.gmra.mxu3 %v821_v21  ;;  %v873_v21 = vld [vmem:[#allocation3 + $0x218] sm:$0xff] }
  0x88   : > { %1343 = vmatmul.f32.gmra.mxu0 %v818_v22 }
  0x89   : > { %1552 = vmatmul.f32.gmra.mxu1 %v819_v23 }
  0x8d   : > { %1764 = vmatmul.f32.gmra.mxu2 %v824_v24  ;;  %v870_v24 = vld [vmem:[#allocation3 + $0x200] sm:$0xff] }
  0x8e   : > { %1973 = vmatmul.f32.gmra.mxu3 %v825_v25  ;;  %v871_v25 = vld [vmem:[#allocation3 + $0x208] sm:$0xff] }
  0x90   : > { %1346 = vmatmul.f32.gmra.mxu0 %v822_v26 }
  0x91   : > { %1555 = vmatmul.f32.gmra.mxu1 %v823_v27  ;;  %v5433_v27 = vld [vmem:[%s7409_s10] sm:$0xf] }
  0x95   : > { %1767 = vmatmul.f32.gmra.mxu2 %v828_v32 }
  0x96   : > { %1976 = vmatmul.f32.gmra.mxu3 %v829_v33  ;;  %v7414_v33 = vperm.slane %v5433_v27, 0 }
  0x98   : > { %1349 = vmatmul.f32.gmra.mxu0 %v826_v34  ;;  %v1103_v34 = vld [vmem:[%s7318_s6 + $0x148] sm:$0xff] }
  0x99   : > { %1558 = vmatmul.f32.gmra.mxu1 %v827_v35  ;;  %v1167_v35 = vld [vmem:[%s7318_s6 + $0x348] sm:$0xff]  ;;  %2159 = vmatpush.msrb.mxu0 %v1103_v34 }
  0x9a   : > { %2368 = vmatpush.msrb.mxu1 %v1167_v35 }
  0x9d   : > { %1770 = vmatmul.f32.gmra.mxu2 %v832_v36  ;;  %v876_v36 = vld [vmem:[#allocation3 + $0x230] sm:$0xff] }
  0x9e   : > { %1979 = vmatmul.f32.gmra.mxu3 %v833_v37  ;;  %v877_v37 = vld [vmem:[#allocation3 + $0x238] sm:$0xff] }
  0xa0   : > { %1352 = vmatmul.f32.gmra.mxu0 %v830_v38 }
  0xa1   : > { %1561 = vmatmul.f32.gmra.mxu1 %v831_v39 }
  0xa5   : > { %1773 = vmatmul.f32.gmra.mxu2 %v836_v40 }
  0xa6   : > { %1982 = vmatmul.f32.gmra.mxu3 %v837_v41 }
  0xa8   : > { %1355 = vmatmul.f32.gmra.mxu0 %v834_v42  ;;  %v874_v42 = vld [vmem:[#allocation3 + $0x220] sm:$0xff] }
  0xa9   : > { %1564 = vmatmul.f32.gmra.mxu1 %v835_v43  ;;  %v875_v43 = vld [vmem:[#allocation3 + $0x228] sm:$0xff] }
  0xad   : > { %1776 = vmatmul.f32.gmra.mxu2 %v840_v44 }
  0xae   : > { %1985 = vmatmul.f32.gmra.mxu3 %v841_v45 }
  0xb0   : > { %1358 = vmatmul.f32.gmra.mxu0 %v838_v46 }
  0xb1   : > { %1567 = vmatmul.f32.gmra.mxu1 %v839_v47 }
  0xb5   : > { %1779 = vmatmul.f32.gmra.mxu2 %v844_v52 }
  0xb6   : > { %1988 = vmatmul.f32.gmra.mxu3 %v845_v53 }
  0xb8   : > { %1361 = vmatmul.f32.gmra.mxu0 %v842_v54  ;;  %v878_v54 = vld [vmem:[#allocation3 + $0x240] sm:$0xff] }
  0xb9   : > { %1570 = vmatmul.f32.gmra.mxu1 %v843_v55  ;;  %v879_v55 = vld [vmem:[#allocation3 + $0x248] sm:$0xff] }
  0xbd   : > { %1782 = vmatmul.f32.gmra.mxu2 %v848_v56 }
  0xbe   : > { %1991 = vmatmul.f32.gmra.mxu3 %v849_v57 }
  0xc0   : > { %1364 = vmatmul.f32.gmra.mxu0 %v846_v58 }
  0xc1   : > { %1573 = vmatmul.f32.gmra.mxu1 %v847_v59 }
  0xc5   : > { %1785 = vmatmul.f32.gmra.mxu2 %v852_v60  ;;  %v884_v60 = vld [vmem:[#allocation3 + $0x270] sm:$0xff] }
  0xc6   : > { %1994 = vmatmul.f32.gmra.mxu3 %v853_v61  ;;  %v885_v61 = vld [vmem:[#allocation3 + $0x278] sm:$0xff] }
  0xc8   : > { %1367 = vmatmul.f32.gmra.mxu0 %v850_v62 }
  0xc9   : > { %1576 = vmatmul.f32.gmra.mxu1 %v851_v63 }
  0xcd   : > { %1788 = vmatmul.f32.gmra.mxu2 %v856_v0 }
  0xce   : > { %1997 = vmatmul.f32.gmra.mxu3 %v857_v1 }
  0xd0   : > { %1370 = vmatmul.f32.gmra.mxu0 %v854_v2  ;;  %v882_v2 = vld [vmem:[#allocation3 + $0x260] sm:$0xff] }
  0xd1   : > { %1579 = vmatmul.f32.gmra.mxu1 %v855_v3  ;;  %v883_v3 = vld [vmem:[#allocation3 + $0x268] sm:$0xff] }
  0xd5   : > { %1791 = vmatmul.f32.gmra.mxu2 %v860_v8  ;;  %v888_v8 = vld [vmem:[#allocation3 + $0x290] sm:$0xff] }
  0xd6   : > { %2000 = vmatmul.f32.gmra.mxu3 %v861_v9  ;;  %v889_v9 = vld [vmem:[#allocation3 + $0x298] sm:$0xff] }
  0xd8   : > { %1373 = vmatmul.f32.gmra.mxu0 %v858_v10 }
  0xd9   : > { %1582 = vmatmul.f32.gmra.mxu1 %v859_v11 }
  0xdd   : > { %1794 = vmatmul.f32.gmra.mxu2 %v864_v12 }
  0xde   : > { %2003 = vmatmul.f32.gmra.mxu3 %v865_v13 }
  0xe0   : > { %1376 = vmatmul.f32.gmra.mxu0 %v862_v14  ;;  %v886_v14 = vld [vmem:[#allocation3 + $0x280] sm:$0xff] }
  0xe1   : > { %1585 = vmatmul.f32.gmra.mxu1 %v863_v15  ;;  %v887_v15 = vld [vmem:[#allocation3 + $0x288] sm:$0xff] }
  0xe5   : > { %1797 = vmatmul.f32.gmra.mxu2 %v868_v16 }
  0xe6   : > { %2006 = vmatmul.f32.gmra.mxu3 %v869_v17  ;;  %v1227_v17 = vld [vmem:[%s7318_s6 + $0x528] sm:$0xff] }
  0xe7   : > { %2578 = vmatpush.msrb.mxu2 %v1227_v17 }
  0xe8   : > { %1379 = vmatmul.f32.gmra.mxu0 %v866_v18  ;;  %v1291_v18 = vld [vmem:[%s7318_s6 + $0x728] sm:$0xff] }
  0xe9   : > { %1588 = vmatmul.f32.gmra.mxu1 %v867_v19  ;;  %2787 = vmatpush.msrb.mxu3 %v1291_v18 }
  0xed   : > { %1800 = vmatmul.f32.gmra.mxu2 %v872_v20  ;;  %v1335_v22 = vpop.f32.mrf.mxu0 }
  0xee   : > { %v1544_v23 = vpop.f32.mrf.mxu1  ;;  %2009 = vmatmul.f32.gmra.mxu3 %v873_v21 }
  0xef   : > { %v1545_v26 = vadd.f32 %v1544_v23, %v1335_v22  ;;  %v1099_v22 = vld [vmem:[%s7318_s6 + $0x128] sm:$0xff] }
  0xf0   : > { %v1753_v30 = vpop.f32.mrf.mxu2  ;;  %1382 = vmatmul.f32.gmra.mxu0 %v870_v24  ;;  %v1163_v23 = vld [vmem:[%s7318_s6 + $0x328] sm:$0xff]  ;;  %v892_v24 = vld [vmem:[#allocation3 + $0x2b0] sm:$0xff] }
  0xf1   : > { %1591 = vmatmul.f32.gmra.mxu1 %v871_v25  ;;  %v1962_v31 = vpop.f32.mrf.mxu3  ;;  %v1754_v32 = vadd.f32 %v1753_v30, %v1545_v26  ;;  %v893_v25 = vld [vmem:[#allocation3 + $0x2b8] sm:$0xff]  ;;  %2160 = vmatpush.msrb.mxu0 %v1099_v22  ;;  %v890_v30 = vld [vmem:[#allocation3 + $0x2a0] sm:$0xff] }
  0xf2   : > { %2369 = vmatpush.msrb.mxu1 %v1163_v23 }
  0xf3   : > { %v1963_v38 = vadd.f32 %v1962_v31, %v1754_v32  ;;  %v891_v31 = vld [vmem:[#allocation3 + $0x2a8] sm:$0xff] }
  0xf5   : > { %v5443_v39 = vadd.f32 %v7414_v33, %v1963_v38  ;;  %1803 = vmatmul.f32.gmra.mxu2 %v876_v36  ;;  %v1338_v40 = vpop.f32.mrf.mxu0  ;;  %v897_v38 = vld [vmem:[#allocation3 + $0x2d8] sm:$0xff] }
  0xf6   : > { %v1547_v41 = vpop.f32.mrf.mxu1  ;;  %2012 = vmatmul.f32.gmra.mxu3 %v877_v37  ;;  %v896_v37 = vld [vmem:[#allocation3 + $0x2d0] sm:$0xff] }
  0xf7   : > { %v1548_v44 = vadd.f32 %v1547_v41, %v1338_v40  ;;  %5699 = vst [vmem:[%s7421_s11] sm:$0xff] %v5443_v39 }
  0xf8   : > { %v1756_v45 = vpop.f32.mrf.mxu2  ;;  %1385 = vmatmul.f32.gmra.mxu0 %v874_v42 }
  0xf9   : > { %1594 = vmatmul.f32.gmra.mxu1 %v875_v43  ;;  %v1965_v46 = vpop.f32.mrf.mxu3  ;;  %v1757_v47 = vadd.f32 %v1756_v45, %v1548_v44  ;;  %v894_v43 = vld [vmem:[#allocation3 + $0x2c0] sm:$0xff]  ;;  %v895_v44 = vld [vmem:[#allocation3 + $0x2c8] sm:$0xff] }
  0xfb   : > { %v1966_v50 = vadd.f32 %v1965_v46, %v1757_v47 }
  0xfd   : > { %v5447_v51 = vadd.f32 %v7414_v33, %v1966_v50  ;;  %1806 = vmatmul.f32.gmra.mxu2 %v880_v48  ;;  %v1341_v52 = vpop.f32.mrf.mxu0  ;;  %v901_v50 = vld [vmem:[#allocation3 + $0x2f8] sm:$0xff] }
  0xfe   : > { %v1550_v53 = vpop.f32.mrf.mxu1  ;;  %2015 = vmatmul.f32.gmra.mxu3 %v881_v49  ;;  %v900_v49 = vld [vmem:[#allocation3 + $0x2f0] sm:$0xff] }
  0xff   : > { %v1551_v56 = vadd.f32 %v1550_v53, %v1341_v52  ;;  %5703 = vst [vmem:[%s7421_s11 + $0x20] sm:$0xff] %v5447_v51 }
 0x100   : > { %v1759_v57 = vpop.f32.mrf.mxu2  ;;  %1388 = vmatmul.f32.gmra.mxu0 %v878_v54 }
 0x101   : > { %1597 = vmatmul.f32.gmra.mxu1 %v879_v55  ;;  %v1968_v58 = vpop.f32.mrf.mxu3  ;;  %v1760_v59 = vadd.f32 %v1759_v57, %v1551_v56  ;;  %v898_v55 = vld [vmem:[#allocation3 + $0x2e0] sm:$0xff]  ;;  %v899_v56 = vld [vmem:[#allocation3 + $0x2e8] sm:$0xff] }
 0x103   : > { %v1969_v62 = vadd.f32 %v1968_v58, %v1760_v59 }
 0x105   : > { %v5451_v63 = vadd.f32 %v7414_v33, %v1969_v62  ;;  %1809 = vmatmul.f32.gmra.mxu2 %v884_v60  ;;  %v1344_v0 = vpop.f32.mrf.mxu0  ;;  %v905_v62 = vld [vmem:[#allocation3 + $0x318] sm:$0xff] }
 0x106   : > { %v1553_v1 = vpop.f32.mrf.mxu1  ;;  %2018 = vmatmul.f32.gmra.mxu3 %v885_v61  ;;  %v904_v61 = vld [vmem:[#allocation3 + $0x310] sm:$0xff] }
 0x107   : > { %v1554_v4 = vadd.f32 %v1553_v1, %v1344_v0  ;;  %5707 = vst [vmem:[%s7421_s11 + $0x40] sm:$0xff] %v5451_v63 }
 0x108   : > { %v1762_v5 = vpop.f32.mrf.mxu2  ;;  %1391 = vmatmul.f32.gmra.mxu0 %v882_v2 }
 0x109   : > { %1600 = vmatmul.f32.gmra.mxu1 %v883_v3  ;;  %v1971_v6 = vpop.f32.mrf.mxu3  ;;  %v1763_v7 = vadd.f32 %v1762_v5, %v1554_v4  ;;  %v902_v3 = vld [vmem:[#allocation3 + $0x300] sm:$0xff]  ;;  %v903_v4 = vld [vmem:[#allocation3 + $0x308] sm:$0xff] }
 0x10b   : > { %v1972_v10 = vadd.f32 %v1971_v6, %v1763_v7  ;;  %v1223_v6 = vld [vmem:[%s7318_s6 + $0x508] sm:$0xff] }
 0x10c   : > { %v1287_v7 = vld [vmem:[%s7318_s6 + $0x708] sm:$0xff]  ;;  %2579 = vmatpush.msrb.mxu2 %v1223_v6 }
 0x10d   : > { %v5455_v11 = vadd.f32 %v7414_v33, %v1972_v10  ;;  %1812 = vmatmul.f32.gmra.mxu2 %v888_v8  ;;  %v1347_v12 = vpop.f32.mrf.mxu0  ;;  %2788 = vmatpush.msrb.mxu3 %v1287_v7 }
 0x10e   : > { %v1556_v13 = vpop.f32.mrf.mxu1  ;;  %2021 = vmatmul.f32.gmra.mxu3 %v889_v9 }
 0x10f   : > { %v1557_v16 = vadd.f32 %v1556_v13, %v1347_v12  ;;  %5711 = vst [vmem:[%s7421_s11 + $0x60] sm:$0xff] %v5455_v11  ;;  %v1095_v11 = vld [vmem:[%s7318_s6 + $0x108] sm:$0xff]  ;;  %v908_v13 = vld [vmem:[#allocation3 + $0x330] sm:$0xff] }
 0x110   : > { %v1765_v19 = vpop.f32.mrf.mxu2  ;;  %1394 = vmatmul.f32.gmra.mxu0 %v886_v14  ;;  %v1159_v12 = vld [vmem:[%s7318_s6 + $0x308] sm:$0xff]  ;;  %v909_v14 = vld [vmem:[#allocation3 + $0x338] sm:$0xff] }
 0x111   : > { %1603 = vmatmul.f32.gmra.mxu1 %v887_v15  ;;  %v1974_v20 = vpop.f32.mrf.mxu3  ;;  %v1766_v21 = vadd.f32 %v1765_v19, %v1557_v16  ;;  %2161 = vmatpush.msrb.mxu0 %v1095_v11  ;;  %v906_v19 = vld [vmem:[#allocation3 + $0x320] sm:$0xff] }
 0x112   : > { %2370 = vmatpush.msrb.mxu1 %v1159_v12 }
 0x113   : > { %v1975_v26 = vadd.f32 %v1974_v20, %v1766_v21  ;;  %v907_v20 = vld [vmem:[#allocation3 + $0x328] sm:$0xff] }
 0x115   : > { %v5459_v27 = vadd.f32 %v7414_v33, %v1975_v26  ;;  %1815 = vmatmul.f32.gmra.mxu2 %v892_v24  ;;  %v1350_v28 = vpop.f32.mrf.mxu0  ;;  %v913_v26 = vld [vmem:[#allocation3 + $0x358] sm:$0xff] }
 0x116   : > { %v1559_v29 = vpop.f32.mrf.mxu1  ;;  %2024 = vmatmul.f32.gmra.mxu3 %v893_v25  ;;  %v912_v25 = vld [vmem:[#allocation3 + $0x350] sm:$0xff] }
 0x117   : > { %v1560_v32 = vadd.f32 %v1559_v29, %v1350_v28  ;;  %5715 = vst [vmem:[%s7421_s11 + $0x80] sm:$0xff] %v5459_v27 }
 0x118   : > { %v1768_v34 = vpop.f32.mrf.mxu2  ;;  %1397 = vmatmul.f32.gmra.mxu0 %v890_v30 }
 0x119   : > { %1606 = vmatmul.f32.gmra.mxu1 %v891_v31  ;;  %v1977_v35 = vpop.f32.mrf.mxu3  ;;  %v1769_v36 = vadd.f32 %v1768_v34, %v1560_v32  ;;  %v910_v31 = vld [vmem:[#allocation3 + $0x340] sm:$0xff]  ;;  %v911_v32 = vld [vmem:[#allocation3 + $0x348] sm:$0xff] }
 0x11b   : > { %v1978_v39 = vadd.f32 %v1977_v35, %v1769_v36 }
 0x11d   : > { %v5463_v40 = vadd.f32 %v7414_v33, %v1978_v39  ;;  %1818 = vmatmul.f32.gmra.mxu2 %v896_v37  ;;  %v1353_v41 = vpop.f32.mrf.mxu0  ;;  %v917_v39 = vld [vmem:[#allocation3 + $0x378] sm:$0xff] }
 0x11e   : > { %v1562_v42 = vpop.f32.mrf.mxu1  ;;  %2027 = vmatmul.f32.gmra.mxu3 %v897_v38  ;;  %v916_v38 = vld [vmem:[#allocation3 + $0x370] sm:$0xff] }
 0x11f   : > { %v1563_v45 = vadd.f32 %v1562_v42, %v1353_v41  ;;  %5719 = vst [vmem:[%s7421_s11 + $0xa0] sm:$0xff] %v5463_v40 }
 0x120   : > { %v1771_v46 = vpop.f32.mrf.mxu2  ;;  %1400 = vmatmul.f32.gmra.mxu0 %v894_v43 }
 0x121   : > { %1609 = vmatmul.f32.gmra.mxu1 %v895_v44  ;;  %v1980_v47 = vpop.f32.mrf.mxu3  ;;  %v1772_v48 = vadd.f32 %v1771_v46, %v1563_v45  ;;  %v914_v44 = vld [vmem:[#allocation3 + $0x360] sm:$0xff]  ;;  %v915_v45 = vld [vmem:[#allocation3 + $0x368] sm:$0xff] }
 0x123   : > { %v1981_v51 = vadd.f32 %v1980_v47, %v1772_v48 }
 0x125   : > { %v5467_v52 = vadd.f32 %v7414_v33, %v1981_v51  ;;  %1821 = vmatmul.f32.gmra.mxu2 %v900_v49  ;;  %v1356_v53 = vpop.f32.mrf.mxu0  ;;  %v921_v51 = vld [vmem:[#allocation3 + $0x398] sm:$0xff] }
 0x126   : > { %v1565_v54 = vpop.f32.mrf.mxu1  ;;  %2030 = vmatmul.f32.gmra.mxu3 %v901_v50  ;;  %v920_v50 = vld [vmem:[#allocation3 + $0x390] sm:$0xff] }
 0x127   : > { %v1566_v57 = vadd.f32 %v1565_v54, %v1356_v53  ;;  %5723 = vst [vmem:[%s7421_s11 + $0xc0] sm:$0xff] %v5467_v52 }
 0x128   : > { %v1774_v58 = vpop.f32.mrf.mxu2  ;;  %1403 = vmatmul.f32.gmra.mxu0 %v898_v55 }
 0x129   : > { %1612 = vmatmul.f32.gmra.mxu1 %v899_v56  ;;  %v1983_v59 = vpop.f32.mrf.mxu3  ;;  %v1775_v60 = vadd.f32 %v1774_v58, %v1566_v57  ;;  %v918_v56 = vld [vmem:[#allocation3 + $0x380] sm:$0xff]  ;;  %v919_v57 = vld [vmem:[#allocation3 + $0x388] sm:$0xff] }
 0x12b   : > { %v1984_v63 = vadd.f32 %v1983_v59, %v1775_v60  ;;  %v1219_v59 = vld [vmem:[%s7318_s6 + $0x4e8] sm:$0xff] }
 0x12c   : > { %v1283_v60 = vld [vmem:[%s7318_s6 + $0x6e8] sm:$0xff]  ;;  %2580 = vmatpush.msrb.mxu2 %v1219_v59 }
 0x12d   : > { %v5471_v0 = vadd.f32 %v7414_v33, %v1984_v63  ;;  %1824 = vmatmul.f32.gmra.mxu2 %v904_v61  ;;  %v1359_v1 = vpop.f32.mrf.mxu0  ;;  %2789 = vmatpush.msrb.mxu3 %v1283_v60 }
 0x12e   : > { %v1568_v2 = vpop.f32.mrf.mxu1  ;;  %2033 = vmatmul.f32.gmra.mxu3 %v905_v62 }
 0x12f   : > { %v1569_v5 = vadd.f32 %v1568_v2, %v1359_v1  ;;  %5727 = vst [vmem:[%s7421_s11 + $0xe0] sm:$0xff] %v5471_v0  ;;  %v1091_v0 = vld [vmem:[%s7318_s6 + $0xe8] sm:$0xff]  ;;  %v924_v2 = vld [vmem:[#allocation3 + $0x3b0] sm:$0xff] }
 0x130   : > { %v1777_v8 = vpop.f32.mrf.mxu2  ;;  %1406 = vmatmul.f32.gmra.mxu0 %v902_v3  ;;  %v1155_v1 = vld [vmem:[%s7318_s6 + $0x2e8] sm:$0xff]  ;;  %v925_v3 = vld [vmem:[#allocation3 + $0x3b8] sm:$0xff] }
 0x131   : > { %1615 = vmatmul.f32.gmra.mxu1 %v903_v4  ;;  %v1986_v9 = vpop.f32.mrf.mxu3  ;;  %v1778_v10 = vadd.f32 %v1777_v8, %v1569_v5  ;;  %2162 = vmatpush.msrb.mxu0 %v1091_v0  ;;  %v922_v8 = vld [vmem:[#allocation3 + $0x3a0] sm:$0xff] }
 0x132   : > { %2371 = vmatpush.msrb.mxu1 %v1155_v1 }
 0x133   : > { %v1987_v15 = vadd.f32 %v1986_v9, %v1778_v10  ;;  %v923_v9 = vld [vmem:[#allocation3 + $0x3a8] sm:$0xff] }
 0x135   : > { %v5475_v16 = vadd.f32 %v7414_v33, %v1987_v15  ;;  %1827 = vmatmul.f32.gmra.mxu2 %v908_v13  ;;  %v1362_v17 = vpop.f32.mrf.mxu0  ;;  %v929_v15 = vld [vmem:[#allocation3 + $0x3d8] sm:$0xff] }
 0x136   : > { %v1571_v18 = vpop.f32.mrf.mxu1  ;;  %2036 = vmatmul.f32.gmra.mxu3 %v909_v14  ;;  %v928_v14 = vld [vmem:[#allocation3 + $0x3d0] sm:$0xff] }
 0x137   : > { %v1572_v21 = vadd.f32 %v1571_v18, %v1362_v17  ;;  %5731 = vst [vmem:[%s7421_s11 + $0x100] sm:$0xff] %v5475_v16 }
 0x138   : > { %v1780_v22 = vpop.f32.mrf.mxu2  ;;  %1409 = vmatmul.f32.gmra.mxu0 %v906_v19 }
 0x139   : > { %1618 = vmatmul.f32.gmra.mxu1 %v907_v20  ;;  %v1989_v23 = vpop.f32.mrf.mxu3  ;;  %v1781_v24 = vadd.f32 %v1780_v22, %v1572_v21  ;;  %v926_v20 = vld [vmem:[#allocation3 + $0x3c0] sm:$0xff]  ;;  %v927_v21 = vld [vmem:[#allocation3 + $0x3c8] sm:$0xff] }
 0x13b   : > { %v1990_v27 = vadd.f32 %v1989_v23, %v1781_v24 }
 0x13d   : > { %v5479_v28 = vadd.f32 %v7414_v33, %v1990_v27  ;;  %1830 = vmatmul.f32.gmra.mxu2 %v912_v25  ;;  %v1365_v29 = vpop.f32.mrf.mxu0  ;;  %v933_v27 = vld [vmem:[#allocation3 + $0x3f8] sm:$0xff] }
 0x13e   : > { %v1574_v30 = vpop.f32.mrf.mxu1  ;;  %2039 = vmatmul.f32.gmra.mxu3 %v913_v26  ;;  %v932_v26 = vld [vmem:[#allocation3 + $0x3f0] sm:$0xff] }
 0x13f   : > { %v1575_v34 = vadd.f32 %v1574_v30, %v1365_v29  ;;  %5735 = vst [vmem:[%s7421_s11 + $0x120] sm:$0xff] %v5479_v28 }
 0x140   : > { %v1783_v35 = vpop.f32.mrf.mxu2  ;;  %1412 = vmatmul.f32.gmra.mxu0 %v910_v31 }
 0x141   : > { %1621 = vmatmul.f32.gmra.mxu1 %v911_v32  ;;  %v1992_v36 = vpop.f32.mrf.mxu3  ;;  %v1784_v37 = vadd.f32 %v1783_v35, %v1575_v34  ;;  %v930_v32 = vld [vmem:[#allocation3 + $0x3e0] sm:$0xff]  ;;  %v931_v34 = vld [vmem:[#allocation3 + $0x3e8] sm:$0xff] }
 0x143   : > { %v1993_v40 = vadd.f32 %v1992_v36, %v1784_v37 }
 0x145   : > { %v5483_v41 = vadd.f32 %v7414_v33, %v1993_v40  ;;  %1833 = vmatmul.f32.gmra.mxu2 %v916_v38  ;;  %v1368_v42 = vpop.f32.mrf.mxu0  ;;  %v937_v40 = vld [vmem:[#allocation3 + $0x418] sm:$0xff] }
 0x146   : > { %v1577_v43 = vpop.f32.mrf.mxu1  ;;  %2042 = vmatmul.f32.gmra.mxu3 %v917_v39  ;;  %v936_v39 = vld [vmem:[#allocation3 + $0x410] sm:$0xff] }
 0x147   : > { %v1578_v46 = vadd.f32 %v1577_v43, %v1368_v42  ;;  %5739 = vst [vmem:[%s7421_s11 + $0x140] sm:$0xff] %v5483_v41 }
 0x148   : > { %v1786_v47 = vpop.f32.mrf.mxu2  ;;  %1415 = vmatmul.f32.gmra.mxu0 %v914_v44 }
 0x149   : > { %1624 = vmatmul.f32.gmra.mxu1 %v915_v45  ;;  %v1995_v48 = vpop.f32.mrf.mxu3  ;;  %v1787_v49 = vadd.f32 %v1786_v47, %v1578_v46  ;;  %v934_v45 = vld [vmem:[#allocation3 + $0x400] sm:$0xff]  ;;  %v935_v46 = vld [vmem:[#allocation3 + $0x408] sm:$0xff] }
 0x14b   : > { %v1996_v52 = vadd.f32 %v1995_v48, %v1787_v49  ;;  %v1215_v48 = vld [vmem:[%s7318_s6 + $0x4c8] sm:$0xff] }
 0x14c   : > { %v1279_v49 = vld [vmem:[%s7318_s6 + $0x6c8] sm:$0xff]  ;;  %2581 = vmatpush.msrb.mxu2 %v1215_v48 }
 0x14d   : > { %v5487_v53 = vadd.f32 %v7414_v33, %v1996_v52  ;;  %1836 = vmatmul.f32.gmra.mxu2 %v920_v50  ;;  %v1371_v54 = vpop.f32.mrf.mxu0  ;;  %2790 = vmatpush.msrb.mxu3 %v1279_v49 }
 0x14e   : > { %v1580_v55 = vpop.f32.mrf.mxu1  ;;  %2045 = vmatmul.f32.gmra.mxu3 %v921_v51 }
 0x14f   : > { %v1581_v58 = vadd.f32 %v1580_v55, %v1371_v54  ;;  %5743 = vst [vmem:[%s7421_s11 + $0x160] sm:$0xff] %v5487_v53  ;;  %v1087_v53 = vld [vmem:[%s7318_s6 + $0xc8] sm:$0xff]  ;;  %v940_v55 = vld [vmem:[#allocation3 + $0x430] sm:$0xff] }
 0x150   : > { %v1789_v61 = vpop.f32.mrf.mxu2  ;;  %1418 = vmatmul.f32.gmra.mxu0 %v918_v56  ;;  %v1151_v54 = vld [vmem:[%s7318_s6 + $0x2c8] sm:$0xff]  ;;  %v941_v56 = vld [vmem:[#allocation3 + $0x438] sm:$0xff] }
 0x151   : > { %1627 = vmatmul.f32.gmra.mxu1 %v919_v57  ;;  %v1998_v62 = vpop.f32.mrf.mxu3  ;;  %v1790_v63 = vadd.f32 %v1789_v61, %v1581_v58  ;;  %2163 = vmatpush.msrb.mxu0 %v1087_v53  ;;  %v938_v61 = vld [vmem:[#allocation3 + $0x420] sm:$0xff] }
 0x152   : > { %2372 = vmatpush.msrb.mxu1 %v1151_v54 }
 0x153   : > { %v1999_v4 = vadd.f32 %v1998_v62, %v1790_v63  ;;  %v939_v62 = vld [vmem:[#allocation3 + $0x428] sm:$0xff] }
 0x155   : > { %v5491_v5 = vadd.f32 %v7414_v33, %v1999_v4  ;;  %1839 = vmatmul.f32.gmra.mxu2 %v924_v2  ;;  %v1374_v6 = vpop.f32.mrf.mxu0  ;;  %v945_v4 = vld [vmem:[#allocation3 + $0x458] sm:$0xff] }
 0x156   : > { %v1583_v7 = vpop.f32.mrf.mxu1  ;;  %2048 = vmatmul.f32.gmra.mxu3 %v925_v3  ;;  %v944_v3 = vld [vmem:[#allocation3 + $0x450] sm:$0xff] }
 0x157   : > { %v1584_v10 = vadd.f32 %v1583_v7, %v1374_v6  ;;  %5747 = vst [vmem:[%s7421_s11 + $0x180] sm:$0xff] %v5491_v5 }
 0x158   : > { %v1792_v11 = vpop.f32.mrf.mxu2  ;;  %1421 = vmatmul.f32.gmra.mxu0 %v922_v8 }
 0x159   : > { %1630 = vmatmul.f32.gmra.mxu1 %v923_v9  ;;  %v2001_v12 = vpop.f32.mrf.mxu3  ;;  %v1793_v13 = vadd.f32 %v1792_v11, %v1584_v10  ;;  %v942_v9 = vld [vmem:[#allocation3 + $0x440] sm:$0xff]  ;;  %v943_v10 = vld [vmem:[#allocation3 + $0x448] sm:$0xff] }
 0x15b   : > { %v2002_v16 = vadd.f32 %v2001_v12, %v1793_v13 }
 0x15d   : > { %v5495_v17 = vadd.f32 %v7414_v33, %v2002_v16  ;;  %1842 = vmatmul.f32.gmra.mxu2 %v928_v14  ;;  %v1377_v18 = vpop.f32.mrf.mxu0  ;;  %v949_v16 = vld [vmem:[#allocation3 + $0x478] sm:$0xff] }
 0x15e   : > { %v1586_v19 = vpop.f32.mrf.mxu1  ;;  %2051 = vmatmul.f32.gmra.mxu3 %v929_v15  ;;  %v948_v15 = vld [vmem:[#allocation3 + $0x470] sm:$0xff] }
 0x15f   : > { %v1587_v22 = vadd.f32 %v1586_v19, %v1377_v18  ;;  %5751 = vst [vmem:[%s7421_s11 + $0x1a0] sm:$0xff] %v5495_v17 }
 0x160   : > { %v1795_v23 = vpop.f32.mrf.mxu2  ;;  %1424 = vmatmul.f32.gmra.mxu0 %v926_v20 }
 0x161   : > { %1633 = vmatmul.f32.gmra.mxu1 %v927_v21  ;;  %v2004_v24 = vpop.f32.mrf.mxu3  ;;  %v1796_v25 = vadd.f32 %v1795_v23, %v1587_v22  ;;  %v946_v21 = vld [vmem:[#allocation3 + $0x460] sm:$0xff]  ;;  %v947_v22 = vld [vmem:[#allocation3 + $0x468] sm:$0xff] }
 0x163   : > { %v2005_v28 = vadd.f32 %v2004_v24, %v1796_v25 }
 0x165   : > { %v5499_v29 = vadd.f32 %v7414_v33, %v2005_v28  ;;  %1845 = vmatmul.f32.gmra.mxu2 %v932_v26  ;;  %v1380_v30 = vpop.f32.mrf.mxu0  ;;  %v953_v28 = vld [vmem:[#allocation3 + $0x498] sm:$0xff] }
 0x166   : > { %v1589_v31 = vpop.f32.mrf.mxu1  ;;  %2054 = vmatmul.f32.gmra.mxu3 %v933_v27  ;;  %v952_v27 = vld [vmem:[#allocation3 + $0x490] sm:$0xff] }
 0x167   : > { %v1590_v35 = vadd.f32 %v1589_v31, %v1380_v30  ;;  %5755 = vst [vmem:[%s7421_s11 + $0x1c0] sm:$0xff] %v5499_v29 }
 0x168   : > { %v1798_v36 = vpop.f32.mrf.mxu2  ;;  %1427 = vmatmul.f32.gmra.mxu0 %v930_v32 }
 0x169   : > { %1636 = vmatmul.f32.gmra.mxu1 %v931_v34  ;;  %v2007_v37 = vpop.f32.mrf.mxu3  ;;  %v1799_v38 = vadd.f32 %v1798_v36, %v1590_v35  ;;  %v950_v34 = vld [vmem:[#allocation3 + $0x480] sm:$0xff]  ;;  %v951_v35 = vld [vmem:[#allocation3 + $0x488] sm:$0xff] }
 0x16b   : > { %v2008_v41 = vadd.f32 %v2007_v37, %v1799_v38  ;;  %v1211_v37 = vld [vmem:[%s7318_s6 + $0x4a8] sm:$0xff] }
 0x16c   : > { %v1275_v38 = vld [vmem:[%s7318_s6 + $0x6a8] sm:$0xff]  ;;  %2582 = vmatpush.msrb.mxu2 %v1211_v37 }
 0x16d   : > { %v5503_v42 = vadd.f32 %v7414_v33, %v2008_v41  ;;  %1848 = vmatmul.f32.gmra.mxu2 %v936_v39  ;;  %v1383_v43 = vpop.f32.mrf.mxu0  ;;  %2791 = vmatpush.msrb.mxu3 %v1275_v38 }
 0x16e   : > { %v1592_v44 = vpop.f32.mrf.mxu1  ;;  %2057 = vmatmul.f32.gmra.mxu3 %v937_v40 }
 0x16f   : > { %v1593_v47 = vadd.f32 %v1592_v44, %v1383_v43  ;;  %5759 = vst [vmem:[%s7421_s11 + $0x1e0] sm:$0xff] %v5503_v42  ;;  %v1083_v42 = vld [vmem:[%s7318_s6 + $0xa8] sm:$0xff]  ;;  %v956_v44 = vld [vmem:[#allocation3 + $0x4b0] sm:$0xff] }
 0x170   : > { %v1801_v50 = vpop.f32.mrf.mxu2  ;;  %1430 = vmatmul.f32.gmra.mxu0 %v934_v45  ;;  %v1147_v43 = vld [vmem:[%s7318_s6 + $0x2a8] sm:$0xff]  ;;  %v957_v45 = vld [vmem:[#allocation3 + $0x4b8] sm:$0xff] }
 0x171   : > { %1639 = vmatmul.f32.gmra.mxu1 %v935_v46  ;;  %v2010_v51 = vpop.f32.mrf.mxu3  ;;  %v1802_v52 = vadd.f32 %v1801_v50, %v1593_v47  ;;  %2164 = vmatpush.msrb.mxu0 %v1083_v42  ;;  %v954_v50 = vld [vmem:[#allocation3 + $0x4a0] sm:$0xff] }
 0x172   : > { %2373 = vmatpush.msrb.mxu1 %v1147_v43 }
 0x173   : > { %v2011_v57 = vadd.f32 %v2010_v51, %v1802_v52  ;;  %v955_v51 = vld [vmem:[#allocation3 + $0x4a8] sm:$0xff] }
 0x175   : > { %v5507_v58 = vadd.f32 %v7414_v33, %v2011_v57  ;;  %1851 = vmatmul.f32.gmra.mxu2 %v940_v55  ;;  %v1386_v59 = vpop.f32.mrf.mxu0  ;;  %v961_v57 = vld [vmem:[#allocation3 + $0x4d8] sm:$0xff] }
 0x176   : > { %v1595_v60 = vpop.f32.mrf.mxu1  ;;  %2060 = vmatmul.f32.gmra.mxu3 %v941_v56  ;;  %v960_v56 = vld [vmem:[#allocation3 + $0x4d0] sm:$0xff] }
 0x177   : > { %v1596_v63 = vadd.f32 %v1595_v60, %v1386_v59  ;;  %5763 = vst [vmem:[%s7421_s11 + $0x200] sm:$0xff] %v5507_v58 }
 0x178   : > { %v1804_v0 = vpop.f32.mrf.mxu2  ;;  %1433 = vmatmul.f32.gmra.mxu0 %v938_v61 }
 0x179   : > { %1642 = vmatmul.f32.gmra.mxu1 %v939_v62  ;;  %v2013_v1 = vpop.f32.mrf.mxu3  ;;  %v1805_v2 = vadd.f32 %v1804_v0, %v1596_v63  ;;  %v958_v62 = vld [vmem:[#allocation3 + $0x4c0] sm:$0xff]  ;;  %v959_v63 = vld [vmem:[#allocation3 + $0x4c8] sm:$0xff] }
 0x17b   : > { %v2014_v5 = vadd.f32 %v2013_v1, %v1805_v2 }
 0x17d   : > { %v5511_v6 = vadd.f32 %v7414_v33, %v2014_v5  ;;  %1854 = vmatmul.f32.gmra.mxu2 %v944_v3  ;;  %v1389_v7 = vpop.f32.mrf.mxu0  ;;  %v965_v5 = vld [vmem:[#allocation3 + $0x4f8] sm:$0xff] }
 0x17e   : > { %v1598_v8 = vpop.f32.mrf.mxu1  ;;  %2063 = vmatmul.f32.gmra.mxu3 %v945_v4  ;;  %v964_v4 = vld [vmem:[#allocation3 + $0x4f0] sm:$0xff] }
 0x17f   : > { %v1599_v11 = vadd.f32 %v1598_v8, %v1389_v7  ;;  %5767 = vst [vmem:[%s7421_s11 + $0x220] sm:$0xff] %v5511_v6 }
 0x180   : > { %v1807_v12 = vpop.f32.mrf.mxu2  ;;  %1436 = vmatmul.f32.gmra.mxu0 %v942_v9 }
 0x181   : > { %1645 = vmatmul.f32.gmra.mxu1 %v943_v10  ;;  %v2016_v13 = vpop.f32.mrf.mxu3  ;;  %v1808_v14 = vadd.f32 %v1807_v12, %v1599_v11  ;;  %v962_v10 = vld [vmem:[#allocation3 + $0x4e0] sm:$0xff]  ;;  %v963_v11 = vld [vmem:[#allocation3 + $0x4e8] sm:$0xff] }
 0x183   : > { %v2017_v17 = vadd.f32 %v2016_v13, %v1808_v14 }
 0x185   : > { %v5515_v18 = vadd.f32 %v7414_v33, %v2017_v17  ;;  %1857 = vmatmul.f32.gmra.mxu2 %v948_v15  ;;  %v1392_v19 = vpop.f32.mrf.mxu0  ;;  %v969_v17 = vld [vmem:[#allocation3 + $0x518] sm:$0xff] }
 0x186   : > { %v1601_v20 = vpop.f32.mrf.mxu1  ;;  %2066 = vmatmul.f32.gmra.mxu3 %v949_v16  ;;  %v968_v16 = vld [vmem:[#allocation3 + $0x510] sm:$0xff] }
 0x187   : > { %v1602_v23 = vadd.f32 %v1601_v20, %v1392_v19  ;;  %5771 = vst [vmem:[%s7421_s11 + $0x240] sm:$0xff] %v5515_v18 }
 0x188   : > { %v1810_v24 = vpop.f32.mrf.mxu2  ;;  %1439 = vmatmul.f32.gmra.mxu0 %v946_v21 }
 0x189   : > { %1648 = vmatmul.f32.gmra.mxu1 %v947_v22  ;;  %v2019_v25 = vpop.f32.mrf.mxu3  ;;  %v1811_v26 = vadd.f32 %v1810_v24, %v1602_v23  ;;  %v966_v22 = vld [vmem:[#allocation3 + $0x500] sm:$0xff]  ;;  %v967_v23 = vld [vmem:[#allocation3 + $0x508] sm:$0xff] }
 0x18b   : > { %v2020_v29 = vadd.f32 %v2019_v25, %v1811_v26  ;;  %v1207_v25 = vld [vmem:[%s7318_s6 + $0x488] sm:$0xff] }
 0x18c   : > { %v1271_v26 = vld [vmem:[%s7318_s6 + $0x688] sm:$0xff]  ;;  %2583 = vmatpush.msrb.mxu2 %v1207_v25 }
 0x18d   : > { %v5519_v30 = vadd.f32 %v7414_v33, %v2020_v29  ;;  %1860 = vmatmul.f32.gmra.mxu2 %v952_v27  ;;  %v1395_v31 = vpop.f32.mrf.mxu0  ;;  %2792 = vmatpush.msrb.mxu3 %v1271_v26 }
 0x18e   : > { %v1604_v32 = vpop.f32.mrf.mxu1  ;;  %2069 = vmatmul.f32.gmra.mxu3 %v953_v28 }
 0x18f   : > { %v1605_v36 = vadd.f32 %v1604_v32, %v1395_v31  ;;  %5775 = vst [vmem:[%s7421_s11 + $0x260] sm:$0xff] %v5519_v30  ;;  %v1079_v30 = vld [vmem:[%s7318_s6 + $0x88] sm:$0xff]  ;;  %v972_v32 = vld [vmem:[#allocation3 + $0x530] sm:$0xff] }
 0x190   : > { %v1813_v39 = vpop.f32.mrf.mxu2  ;;  %1442 = vmatmul.f32.gmra.mxu0 %v950_v34  ;;  %v1143_v31 = vld [vmem:[%s7318_s6 + $0x288] sm:$0xff]  ;;  %v973_v34 = vld [vmem:[#allocation3 + $0x538] sm:$0xff] }
 0x191   : > { %1651 = vmatmul.f32.gmra.mxu1 %v951_v35  ;;  %v2022_v40 = vpop.f32.mrf.mxu3  ;;  %v1814_v41 = vadd.f32 %v1813_v39, %v1605_v36  ;;  %2165 = vmatpush.msrb.mxu0 %v1079_v30  ;;  %v970_v39 = vld [vmem:[#allocation3 + $0x520] sm:$0xff] }
 0x192   : > { %2374 = vmatpush.msrb.mxu1 %v1143_v31 }
 0x193   : > { %v2023_v46 = vadd.f32 %v2022_v40, %v1814_v41  ;;  %v971_v40 = vld [vmem:[#allocation3 + $0x528] sm:$0xff] }
 0x195   : > { %v5523_v47 = vadd.f32 %v7414_v33, %v2023_v46  ;;  %1863 = vmatmul.f32.gmra.mxu2 %v956_v44  ;;  %v1398_v48 = vpop.f32.mrf.mxu0  ;;  %v977_v46 = vld [vmem:[#allocation3 + $0x558] sm:$0xff] }
 0x196   : > { %v1607_v49 = vpop.f32.mrf.mxu1  ;;  %2072 = vmatmul.f32.gmra.mxu3 %v957_v45  ;;  %v976_v45 = vld [vmem:[#allocation3 + $0x550] sm:$0xff] }
 0x197   : > { %v1608_v52 = vadd.f32 %v1607_v49, %v1398_v48  ;;  %5779 = vst [vmem:[%s7421_s11 + $0x280] sm:$0xff] %v5523_v47 }
 0x198   : > { %v1816_v53 = vpop.f32.mrf.mxu2  ;;  %1445 = vmatmul.f32.gmra.mxu0 %v954_v50 }
 0x199   : > { %1654 = vmatmul.f32.gmra.mxu1 %v955_v51  ;;  %v2025_v54 = vpop.f32.mrf.mxu3  ;;  %v1817_v55 = vadd.f32 %v1816_v53, %v1608_v52  ;;  %v974_v51 = vld [vmem:[#allocation3 + $0x540] sm:$0xff]  ;;  %v975_v52 = vld [vmem:[#allocation3 + $0x548] sm:$0xff] }
 0x19b   : > { %v2026_v58 = vadd.f32 %v2025_v54, %v1817_v55 }
 0x19d   : > { %v5527_v59 = vadd.f32 %v7414_v33, %v2026_v58  ;;  %1866 = vmatmul.f32.gmra.mxu2 %v960_v56  ;;  %v1401_v60 = vpop.f32.mrf.mxu0  ;;  %v981_v58 = vld [vmem:[#allocation3 + $0x578] sm:$0xff] }
 0x19e   : > { %v1610_v61 = vpop.f32.mrf.mxu1  ;;  %2075 = vmatmul.f32.gmra.mxu3 %v961_v57  ;;  %v980_v57 = vld [vmem:[#allocation3 + $0x570] sm:$0xff] }
 0x19f   : > { %v1611_v0 = vadd.f32 %v1610_v61, %v1401_v60  ;;  %5783 = vst [vmem:[%s7421_s11 + $0x2a0] sm:$0xff] %v5527_v59 }
 0x1a0   : > { %v1819_v1 = vpop.f32.mrf.mxu2  ;;  %1448 = vmatmul.f32.gmra.mxu0 %v958_v62 }
 0x1a1   : > { %1657 = vmatmul.f32.gmra.mxu1 %v959_v63  ;;  %v2028_v2 = vpop.f32.mrf.mxu3  ;;  %v1820_v3 = vadd.f32 %v1819_v1, %v1611_v0  ;;  %v978_v63 = vld [vmem:[#allocation3 + $0x560] sm:$0xff]  ;;  %v979_v0 = vld [vmem:[#allocation3 + $0x568] sm:$0xff] }
 0x1a3   : > { %v2029_v6 = vadd.f32 %v2028_v2, %v1820_v3 }
 0x1a5   : > { %v5531_v7 = vadd.f32 %v7414_v33, %v2029_v6  ;;  %1869 = vmatmul.f32.gmra.mxu2 %v964_v4  ;;  %v1404_v8 = vpop.f32.mrf.mxu0  ;;  %v985_v6 = vld [vmem:[#allocation3 + $0x598] sm:$0xff] }
 0x1a6   : > { %v1613_v9 = vpop.f32.mrf.mxu1  ;;  %2078 = vmatmul.f32.gmra.mxu3 %v965_v5  ;;  %v984_v5 = vld [vmem:[#allocation3 + $0x590] sm:$0xff] }
 0x1a7   : > { %v1614_v12 = vadd.f32 %v1613_v9, %v1404_v8  ;;  %5787 = vst [vmem:[%s7421_s11 + $0x2c0] sm:$0xff] %v5531_v7 }
 0x1a8   : > { %v1822_v13 = vpop.f32.mrf.mxu2  ;;  %1451 = vmatmul.f32.gmra.mxu0 %v962_v10 }
 0x1a9   : > { %1660 = vmatmul.f32.gmra.mxu1 %v963_v11  ;;  %v2031_v14 = vpop.f32.mrf.mxu3  ;;  %v1823_v15 = vadd.f32 %v1822_v13, %v1614_v12  ;;  %v982_v11 = vld [vmem:[#allocation3 + $0x580] sm:$0xff]  ;;  %v983_v12 = vld [vmem:[#allocation3 + $0x588] sm:$0xff] }
 0x1ab   : > { %v2032_v18 = vadd.f32 %v2031_v14, %v1823_v15  ;;  %v1203_v14 = vld [vmem:[%s7318_s6 + $0x468] sm:$0xff] }
 0x1ac   : > { %v1267_v15 = vld [vmem:[%s7318_s6 + $0x668] sm:$0xff]  ;;  %2584 = vmatpush.msrb.mxu2 %v1203_v14 }
 0x1ad   : > { %v5535_v19 = vadd.f32 %v7414_v33, %v2032_v18  ;;  %1872 = vmatmul.f32.gmra.mxu2 %v968_v16  ;;  %v1407_v20 = vpop.f32.mrf.mxu0  ;;  %2793 = vmatpush.msrb.mxu3 %v1267_v15 }
 0x1ae   : > { %v1616_v21 = vpop.f32.mrf.mxu1  ;;  %2081 = vmatmul.f32.gmra.mxu3 %v969_v17 }
 0x1af   : > { %v1617_v24 = vadd.f32 %v1616_v21, %v1407_v20  ;;  %5791 = vst [vmem:[%s7421_s11 + $0x2e0] sm:$0xff] %v5535_v19  ;;  %v1075_v19 = vld [vmem:[%s7318_s6 + $0x68] sm:$0xff]  ;;  %v988_v21 = vld [vmem:[#allocation3 + $0x5b0] sm:$0xff] }
 0x1b0   : > { %v1825_v27 = vpop.f32.mrf.mxu2  ;;  %1454 = vmatmul.f32.gmra.mxu0 %v966_v22  ;;  %v1139_v20 = vld [vmem:[%s7318_s6 + $0x268] sm:$0xff]  ;;  %v989_v22 = vld [vmem:[#allocation3 + $0x5b8] sm:$0xff] }
 0x1b1   : > { %1663 = vmatmul.f32.gmra.mxu1 %v967_v23  ;;  %v2034_v28 = vpop.f32.mrf.mxu3  ;;  %v1826_v29 = vadd.f32 %v1825_v27, %v1617_v24  ;;  %2166 = vmatpush.msrb.mxu0 %v1075_v19  ;;  %v986_v27 = vld [vmem:[#allocation3 + $0x5a0] sm:$0xff] }
 0x1b2   : > { %2375 = vmatpush.msrb.mxu1 %v1139_v20 }
 0x1b3   : > { %v2035_v35 = vadd.f32 %v2034_v28, %v1826_v29  ;;  %v987_v28 = vld [vmem:[#allocation3 + $0x5a8] sm:$0xff] }
 0x1b5   : > { %v5539_v36 = vadd.f32 %v7414_v33, %v2035_v35  ;;  %1875 = vmatmul.f32.gmra.mxu2 %v972_v32  ;;  %v1410_v37 = vpop.f32.mrf.mxu0  ;;  %v993_v35 = vld [vmem:[#allocation3 + $0x5d8] sm:$0xff] }
 0x1b6   : > { %v1619_v38 = vpop.f32.mrf.mxu1  ;;  %2084 = vmatmul.f32.gmra.mxu3 %v973_v34  ;;  %v992_v34 = vld [vmem:[#allocation3 + $0x5d0] sm:$0xff] }
 0x1b7   : > { %v1620_v41 = vadd.f32 %v1619_v38, %v1410_v37  ;;  %5795 = vst [vmem:[%s7421_s11 + $0x300] sm:$0xff] %v5539_v36 }
 0x1b8   : > { %v1828_v42 = vpop.f32.mrf.mxu2  ;;  %1457 = vmatmul.f32.gmra.mxu0 %v970_v39 }
 0x1b9   : > { %1666 = vmatmul.f32.gmra.mxu1 %v971_v40  ;;  %v2037_v43 = vpop.f32.mrf.mxu3  ;;  %v1829_v44 = vadd.f32 %v1828_v42, %v1620_v41  ;;  %v990_v40 = vld [vmem:[#allocation3 + $0x5c0] sm:$0xff]  ;;  %v991_v41 = vld [vmem:[#allocation3 + $0x5c8] sm:$0xff] }
 0x1bb   : > { %v2038_v47 = vadd.f32 %v2037_v43, %v1829_v44 }
 0x1bd   : > { %v5543_v48 = vadd.f32 %v7414_v33, %v2038_v47  ;;  %1878 = vmatmul.f32.gmra.mxu2 %v976_v45  ;;  %v1413_v49 = vpop.f32.mrf.mxu0  ;;  %v997_v47 = vld [vmem:[#allocation3 + $0x5f8] sm:$0xff] }
 0x1be   : > { %v1622_v50 = vpop.f32.mrf.mxu1  ;;  %2087 = vmatmul.f32.gmra.mxu3 %v977_v46  ;;  %v996_v46 = vld [vmem:[#allocation3 + $0x5f0] sm:$0xff] }
 0x1bf   : > { %v1623_v53 = vadd.f32 %v1622_v50, %v1413_v49  ;;  %5799 = vst [vmem:[%s7421_s11 + $0x320] sm:$0xff] %v5543_v48 }
 0x1c0   : > { %v1831_v54 = vpop.f32.mrf.mxu2  ;;  %1460 = vmatmul.f32.gmra.mxu0 %v974_v51 }
 0x1c1   : > { %1669 = vmatmul.f32.gmra.mxu1 %v975_v52  ;;  %v2040_v55 = vpop.f32.mrf.mxu3  ;;  %v1832_v56 = vadd.f32 %v1831_v54, %v1623_v53  ;;  %v994_v52 = vld [vmem:[#allocation3 + $0x5e0] sm:$0xff]  ;;  %v995_v53 = vld [vmem:[#allocation3 + $0x5e8] sm:$0xff] }
 0x1c3   : > { %v2041_v59 = vadd.f32 %v2040_v55, %v1832_v56 }
 0x1c5   : > { %v5547_v60 = vadd.f32 %v7414_v33, %v2041_v59  ;;  %1881 = vmatmul.f32.gmra.mxu2 %v980_v57  ;;  %v1416_v61 = vpop.f32.mrf.mxu0  ;;  %v1001_v59 = vld [vmem:[#allocation3 + $0x618] sm:$0xff] }
 0x1c6   : > { %v1625_v62 = vpop.f32.mrf.mxu1  ;;  %2090 = vmatmul.f32.gmra.mxu3 %v981_v58  ;;  %v1000_v58 = vld [vmem:[#allocation3 + $0x610] sm:$0xff] }
 0x1c7   : > { %v1626_v1 = vadd.f32 %v1625_v62, %v1416_v61  ;;  %5803 = vst [vmem:[%s7421_s11 + $0x340] sm:$0xff] %v5547_v60 }
 0x1c8   : > { %v1834_v2 = vpop.f32.mrf.mxu2  ;;  %1463 = vmatmul.f32.gmra.mxu0 %v978_v63 }
 0x1c9   : > { %1672 = vmatmul.f32.gmra.mxu1 %v979_v0  ;;  %v2043_v3 = vpop.f32.mrf.mxu3  ;;  %v1835_v4 = vadd.f32 %v1834_v2, %v1626_v1  ;;  %v998_v0 = vld [vmem:[#allocation3 + $0x600] sm:$0xff]  ;;  %v999_v1 = vld [vmem:[#allocation3 + $0x608] sm:$0xff] }
 0x1cb   : > { %v2044_v7 = vadd.f32 %v2043_v3, %v1835_v4  ;;  %v1199_v3 = vld [vmem:[%s7318_s6 + $0x448] sm:$0xff] }
 0x1cc   : > { %v1263_v4 = vld [vmem:[%s7318_s6 + $0x648] sm:$0xff]  ;;  %2585 = vmatpush.msrb.mxu2 %v1199_v3 }
 0x1cd   : > { %v5551_v8 = vadd.f32 %v7414_v33, %v2044_v7  ;;  %1884 = vmatmul.f32.gmra.mxu2 %v984_v5  ;;  %v1419_v9 = vpop.f32.mrf.mxu0  ;;  %2794 = vmatpush.msrb.mxu3 %v1263_v4 }
 0x1ce   : > { %v1628_v10 = vpop.f32.mrf.mxu1  ;;  %2093 = vmatmul.f32.gmra.mxu3 %v985_v6 }
 0x1cf   : > { %v1629_v13 = vadd.f32 %v1628_v10, %v1419_v9  ;;  %5807 = vst [vmem:[%s7421_s11 + $0x360] sm:$0xff] %v5551_v8  ;;  %v1071_v8 = vld [vmem:[%s7318_s6 + $0x48] sm:$0xff]  ;;  %v1004_v10 = vld [vmem:[#allocation3 + $0x630] sm:$0xff] }
 0x1d0   : > { %v1837_v16 = vpop.f32.mrf.mxu2  ;;  %1466 = vmatmul.f32.gmra.mxu0 %v982_v11  ;;  %v1135_v9 = vld [vmem:[%s7318_s6 + $0x248] sm:$0xff]  ;;  %v1005_v11 = vld [vmem:[#allocation3 + $0x638] sm:$0xff] }
 0x1d1   : > { %1675 = vmatmul.f32.gmra.mxu1 %v983_v12  ;;  %v2046_v17 = vpop.f32.mrf.mxu3  ;;  %v1838_v18 = vadd.f32 %v1837_v16, %v1629_v13  ;;  %2167 = vmatpush.msrb.mxu0 %v1071_v8  ;;  %v1002_v16 = vld [vmem:[#allocation3 + $0x620] sm:$0xff] }
 0x1d2   : > { %2376 = vmatpush.msrb.mxu1 %v1135_v9 }
 0x1d3   : > { %v2047_v23 = vadd.f32 %v2046_v17, %v1838_v18  ;;  %v1003_v17 = vld [vmem:[#allocation3 + $0x628] sm:$0xff] }
 0x1d5   : > { %v5555_v24 = vadd.f32 %v7414_v33, %v2047_v23  ;;  %1887 = vmatmul.f32.gmra.mxu2 %v988_v21  ;;  %v1422_v25 = vpop.f32.mrf.mxu0  ;;  %v1009_v23 = vld [vmem:[#allocation3 + $0x658] sm:$0xff] }
 0x1d6   : > { %v1631_v26 = vpop.f32.mrf.mxu1  ;;  %2096 = vmatmul.f32.gmra.mxu3 %v989_v22  ;;  %v1008_v22 = vld [vmem:[#allocation3 + $0x650] sm:$0xff] }
 0x1d7   : > { %v1632_v29 = vadd.f32 %v1631_v26, %v1422_v25  ;;  %5811 = vst [vmem:[%s7421_s11 + $0x380] sm:$0xff] %v5555_v24 }
 0x1d8   : > { %v1840_v30 = vpop.f32.mrf.mxu2  ;;  %1469 = vmatmul.f32.gmra.mxu0 %v986_v27 }
 0x1d9   : > { %1678 = vmatmul.f32.gmra.mxu1 %v987_v28  ;;  %v2049_v31 = vpop.f32.mrf.mxu3  ;;  %v1841_v32 = vadd.f32 %v1840_v30, %v1632_v29  ;;  %v1006_v28 = vld [vmem:[#allocation3 + $0x640] sm:$0xff]  ;;  %v1007_v29 = vld [vmem:[#allocation3 + $0x648] sm:$0xff] }
 0x1db   : > { %v2050_v36 = vadd.f32 %v2049_v31, %v1841_v32 }
 0x1dd   : > { %v5559_v37 = vadd.f32 %v7414_v33, %v2050_v36  ;;  %1890 = vmatmul.f32.gmra.mxu2 %v992_v34  ;;  %v1425_v38 = vpop.f32.mrf.mxu0  ;;  %v1013_v36 = vld [vmem:[#allocation3 + $0x678] sm:$0xff] }
 0x1de   : > { %v1634_v39 = vpop.f32.mrf.mxu1  ;;  %2099 = vmatmul.f32.gmra.mxu3 %v993_v35  ;;  %v1012_v35 = vld [vmem:[#allocation3 + $0x670] sm:$0xff] }
 0x1df   : > { %v1635_v42 = vadd.f32 %v1634_v39, %v1425_v38  ;;  %5815 = vst [vmem:[%s7421_s11 + $0x3a0] sm:$0xff] %v5559_v37 }
 0x1e0   : > { %v1843_v43 = vpop.f32.mrf.mxu2  ;;  %1472 = vmatmul.f32.gmra.mxu0 %v990_v40 }
 0x1e1   : > { %1681 = vmatmul.f32.gmra.mxu1 %v991_v41  ;;  %v2052_v44 = vpop.f32.mrf.mxu3  ;;  %v1844_v45 = vadd.f32 %v1843_v43, %v1635_v42  ;;  %v1010_v41 = vld [vmem:[#allocation3 + $0x660] sm:$0xff]  ;;  %v1011_v42 = vld [vmem:[#allocation3 + $0x668] sm:$0xff] }
 0x1e3   : > { %v2053_v48 = vadd.f32 %v2052_v44, %v1844_v45 }
 0x1e5   : > { %v5563_v49 = vadd.f32 %v7414_v33, %v2053_v48  ;;  %1893 = vmatmul.f32.gmra.mxu2 %v996_v46  ;;  %v1428_v50 = vpop.f32.mrf.mxu0  ;;  %v1017_v48 = vld [vmem:[#allocation3 + $0x698] sm:$0xff] }
 0x1e6   : > { %v1637_v51 = vpop.f32.mrf.mxu1  ;;  %2102 = vmatmul.f32.gmra.mxu3 %v997_v47  ;;  %v1016_v47 = vld [vmem:[#allocation3 + $0x690] sm:$0xff] }
 0x1e7   : > { %v1638_v54 = vadd.f32 %v1637_v51, %v1428_v50  ;;  %5819 = vst [vmem:[%s7421_s11 + $0x3c0] sm:$0xff] %v5563_v49 }
 0x1e8   : > { %v1846_v55 = vpop.f32.mrf.mxu2  ;;  %1475 = vmatmul.f32.gmra.mxu0 %v994_v52 }
 0x1e9   : > { %1684 = vmatmul.f32.gmra.mxu1 %v995_v53  ;;  %v2055_v56 = vpop.f32.mrf.mxu3  ;;  %v1847_v57 = vadd.f32 %v1846_v55, %v1638_v54  ;;  %v1014_v53 = vld [vmem:[#allocation3 + $0x680] sm:$0xff]  ;;  %v1015_v54 = vld [vmem:[#allocation3 + $0x688] sm:$0xff] }
 0x1eb   : > { %v2056_v60 = vadd.f32 %v2055_v56, %v1847_v57  ;;  %v1195_v56 = vld [vmem:[%s7318_s6 + $0x428] sm:$0xff] }
 0x1ec   : > { %v1259_v57 = vld [vmem:[%s7318_s6 + $0x628] sm:$0xff]  ;;  %2586 = vmatpush.msrb.mxu2 %v1195_v56 }
 0x1ed   : > { %v5567_v61 = vadd.f32 %v7414_v33, %v2056_v60  ;;  %1896 = vmatmul.f32.gmra.mxu2 %v1000_v58  ;;  %v1431_v62 = vpop.f32.mrf.mxu0  ;;  %2795 = vmatpush.msrb.mxu3 %v1259_v57 }
 0x1ee   : > { %v1640_v63 = vpop.f32.mrf.mxu1  ;;  %2105 = vmatmul.f32.gmra.mxu3 %v1001_v59 }
 0x1ef   : > { %v1641_v2 = vadd.f32 %v1640_v63, %v1431_v62  ;;  %5823 = vst [vmem:[%s7421_s11 + $0x3e0] sm:$0xff] %v5567_v61  ;;  %v1067_v61 = vld [vmem:[%s7318_s6 + $0x28] sm:$0xff]  ;;  %v1020_v63 = vld [vmem:[#allocation3 + $0x6b0] sm:$0xff] }
 0x1f0   : > { %v1849_v5 = vpop.f32.mrf.mxu2  ;;  %1478 = vmatmul.f32.gmra.mxu0 %v998_v0  ;;  %v1131_v62 = vld [vmem:[%s7318_s6 + $0x228] sm:$0xff]  ;;  %v1021_v0 = vld [vmem:[#allocation3 + $0x6b8] sm:$0xff] }
 0x1f1   : > { %1687 = vmatmul.f32.gmra.mxu1 %v999_v1  ;;  %v2058_v6 = vpop.f32.mrf.mxu3  ;;  %v1850_v7 = vadd.f32 %v1849_v5, %v1641_v2  ;;  %2168 = vmatpush.msrb.mxu0 %v1067_v61  ;;  %v1018_v5 = vld [vmem:[#allocation3 + $0x6a0] sm:$0xff] }
 0x1f2   : > { %2377 = vmatpush.msrb.mxu1 %v1131_v62 }
 0x1f3   : > { %v2059_v12 = vadd.f32 %v2058_v6, %v1850_v7  ;;  %v1019_v6 = vld [vmem:[#allocation3 + $0x6a8] sm:$0xff] }
 0x1f5   : > { %v5571_v13 = vadd.f32 %v7414_v33, %v2059_v12  ;;  %1899 = vmatmul.f32.gmra.mxu2 %v1004_v10  ;;  %v1434_v14 = vpop.f32.mrf.mxu0  ;;  %v1025_v12 = vld [vmem:[#allocation3 + $0x6d8] sm:$0xff] }
 0x1f6   : > { %v1643_v15 = vpop.f32.mrf.mxu1  ;;  %2108 = vmatmul.f32.gmra.mxu3 %v1005_v11  ;;  %v1024_v11 = vld [vmem:[#allocation3 + $0x6d0] sm:$0xff] }
 0x1f7   : > { %v1644_v18 = vadd.f32 %v1643_v15, %v1434_v14  ;;  %5827 = vst [vmem:[%s7421_s11 + $0x400] sm:$0xff] %v5571_v13 }
 0x1f8   : > { %v1852_v19 = vpop.f32.mrf.mxu2  ;;  %1481 = vmatmul.f32.gmra.mxu0 %v1002_v16 }
 0x1f9   : > { %1690 = vmatmul.f32.gmra.mxu1 %v1003_v17  ;;  %v2061_v20 = vpop.f32.mrf.mxu3  ;;  %v1853_v21 = vadd.f32 %v1852_v19, %v1644_v18  ;;  %v1022_v17 = vld [vmem:[#allocation3 + $0x6c0] sm:$0xff]  ;;  %v1023_v18 = vld [vmem:[#allocation3 + $0x6c8] sm:$0xff] }
 0x1fb   : > { %v2062_v24 = vadd.f32 %v2061_v20, %v1853_v21 }
 0x1fd   : > { %v5575_v25 = vadd.f32 %v7414_v33, %v2062_v24  ;;  %1902 = vmatmul.f32.gmra.mxu2 %v1008_v22  ;;  %v1437_v26 = vpop.f32.mrf.mxu0  ;;  %v1029_v24 = vld [vmem:[#allocation3 + $0x6f8] sm:$0xff] }
 0x1fe   : > { %v1646_v27 = vpop.f32.mrf.mxu1  ;;  %2111 = vmatmul.f32.gmra.mxu3 %v1009_v23  ;;  %v1028_v23 = vld [vmem:[#allocation3 + $0x6f0] sm:$0xff] }
 0x1ff   : > { %v1647_v30 = vadd.f32 %v1646_v27, %v1437_v26  ;;  %5831 = vst [vmem:[%s7421_s11 + $0x420] sm:$0xff] %v5575_v25 }
 0x200   : > { %v1855_v31 = vpop.f32.mrf.mxu2  ;;  %1484 = vmatmul.f32.gmra.mxu0 %v1006_v28 }
 0x201   : > { %1693 = vmatmul.f32.gmra.mxu1 %v1007_v29  ;;  %v2064_v32 = vpop.f32.mrf.mxu3  ;;  %v1856_v34 = vadd.f32 %v1855_v31, %v1647_v30  ;;  %v1026_v29 = vld [vmem:[#allocation3 + $0x6e0] sm:$0xff]  ;;  %v1027_v30 = vld [vmem:[#allocation3 + $0x6e8] sm:$0xff] }
 0x203   : > { %v2065_v37 = vadd.f32 %v2064_v32, %v1856_v34 }
 0x205   : > { %v5579_v38 = vadd.f32 %v7414_v33, %v2065_v37  ;;  %1905 = vmatmul.f32.gmra.mxu2 %v1012_v35  ;;  %v1440_v39 = vpop.f32.mrf.mxu0  ;;  %v1033_v37 = vld [vmem:[#allocation3 + $0x718] sm:$0xff] }
 0x206   : > { %v1649_v40 = vpop.f32.mrf.mxu1  ;;  %2114 = vmatmul.f32.gmra.mxu3 %v1013_v36  ;;  %v1032_v36 = vld [vmem:[#allocation3 + $0x710] sm:$0xff] }
 0x207   : > { %v1650_v43 = vadd.f32 %v1649_v40, %v1440_v39  ;;  %5835 = vst [vmem:[%s7421_s11 + $0x440] sm:$0xff] %v5579_v38 }
 0x208   : > { %v1858_v44 = vpop.f32.mrf.mxu2  ;;  %1487 = vmatmul.f32.gmra.mxu0 %v1010_v41 }
 0x209   : > { %1696 = vmatmul.f32.gmra.mxu1 %v1011_v42  ;;  %v2067_v45 = vpop.f32.mrf.mxu3  ;;  %v1859_v46 = vadd.f32 %v1858_v44, %v1650_v43  ;;  %v1030_v42 = vld [vmem:[#allocation3 + $0x700] sm:$0xff]  ;;  %v1031_v43 = vld [vmem:[#allocation3 + $0x708] sm:$0xff] }
 0x20b   : > { %v2068_v49 = vadd.f32 %v2067_v45, %v1859_v46  ;;  %v1191_v45 = vld [vmem:[%s7318_s6 + $0x408] sm:$0xff] }
 0x20c   : > { %v1255_v46 = vld [vmem:[%s7318_s6 + $0x608] sm:$0xff]  ;;  %2587 = vmatpush.msrb.mxu2 %v1191_v45 }
 0x20d   : > { %v5583_v50 = vadd.f32 %v7414_v33, %v2068_v49  ;;  %1908 = vmatmul.f32.gmra.mxu2 %v1016_v47  ;;  %v1443_v51 = vpop.f32.mrf.mxu0  ;;  %2796 = vmatpush.msrb.mxu3 %v1255_v46 }
 0x20e   : > { %v1652_v52 = vpop.f32.mrf.mxu1  ;;  %2117 = vmatmul.f32.gmra.mxu3 %v1017_v48 }
 0x20f   : > { %v1653_v55 = vadd.f32 %v1652_v52, %v1443_v51  ;;  %5839 = vst [vmem:[%s7421_s11 + $0x460] sm:$0xff] %v5583_v50  ;;  %v1063_v50 = vld [vmem:[%s7318_s6 + $0x8] sm:$0xff]  ;;  %v1036_v52 = vld [vmem:[#allocation3 + $0x730] sm:$0xff] }
 0x210   : > { %v1861_v58 = vpop.f32.mrf.mxu2  ;;  %1490 = vmatmul.f32.gmra.mxu0 %v1014_v53  ;;  %v1127_v51 = vld [vmem:[%s7318_s6 + $0x208] sm:$0xff]  ;;  %v1037_v53 = vld [vmem:[#allocation3 + $0x738] sm:$0xff] }
 0x211   : > { %1699 = vmatmul.f32.gmra.mxu1 %v1015_v54  ;;  %v2070_v59 = vpop.f32.mrf.mxu3  ;;  %v1862_v60 = vadd.f32 %v1861_v58, %v1653_v55  ;;  %2169 = vmatpush.msrb.mxu0 %v1063_v50  ;;  %v1034_v58 = vld [vmem:[#allocation3 + $0x720] sm:$0xff] }
 0x212   : > { %2378 = vmatpush.msrb.mxu1 %v1127_v51 }
 0x213   : > { %v2071_v1 = vadd.f32 %v2070_v59, %v1862_v60  ;;  %v1035_v59 = vld [vmem:[#allocation3 + $0x728] sm:$0xff] }
 0x215   : > { %v5587_v2 = vadd.f32 %v7414_v33, %v2071_v1  ;;  %1911 = vmatmul.f32.gmra.mxu2 %v1020_v63  ;;  %v1446_v3 = vpop.f32.mrf.mxu0  ;;  %v1041_v1 = vld [vmem:[#allocation3 + $0x758] sm:$0xff] }
 0x216   : > { %v1655_v4 = vpop.f32.mrf.mxu1  ;;  %2120 = vmatmul.f32.gmra.mxu3 %v1021_v0  ;;  %v1040_v0 = vld [vmem:[#allocation3 + $0x750] sm:$0xff] }
 0x217   : > { %v1656_v7 = vadd.f32 %v1655_v4, %v1446_v3  ;;  %5843 = vst [vmem:[%s7421_s11 + $0x480] sm:$0xff] %v5587_v2 }
 0x218   : > { %v1864_v8 = vpop.f32.mrf.mxu2  ;;  %1493 = vmatmul.f32.gmra.mxu0 %v1018_v5 }
 0x219   : > { %1702 = vmatmul.f32.gmra.mxu1 %v1019_v6  ;;  %v2073_v9 = vpop.f32.mrf.mxu3  ;;  %v1865_v10 = vadd.f32 %v1864_v8, %v1656_v7  ;;  %v1038_v6 = vld [vmem:[#allocation3 + $0x740] sm:$0xff]  ;;  %v1039_v7 = vld [vmem:[#allocation3 + $0x748] sm:$0xff] }
 0x21b   : > { %v2074_v13 = vadd.f32 %v2073_v9, %v1865_v10 }
 0x21d   : > { %v5591_v14 = vadd.f32 %v7414_v33, %v2074_v13  ;;  %1914 = vmatmul.f32.gmra.mxu2 %v1024_v11  ;;  %v1449_v15 = vpop.f32.mrf.mxu0  ;;  %v1045_v13 = vld [vmem:[#allocation3 + $0x778] sm:$0xff] }
 0x21e   : > { %v1658_v16 = vpop.f32.mrf.mxu1  ;;  %2123 = vmatmul.f32.gmra.mxu3 %v1025_v12  ;;  %v1044_v12 = vld [vmem:[#allocation3 + $0x770] sm:$0xff] }
 0x21f   : > { %v1659_v19 = vadd.f32 %v1658_v16, %v1449_v15  ;;  %5847 = vst [vmem:[%s7421_s11 + $0x4a0] sm:$0xff] %v5591_v14 }
 0x220   : > { %v1867_v20 = vpop.f32.mrf.mxu2  ;;  %1496 = vmatmul.f32.gmra.mxu0 %v1022_v17 }
 0x221   : > { %1705 = vmatmul.f32.gmra.mxu1 %v1023_v18  ;;  %v2076_v21 = vpop.f32.mrf.mxu3  ;;  %v1868_v22 = vadd.f32 %v1867_v20, %v1659_v19  ;;  %v1042_v18 = vld [vmem:[#allocation3 + $0x760] sm:$0xff]  ;;  %v1043_v19 = vld [vmem:[#allocation3 + $0x768] sm:$0xff] }
 0x223   : > { %v2077_v25 = vadd.f32 %v2076_v21, %v1868_v22 }
 0x225   : > { %v5595_v26 = vadd.f32 %v7414_v33, %v2077_v25  ;;  %1917 = vmatmul.f32.gmra.mxu2 %v1028_v23  ;;  %v1452_v27 = vpop.f32.mrf.mxu0  ;;  %v1049_v25 = vld [vmem:[#allocation3 + $0x798] sm:$0xff] }
 0x226   : > { %v1661_v28 = vpop.f32.mrf.mxu1  ;;  %2126 = vmatmul.f32.gmra.mxu3 %v1029_v24  ;;  %v1048_v24 = vld [vmem:[#allocation3 + $0x790] sm:$0xff] }
 0x227   : > { %v1662_v31 = vadd.f32 %v1661_v28, %v1452_v27  ;;  %5851 = vst [vmem:[%s7421_s11 + $0x4c0] sm:$0xff] %v5595_v26 }
 0x228   : > { %v1870_v32 = vpop.f32.mrf.mxu2  ;;  %1499 = vmatmul.f32.gmra.mxu0 %v1026_v29 }
 0x229   : > { %1708 = vmatmul.f32.gmra.mxu1 %v1027_v30  ;;  %v2079_v34 = vpop.f32.mrf.mxu3  ;;  %v1871_v35 = vadd.f32 %v1870_v32, %v1662_v31  ;;  %v1046_v30 = vld [vmem:[#allocation3 + $0x780] sm:$0xff]  ;;  %v1047_v31 = vld [vmem:[#allocation3 + $0x788] sm:$0xff] }
 0x22b   : > { %v2080_v38 = vadd.f32 %v2079_v34, %v1871_v35  ;;  %v1252_v34 = vld [vmem:[%s7318_s6 + $0x5f0] sm:$0xff] }
 0x22c   : > { %v1316_v35 = vld [vmem:[%s7318_s6 + $0x7f0] sm:$0xff]  ;;  %3408 = vmatpush.msra.mxu2 %v1252_v34 }
 0x22d   : > { %v5599_v39 = vadd.f32 %v7414_v33, %v2080_v38  ;;  %1920 = vmatmul.f32.gmra.mxu2 %v1032_v36  ;;  %v1455_v40 = vpop.f32.mrf.mxu0  ;;  %3617 = vmatpush.msra.mxu3 %v1316_v35  ;;  %v6212_v35 = vld [vmem:[#allocation3 + $0x38] sm:$0xff] }
 0x22e   : > { %v1664_v41 = vpop.f32.mrf.mxu1  ;;  %2129 = vmatmul.f32.gmra.mxu3 %v1033_v37 }
 0x22f   : > { %v1665_v44 = vadd.f32 %v1664_v41, %v1455_v40  ;;  %5855 = vst [vmem:[%s7421_s11 + $0x4e0] sm:$0xff] %v5599_v39  ;;  %v1124_v39 = vld [vmem:[%s7318_s6 + $0x1f0] sm:$0xff] }
 0x230   : > { %v1873_v47 = vpop.f32.mrf.mxu2  ;;  %1502 = vmatmul.f32.gmra.mxu0 %v1030_v42  ;;  %v1188_v40 = vld [vmem:[%s7318_s6 + $0x3f0] sm:$0xff]  ;;  %v1053_v42 = vld [vmem:[#allocation3 + $0x7b8] sm:$0xff] }
 0x231   : > { %1711 = vmatmul.f32.gmra.mxu1 %v1031_v43  ;;  %v2082_v48 = vpop.f32.mrf.mxu3  ;;  %v1874_v49 = vadd.f32 %v1873_v47, %v1665_v44  ;;  %v1052_v41 = vld [vmem:[#allocation3 + $0x7b0] sm:$0xff]  ;;  %2990 = vmatpush.msra.mxu0 %v1124_v39  ;;  %v1050_v47 = vld [vmem:[#allocation3 + $0x7a0] sm:$0xff]  ;;  %v6214_v39 = vld [vmem:[#allocation3 + $0x28] sm:$0xff] }
 0x232   : > { %3199 = vmatpush.msra.mxu1 %v1188_v40 }
 0x233   : > { %v2083_v54 = vadd.f32 %v2082_v48, %v1874_v49  ;;  %v1051_v48 = vld [vmem:[#allocation3 + $0x7a8] sm:$0xff] }
 0x235   : > { %v5603_v55 = vadd.f32 %v7414_v33, %v2083_v54  ;;  %1923 = vmatmul.f32.gmra.mxu2 %v1036_v52  ;;  %v1458_v56 = vpop.f32.mrf.mxu0  ;;  %v1057_v54 = vld [vmem:[#allocation3 + $0x7d8] sm:$0xff] }
 0x236   : > { %v1667_v57 = vpop.f32.mrf.mxu1  ;;  %2132 = vmatmul.f32.gmra.mxu3 %v1037_v53  ;;  %v1056_v53 = vld [vmem:[#allocation3 + $0x7d0] sm:$0xff] }
 0x237   : > { %v1668_v60 = vadd.f32 %v1667_v57, %v1458_v56  ;;  %5859 = vst [vmem:[%s7421_s11 + $0x500] sm:$0xff] %v5603_v55 }
 0x238   : > { %v1876_v61 = vpop.f32.mrf.mxu2  ;;  %1505 = vmatmul.f32.gmra.mxu0 %v1034_v58 }
 0x239   : > { %1714 = vmatmul.f32.gmra.mxu1 %v1035_v59  ;;  %v2085_v62 = vpop.f32.mrf.mxu3  ;;  %v1877_v63 = vadd.f32 %v1876_v61, %v1668_v60  ;;  %v1054_v59 = vld [vmem:[#allocation3 + $0x7c0] sm:$0xff]  ;;  %v1055_v60 = vld [vmem:[#allocation3 + $0x7c8] sm:$0xff] }
 0x23b   : > { %v2086_v2 = vadd.f32 %v2085_v62, %v1877_v63 }
 0x23d   : > { %v5607_v3 = vadd.f32 %v7414_v33, %v2086_v2  ;;  %1926 = vmatmul.f32.gmra.mxu2 %v1040_v0  ;;  %v1461_v4 = vpop.f32.mrf.mxu0  ;;  %v1061_v2 = vld [vmem:[#allocation3 + $0x7f8] sm:$0xff] }
 0x23e   : > { %v1670_v5 = vpop.f32.mrf.mxu1  ;;  %2135 = vmatmul.f32.gmra.mxu3 %v1041_v1  ;;  %v1060_v1 = vld [vmem:[#allocation3 + $0x7f0] sm:$0xff] }
 0x23f   : > { %v1671_v8 = vadd.f32 %v1670_v5, %v1461_v4  ;;  %5863 = vst [vmem:[%s7421_s11 + $0x520] sm:$0xff] %v5607_v3 }
 0x240   : > { %v1879_v9 = vpop.f32.mrf.mxu2  ;;  %1508 = vmatmul.f32.gmra.mxu0 %v1038_v6 }
 0x241   : > { %1717 = vmatmul.f32.gmra.mxu1 %v1039_v7  ;;  %v2088_v10 = vpop.f32.mrf.mxu3  ;;  %v1880_v11 = vadd.f32 %v1879_v9, %v1671_v8  ;;  %v1058_v7 = vld [vmem:[#allocation3 + $0x7e0] sm:$0xff]  ;;  %v1059_v8 = vld [vmem:[#allocation3 + $0x7e8] sm:$0xff] }
 0x243   : > { %v2089_v14 = vadd.f32 %v2088_v10, %v1880_v11 }
 0x245   : > { %v5611_v15 = vadd.f32 %v7414_v33, %v2089_v14  ;;  %1929 = vmatmul.f32.gmra.mxu2 %v1044_v12  ;;  %v1464_v16 = vpop.f32.mrf.mxu0 }
 0x246   : > { %v1673_v17 = vpop.f32.mrf.mxu1  ;;  %2138 = vmatmul.f32.gmra.mxu3 %v1045_v13 }
 0x247   : > { %v1674_v20 = vadd.f32 %v1673_v17, %v1464_v16  ;;  %5867 = vst [vmem:[%s7421_s11 + $0x540] sm:$0xff] %v5611_v15  ;;  %v6207_v15 = vld [vmem:[#allocation3 + $0x10] sm:$0xff] }
 0x248   : > { %v1882_v21 = vpop.f32.mrf.mxu2  ;;  %1511 = vmatmul.f32.gmra.mxu0 %v1042_v18  ;;  %v6208_v18 = vld [vmem:[#allocation3 + $0x18] sm:$0xff] }
 0x249   : > { %1720 = vmatmul.f32.gmra.mxu1 %v1043_v19  ;;  %v2091_v22 = vpop.f32.mrf.mxu3  ;;  %v1883_v23 = vadd.f32 %v1882_v21, %v1674_v20  ;;  %v1248_v20 = vld [vmem:[%s7318_s6 + $0x5d0] sm:$0xff] }
 0x24a   : > { %v1312_v21 = vld [vmem:[%s7318_s6 + $0x7d0] sm:$0xff]  ;;  %3409 = vmatpush.msra.mxu2 %v1248_v20 }
 0x24b   : > { %v2092_v26 = vadd.f32 %v2091_v22, %v1883_v23  ;;  %v6209_v23 = vld [vmem:[#allocation3] sm:$0xff]  ;;  %3618 = vmatpush.msra.mxu3 %v1312_v21  ;;  %v6227_v20 = vld [vmem:[#allocation3 + $0xb0] sm:$0xff] }
 0x24d   : > { %v5615_v27 = vadd.f32 %v7414_v33, %v2092_v26  ;;  %1932 = vmatmul.f32.gmra.mxu2 %v1048_v24  ;;  %v1467_v28 = vpop.f32.mrf.mxu0  ;;  %v6210_v24 = vld [vmem:[#allocation3 + $0x8] sm:$0xff] }
 0x24e   : > { %v1676_v29 = vpop.f32.mrf.mxu1  ;;  %2141 = vmatmul.f32.gmra.mxu3 %v1049_v25 }
 0x24f   : > { %v1677_v32 = vadd.f32 %v1676_v29, %v1467_v28  ;;  %5871 = vst [vmem:[%s7421_s11 + $0x560] sm:$0xff] %v5615_v27  ;;  %v1120_v27 = vld [vmem:[%s7318_s6 + $0x1d0] sm:$0xff] }
 0x250   : > { %v1885_v36 = vpop.f32.mrf.mxu2  ;;  %1514 = vmatmul.f32.gmra.mxu0 %v1046_v30  ;;  %v1184_v28 = vld [vmem:[%s7318_s6 + $0x3d0] sm:$0xff] }
 0x251   : > { %1723 = vmatmul.f32.gmra.mxu1 %v1047_v31  ;;  %v2094_v37 = vpop.f32.mrf.mxu3  ;;  %v1886_v38 = vadd.f32 %v1885_v36, %v1677_v32  ;;  %2991 = vmatpush.msra.mxu0 %v1120_v27  ;;  %v6211_v31 = vld [vmem:[#allocation3 + $0x30] sm:$0xff]  ;;  %v6230_v27 = vld [vmem:[#allocation3 + $0xa8] sm:$0xff] }
 0x252   : > { %3200 = vmatpush.msra.mxu1 %v1184_v28 }
 0x253   : > { %v2095_v43 = vadd.f32 %v2094_v37, %v1886_v38  ;;  %v6213_v38 = vld [vmem:[#allocation3 + $0x20] sm:$0xff] }
 0x255   : > { %v5619_v44 = vadd.f32 %v7414_v33, %v2095_v43  ;;  %1935 = vmatmul.f32.gmra.mxu2 %v1052_v41  ;;  %v1470_v45 = vpop.f32.mrf.mxu0 }
 0x256   : > { %v1679_v46 = vpop.f32.mrf.mxu1  ;;  %2144 = vmatmul.f32.gmra.mxu3 %v1053_v42 }
 0x257   : > { %v1680_v49 = vadd.f32 %v1679_v46, %v1470_v45  ;;  %5875 = vst [vmem:[%s7421_s11 + $0x580] sm:$0xff] %v5619_v44  ;;  %v6215_v44 = vld [vmem:[#allocation3 + $0x50] sm:$0xff] }
 0x258   : > { %v1888_v50 = vpop.f32.mrf.mxu2  ;;  %1517 = vmatmul.f32.gmra.mxu0 %v1050_v47  ;;  %v6216_v47 = vld [vmem:[#allocation3 + $0x58] sm:$0xff] }
 0x259   : > { %1726 = vmatmul.f32.gmra.mxu1 %v1051_v48  ;;  %v2097_v51 = vpop.f32.mrf.mxu3  ;;  %v1889_v52 = vadd.f32 %v1888_v50, %v1680_v49  ;;  %v6217_v50 = vld [vmem:[#allocation3 + $0x40] sm:$0xff] }
 0x25b   : > { %v2098_v55 = vadd.f32 %v2097_v51, %v1889_v52  ;;  %v6218_v51 = vld [vmem:[#allocation3 + $0x48] sm:$0xff] }
 0x25d   : > { %v5623_v56 = vadd.f32 %v7414_v33, %v2098_v55  ;;  %1938 = vmatmul.f32.gmra.mxu2 %v1056_v53  ;;  %v1473_v57 = vpop.f32.mrf.mxu0 }
 0x25e   : > { %v1682_v58 = vpop.f32.mrf.mxu1  ;;  %2147 = vmatmul.f32.gmra.mxu3 %v1057_v54 }
 0x25f   : > { %v1683_v61 = vadd.f32 %v1682_v58, %v1473_v57  ;;  %5879 = vst [vmem:[%s7421_s11 + $0x5a0] sm:$0xff] %v5623_v56  ;;  %v6219_v56 = vld [vmem:[#allocation3 + $0x70] sm:$0xff] }
 0x260   : > { %v1891_v62 = vpop.f32.mrf.mxu2  ;;  %1520 = vmatmul.f32.gmra.mxu0 %v1054_v59  ;;  %v6220_v59 = vld [vmem:[#allocation3 + $0x78] sm:$0xff] }
 0x261   : > { %1729 = vmatmul.f32.gmra.mxu1 %v1055_v60  ;;  %v2100_v63 = vpop.f32.mrf.mxu3  ;;  %v1892_v0 = vadd.f32 %v1891_v62, %v1683_v61  ;;  %v6221_v62 = vld [vmem:[#allocation3 + $0x60] sm:$0xff] }
 0x263   : > { %v2101_v3 = vadd.f32 %v2100_v63, %v1892_v0  ;;  %v6222_v63 = vld [vmem:[#allocation3 + $0x68] sm:$0xff] }
 0x265   : > { %v5627_v4 = vadd.f32 %v7414_v33, %v2101_v3  ;;  %1941 = vmatmul.f32.gmra.mxu2 %v1060_v1  ;;  %v1476_v5 = vpop.f32.mrf.mxu0 }
 0x266   : > { %v1685_v6 = vpop.f32.mrf.mxu1  ;;  %2150 = vmatmul.f32.gmra.mxu3 %v1061_v2 }
 0x267   : > { %v1686_v9 = vadd.f32 %v1685_v6, %v1476_v5  ;;  %5883 = vst [vmem:[%s7421_s11 + $0x5c0] sm:$0xff] %v5627_v4  ;;  %v6223_v4 = vld [vmem:[#allocation3 + $0x90] sm:$0xff] }
 0x268   : > { %v1894_v10 = vpop.f32.mrf.mxu2  ;;  %1523 = vmatmul.f32.gmra.mxu0 %v1058_v7  ;;  %v6224_v7 = vld [vmem:[#allocation3 + $0x98] sm:$0xff] }
 0x269   : > { %1732 = vmatmul.f32.gmra.mxu1 %v1059_v8  ;;  %v2103_v11 = vpop.f32.mrf.mxu3  ;;  %v1895_v12 = vadd.f32 %v1894_v10, %v1686_v9  ;;  %v1244_v9 = vld [vmem:[%s7318_s6 + $0x5b0] sm:$0xff] }
 0x26a   : > { %v1308_v10 = vld [vmem:[%s7318_s6 + $0x7b0] sm:$0xff]  ;;  %3410 = vmatpush.msra.mxu2 %v1244_v9 }
 0x26b   : > { %v2104_v13 = vadd.f32 %v2103_v11, %v1895_v12  ;;  %v6225_v12 = vld [vmem:[#allocation3 + $0x80] sm:$0xff]  ;;  %3619 = vmatpush.msra.mxu3 %v1308_v10  ;;  %v6243_v9 = vld [vmem:[#allocation3 + $0x130] sm:$0xff] }
 0x26d   : > { %v5631_v14 = vadd.f32 %v7414_v33, %v2104_v13  ;;  %2588 = vmatmul.f32.vlgmr.msrb.gmra.mxu2 %v6207_v15  ;;  %v1479_v16 = vpop.f32.mrf.mxu0  ;;  %v6226_v13 = vld [vmem:[#allocation3 + $0x88] sm:$0xff] }
 0x26e   : > { %v1688_v17 = vpop.f32.mrf.mxu1  ;;  %2797 = vmatmul.f32.vlgmr.msrb.gmra.mxu3 %v6208_v18 }
 0x26f   : > { %v1689_v19 = vadd.f32 %v1688_v17, %v1479_v16  ;;  %5887 = vst [vmem:[%s7421_s11 + $0x5e0] sm:$0xff] %v5631_v14  ;;  %v1116_v16 = vld [vmem:[%s7318_s6 + $0x1b0] sm:$0xff] }
 0x270   : > { %v1897_v22 = vpop.f32.mrf.mxu2  ;;  %2170 = vmatmul.f32.vlgmr.msrb.gmra.mxu0 %v6209_v23  ;;  %v1180_v17 = vld [vmem:[%s7318_s6 + $0x3b0] sm:$0xff]  ;;  %v6228_v23 = vld [vmem:[#allocation3 + $0xb8] sm:$0xff] }
 0x271   : > { %2379 = vmatmul.f32.vlgmr.msrb.gmra.mxu1 %v6210_v24  ;;  %v2106_v25 = vpop.f32.mrf.mxu3  ;;  %v1898_v26 = vadd.f32 %v1897_v22, %v1689_v19  ;;  %2992 = vmatpush.msra.mxu0 %v1116_v16  ;;  %v6246_v16 = vld [vmem:[#allocation3 + $0x128] sm:$0xff] }
 0x272   : > { %3201 = vmatpush.msra.mxu1 %v1180_v17 }
 0x273   : > { %v2107_v29 = vadd.f32 %v2106_v25, %v1898_v26  ;;  %v6229_v26 = vld [vmem:[#allocation3 + $0xa0] sm:$0xff] }
 0x275   : > { %v5635_v30 = vadd.f32 %v7414_v33, %v2107_v29  ;;  %2591 = vmatmul.f32.gmra.mxu2 %v6211_v31  ;;  %v1482_v32 = vpop.f32.mrf.mxu0 }
 0x276   : > { %v1691_v34 = vpop.f32.mrf.mxu1  ;;  %2800 = vmatmul.f32.gmra.mxu3 %v6212_v35 }
 0x277   : > { %v1692_v36 = vadd.f32 %v1691_v34, %v1482_v32  ;;  %5891 = vst [vmem:[%s7421_s11 + $0x600] sm:$0xff] %v5635_v30  ;;  %v6231_v32 = vld [vmem:[#allocation3 + $0xd0] sm:$0xff] }
 0x278   : > { %v1900_v37 = vpop.f32.mrf.mxu2  ;;  %2173 = vmatmul.f32.gmra.mxu0 %v6213_v38 }
 0x279   : > { %2382 = vmatmul.f32.gmra.mxu1 %v6214_v39  ;;  %v2109_v40 = vpop.f32.mrf.mxu3  ;;  %v1901_v41 = vadd.f32 %v1900_v37, %v1692_v36  ;;  %v6232_v36 = vld [vmem:[#allocation3 + $0xd8] sm:$0xff]  ;;  %v6233_v39 = vld [vmem:[#allocation3 + $0xc0] sm:$0xff] }
 0x27b   : > { %v2110_v42 = vadd.f32 %v2109_v40, %v1901_v41  ;;  %v6234_v40 = vld [vmem:[#allocation3 + $0xc8] sm:$0xff] }
 0x27d   : > { %v5639_v43 = vadd.f32 %v7414_v33, %v2110_v42  ;;  %2594 = vmatmul.f32.gmra.mxu2 %v6215_v44  ;;  %v1485_v45 = vpop.f32.mrf.mxu0 }
 0x27e   : > { %v1694_v46 = vpop.f32.mrf.mxu1  ;;  %2803 = vmatmul.f32.gmra.mxu3 %v6216_v47 }
 0x27f   : > { %v1695_v48 = vadd.f32 %v1694_v46, %v1485_v45  ;;  %5895 = vst [vmem:[%s7421_s11 + $0x620] sm:$0xff] %v5639_v43  ;;  %v6235_v45 = vld [vmem:[#allocation3 + $0xf0] sm:$0xff] }
 0x280   : > { %v1903_v49 = vpop.f32.mrf.mxu2  ;;  %2176 = vmatmul.f32.gmra.mxu0 %v6217_v50 }
 0x281   : > { %2385 = vmatmul.f32.gmra.mxu1 %v6218_v51  ;;  %v2112_v52 = vpop.f32.mrf.mxu3  ;;  %v1904_v53 = vadd.f32 %v1903_v49, %v1695_v48  ;;  %v6236_v48 = vld [vmem:[#allocation3 + $0xf8] sm:$0xff]  ;;  %v6237_v51 = vld [vmem:[#allocation3 + $0xe0] sm:$0xff] }
 0x283   : > { %v2113_v54 = vadd.f32 %v2112_v52, %v1904_v53  ;;  %v6238_v52 = vld [vmem:[#allocation3 + $0xe8] sm:$0xff] }
 0x285   : > { %v5643_v55 = vadd.f32 %v7414_v33, %v2113_v54  ;;  %2597 = vmatmul.f32.gmra.mxu2 %v6219_v56  ;;  %v1488_v57 = vpop.f32.mrf.mxu0 }
 0x286   : > { %v1697_v58 = vpop.f32.mrf.mxu1  ;;  %2806 = vmatmul.f32.gmra.mxu3 %v6220_v59 }
 0x287   : > { %v1698_v60 = vadd.f32 %v1697_v58, %v1488_v57  ;;  %5899 = vst [vmem:[%s7421_s11 + $0x640] sm:$0xff] %v5643_v55  ;;  %v6239_v57 = vld [vmem:[#allocation3 + $0x110] sm:$0xff] }
 0x288   : > { %v1906_v61 = vpop.f32.mrf.mxu2  ;;  %2179 = vmatmul.f32.gmra.mxu0 %v6221_v62  ;;  %v1240_v62 = vld [vmem:[%s7318_s6 + $0x590] sm:$0xff] }
 0x289   : > { %2388 = vmatmul.f32.gmra.mxu1 %v6222_v63  ;;  %v2115_v0 = vpop.f32.mrf.mxu3  ;;  %v1907_v1 = vadd.f32 %v1906_v61, %v1698_v60  ;;  %v6240_v60 = vld [vmem:[#allocation3 + $0x118] sm:$0xff]  ;;  %v1304_v63 = vld [vmem:[%s7318_s6 + $0x790] sm:$0xff]  ;;  %3411 = vmatpush.msra.mxu2 %v1240_v62 }
 0x28a   : > { %3620 = vmatpush.msra.mxu3 %v1304_v63  ;;  %v6259_v62 = vld [vmem:[#allocation3 + $0x1b0] sm:$0xff] }
 0x28b   : > { %v2116_v2 = vadd.f32 %v2115_v0, %v1907_v1  ;;  %v6241_v1 = vld [vmem:[#allocation3 + $0x100] sm:$0xff] }
 0x28d   : > { %v5647_v3 = vadd.f32 %v7414_v33, %v2116_v2  ;;  %2600 = vmatmul.f32.gmra.mxu2 %v6223_v4  ;;  %v1491_v5 = vpop.f32.mrf.mxu0  ;;  %v6242_v2 = vld [vmem:[#allocation3 + $0x108] sm:$0xff] }
 0x28e   : > { %v1700_v6 = vpop.f32.mrf.mxu1  ;;  %2809 = vmatmul.f32.gmra.mxu3 %v6224_v7 }
 0x28f   : > { %v1701_v8 = vadd.f32 %v1700_v6, %v1491_v5  ;;  %5903 = vst [vmem:[%s7421_s11 + $0x660] sm:$0xff] %v5647_v3  ;;  %v1112_v5 = vld [vmem:[%s7318_s6 + $0x190] sm:$0xff] }
 0x290   : > { %v1909_v11 = vpop.f32.mrf.mxu2  ;;  %2182 = vmatmul.f32.gmra.mxu0 %v6225_v12  ;;  %v1176_v6 = vld [vmem:[%s7318_s6 + $0x390] sm:$0xff]  ;;  %v6244_v12 = vld [vmem:[#allocation3 + $0x138] sm:$0xff] }
 0x291   : > { %2391 = vmatmul.f32.gmra.mxu1 %v6226_v13  ;;  %v2118_v14 = vpop.f32.mrf.mxu3  ;;  %v1910_v15 = vadd.f32 %v1909_v11, %v1701_v8  ;;  %2993 = vmatpush.msra.mxu0 %v1112_v5  ;;  %v6262_v5 = vld [vmem:[#allocation3 + $0x1a8] sm:$0xff] }
 0x292   : > { %3202 = vmatpush.msra.mxu1 %v1176_v6 }
 0x293   : > { %v2119_v18 = vadd.f32 %v2118_v14, %v1910_v15  ;;  %v6245_v15 = vld [vmem:[#allocation3 + $0x120] sm:$0xff] }
 0x295   : > { %v5651_v19 = vadd.f32 %v7414_v33, %v2119_v18  ;;  %2603 = vmatmul.f32.gmra.mxu2 %v6227_v20  ;;  %v1494_v21 = vpop.f32.mrf.mxu0 }
 0x296   : > { %v1703_v22 = vpop.f32.mrf.mxu1  ;;  %2812 = vmatmul.f32.gmra.mxu3 %v6228_v23 }
 0x297   : > { %v1704_v24 = vadd.f32 %v1703_v22, %v1494_v21  ;;  %5907 = vst [vmem:[%s7421_s11 + $0x680] sm:$0xff] %v5651_v19  ;;  %v6247_v21 = vld [vmem:[#allocation3 + $0x150] sm:$0xff] }
 0x298   : > { %v1912_v25 = vpop.f32.mrf.mxu2  ;;  %2185 = vmatmul.f32.gmra.mxu0 %v6229_v26 }
 0x299   : > { %2394 = vmatmul.f32.gmra.mxu1 %v6230_v27  ;;  %v2121_v28 = vpop.f32.mrf.mxu3  ;;  %v1913_v29 = vadd.f32 %v1912_v25, %v1704_v24  ;;  %v6248_v24 = vld [vmem:[#allocation3 + $0x158] sm:$0xff]  ;;  %v6249_v27 = vld [vmem:[#allocation3 + $0x140] sm:$0xff] }
 0x29b   : > { %v2122_v30 = vadd.f32 %v2121_v28, %v1913_v29  ;;  %v6250_v28 = vld [vmem:[#allocation3 + $0x148] sm:$0xff] }
 0x29d   : > { %v5655_v31 = vadd.f32 %v7414_v33, %v2122_v30  ;;  %2606 = vmatmul.f32.gmra.mxu2 %v6231_v32  ;;  %v1497_v34 = vpop.f32.mrf.mxu0 }
 0x29e   : > { %v1706_v35 = vpop.f32.mrf.mxu1  ;;  %2815 = vmatmul.f32.gmra.mxu3 %v6232_v36 }
 0x29f   : > { %v1707_v37 = vadd.f32 %v1706_v35, %v1497_v34  ;;  %5911 = vst [vmem:[%s7421_s11 + $0x6a0] sm:$0xff] %v5655_v31  ;;  %v6251_v34 = vld [vmem:[#allocation3 + $0x170] sm:$0xff] }
 0x2a0   : > { %v1915_v38 = vpop.f32.mrf.mxu2  ;;  %2188 = vmatmul.f32.gmra.mxu0 %v6233_v39 }
 0x2a1   : > { %2397 = vmatmul.f32.gmra.mxu1 %v6234_v40  ;;  %v2124_v41 = vpop.f32.mrf.mxu3  ;;  %v1916_v42 = vadd.f32 %v1915_v38, %v1707_v37  ;;  %v6252_v37 = vld [vmem:[#allocation3 + $0x178] sm:$0xff]  ;;  %v6253_v40 = vld [vmem:[#allocation3 + $0x160] sm:$0xff] }
 0x2a3   : > { %v2125_v43 = vadd.f32 %v2124_v41, %v1916_v42  ;;  %v6254_v41 = vld [vmem:[#allocation3 + $0x168] sm:$0xff] }
 0x2a5   : > { %v5659_v44 = vadd.f32 %v7414_v33, %v2125_v43  ;;  %2609 = vmatmul.f32.gmra.mxu2 %v6235_v45  ;;  %v1500_v46 = vpop.f32.mrf.mxu0 }
 0x2a6   : > { %v1709_v47 = vpop.f32.mrf.mxu1  ;;  %2818 = vmatmul.f32.gmra.mxu3 %v6236_v48 }
 0x2a7   : > { %v1710_v49 = vadd.f32 %v1709_v47, %v1500_v46  ;;  %5915 = vst [vmem:[%s7421_s11 + $0x6c0] sm:$0xff] %v5659_v44  ;;  %v6255_v46 = vld [vmem:[#allocation3 + $0x190] sm:$0xff] }
 0x2a8   : > { %v1918_v50 = vpop.f32.mrf.mxu2  ;;  %2191 = vmatmul.f32.gmra.mxu0 %v6237_v51  ;;  %v1236_v51 = vld [vmem:[%s7318_s6 + $0x570] sm:$0xff] }
 0x2a9   : > { %2400 = vmatmul.f32.gmra.mxu1 %v6238_v52  ;;  %v2127_v53 = vpop.f32.mrf.mxu3  ;;  %v1919_v54 = vadd.f32 %v1918_v50, %v1710_v49  ;;  %v6256_v49 = vld [vmem:[#allocation3 + $0x198] sm:$0xff]  ;;  %v1300_v52 = vld [vmem:[%s7318_s6 + $0x770] sm:$0xff]  ;;  %3412 = vmatpush.msra.mxu2 %v1236_v51 }
 0x2aa   : > { %3621 = vmatpush.msra.mxu3 %v1300_v52  ;;  %v6276_v52 = vld [vmem:[#allocation3 + $0x230] sm:$0xff] }
 0x2ab   : > { %v2128_v55 = vadd.f32 %v2127_v53, %v1919_v54  ;;  %v6257_v54 = vld [vmem:[#allocation3 + $0x180] sm:$0xff] }
 0x2ad   : > { %v5663_v56 = vadd.f32 %v7414_v33, %v2128_v55  ;;  %2612 = vmatmul.f32.gmra.mxu2 %v6239_v57  ;;  %v1503_v58 = vpop.f32.mrf.mxu0  ;;  %v6258_v55 = vld [vmem:[#allocation3 + $0x188] sm:$0xff] }
 0x2ae   : > { %v1712_v59 = vpop.f32.mrf.mxu1  ;;  %2821 = vmatmul.f32.gmra.mxu3 %v6240_v60 }
 0x2af   : > { %v1713_v61 = vadd.f32 %v1712_v59, %v1503_v58  ;;  %5919 = vst [vmem:[%s7421_s11 + $0x6e0] sm:$0xff] %v5663_v56  ;;  %v1108_v58 = vld [vmem:[%s7318_s6 + $0x170] sm:$0xff] }
 0x2b0   : > { %v1921_v0 = vpop.f32.mrf.mxu2  ;;  %2194 = vmatmul.f32.gmra.mxu0 %v6241_v1  ;;  %v1172_v59 = vld [vmem:[%s7318_s6 + $0x370] sm:$0xff]  ;;  %v6260_v1 = vld [vmem:[#allocation3 + $0x1b8] sm:$0xff] }
 0x2b1   : > { %2403 = vmatmul.f32.gmra.mxu1 %v6242_v2  ;;  %v2130_v3 = vpop.f32.mrf.mxu3  ;;  %v1922_v4 = vadd.f32 %v1921_v0, %v1713_v61  ;;  %2994 = vmatpush.msra.mxu0 %v1108_v58  ;;  %v6278_v58 = vld [vmem:[#allocation3 + $0x220] sm:$0xff] }
 0x2b2   : > { %3203 = vmatpush.msra.mxu1 %v1172_v59  ;;  %v6279_v59 = vld [vmem:[#allocation3 + $0x228] sm:$0xff] }
 0x2b3   : > { %v2131_v7 = vadd.f32 %v2130_v3, %v1922_v4  ;;  %v6261_v4 = vld [vmem:[#allocation3 + $0x1a0] sm:$0xff] }
 0x2b5   : > { %v5667_v8 = vadd.f32 %v7414_v33, %v2131_v7  ;;  %2615 = vmatmul.f32.gmra.mxu2 %v6243_v9  ;;  %v1506_v10 = vpop.f32.mrf.mxu0 }
 0x2b6   : > { %v1715_v11 = vpop.f32.mrf.mxu1  ;;  %2824 = vmatmul.f32.gmra.mxu3 %v6244_v12 }
 0x2b7   : > { %v1716_v13 = vadd.f32 %v1715_v11, %v1506_v10  ;;  %5923 = vst [vmem:[%s7421_s11 + $0x700] sm:$0xff] %v5667_v8  ;;  %v6263_v10 = vld [vmem:[#allocation3 + $0x1d0] sm:$0xff] }
 0x2b8   : > { %v1924_v14 = vpop.f32.mrf.mxu2  ;;  %2197 = vmatmul.f32.gmra.mxu0 %v6245_v15 }
 0x2b9   : > { %2406 = vmatmul.f32.gmra.mxu1 %v6246_v16  ;;  %v2133_v17 = vpop.f32.mrf.mxu3  ;;  %v1925_v18 = vadd.f32 %v1924_v14, %v1716_v13  ;;  %v6264_v13 = vld [vmem:[#allocation3 + $0x1d8] sm:$0xff]  ;;  %v6265_v16 = vld [vmem:[#allocation3 + $0x1c0] sm:$0xff] }
 0x2bb   : > { %v2134_v19 = vadd.f32 %v2133_v17, %v1925_v18  ;;  %v6266_v17 = vld [vmem:[#allocation3 + $0x1c8] sm:$0xff] }
 0x2bd   : > { %v5671_v20 = vadd.f32 %v7414_v33, %v2134_v19  ;;  %2618 = vmatmul.f32.gmra.mxu2 %v6247_v21  ;;  %v1509_v22 = vpop.f32.mrf.mxu0 }
 0x2be   : > { %v1718_v23 = vpop.f32.mrf.mxu1  ;;  %2827 = vmatmul.f32.gmra.mxu3 %v6248_v24 }
 0x2bf   : > { %v1719_v25 = vadd.f32 %v1718_v23, %v1509_v22  ;;  %5927 = vst [vmem:[%s7421_s11 + $0x720] sm:$0xff] %v5671_v20  ;;  %v6267_v22 = vld [vmem:[#allocation3 + $0x1f0] sm:$0xff] }
 0x2c0   : > { %v1927_v26 = vpop.f32.mrf.mxu2  ;;  %2200 = vmatmul.f32.gmra.mxu0 %v6249_v27 }
 0x2c1   : > { %2409 = vmatmul.f32.gmra.mxu1 %v6250_v28  ;;  %v2136_v29 = vpop.f32.mrf.mxu3  ;;  %v1928_v30 = vadd.f32 %v1927_v26, %v1719_v25  ;;  %v6268_v25 = vld [vmem:[#allocation3 + $0x1f8] sm:$0xff]  ;;  %v6269_v28 = vld [vmem:[#allocation3 + $0x1e0] sm:$0xff] }
 0x2c3   : > { %v2137_v31 = vadd.f32 %v2136_v29, %v1928_v30  ;;  %v6270_v29 = vld [vmem:[#allocation3 + $0x1e8] sm:$0xff] }
 0x2c5   : > { %v5675_v32 = vadd.f32 %v7414_v33, %v2137_v31  ;;  %2621 = vmatmul.f32.gmra.mxu2 %v6251_v34  ;;  %v1512_v35 = vpop.f32.mrf.mxu0 }
 0x2c6   : > { %v1721_v36 = vpop.f32.mrf.mxu1  ;;  %2830 = vmatmul.f32.gmra.mxu3 %v6252_v37 }
 0x2c7   : > { %v1722_v38 = vadd.f32 %v1721_v36, %v1512_v35  ;;  %5931 = vst [vmem:[%s7421_s11 + $0x740] sm:$0xff] %v5675_v32  ;;  %v6271_v35 = vld [vmem:[#allocation3 + $0x210] sm:$0xff] }
 0x2c8   : > { %v1930_v39 = vpop.f32.mrf.mxu2  ;;  %2203 = vmatmul.f32.gmra.mxu0 %v6253_v40  ;;  %v1232_v40 = vld [vmem:[%s7318_s6 + $0x550] sm:$0xff] }
 0x2c9   : > { %2412 = vmatmul.f32.gmra.mxu1 %v6254_v41  ;;  %v2139_v42 = vpop.f32.mrf.mxu3  ;;  %v1931_v43 = vadd.f32 %v1930_v39, %v1722_v38  ;;  %v6272_v38 = vld [vmem:[#allocation3 + $0x218] sm:$0xff]  ;;  %v1296_v41 = vld [vmem:[%s7318_s6 + $0x750] sm:$0xff]  ;;  %3413 = vmatpush.msra.mxu2 %v1232_v40 }
 0x2ca   : > { %3622 = vmatpush.msra.mxu3 %v1296_v41  ;;  %v6292_v41 = vld [vmem:[#allocation3 + $0x2b0] sm:$0xff] }
 0x2cb   : > { %v2140_v44 = vadd.f32 %v2139_v42, %v1931_v43  ;;  %v6273_v43 = vld [vmem:[#allocation3 + $0x200] sm:$0xff] }
 0x2cd   : > { %v5679_v45 = vadd.f32 %v7414_v33, %v2140_v44  ;;  %2624 = vmatmul.f32.gmra.mxu2 %v6255_v46  ;;  %v1515_v47 = vpop.f32.mrf.mxu0  ;;  %v6274_v44 = vld [vmem:[#allocation3 + $0x208] sm:$0xff]  ;;  %v6275_v46 = vld [vmem:[%s7409_s10] sm:$0xf] }
 0x2ce   : > { %v1724_v48 = vpop.f32.mrf.mxu1  ;;  %2833 = vmatmul.f32.gmra.mxu3 %v6256_v49  ;;  %v1168_v49 = vld [vmem:[%s7318_s6 + $0x350] sm:$0xff] }
 0x2cf   : > { %v1725_v50 = vadd.f32 %v1724_v48, %v1515_v47  ;;  %5935 = vst [vmem:[%s7421_s11 + $0x760] sm:$0xff] %v5679_v45  ;;  %v7613_v47 = vperm.slane %v6275_v46, 1  ;;  %v1104_v48 = vld [vmem:[%s7318_s6 + $0x150] sm:$0xff]  ;;  %3204 = vmatpush.msra.mxu1 %v1168_v49  ;;  %v6294_v46 = vld [vmem:[#allocation3 + $0x2a0] sm:$0xff] }
 0x2d0   : > { %v1933_v53 = vpop.f32.mrf.mxu2  ;;  %2206 = vmatmul.f32.gmra.mxu0 %v6257_v54 }
 0x2d1   : > { %2415 = vmatmul.f32.gmra.mxu1 %v6258_v55  ;;  %v2142_v56 = vpop.f32.mrf.mxu3  ;;  %v1934_v57 = vadd.f32 %v1933_v53, %v1725_v50  ;;  %2995 = vmatpush.msra.mxu0 %v1104_v48  ;;  %v6277_v55 = vld [vmem:[#allocation3 + $0x238] sm:$0xff]  ;;  %v6295_v48 = vld [vmem:[#allocation3 + $0x2a8] sm:$0xff] }
 0x2d3   : > { %v2143_v60 = vadd.f32 %v2142_v56, %v1934_v57 }
 0x2d5   : > { %v5683_v61 = vadd.f32 %v7414_v33, %v2143_v60  ;;  %2627 = vmatmul.f32.gmra.mxu2 %v6259_v62  ;;  %v1518_v63 = vpop.f32.mrf.mxu0 }
 0x2d6   : > { %v1727_v0 = vpop.f32.mrf.mxu1  ;;  %2836 = vmatmul.f32.gmra.mxu3 %v6260_v1 }
 0x2d7   : > { %v1728_v2 = vadd.f32 %v1727_v0, %v1518_v63  ;;  %5939 = vst [vmem:[%s7421_s11 + $0x780] sm:$0xff] %v5683_v61  ;;  %v6280_v0 = vld [vmem:[#allocation3 + $0x250] sm:$0xff] }
 0x2d8   : > { %v1936_v3 = vpop.f32.mrf.mxu2  ;;  %2209 = vmatmul.f32.gmra.mxu0 %v6261_v4 }
 0x2d9   : > { %2418 = vmatmul.f32.gmra.mxu1 %v6262_v5  ;;  %v2145_v6 = vpop.f32.mrf.mxu3  ;;  %v1937_v7 = vadd.f32 %v1936_v3, %v1728_v2  ;;  %v6281_v3 = vld [vmem:[#allocation3 + $0x258] sm:$0xff] }
 0x2db   : > { %v2146_v8 = vadd.f32 %v2145_v6, %v1937_v7  ;;  %v6282_v6 = vld [vmem:[#allocation3 + $0x240] sm:$0xff]  ;;  %v6283_v7 = vld [vmem:[#allocation3 + $0x248] sm:$0xff] }
 0x2dd   : > { %v5687_v9 = vadd.f32 %v7414_v33, %v2146_v8  ;;  %2630 = vmatmul.f32.gmra.mxu2 %v6263_v10  ;;  %v1521_v11 = vpop.f32.mrf.mxu0 }
 0x2de   : > { %v1730_v12 = vpop.f32.mrf.mxu1  ;;  %2839 = vmatmul.f32.gmra.mxu3 %v6264_v13 }
 0x2df   : > { %v1731_v14 = vadd.f32 %v1730_v12, %v1521_v11  ;;  %5943 = vst [vmem:[%s7421_s11 + $0x7a0] sm:$0xff] %v5687_v9  ;;  %v6284_v12 = vld [vmem:[#allocation3 + $0x270] sm:$0xff] }
 0x2e0   : > { %v1939_v15 = vpop.f32.mrf.mxu2  ;;  %2212 = vmatmul.f32.gmra.mxu0 %v6265_v16 }
 0x2e1   : > { %2421 = vmatmul.f32.gmra.mxu1 %v6266_v17  ;;  %v2148_v18 = vpop.f32.mrf.mxu3  ;;  %v1940_v19 = vadd.f32 %v1939_v15, %v1731_v14  ;;  %v6285_v15 = vld [vmem:[#allocation3 + $0x278] sm:$0xff] }
 0x2e3   : > { %v2149_v20 = vadd.f32 %v2148_v18, %v1940_v19  ;;  %v6286_v18 = vld [vmem:[#allocation3 + $0x260] sm:$0xff]  ;;  %v6287_v19 = vld [vmem:[#allocation3 + $0x268] sm:$0xff] }
 0x2e5   : > { %v5691_v21 = vadd.f32 %v7414_v33, %v2149_v20  ;;  %2633 = vmatmul.f32.gmra.mxu2 %v6267_v22  ;;  %v1524_v23 = vpop.f32.mrf.mxu0 }
 0x2e6   : > { %v1733_v24 = vpop.f32.mrf.mxu1  ;;  %2842 = vmatmul.f32.gmra.mxu3 %v6268_v25 }
 0x2e7   : > { %v1734_v26 = vadd.f32 %v1733_v24, %v1524_v23  ;;  %5947 = vst [vmem:[%s7421_s11 + $0x7c0] sm:$0xff] %v5691_v21  ;;  %v6288_v24 = vld [vmem:[#allocation3 + $0x290] sm:$0xff] }
 0x2e8   : > { %v1942_v27 = vpop.f32.mrf.mxu2  ;;  %2215 = vmatmul.f32.gmra.mxu0 %v6269_v28 }
 0x2e9   : > { %2424 = vmatmul.f32.gmra.mxu1 %v6270_v29  ;;  %v2151_v30 = vpop.f32.mrf.mxu3  ;;  %v1943_v31 = vadd.f32 %v1942_v27, %v1734_v26  ;;  %v6289_v27 = vld [vmem:[#allocation3 + $0x298] sm:$0xff]  ;;  %v1228_v29 = vld [vmem:[%s7318_s6 + $0x530] sm:$0xff] }
 0x2ea   : > { %3414 = vmatpush.msra.mxu2 %v1228_v29  ;;  %v6308_v29 = vld [vmem:[#allocation3 + $0x330] sm:$0xff] }
 0x2eb   : > { %v2152_v32 = vadd.f32 %v2151_v30, %v1943_v31  ;;  %v1292_v30 = vld [vmem:[%s7318_s6 + $0x730] sm:$0xff] }
 0x2ec   : > { %3623 = vmatpush.msra.mxu3 %v1292_v30 }
 0x2ed   : > { %v5695_v34 = vadd.f32 %v7414_v33, %v2152_v32  ;;  %2636 = vmatmul.f32.gmra.mxu2 %v6271_v35  ;;  %v2171_v36 = vpop.f32.mrf.mxu0  ;;  %v6290_v32 = vld [vmem:[#allocation3 + $0x280] sm:$0xff] }
 0x2ee   : > { %v2380_v37 = vpop.f32.mrf.mxu1  ;;  %2845 = vmatmul.f32.gmra.mxu3 %v6272_v38  ;;  %v1164_v38 = vld [vmem:[%s7318_s6 + $0x330] sm:$0xff] }
 0x2ef   : > { %v2381_v39 = vadd.f32 %v2380_v37, %v2171_v36  ;;  %5951 = vst [vmem:[%s7421_s11 + $0x7e0] sm:$0xff] %v5695_v34  ;;  %v6291_v34 = vld [vmem:[#allocation3 + $0x288] sm:$0xff]  ;;  %v1100_v37 = vld [vmem:[%s7318_s6 + $0x130] sm:$0xff]  ;;  %3205 = vmatpush.msra.mxu1 %v1164_v38 }
 0x2f0   : > { %v2589_v42 = vpop.f32.mrf.mxu2  ;;  %2218 = vmatmul.f32.gmra.mxu0 %v6273_v43 }
 0x2f1   : > { %2427 = vmatmul.f32.gmra.mxu1 %v6274_v44  ;;  %v2798_v45 = vpop.f32.mrf.mxu3  ;;  %v2590_v33 = vadd.f32 %v2589_v42, %v2381_v39  ;;  %2996 = vmatpush.msra.mxu0 %v1100_v37  ;;  %v6293_v44 = vld [vmem:[#allocation3 + $0x2b8] sm:$0xff]  ;;  %v6311_v37 = vld [vmem:[#allocation3 + $0x328] sm:$0xff] }
 0x2f3   : > { %v2799_v50 = vadd.f32 %v2798_v45, %v2590_v33 }
 0x2f5   : > { %v5444_v51 = vadd.f32 %v7613_v47, %v2799_v50  ;;  %2639 = vmatmul.f32.gmra.mxu2 %v6276_v52  ;;  %v2174_v53 = vpop.f32.mrf.mxu0 }
 0x2f6   : > { %v2383_v54 = vpop.f32.mrf.mxu1  ;;  %2848 = vmatmul.f32.gmra.mxu3 %v6277_v55 }
 0x2f7   : > { %v2384_v56 = vadd.f32 %v2383_v54, %v2174_v53  ;;  %5700 = vst [vmem:[%s7421_s11 + $0x8] sm:$0xff] %v5444_v51  ;;  %v6296_v53 = vld [vmem:[#allocation3 + $0x2d0] sm:$0xff] }
 0x2f8   : > { %v2592_v57 = vpop.f32.mrf.mxu2  ;;  %2221 = vmatmul.f32.gmra.mxu0 %v6278_v58 }
 0x2f9   : > { %2430 = vmatmul.f32.gmra.mxu1 %v6279_v59  ;;  %v2801_v60 = vpop.f32.mrf.mxu3  ;;  %v2593_v61 = vadd.f32 %v2592_v57, %v2384_v56  ;;  %v6297_v56 = vld [vmem:[#allocation3 + $0x2d8] sm:$0xff]  ;;  %v6298_v59 = vld [vmem:[#allocation3 + $0x2c0] sm:$0xff] }
 0x2fb   : > { %v2802_v62 = vadd.f32 %v2801_v60, %v2593_v61  ;;  %v6299_v60 = vld [vmem:[#allocation3 + $0x2c8] sm:$0xff] }
 0x2fd   : > { %v5448_v63 = vadd.f32 %v7613_v47, %v2802_v62  ;;  %2642 = vmatmul.f32.gmra.mxu2 %v6280_v0  ;;  %v2177_v1 = vpop.f32.mrf.mxu0 }
 0x2fe   : > { %v2386_v2 = vpop.f32.mrf.mxu1  ;;  %2851 = vmatmul.f32.gmra.mxu3 %v6281_v3 }
 0x2ff   : > { %v2387_v4 = vadd.f32 %v2386_v2, %v2177_v1  ;;  %5704 = vst [vmem:[%s7421_s11 + $0x28] sm:$0xff] %v5448_v63  ;;  %v6300_v1 = vld [vmem:[#allocation3 + $0x2f0] sm:$0xff] }
 0x300   : > { %v2595_v5 = vpop.f32.mrf.mxu2  ;;  %2224 = vmatmul.f32.gmra.mxu0 %v6282_v6 }
 0x301   : > { %2433 = vmatmul.f32.gmra.mxu1 %v6283_v7  ;;  %v2804_v8 = vpop.f32.mrf.mxu3  ;;  %v2596_v9 = vadd.f32 %v2595_v5, %v2387_v4  ;;  %v6301_v4 = vld [vmem:[#allocation3 + $0x2f8] sm:$0xff]  ;;  %v6302_v7 = vld [vmem:[#allocation3 + $0x2e0] sm:$0xff] }
 0x303   : > { %v2805_v10 = vadd.f32 %v2804_v8, %v2596_v9  ;;  %v6303_v8 = vld [vmem:[#allocation3 + $0x2e8] sm:$0xff] }
 0x305   : > { %v5452_v11 = vadd.f32 %v7613_v47, %v2805_v10  ;;  %2645 = vmatmul.f32.gmra.mxu2 %v6284_v12  ;;  %v2180_v13 = vpop.f32.mrf.mxu0 }
 0x306   : > { %v2389_v14 = vpop.f32.mrf.mxu1  ;;  %2854 = vmatmul.f32.gmra.mxu3 %v6285_v15 }
 0x307   : > { %v2390_v16 = vadd.f32 %v2389_v14, %v2180_v13  ;;  %5708 = vst [vmem:[%s7421_s11 + $0x48] sm:$0xff] %v5452_v11  ;;  %v6304_v13 = vld [vmem:[#allocation3 + $0x310] sm:$0xff] }
 0x308   : > { %v2598_v17 = vpop.f32.mrf.mxu2  ;;  %2227 = vmatmul.f32.gmra.mxu0 %v6286_v18  ;;  %v1224_v18 = vld [vmem:[%s7318_s6 + $0x510] sm:$0xff] }
 0x309   : > { %2436 = vmatmul.f32.gmra.mxu1 %v6287_v19  ;;  %v2807_v20 = vpop.f32.mrf.mxu3  ;;  %v2599_v21 = vadd.f32 %v2598_v17, %v2390_v16  ;;  %v6305_v16 = vld [vmem:[#allocation3 + $0x318] sm:$0xff]  ;;  %v1288_v19 = vld [vmem:[%s7318_s6 + $0x710] sm:$0xff]  ;;  %3415 = vmatpush.msra.mxu2 %v1224_v18 }
 0x30a   : > { %3624 = vmatpush.msra.mxu3 %v1288_v19  ;;  %v6324_v18 = vld [vmem:[#allocation3 + $0x3b0] sm:$0xff] }
 0x30b   : > { %v2808_v22 = vadd.f32 %v2807_v20, %v2599_v21  ;;  %v6306_v21 = vld [vmem:[#allocation3 + $0x300] sm:$0xff] }
 0x30d   : > { %v5456_v23 = vadd.f32 %v7613_v47, %v2808_v22  ;;  %2648 = vmatmul.f32.gmra.mxu2 %v6288_v24  ;;  %v2183_v25 = vpop.f32.mrf.mxu0  ;;  %v6307_v22 = vld [vmem:[#allocation3 + $0x308] sm:$0xff] }
 0x30e   : > { %v2392_v26 = vpop.f32.mrf.mxu1  ;;  %2857 = vmatmul.f32.gmra.mxu3 %v6289_v27 }
 0x30f   : > { %v2393_v28 = vadd.f32 %v2392_v26, %v2183_v25  ;;  %5712 = vst [vmem:[%s7421_s11 + $0x68] sm:$0xff] %v5456_v23  ;;  %v1096_v25 = vld [vmem:[%s7318_s6 + $0x110] sm:$0xff] }
 0x310   : > { %v2601_v31 = vpop.f32.mrf.mxu2  ;;  %2230 = vmatmul.f32.gmra.mxu0 %v6290_v32  ;;  %v1160_v26 = vld [vmem:[%s7318_s6 + $0x310] sm:$0xff]  ;;  %v6309_v32 = vld [vmem:[#allocation3 + $0x338] sm:$0xff] }
 0x311   : > { %2439 = vmatmul.f32.gmra.mxu1 %v6291_v34  ;;  %v2810_v35 = vpop.f32.mrf.mxu3  ;;  %v2602_v36 = vadd.f32 %v2601_v31, %v2393_v28  ;;  %2997 = vmatpush.msra.mxu0 %v1096_v25  ;;  %v6327_v25 = vld [vmem:[#allocation3 + $0x3a8] sm:$0xff] }
 0x312   : > { %3206 = vmatpush.msra.mxu1 %v1160_v26 }
 0x313   : > { %v2811_v39 = vadd.f32 %v2810_v35, %v2602_v36  ;;  %v6310_v36 = vld [vmem:[#allocation3 + $0x320] sm:$0xff] }
 0x315   : > { %v5460_v40 = vadd.f32 %v7613_v47, %v2811_v39  ;;  %2651 = vmatmul.f32.gmra.mxu2 %v6292_v41  ;;  %v2186_v42 = vpop.f32.mrf.mxu0 }
 0x316   : > { %v2395_v43 = vpop.f32.mrf.mxu1  ;;  %2860 = vmatmul.f32.gmra.mxu3 %v6293_v44 }
 0x317   : > { %v2396_v45 = vadd.f32 %v2395_v43, %v2186_v42  ;;  %5716 = vst [vmem:[%s7421_s11 + $0x88] sm:$0xff] %v5460_v40  ;;  %v6312_v42 = vld [vmem:[#allocation3 + $0x350] sm:$0xff] }
 0x318   : > { %v2604_v33 = vpop.f32.mrf.mxu2  ;;  %2233 = vmatmul.f32.gmra.mxu0 %v6294_v46 }
 0x319   : > { %2442 = vmatmul.f32.gmra.mxu1 %v6295_v48  ;;  %v2813_v49 = vpop.f32.mrf.mxu3  ;;  %v2605_v50 = vadd.f32 %v2604_v33, %v2396_v45  ;;  %v6313_v45 = vld [vmem:[#allocation3 + $0x358] sm:$0xff]  ;;  %v6314_v48 = vld [vmem:[#allocation3 + $0x340] sm:$0xff] }
 0x31b   : > { %v2814_v51 = vadd.f32 %v2813_v49, %v2605_v50  ;;  %v6315_v49 = vld [vmem:[#allocation3 + $0x348] sm:$0xff] }
 0x31d   : > { %v5464_v52 = vadd.f32 %v7613_v47, %v2814_v51  ;;  %2654 = vmatmul.f32.gmra.mxu2 %v6296_v53  ;;  %v2189_v54 = vpop.f32.mrf.mxu0 }
 0x31e   : > { %v2398_v55 = vpop.f32.mrf.mxu1  ;;  %2863 = vmatmul.f32.gmra.mxu3 %v6297_v56 }
 0x31f   : > { %v2399_v57 = vadd.f32 %v2398_v55, %v2189_v54  ;;  %5720 = vst [vmem:[%s7421_s11 + $0xa8] sm:$0xff] %v5464_v52  ;;  %v6316_v54 = vld [vmem:[#allocation3 + $0x370] sm:$0xff] }
 0x320   : > { %v2607_v58 = vpop.f32.mrf.mxu2  ;;  %2236 = vmatmul.f32.gmra.mxu0 %v6298_v59 }
 0x321   : > { %2445 = vmatmul.f32.gmra.mxu1 %v6299_v60  ;;  %v2816_v61 = vpop.f32.mrf.mxu3  ;;  %v2608_v62 = vadd.f32 %v2607_v58, %v2399_v57  ;;  %v6317_v57 = vld [vmem:[#allocation3 + $0x378] sm:$0xff]  ;;  %v6318_v60 = vld [vmem:[#allocation3 + $0x360] sm:$0xff] }
 0x323   : > { %v2817_v63 = vadd.f32 %v2816_v61, %v2608_v62  ;;  %v6319_v61 = vld [vmem:[#allocation3 + $0x368] sm:$0xff] }
 0x325   : > { %v5468_v0 = vadd.f32 %v7613_v47, %v2817_v63  ;;  %2657 = vmatmul.f32.gmra.mxu2 %v6300_v1  ;;  %v2192_v2 = vpop.f32.mrf.mxu0 }
 0x326   : > { %v2401_v3 = vpop.f32.mrf.mxu1  ;;  %2866 = vmatmul.f32.gmra.mxu3 %v6301_v4 }
 0x327   : > { %v2402_v5 = vadd.f32 %v2401_v3, %v2192_v2  ;;  %5724 = vst [vmem:[%s7421_s11 + $0xc8] sm:$0xff] %v5468_v0  ;;  %v6320_v2 = vld [vmem:[#allocation3 + $0x390] sm:$0xff] }
 0x328   : > { %v2610_v6 = vpop.f32.mrf.mxu2  ;;  %2239 = vmatmul.f32.gmra.mxu0 %v6302_v7  ;;  %v1220_v7 = vld [vmem:[%s7318_s6 + $0x4f0] sm:$0xff] }
 0x329   : > { %2448 = vmatmul.f32.gmra.mxu1 %v6303_v8  ;;  %v2819_v9 = vpop.f32.mrf.mxu3  ;;  %v2611_v10 = vadd.f32 %v2610_v6, %v2402_v5  ;;  %v6321_v5 = vld [vmem:[#allocation3 + $0x398] sm:$0xff]  ;;  %v1284_v8 = vld [vmem:[%s7318_s6 + $0x6f0] sm:$0xff]  ;;  %3416 = vmatpush.msra.mxu2 %v1220_v7 }
 0x32a   : > { %3625 = vmatpush.msra.mxu3 %v1284_v8  ;;  %v6340_v7 = vld [vmem:[#allocation3 + $0x430] sm:$0xff] }
 0x32b   : > { %v2820_v11 = vadd.f32 %v2819_v9, %v2611_v10  ;;  %v6322_v10 = vld [vmem:[#allocation3 + $0x380] sm:$0xff] }
 0x32d   : > { %v5472_v12 = vadd.f32 %v7613_v47, %v2820_v11  ;;  %2660 = vmatmul.f32.gmra.mxu2 %v6304_v13  ;;  %v2195_v14 = vpop.f32.mrf.mxu0  ;;  %v6323_v11 = vld [vmem:[#allocation3 + $0x388] sm:$0xff] }
 0x32e   : > { %v2404_v15 = vpop.f32.mrf.mxu1  ;;  %2869 = vmatmul.f32.gmra.mxu3 %v6305_v16 }
 0x32f   : > { %v2405_v17 = vadd.f32 %v2404_v15, %v2195_v14  ;;  %5728 = vst [vmem:[%s7421_s11 + $0xe8] sm:$0xff] %v5472_v12  ;;  %v1092_v14 = vld [vmem:[%s7318_s6 + $0xf0] sm:$0xff] }
 0x330   : > { %v2613_v20 = vpop.f32.mrf.mxu2  ;;  %2242 = vmatmul.f32.gmra.mxu0 %v6306_v21  ;;  %v1156_v15 = vld [vmem:[%s7318_s6 + $0x2f0] sm:$0xff]  ;;  %v6325_v21 = vld [vmem:[#allocation3 + $0x3b8] sm:$0xff] }
 0x331   : > { %2451 = vmatmul.f32.gmra.mxu1 %v6307_v22  ;;  %v2822_v23 = vpop.f32.mrf.mxu3  ;;  %v2614_v24 = vadd.f32 %v2613_v20, %v2405_v17  ;;  %2998 = vmatpush.msra.mxu0 %v1092_v14  ;;  %v6343_v14 = vld [vmem:[#allocation3 + $0x428] sm:$0xff] }
 0x332   : > { %3207 = vmatpush.msra.mxu1 %v1156_v15 }
 0x333   : > { %v2823_v27 = vadd.f32 %v2822_v23, %v2614_v24  ;;  %v6326_v24 = vld [vmem:[#allocation3 + $0x3a0] sm:$0xff] }
 0x335   : > { %v5476_v28 = vadd.f32 %v7613_v47, %v2823_v27  ;;  %2663 = vmatmul.f32.gmra.mxu2 %v6308_v29  ;;  %v2198_v30 = vpop.f32.mrf.mxu0 }
 0x336   : > { %v2407_v31 = vpop.f32.mrf.mxu1  ;;  %2872 = vmatmul.f32.gmra.mxu3 %v6309_v32 }
 0x337   : > { %v2408_v34 = vadd.f32 %v2407_v31, %v2198_v30  ;;  %5732 = vst [vmem:[%s7421_s11 + $0x108] sm:$0xff] %v5476_v28  ;;  %v6328_v30 = vld [vmem:[#allocation3 + $0x3d0] sm:$0xff] }
 0x338   : > { %v2616_v35 = vpop.f32.mrf.mxu2  ;;  %2245 = vmatmul.f32.gmra.mxu0 %v6310_v36 }
 0x339   : > { %2454 = vmatmul.f32.gmra.mxu1 %v6311_v37  ;;  %v2825_v38 = vpop.f32.mrf.mxu3  ;;  %v2617_v39 = vadd.f32 %v2616_v35, %v2408_v34  ;;  %v6329_v34 = vld [vmem:[#allocation3 + $0x3d8] sm:$0xff]  ;;  %v6330_v37 = vld [vmem:[#allocation3 + $0x3c0] sm:$0xff] }
 0x33b   : > { %v2826_v40 = vadd.f32 %v2825_v38, %v2617_v39  ;;  %v6331_v38 = vld [vmem:[#allocation3 + $0x3c8] sm:$0xff] }
 0x33d   : > { %v5480_v41 = vadd.f32 %v7613_v47, %v2826_v40  ;;  %2666 = vmatmul.f32.gmra.mxu2 %v6312_v42  ;;  %v2201_v43 = vpop.f32.mrf.mxu0 }
 0x33e   : > { %v2410_v44 = vpop.f32.mrf.mxu1  ;;  %2875 = vmatmul.f32.gmra.mxu3 %v6313_v45 }
 0x33f   : > { %v2411_v33 = vadd.f32 %v2410_v44, %v2201_v43  ;;  %5736 = vst [vmem:[%s7421_s11 + $0x128] sm:$0xff] %v5480_v41  ;;  %v6332_v43 = vld [vmem:[#allocation3 + $0x3f0] sm:$0xff] }
 0x340   : > { %v2619_v46 = vpop.f32.mrf.mxu2  ;;  %2248 = vmatmul.f32.gmra.mxu0 %v6314_v48 }
 0x341   : > { %2457 = vmatmul.f32.gmra.mxu1 %v6315_v49  ;;  %v2828_v50 = vpop.f32.mrf.mxu3  ;;  %v2620_v51 = vadd.f32 %v2619_v46, %v2411_v33  ;;  %v6333_v33 = vld [vmem:[#allocation3 + $0x3f8] sm:$0xff]  ;;  %v6334_v49 = vld [vmem:[#allocation3 + $0x3e0] sm:$0xff] }
 0x343   : > { %v2829_v52 = vadd.f32 %v2828_v50, %v2620_v51  ;;  %v6335_v50 = vld [vmem:[#allocation3 + $0x3e8] sm:$0xff] }
 0x345   : > { %v5484_v53 = vadd.f32 %v7613_v47, %v2829_v52  ;;  %2669 = vmatmul.f32.gmra.mxu2 %v6316_v54  ;;  %v2204_v55 = vpop.f32.mrf.mxu0 }
 0x346   : > { %v2413_v56 = vpop.f32.mrf.mxu1  ;;  %2878 = vmatmul.f32.gmra.mxu3 %v6317_v57 }
 0x347   : > { %v2414_v58 = vadd.f32 %v2413_v56, %v2204_v55  ;;  %5740 = vst [vmem:[%s7421_s11 + $0x148] sm:$0xff] %v5484_v53  ;;  %v6336_v55 = vld [vmem:[#allocation3 + $0x410] sm:$0xff] }
 0x348   : > { %v2622_v59 = vpop.f32.mrf.mxu2  ;;  %2251 = vmatmul.f32.gmra.mxu0 %v6318_v60  ;;  %v1216_v60 = vld [vmem:[%s7318_s6 + $0x4d0] sm:$0xff] }
 0x349   : > { %2460 = vmatmul.f32.gmra.mxu1 %v6319_v61  ;;  %v2831_v62 = vpop.f32.mrf.mxu3  ;;  %v2623_v63 = vadd.f32 %v2622_v59, %v2414_v58  ;;  %v6337_v58 = vld [vmem:[#allocation3 + $0x418] sm:$0xff]  ;;  %v1280_v61 = vld [vmem:[%s7318_s6 + $0x6d0] sm:$0xff]  ;;  %3417 = vmatpush.msra.mxu2 %v1216_v60 }
 0x34a   : > { %3626 = vmatpush.msra.mxu3 %v1280_v61  ;;  %v6356_v60 = vld [vmem:[#allocation3 + $0x4b0] sm:$0xff] }
 0x34b   : > { %v2832_v0 = vadd.f32 %v2831_v62, %v2623_v63  ;;  %v6338_v63 = vld [vmem:[#allocation3 + $0x400] sm:$0xff] }
 0x34d   : > { %v5488_v1 = vadd.f32 %v7613_v47, %v2832_v0  ;;  %2672 = vmatmul.f32.gmra.mxu2 %v6320_v2  ;;  %v2207_v3 = vpop.f32.mrf.mxu0  ;;  %v6339_v0 = vld [vmem:[#allocation3 + $0x408] sm:$0xff] }
 0x34e   : > { %v2416_v4 = vpop.f32.mrf.mxu1  ;;  %2881 = vmatmul.f32.gmra.mxu3 %v6321_v5 }
 0x34f   : > { %v2417_v6 = vadd.f32 %v2416_v4, %v2207_v3  ;;  %5744 = vst [vmem:[%s7421_s11 + $0x168] sm:$0xff] %v5488_v1  ;;  %v1088_v3 = vld [vmem:[%s7318_s6 + $0xd0] sm:$0xff] }
 0x350   : > { %v2625_v9 = vpop.f32.mrf.mxu2  ;;  %2254 = vmatmul.f32.gmra.mxu0 %v6322_v10  ;;  %v1152_v4 = vld [vmem:[%s7318_s6 + $0x2d0] sm:$0xff]  ;;  %v6341_v10 = vld [vmem:[#allocation3 + $0x438] sm:$0xff] }
 0x351   : > { %2463 = vmatmul.f32.gmra.mxu1 %v6323_v11  ;;  %v2834_v12 = vpop.f32.mrf.mxu3  ;;  %v2626_v13 = vadd.f32 %v2625_v9, %v2417_v6  ;;  %2999 = vmatpush.msra.mxu0 %v1088_v3  ;;  %v6359_v3 = vld [vmem:[#allocation3 + $0x4a8] sm:$0xff] }
 0x352   : > { %3208 = vmatpush.msra.mxu1 %v1152_v4 }
 0x353   : > { %v2835_v16 = vadd.f32 %v2834_v12, %v2626_v13  ;;  %v6342_v13 = vld [vmem:[#allocation3 + $0x420] sm:$0xff] }
 0x355   : > { %v5492_v17 = vadd.f32 %v7613_v47, %v2835_v16  ;;  %2675 = vmatmul.f32.gmra.mxu2 %v6324_v18  ;;  %v2210_v19 = vpop.f32.mrf.mxu0 }
 0x356   : > { %v2419_v20 = vpop.f32.mrf.mxu1  ;;  %2884 = vmatmul.f32.gmra.mxu3 %v6325_v21 }
 0x357   : > { %v2420_v22 = vadd.f32 %v2419_v20, %v2210_v19  ;;  %5748 = vst [vmem:[%s7421_s11 + $0x188] sm:$0xff] %v5492_v17  ;;  %v6344_v19 = vld [vmem:[#allocation3 + $0x450] sm:$0xff] }
 0x358   : > { %v2628_v23 = vpop.f32.mrf.mxu2  ;;  %2257 = vmatmul.f32.gmra.mxu0 %v6326_v24 }
 0x359   : > { %2466 = vmatmul.f32.gmra.mxu1 %v6327_v25  ;;  %v2837_v26 = vpop.f32.mrf.mxu3  ;;  %v2629_v27 = vadd.f32 %v2628_v23, %v2420_v22  ;;  %v6345_v22 = vld [vmem:[#allocation3 + $0x458] sm:$0xff]  ;;  %v6346_v25 = vld [vmem:[#allocation3 + $0x440] sm:$0xff] }
 0x35b   : > { %v2838_v28 = vadd.f32 %v2837_v26, %v2629_v27  ;;  %v6347_v26 = vld [vmem:[#allocation3 + $0x448] sm:$0xff] }
 0x35d   : > { %v5496_v29 = vadd.f32 %v7613_v47, %v2838_v28  ;;  %2678 = vmatmul.f32.gmra.mxu2 %v6328_v30  ;;  %v2213_v31 = vpop.f32.mrf.mxu0 }
 0x35e   : > { %v2422_v32 = vpop.f32.mrf.mxu1  ;;  %2887 = vmatmul.f32.gmra.mxu3 %v6329_v34 }
 0x35f   : > { %v2423_v35 = vadd.f32 %v2422_v32, %v2213_v31  ;;  %5752 = vst [vmem:[%s7421_s11 + $0x1a8] sm:$0xff] %v5496_v29  ;;  %v6348_v31 = vld [vmem:[#allocation3 + $0x470] sm:$0xff] }
 0x360   : > { %v2631_v36 = vpop.f32.mrf.mxu2  ;;  %2260 = vmatmul.f32.gmra.mxu0 %v6330_v37 }
 0x361   : > { %2469 = vmatmul.f32.gmra.mxu1 %v6331_v38  ;;  %v2840_v39 = vpop.f32.mrf.mxu3  ;;  %v2632_v40 = vadd.f32 %v2631_v36, %v2423_v35  ;;  %v6349_v35 = vld [vmem:[#allocation3 + $0x478] sm:$0xff]  ;;  %v6350_v38 = vld [vmem:[#allocation3 + $0x460] sm:$0xff] }
 0x363   : > { %v2841_v41 = vadd.f32 %v2840_v39, %v2632_v40  ;;  %v6351_v39 = vld [vmem:[#allocation3 + $0x468] sm:$0xff] }
 0x365   : > { %v5500_v42 = vadd.f32 %v7613_v47, %v2841_v41  ;;  %2681 = vmatmul.f32.gmra.mxu2 %v6332_v43  ;;  %v2216_v44 = vpop.f32.mrf.mxu0 }
 0x366   : > { %v2425_v45 = vpop.f32.mrf.mxu1  ;;  %2890 = vmatmul.f32.gmra.mxu3 %v6333_v33 }
 0x367   : > { %v2426_v46 = vadd.f32 %v2425_v45, %v2216_v44  ;;  %5756 = vst [vmem:[%s7421_s11 + $0x1c8] sm:$0xff] %v5500_v42  ;;  %v6352_v44 = vld [vmem:[#allocation3 + $0x490] sm:$0xff] }
 0x368   : > { %v2634_v48 = vpop.f32.mrf.mxu2  ;;  %2263 = vmatmul.f32.gmra.mxu0 %v6334_v49  ;;  %v1212_v49 = vld [vmem:[%s7318_s6 + $0x4b0] sm:$0xff] }
 0x369   : > { %2472 = vmatmul.f32.gmra.mxu1 %v6335_v50  ;;  %v2843_v51 = vpop.f32.mrf.mxu3  ;;  %v2635_v52 = vadd.f32 %v2634_v48, %v2426_v46  ;;  %v6353_v46 = vld [vmem:[#allocation3 + $0x498] sm:$0xff]  ;;  %v1276_v50 = vld [vmem:[%s7318_s6 + $0x6b0] sm:$0xff]  ;;  %3418 = vmatpush.msra.mxu2 %v1212_v49 }
 0x36a   : > { %3627 = vmatpush.msra.mxu3 %v1276_v50  ;;  %v6372_v49 = vld [vmem:[#allocation3 + $0x530] sm:$0xff] }
 0x36b   : > { %v2844_v53 = vadd.f32 %v2843_v51, %v2635_v52  ;;  %v6354_v52 = vld [vmem:[#allocation3 + $0x480] sm:$0xff] }
 0x36d   : > { %v5504_v54 = vadd.f32 %v7613_v47, %v2844_v53  ;;  %2684 = vmatmul.f32.gmra.mxu2 %v6336_v55  ;;  %v2219_v56 = vpop.f32.mrf.mxu0  ;;  %v6355_v53 = vld [vmem:[#allocation3 + $0x488] sm:$0xff] }
 0x36e   : > { %v2428_v57 = vpop.f32.mrf.mxu1  ;;  %2893 = vmatmul.f32.gmra.mxu3 %v6337_v58 }
 0x36f   : > { %v2429_v59 = vadd.f32 %v2428_v57, %v2219_v56  ;;  %5760 = vst [vmem:[%s7421_s11 + $0x1e8] sm:$0xff] %v5504_v54  ;;  %v1084_v56 = vld [vmem:[%s7318_s6 + $0xb0] sm:$0xff] }
 0x370   : > { %v2637_v62 = vpop.f32.mrf.mxu2  ;;  %2266 = vmatmul.f32.gmra.mxu0 %v6338_v63  ;;  %v1148_v57 = vld [vmem:[%s7318_s6 + $0x2b0] sm:$0xff]  ;;  %v6357_v63 = vld [vmem:[#allocation3 + $0x4b8] sm:$0xff] }
 0x371   : > { %2475 = vmatmul.f32.gmra.mxu1 %v6339_v0  ;;  %v2846_v1 = vpop.f32.mrf.mxu3  ;;  %v2638_v2 = vadd.f32 %v2637_v62, %v2429_v59  ;;  %3000 = vmatpush.msra.mxu0 %v1084_v56  ;;  %v6375_v56 = vld [vmem:[#allocation3 + $0x528] sm:$0xff] }
 0x372   : > { %3209 = vmatpush.msra.mxu1 %v1148_v57 }
 0x373   : > { %v2847_v5 = vadd.f32 %v2846_v1, %v2638_v2  ;;  %v6358_v2 = vld [vmem:[#allocation3 + $0x4a0] sm:$0xff] }
 0x375   : > { %v5508_v6 = vadd.f32 %v7613_v47, %v2847_v5  ;;  %2687 = vmatmul.f32.gmra.mxu2 %v6340_v7  ;;  %v2222_v8 = vpop.f32.mrf.mxu0 }
 0x376   : > { %v2431_v9 = vpop.f32.mrf.mxu1  ;;  %2896 = vmatmul.f32.gmra.mxu3 %v6341_v10 }
 0x377   : > { %v2432_v11 = vadd.f32 %v2431_v9, %v2222_v8  ;;  %5764 = vst [vmem:[%s7421_s11 + $0x208] sm:$0xff] %v5508_v6  ;;  %v6360_v8 = vld [vmem:[#allocation3 + $0x4d0] sm:$0xff] }
 0x378   : > { %v2640_v12 = vpop.f32.mrf.mxu2  ;;  %2269 = vmatmul.f32.gmra.mxu0 %v6342_v13 }
 0x379   : > { %2478 = vmatmul.f32.gmra.mxu1 %v6343_v14  ;;  %v2849_v15 = vpop.f32.mrf.mxu3  ;;  %v2641_v16 = vadd.f32 %v2640_v12, %v2432_v11  ;;  %v6361_v11 = vld [vmem:[#allocation3 + $0x4d8] sm:$0xff]  ;;  %v6362_v14 = vld [vmem:[#allocation3 + $0x4c0] sm:$0xff] }
 0x37b   : > { %v2850_v17 = vadd.f32 %v2849_v15, %v2641_v16  ;;  %v6363_v15 = vld [vmem:[#allocation3 + $0x4c8] sm:$0xff] }
 0x37d   : > { %v5512_v18 = vadd.f32 %v7613_v47, %v2850_v17  ;;  %2690 = vmatmul.f32.gmra.mxu2 %v6344_v19  ;;  %v2225_v20 = vpop.f32.mrf.mxu0 }
 0x37e   : > { %v2434_v21 = vpop.f32.mrf.mxu1  ;;  %2899 = vmatmul.f32.gmra.mxu3 %v6345_v22 }
 0x37f   : > { %v2435_v23 = vadd.f32 %v2434_v21, %v2225_v20  ;;  %5768 = vst [vmem:[%s7421_s11 + $0x228] sm:$0xff] %v5512_v18  ;;  %v6364_v20 = vld [vmem:[#allocation3 + $0x4f0] sm:$0xff] }
 0x380   : > { %v2643_v24 = vpop.f32.mrf.mxu2  ;;  %2272 = vmatmul.f32.gmra.mxu0 %v6346_v25 }
 0x381   : > { %2481 = vmatmul.f32.gmra.mxu1 %v6347_v26  ;;  %v2852_v27 = vpop.f32.mrf.mxu3  ;;  %v2644_v28 = vadd.f32 %v2643_v24, %v2435_v23  ;;  %v6365_v23 = vld [vmem:[#allocation3 + $0x4f8] sm:$0xff]  ;;  %v6366_v26 = vld [vmem:[#allocation3 + $0x4e0] sm:$0xff] }
 0x383   : > { %v2853_v29 = vadd.f32 %v2852_v27, %v2644_v28  ;;  %v6367_v27 = vld [vmem:[#allocation3 + $0x4e8] sm:$0xff] }
 0x385   : > { %v5516_v30 = vadd.f32 %v7613_v47, %v2853_v29  ;;  %2693 = vmatmul.f32.gmra.mxu2 %v6348_v31  ;;  %v2228_v32 = vpop.f32.mrf.mxu0 }
 0x386   : > { %v2437_v34 = vpop.f32.mrf.mxu1  ;;  %2902 = vmatmul.f32.gmra.mxu3 %v6349_v35 }
 0x387   : > { %v2438_v36 = vadd.f32 %v2437_v34, %v2228_v32  ;;  %5772 = vst [vmem:[%s7421_s11 + $0x248] sm:$0xff] %v5516_v30  ;;  %v6368_v32 = vld [vmem:[#allocation3 + $0x510] sm:$0xff] }
 0x388   : > { %v2646_v37 = vpop.f32.mrf.mxu2  ;;  %2275 = vmatmul.f32.gmra.mxu0 %v6350_v38  ;;  %v1208_v38 = vld [vmem:[%s7318_s6 + $0x490] sm:$0xff] }
 0x389   : > { %2484 = vmatmul.f32.gmra.mxu1 %v6351_v39  ;;  %v2855_v40 = vpop.f32.mrf.mxu3  ;;  %v2647_v41 = vadd.f32 %v2646_v37, %v2438_v36  ;;  %v6369_v36 = vld [vmem:[#allocation3 + $0x518] sm:$0xff]  ;;  %v1272_v39 = vld [vmem:[%s7318_s6 + $0x690] sm:$0xff]  ;;  %3419 = vmatpush.msra.mxu2 %v1208_v38 }
 0x38a   : > { %3628 = vmatpush.msra.mxu3 %v1272_v39  ;;  %v6388_v38 = vld [vmem:[#allocation3 + $0x5b0] sm:$0xff] }
 0x38b   : > { %v2856_v42 = vadd.f32 %v2855_v40, %v2647_v41  ;;  %v6370_v41 = vld [vmem:[#allocation3 + $0x500] sm:$0xff] }
 0x38d   : > { %v5520_v43 = vadd.f32 %v7613_v47, %v2856_v42  ;;  %2696 = vmatmul.f32.gmra.mxu2 %v6352_v44  ;;  %v2231_v45 = vpop.f32.mrf.mxu0  ;;  %v6371_v42 = vld [vmem:[#allocation3 + $0x508] sm:$0xff] }
 0x38e   : > { %v2440_v33 = vpop.f32.mrf.mxu1  ;;  %2905 = vmatmul.f32.gmra.mxu3 %v6353_v46 }
 0x38f   : > { %v2441_v48 = vadd.f32 %v2440_v33, %v2231_v45  ;;  %5776 = vst [vmem:[%s7421_s11 + $0x268] sm:$0xff] %v5520_v43  ;;  %v1080_v45 = vld [vmem:[%s7318_s6 + $0x90] sm:$0xff] }
 0x390   : > { %v2649_v51 = vpop.f32.mrf.mxu2  ;;  %2278 = vmatmul.f32.gmra.mxu0 %v6354_v52  ;;  %v1144_v33 = vld [vmem:[%s7318_s6 + $0x290] sm:$0xff]  ;;  %v6373_v52 = vld [vmem:[#allocation3 + $0x538] sm:$0xff] }
 0x391   : > { %2487 = vmatmul.f32.gmra.mxu1 %v6355_v53  ;;  %v2858_v54 = vpop.f32.mrf.mxu3  ;;  %v2650_v55 = vadd.f32 %v2649_v51, %v2441_v48  ;;  %3001 = vmatpush.msra.mxu0 %v1080_v45  ;;  %v6391_v45 = vld [vmem:[#allocation3 + $0x5a8] sm:$0xff] }
 0x392   : > { %3210 = vmatpush.msra.mxu1 %v1144_v33 }
 0x393   : > { %v2859_v58 = vadd.f32 %v2858_v54, %v2650_v55  ;;  %v6374_v55 = vld [vmem:[#allocation3 + $0x520] sm:$0xff] }
 0x395   : > { %v5524_v59 = vadd.f32 %v7613_v47, %v2859_v58  ;;  %2699 = vmatmul.f32.gmra.mxu2 %v6356_v60  ;;  %v2234_v61 = vpop.f32.mrf.mxu0 }
 0x396   : > { %v2443_v62 = vpop.f32.mrf.mxu1  ;;  %2908 = vmatmul.f32.gmra.mxu3 %v6357_v63 }
 0x397   : > { %v2444_v0 = vadd.f32 %v2443_v62, %v2234_v61  ;;  %5780 = vst [vmem:[%s7421_s11 + $0x288] sm:$0xff] %v5524_v59  ;;  %v6376_v61 = vld [vmem:[#allocation3 + $0x550] sm:$0xff] }
 0x398   : > { %v2652_v1 = vpop.f32.mrf.mxu2  ;;  %2281 = vmatmul.f32.gmra.mxu0 %v6358_v2 }
 0x399   : > { %2490 = vmatmul.f32.gmra.mxu1 %v6359_v3  ;;  %v2861_v4 = vpop.f32.mrf.mxu3  ;;  %v2653_v5 = vadd.f32 %v2652_v1, %v2444_v0  ;;  %v6377_v0 = vld [vmem:[#allocation3 + $0x558] sm:$0xff]  ;;  %v6378_v3 = vld [vmem:[#allocation3 + $0x540] sm:$0xff] }
 0x39b   : > { %v2862_v6 = vadd.f32 %v2861_v4, %v2653_v5  ;;  %v6379_v4 = vld [vmem:[#allocation3 + $0x548] sm:$0xff] }
 0x39d   : > { %v5528_v7 = vadd.f32 %v7613_v47, %v2862_v6  ;;  %2702 = vmatmul.f32.gmra.mxu2 %v6360_v8  ;;  %v2237_v9 = vpop.f32.mrf.mxu0 }
 0x39e   : > { %v2446_v10 = vpop.f32.mrf.mxu1  ;;  %2911 = vmatmul.f32.gmra.mxu3 %v6361_v11 }
 0x39f   : > { %v2447_v12 = vadd.f32 %v2446_v10, %v2237_v9  ;;  %5784 = vst [vmem:[%s7421_s11 + $0x2a8] sm:$0xff] %v5528_v7  ;;  %v6380_v9 = vld [vmem:[#allocation3 + $0x570] sm:$0xff] }
 0x3a0   : > { %v2655_v13 = vpop.f32.mrf.mxu2  ;;  %2284 = vmatmul.f32.gmra.mxu0 %v6362_v14 }
 0x3a1   : > { %2493 = vmatmul.f32.gmra.mxu1 %v6363_v15  ;;  %v2864_v16 = vpop.f32.mrf.mxu3  ;;  %v2656_v17 = vadd.f32 %v2655_v13, %v2447_v12  ;;  %v6381_v12 = vld [vmem:[#allocation3 + $0x578] sm:$0xff]  ;;  %v6382_v15 = vld [vmem:[#allocation3 + $0x560] sm:$0xff] }
 0x3a3   : > { %v2865_v18 = vadd.f32 %v2864_v16, %v2656_v17  ;;  %v6383_v16 = vld [vmem:[#allocation3 + $0x568] sm:$0xff] }
 0x3a5   : > { %v5532_v19 = vadd.f32 %v7613_v47, %v2865_v18  ;;  %2705 = vmatmul.f32.gmra.mxu2 %v6364_v20  ;;  %v2240_v21 = vpop.f32.mrf.mxu0 }
 0x3a6   : > { %v2449_v22 = vpop.f32.mrf.mxu1  ;;  %2914 = vmatmul.f32.gmra.mxu3 %v6365_v23 }
 0x3a7   : > { %v2450_v24 = vadd.f32 %v2449_v22, %v2240_v21  ;;  %5788 = vst [vmem:[%s7421_s11 + $0x2c8] sm:$0xff] %v5532_v19  ;;  %v6384_v21 = vld [vmem:[#allocation3 + $0x590] sm:$0xff] }
 0x3a8   : > { %v2658_v25 = vpop.f32.mrf.mxu2  ;;  %2287 = vmatmul.f32.gmra.mxu0 %v6366_v26  ;;  %v1204_v26 = vld [vmem:[%s7318_s6 + $0x470] sm:$0xff] }
 0x3a9   : > { %2496 = vmatmul.f32.gmra.mxu1 %v6367_v27  ;;  %v2867_v28 = vpop.f32.mrf.mxu3  ;;  %v2659_v29 = vadd.f32 %v2658_v25, %v2450_v24  ;;  %v6385_v24 = vld [vmem:[#allocation3 + $0x598] sm:$0xff]  ;;  %v1268_v27 = vld [vmem:[%s7318_s6 + $0x670] sm:$0xff]  ;;  %3420 = vmatpush.msra.mxu2 %v1204_v26 }
 0x3aa   : > { %3629 = vmatpush.msra.mxu3 %v1268_v27  ;;  %v6404_v26 = vld [vmem:[#allocation3 + $0x630] sm:$0xff] }
 0x3ab   : > { %v2868_v30 = vadd.f32 %v2867_v28, %v2659_v29  ;;  %v6386_v29 = vld [vmem:[#allocation3 + $0x580] sm:$0xff] }
 0x3ad   : > { %v5536_v31 = vadd.f32 %v7613_v47, %v2868_v30  ;;  %2708 = vmatmul.f32.gmra.mxu2 %v6368_v32  ;;  %v2243_v34 = vpop.f32.mrf.mxu0  ;;  %v6387_v30 = vld [vmem:[#allocation3 + $0x588] sm:$0xff] }
 0x3ae   : > { %v2452_v35 = vpop.f32.mrf.mxu1  ;;  %2917 = vmatmul.f32.gmra.mxu3 %v6369_v36 }
 0x3af   : > { %v2453_v37 = vadd.f32 %v2452_v35, %v2243_v34  ;;  %5792 = vst [vmem:[%s7421_s11 + $0x2e8] sm:$0xff] %v5536_v31  ;;  %v1076_v34 = vld [vmem:[%s7318_s6 + $0x70] sm:$0xff] }
 0x3b0   : > { %v2661_v40 = vpop.f32.mrf.mxu2  ;;  %2290 = vmatmul.f32.gmra.mxu0 %v6370_v41  ;;  %v1140_v35 = vld [vmem:[%s7318_s6 + $0x270] sm:$0xff]  ;;  %v6389_v41 = vld [vmem:[#allocation3 + $0x5b8] sm:$0xff] }
 0x3b1   : > { %2499 = vmatmul.f32.gmra.mxu1 %v6371_v42  ;;  %v2870_v43 = vpop.f32.mrf.mxu3  ;;  %v2662_v44 = vadd.f32 %v2661_v40, %v2453_v37  ;;  %3002 = vmatpush.msra.mxu0 %v1076_v34  ;;  %v6407_v34 = vld [vmem:[#allocation3 + $0x628] sm:$0xff] }
 0x3b2   : > { %3211 = vmatpush.msra.mxu1 %v1140_v35 }
 0x3b3   : > { %v2871_v46 = vadd.f32 %v2870_v43, %v2662_v44  ;;  %v6390_v44 = vld [vmem:[#allocation3 + $0x5a0] sm:$0xff] }
 0x3b5   : > { %v5540_v48 = vadd.f32 %v7613_v47, %v2871_v46  ;;  %2711 = vmatmul.f32.gmra.mxu2 %v6372_v49  ;;  %v2246_v50 = vpop.f32.mrf.mxu0 }
 0x3b6   : > { %v2455_v51 = vpop.f32.mrf.mxu1  ;;  %2920 = vmatmul.f32.gmra.mxu3 %v6373_v52 }
 0x3b7   : > { %v2456_v53 = vadd.f32 %v2455_v51, %v2246_v50  ;;  %5796 = vst [vmem:[%s7421_s11 + $0x308] sm:$0xff] %v5540_v48  ;;  %v6392_v50 = vld [vmem:[#allocation3 + $0x5d0] sm:$0xff] }
 0x3b8   : > { %v2664_v54 = vpop.f32.mrf.mxu2  ;;  %2293 = vmatmul.f32.gmra.mxu0 %v6374_v55 }
 0x3b9   : > { %2502 = vmatmul.f32.gmra.mxu1 %v6375_v56  ;;  %v2873_v57 = vpop.f32.mrf.mxu3  ;;  %v2665_v58 = vadd.f32 %v2664_v54, %v2456_v53  ;;  %v6393_v53 = vld [vmem:[#allocation3 + $0x5d8] sm:$0xff]  ;;  %v6394_v56 = vld [vmem:[#allocation3 + $0x5c0] sm:$0xff] }
 0x3bb   : > { %v2874_v59 = vadd.f32 %v2873_v57, %v2665_v58  ;;  %v6395_v57 = vld [vmem:[#allocation3 + $0x5c8] sm:$0xff] }
 0x3bd   : > { %v5544_v60 = vadd.f32 %v7613_v47, %v2874_v59  ;;  %2714 = vmatmul.f32.gmra.mxu2 %v6376_v61  ;;  %v2249_v62 = vpop.f32.mrf.mxu0 }
 0x3be   : > { %v2458_v63 = vpop.f32.mrf.mxu1  ;;  %2923 = vmatmul.f32.gmra.mxu3 %v6377_v0 }
 0x3bf   : > { %v2459_v1 = vadd.f32 %v2458_v63, %v2249_v62  ;;  %5800 = vst [vmem:[%s7421_s11 + $0x328] sm:$0xff] %v5544_v60  ;;  %v6396_v62 = vld [vmem:[#allocation3 + $0x5f0] sm:$0xff] }
 0x3c0   : > { %v2667_v2 = vpop.f32.mrf.mxu2  ;;  %2296 = vmatmul.f32.gmra.mxu0 %v6378_v3 }
 0x3c1   : > { %2505 = vmatmul.f32.gmra.mxu1 %v6379_v4  ;;  %v2876_v5 = vpop.f32.mrf.mxu3  ;;  %v2668_v6 = vadd.f32 %v2667_v2, %v2459_v1  ;;  %v6397_v1 = vld [vmem:[#allocation3 + $0x5f8] sm:$0xff]  ;;  %v6398_v4 = vld [vmem:[#allocation3 + $0x5e0] sm:$0xff] }
 0x3c3   : > { %v2877_v7 = vadd.f32 %v2876_v5, %v2668_v6  ;;  %v6399_v5 = vld [vmem:[#allocation3 + $0x5e8] sm:$0xff] }
 0x3c5   : > { %v5548_v8 = vadd.f32 %v7613_v47, %v2877_v7  ;;  %2717 = vmatmul.f32.gmra.mxu2 %v6380_v9  ;;  %v2252_v10 = vpop.f32.mrf.mxu0 }
 0x3c6   : > { %v2461_v11 = vpop.f32.mrf.mxu1  ;;  %2926 = vmatmul.f32.gmra.mxu3 %v6381_v12 }
 0x3c7   : > { %v2462_v13 = vadd.f32 %v2461_v11, %v2252_v10  ;;  %5804 = vst [vmem:[%s7421_s11 + $0x348] sm:$0xff] %v5548_v8  ;;  %v6400_v10 = vld [vmem:[#allocation3 + $0x610] sm:$0xff] }
 0x3c8   : > { %v2670_v14 = vpop.f32.mrf.mxu2  ;;  %2299 = vmatmul.f32.gmra.mxu0 %v6382_v15  ;;  %v1200_v15 = vld [vmem:[%s7318_s6 + $0x450] sm:$0xff] }
 0x3c9   : > { %2508 = vmatmul.f32.gmra.mxu1 %v6383_v16  ;;  %v2879_v17 = vpop.f32.mrf.mxu3  ;;  %v2671_v18 = vadd.f32 %v2670_v14, %v2462_v13  ;;  %v6401_v13 = vld [vmem:[#allocation3 + $0x618] sm:$0xff]  ;;  %v1264_v16 = vld [vmem:[%s7318_s6 + $0x650] sm:$0xff]  ;;  %3421 = vmatpush.msra.mxu2 %v1200_v15 }
 0x3ca   : > { %3630 = vmatpush.msra.mxu3 %v1264_v16  ;;  %v6420_v15 = vld [vmem:[#allocation3 + $0x6b0] sm:$0xff] }
 0x3cb   : > { %v2880_v19 = vadd.f32 %v2879_v17, %v2671_v18  ;;  %v6402_v18 = vld [vmem:[#allocation3 + $0x600] sm:$0xff] }
 0x3cd   : > { %v5552_v20 = vadd.f32 %v7613_v47, %v2880_v19  ;;  %2720 = vmatmul.f32.gmra.mxu2 %v6384_v21  ;;  %v2255_v22 = vpop.f32.mrf.mxu0  ;;  %v6403_v19 = vld [vmem:[#allocation3 + $0x608] sm:$0xff] }
 0x3ce   : > { %v2464_v23 = vpop.f32.mrf.mxu1  ;;  %2929 = vmatmul.f32.gmra.mxu3 %v6385_v24 }
 0x3cf   : > { %v2465_v25 = vadd.f32 %v2464_v23, %v2255_v22  ;;  %5808 = vst [vmem:[%s7421_s11 + $0x368] sm:$0xff] %v5552_v20  ;;  %v1072_v22 = vld [vmem:[%s7318_s6 + $0x50] sm:$0xff] }
 0x3d0   : > { %v2673_v28 = vpop.f32.mrf.mxu2  ;;  %2302 = vmatmul.f32.gmra.mxu0 %v6386_v29  ;;  %v1136_v23 = vld [vmem:[%s7318_s6 + $0x250] sm:$0xff]  ;;  %v6405_v29 = vld [vmem:[#allocation3 + $0x638] sm:$0xff] }
 0x3d1   : > { %2511 = vmatmul.f32.gmra.mxu1 %v6387_v30  ;;  %v2882_v31 = vpop.f32.mrf.mxu3  ;;  %v2674_v32 = vadd.f32 %v2673_v28, %v2465_v25  ;;  %3003 = vmatpush.msra.mxu0 %v1072_v22  ;;  %v6423_v22 = vld [vmem:[#allocation3 + $0x6a8] sm:$0xff] }
 0x3d2   : > { %3212 = vmatpush.msra.mxu1 %v1136_v23 }
 0x3d3   : > { %v2883_v36 = vadd.f32 %v2882_v31, %v2674_v32  ;;  %v6406_v32 = vld [vmem:[#allocation3 + $0x620] sm:$0xff] }
 0x3d5   : > { %v5556_v37 = vadd.f32 %v7613_v47, %v2883_v36  ;;  %2723 = vmatmul.f32.gmra.mxu2 %v6388_v38  ;;  %v2258_v39 = vpop.f32.mrf.mxu0 }
 0x3d6   : > { %v2467_v40 = vpop.f32.mrf.mxu1  ;;  %2932 = vmatmul.f32.gmra.mxu3 %v6389_v41 }
 0x3d7   : > { %v2468_v42 = vadd.f32 %v2467_v40, %v2258_v39  ;;  %5812 = vst [vmem:[%s7421_s11 + $0x388] sm:$0xff] %v5556_v37  ;;  %v6408_v39 = vld [vmem:[#allocation3 + $0x650] sm:$0xff] }
 0x3d8   : > { %v2676_v43 = vpop.f32.mrf.mxu2  ;;  %2305 = vmatmul.f32.gmra.mxu0 %v6390_v44 }
 0x3d9   : > { %2514 = vmatmul.f32.gmra.mxu1 %v6391_v45  ;;  %v2885_v33 = vpop.f32.mrf.mxu3  ;;  %v2677_v46 = vadd.f32 %v2676_v43, %v2468_v42  ;;  %v6409_v42 = vld [vmem:[#allocation3 + $0x658] sm:$0xff]  ;;  %v6410_v45 = vld [vmem:[#allocation3 + $0x640] sm:$0xff] }
 0x3db   : > { %v2886_v48 = vadd.f32 %v2885_v33, %v2677_v46  ;;  %v6411_v33 = vld [vmem:[#allocation3 + $0x648] sm:$0xff] }
 0x3dd   : > { %v5560_v49 = vadd.f32 %v7613_v47, %v2886_v48  ;;  %2726 = vmatmul.f32.gmra.mxu2 %v6392_v50  ;;  %v2261_v51 = vpop.f32.mrf.mxu0 }
 0x3de   : > { %v2470_v52 = vpop.f32.mrf.mxu1  ;;  %2935 = vmatmul.f32.gmra.mxu3 %v6393_v53 }
 0x3df   : > { %v2471_v54 = vadd.f32 %v2470_v52, %v2261_v51  ;;  %5816 = vst [vmem:[%s7421_s11 + $0x3a8] sm:$0xff] %v5560_v49  ;;  %v6412_v51 = vld [vmem:[#allocation3 + $0x670] sm:$0xff] }
 0x3e0   : > { %v2679_v55 = vpop.f32.mrf.mxu2  ;;  %2308 = vmatmul.f32.gmra.mxu0 %v6394_v56 }
 0x3e1   : > { %2517 = vmatmul.f32.gmra.mxu1 %v6395_v57  ;;  %v2888_v58 = vpop.f32.mrf.mxu3  ;;  %v2680_v59 = vadd.f32 %v2679_v55, %v2471_v54  ;;  %v6413_v54 = vld [vmem:[#allocation3 + $0x678] sm:$0xff]  ;;  %v6414_v57 = vld [vmem:[#allocation3 + $0x660] sm:$0xff] }
 0x3e3   : > { %v2889_v60 = vadd.f32 %v2888_v58, %v2680_v59  ;;  %v6415_v58 = vld [vmem:[#allocation3 + $0x668] sm:$0xff] }
 0x3e5   : > { %v5564_v61 = vadd.f32 %v7613_v47, %v2889_v60  ;;  %2729 = vmatmul.f32.gmra.mxu2 %v6396_v62  ;;  %v2264_v63 = vpop.f32.mrf.mxu0 }
 0x3e6   : > { %v2473_v0 = vpop.f32.mrf.mxu1  ;;  %2938 = vmatmul.f32.gmra.mxu3 %v6397_v1 }
 0x3e7   : > { %v2474_v2 = vadd.f32 %v2473_v0, %v2264_v63  ;;  %5820 = vst [vmem:[%s7421_s11 + $0x3c8] sm:$0xff] %v5564_v61  ;;  %v6416_v63 = vld [vmem:[#allocation3 + $0x690] sm:$0xff] }
 0x3e8   : > { %v2682_v3 = vpop.f32.mrf.mxu2  ;;  %2311 = vmatmul.f32.gmra.mxu0 %v6398_v4  ;;  %v1196_v4 = vld [vmem:[%s7318_s6 + $0x430] sm:$0xff] }
 0x3e9   : > { %2520 = vmatmul.f32.gmra.mxu1 %v6399_v5  ;;  %v2891_v6 = vpop.f32.mrf.mxu3  ;;  %v2683_v7 = vadd.f32 %v2682_v3, %v2474_v2  ;;  %v6417_v2 = vld [vmem:[#allocation3 + $0x698] sm:$0xff]  ;;  %v1260_v5 = vld [vmem:[%s7318_s6 + $0x630] sm:$0xff]  ;;  %3422 = vmatpush.msra.mxu2 %v1196_v4 }
 0x3ea   : > { %3631 = vmatpush.msra.mxu3 %v1260_v5  ;;  %v6436_v4 = vld [vmem:[#allocation3 + $0x730] sm:$0xff] }
 0x3eb   : > { %v2892_v8 = vadd.f32 %v2891_v6, %v2683_v7  ;;  %v6418_v7 = vld [vmem:[#allocation3 + $0x680] sm:$0xff] }
 0x3ed   : > { %v5568_v9 = vadd.f32 %v7613_v47, %v2892_v8  ;;  %2732 = vmatmul.f32.gmra.mxu2 %v6400_v10  ;;  %v2267_v11 = vpop.f32.mrf.mxu0  ;;  %v6419_v8 = vld [vmem:[#allocation3 + $0x688] sm:$0xff] }
 0x3ee   : > { %v2476_v12 = vpop.f32.mrf.mxu1  ;;  %2941 = vmatmul.f32.gmra.mxu3 %v6401_v13 }
 0x3ef   : > { %v2477_v14 = vadd.f32 %v2476_v12, %v2267_v11  ;;  %5824 = vst [vmem:[%s7421_s11 + $0x3e8] sm:$0xff] %v5568_v9  ;;  %v1068_v11 = vld [vmem:[%s7318_s6 + $0x30] sm:$0xff] }
 0x3f0   : > { %v2685_v17 = vpop.f32.mrf.mxu2  ;;  %2314 = vmatmul.f32.gmra.mxu0 %v6402_v18  ;;  %v1132_v12 = vld [vmem:[%s7318_s6 + $0x230] sm:$0xff]  ;;  %v6421_v18 = vld [vmem:[#allocation3 + $0x6b8] sm:$0xff] }
 0x3f1   : > { %2523 = vmatmul.f32.gmra.mxu1 %v6403_v19  ;;  %v2894_v20 = vpop.f32.mrf.mxu3  ;;  %v2686_v21 = vadd.f32 %v2685_v17, %v2477_v14  ;;  %3004 = vmatpush.msra.mxu0 %v1068_v11  ;;  %v6439_v11 = vld [vmem:[#allocation3 + $0x728] sm:$0xff] }
 0x3f2   : > { %3213 = vmatpush.msra.mxu1 %v1132_v12 }
 0x3f3   : > { %v2895_v24 = vadd.f32 %v2894_v20, %v2686_v21  ;;  %v6422_v21 = vld [vmem:[#allocation3 + $0x6a0] sm:$0xff] }
 0x3f5   : > { %v5572_v25 = vadd.f32 %v7613_v47, %v2895_v24  ;;  %2735 = vmatmul.f32.gmra.mxu2 %v6404_v26  ;;  %v2270_v27 = vpop.f32.mrf.mxu0 }
 0x3f6   : > { %v2479_v28 = vpop.f32.mrf.mxu1  ;;  %2944 = vmatmul.f32.gmra.mxu3 %v6405_v29 }
 0x3f7   : > { %v2480_v30 = vadd.f32 %v2479_v28, %v2270_v27  ;;  %5828 = vst [vmem:[%s7421_s11 + $0x408] sm:$0xff] %v5572_v25  ;;  %v6424_v27 = vld [vmem:[#allocation3 + $0x6d0] sm:$0xff] }
 0x3f8   : > { %v2688_v31 = vpop.f32.mrf.mxu2  ;;  %2317 = vmatmul.f32.gmra.mxu0 %v6406_v32 }
 0x3f9   : > { %2526 = vmatmul.f32.gmra.mxu1 %v6407_v34  ;;  %v2897_v35 = vpop.f32.mrf.mxu3  ;;  %v2689_v36 = vadd.f32 %v2688_v31, %v2480_v30  ;;  %v6425_v30 = vld [vmem:[#allocation3 + $0x6d8] sm:$0xff]  ;;  %v6426_v34 = vld [vmem:[#allocation3 + $0x6c0] sm:$0xff] }
 0x3fb   : > { %v2898_v37 = vadd.f32 %v2897_v35, %v2689_v36  ;;  %v6427_v35 = vld [vmem:[#allocation3 + $0x6c8] sm:$0xff] }
 0x3fd   : > { %v5576_v38 = vadd.f32 %v7613_v47, %v2898_v37  ;;  %2738 = vmatmul.f32.gmra.mxu2 %v6408_v39  ;;  %v2273_v40 = vpop.f32.mrf.mxu0 }
 0x3fe   : > { %v2482_v41 = vpop.f32.mrf.mxu1  ;;  %2947 = vmatmul.f32.gmra.mxu3 %v6409_v42 }
 0x3ff   : > { %v2483_v43 = vadd.f32 %v2482_v41, %v2273_v40  ;;  %5832 = vst [vmem:[%s7421_s11 + $0x428] sm:$0xff] %v5576_v38  ;;  %v6428_v40 = vld [vmem:[#allocation3 + $0x6f0] sm:$0xff] }
 0x400   : > { %v2691_v44 = vpop.f32.mrf.mxu2  ;;  %2320 = vmatmul.f32.gmra.mxu0 %v6410_v45 }
 0x401   : > { %2529 = vmatmul.f32.gmra.mxu1 %v6411_v33  ;;  %v2900_v46 = vpop.f32.mrf.mxu3  ;;  %v2692_v48 = vadd.f32 %v2691_v44, %v2483_v43  ;;  %v6429_v43 = vld [vmem:[#allocation3 + $0x6f8] sm:$0xff]  ;;  %v6430_v33 = vld [vmem:[#allocation3 + $0x6e0] sm:$0xff] }
 0x403   : > { %v2901_v49 = vadd.f32 %v2900_v46, %v2692_v48  ;;  %v6431_v46 = vld [vmem:[#allocation3 + $0x6e8] sm:$0xff] }
 0x405   : > { %v5580_v50 = vadd.f32 %v7613_v47, %v2901_v49  ;;  %2741 = vmatmul.f32.gmra.mxu2 %v6412_v51  ;;  %v2276_v52 = vpop.f32.mrf.mxu0 }
 0x406   : > { %v2485_v53 = vpop.f32.mrf.mxu1  ;;  %2950 = vmatmul.f32.gmra.mxu3 %v6413_v54 }
 0x407   : > { %v2486_v55 = vadd.f32 %v2485_v53, %v2276_v52  ;;  %5836 = vst [vmem:[%s7421_s11 + $0x448] sm:$0xff] %v5580_v50  ;;  %v6432_v52 = vld [vmem:[#allocation3 + $0x710] sm:$0xff] }
 0x408   : > { %v2694_v56 = vpop.f32.mrf.mxu2  ;;  %2323 = vmatmul.f32.gmra.mxu0 %v6414_v57  ;;  %v1192_v57 = vld [vmem:[%s7318_s6 + $0x410] sm:$0xff] }
 0x409   : > { %2532 = vmatmul.f32.gmra.mxu1 %v6415_v58  ;;  %v2903_v59 = vpop.f32.mrf.mxu3  ;;  %v2695_v60 = vadd.f32 %v2694_v56, %v2486_v55  ;;  %v6433_v55 = vld [vmem:[#allocation3 + $0x718] sm:$0xff]  ;;  %v1256_v58 = vld [vmem:[%s7318_s6 + $0x610] sm:$0xff]  ;;  %3423 = vmatpush.msra.mxu2 %v1192_v57 }
 0x40a   : > { %3632 = vmatpush.msra.mxu3 %v1256_v58  ;;  %v6452_v57 = vld [vmem:[#allocation3 + $0x7b0] sm:$0xff] }
 0x40b   : > { %v2904_v61 = vadd.f32 %v2903_v59, %v2695_v60  ;;  %v6434_v60 = vld [vmem:[#allocation3 + $0x700] sm:$0xff] }
 0x40d   : > { %v5584_v62 = vadd.f32 %v7613_v47, %v2904_v61  ;;  %2744 = vmatmul.f32.gmra.mxu2 %v6416_v63  ;;  %v2279_v0 = vpop.f32.mrf.mxu0  ;;  %v6435_v61 = vld [vmem:[#allocation3 + $0x708] sm:$0xff] }
 0x40e   : > { %v2488_v1 = vpop.f32.mrf.mxu1  ;;  %2953 = vmatmul.f32.gmra.mxu3 %v6417_v2 }
 0x40f   : > { %v2489_v3 = vadd.f32 %v2488_v1, %v2279_v0  ;;  %5840 = vst [vmem:[%s7421_s11 + $0x468] sm:$0xff] %v5584_v62  ;;  %v1064_v0 = vld [vmem:[%s7318_s6 + $0x10] sm:$0xff] }
 0x410   : > { %v2697_v6 = vpop.f32.mrf.mxu2  ;;  %2326 = vmatmul.f32.gmra.mxu0 %v6418_v7  ;;  %v1128_v1 = vld [vmem:[%s7318_s6 + $0x210] sm:$0xff]  ;;  %v6437_v7 = vld [vmem:[#allocation3 + $0x738] sm:$0xff] }
 0x411   : > { %2535 = vmatmul.f32.gmra.mxu1 %v6419_v8  ;;  %v2906_v9 = vpop.f32.mrf.mxu3  ;;  %v2698_v10 = vadd.f32 %v2697_v6, %v2489_v3  ;;  %3005 = vmatpush.msra.mxu0 %v1064_v0  ;;  %v6455_v0 = vld [vmem:[#allocation3 + $0x7a8] sm:$0xff] }
 0x412   : > { %3214 = vmatpush.msra.mxu1 %v1128_v1 }
 0x413   : > { %v2907_v13 = vadd.f32 %v2906_v9, %v2698_v10  ;;  %v6438_v10 = vld [vmem:[#allocation3 + $0x720] sm:$0xff] }
 0x415   : > { %v5588_v14 = vadd.f32 %v7613_v47, %v2907_v13  ;;  %2747 = vmatmul.f32.gmra.mxu2 %v6420_v15  ;;  %v2282_v16 = vpop.f32.mrf.mxu0 }
 0x416   : > { %v2491_v17 = vpop.f32.mrf.mxu1  ;;  %2956 = vmatmul.f32.gmra.mxu3 %v6421_v18 }
 0x417   : > { %v2492_v19 = vadd.f32 %v2491_v17, %v2282_v16  ;;  %5844 = vst [vmem:[%s7421_s11 + $0x488] sm:$0xff] %v5588_v14  ;;  %v6440_v16 = vld [vmem:[#allocation3 + $0x750] sm:$0xff] }
 0x418   : > { %v2700_v20 = vpop.f32.mrf.mxu2  ;;  %2329 = vmatmul.f32.gmra.mxu0 %v6422_v21 }
 0x419   : > { %2538 = vmatmul.f32.gmra.mxu1 %v6423_v22  ;;  %v2909_v23 = vpop.f32.mrf.mxu3  ;;  %v2701_v24 = vadd.f32 %v2700_v20, %v2492_v19  ;;  %v6441_v19 = vld [vmem:[#allocation3 + $0x758] sm:$0xff]  ;;  %v6442_v22 = vld [vmem:[#allocation3 + $0x740] sm:$0xff] }
 0x41b   : > { %v2910_v25 = vadd.f32 %v2909_v23, %v2701_v24  ;;  %v6443_v23 = vld [vmem:[#allocation3 + $0x748] sm:$0xff] }
 0x41d   : > { %v5592_v26 = vadd.f32 %v7613_v47, %v2910_v25  ;;  %2750 = vmatmul.f32.gmra.mxu2 %v6424_v27  ;;  %v2285_v28 = vpop.f32.mrf.mxu0 }
 0x41e   : > { %v2494_v29 = vpop.f32.mrf.mxu1  ;;  %2959 = vmatmul.f32.gmra.mxu3 %v6425_v30 }
 0x41f   : > { %v2495_v31 = vadd.f32 %v2494_v29, %v2285_v28  ;;  %5848 = vst [vmem:[%s7421_s11 + $0x4a8] sm:$0xff] %v5592_v26  ;;  %v6444_v28 = vld [vmem:[#allocation3 + $0x770] sm:$0xff] }
 0x420   : > { %v2703_v32 = vpop.f32.mrf.mxu2  ;;  %2332 = vmatmul.f32.gmra.mxu0 %v6426_v34 }
 0x421   : > { %2541 = vmatmul.f32.gmra.mxu1 %v6427_v35  ;;  %v2912_v36 = vpop.f32.mrf.mxu3  ;;  %v2704_v37 = vadd.f32 %v2703_v32, %v2495_v31  ;;  %v6445_v31 = vld [vmem:[#allocation3 + $0x778] sm:$0xff]  ;;  %v6446_v35 = vld [vmem:[#allocation3 + $0x760] sm:$0xff] }
 0x423   : > { %v2913_v38 = vadd.f32 %v2912_v36, %v2704_v37  ;;  %v6447_v36 = vld [vmem:[#allocation3 + $0x768] sm:$0xff] }
 0x425   : > { %v5596_v39 = vadd.f32 %v7613_v47, %v2913_v38  ;;  %2753 = vmatmul.f32.gmra.mxu2 %v6428_v40  ;;  %v2288_v41 = vpop.f32.mrf.mxu0 }
 0x426   : > { %v2497_v42 = vpop.f32.mrf.mxu1  ;;  %2962 = vmatmul.f32.gmra.mxu3 %v6429_v43 }
 0x427   : > { %v2498_v44 = vadd.f32 %v2497_v42, %v2288_v41  ;;  %5852 = vst [vmem:[%s7421_s11 + $0x4c8] sm:$0xff] %v5596_v39  ;;  %v6448_v41 = vld [vmem:[#allocation3 + $0x790] sm:$0xff] }
 0x428   : > { %v2706_v45 = vpop.f32.mrf.mxu2  ;;  %2335 = vmatmul.f32.gmra.mxu0 %v6430_v33  ;;  %v1253_v33 = vld [vmem:[%s7318_s6 + $0x5f8] sm:$0xff] }
 0x429   : > { %2544 = vmatmul.f32.gmra.mxu1 %v6431_v46  ;;  %v2915_v48 = vpop.f32.mrf.mxu3  ;;  %v2707_v49 = vadd.f32 %v2706_v45, %v2498_v44  ;;  %v6449_v44 = vld [vmem:[#allocation3 + $0x798] sm:$0xff]  ;;  %4244 = vmatpush.msrb.mxu2 %v1253_v33  ;;  %v6468_v33 = vld [vmem:[#allocation3 + $0x30] sm:$0xff] }
 0x42a   : > { %v1317_v46 = vld [vmem:[%s7318_s6 + $0x7f8] sm:$0xff] }
 0x42b   : > { %v2916_v50 = vadd.f32 %v2915_v48, %v2707_v49  ;;  %v6450_v49 = vld [vmem:[#allocation3 + $0x780] sm:$0xff]  ;;  %4453 = vmatpush.msrb.mxu3 %v1317_v46 }
 0x42d   : > { %v5600_v51 = vadd.f32 %v7613_v47, %v2916_v50  ;;  %2756 = vmatmul.f32.gmra.mxu2 %v6432_v52  ;;  %v2291_v53 = vpop.f32.mrf.mxu0  ;;  %v6451_v50 = vld [vmem:[#allocation3 + $0x788] sm:$0xff] }
 0x42e   : > { %v2500_v54 = vpop.f32.mrf.mxu1  ;;  %2965 = vmatmul.f32.gmra.mxu3 %v6433_v55 }
 0x42f   : > { %v2501_v56 = vadd.f32 %v2500_v54, %v2291_v53  ;;  %5856 = vst [vmem:[%s7421_s11 + $0x4e8] sm:$0xff] %v5600_v51  ;;  %v1125_v53 = vld [vmem:[%s7318_s6 + $0x1f8] sm:$0xff] }
 0x430   : > { %v2709_v59 = vpop.f32.mrf.mxu2  ;;  %2338 = vmatmul.f32.gmra.mxu0 %v6434_v60  ;;  %v1189_v54 = vld [vmem:[%s7318_s6 + $0x3f8] sm:$0xff] }
 0x431   : > { %2547 = vmatmul.f32.gmra.mxu1 %v6435_v61  ;;  %v2918_v62 = vpop.f32.mrf.mxu3  ;;  %v2710_v63 = vadd.f32 %v2709_v59, %v2501_v56  ;;  %3826 = vmatpush.msrb.mxu0 %v1125_v53  ;;  %v6453_v60 = vld [vmem:[#allocation3 + $0x7b8] sm:$0xff]  ;;  %v6471_v53 = vld [vmem:[#allocation3 + $0x28] sm:$0xff] }
 0x432   : > { %4035 = vmatpush.msrb.mxu1 %v1189_v54 }
 0x433   : > { %v2919_v2 = vadd.f32 %v2918_v62, %v2710_v63  ;;  %v6454_v63 = vld [vmem:[#allocation3 + $0x7a0] sm:$0xff] }
 0x435   : > { %v5604_v3 = vadd.f32 %v7613_v47, %v2919_v2  ;;  %2759 = vmatmul.f32.gmra.mxu2 %v6436_v4  ;;  %v2294_v5 = vpop.f32.mrf.mxu0 }
 0x436   : > { %v2503_v6 = vpop.f32.mrf.mxu1  ;;  %2968 = vmatmul.f32.gmra.mxu3 %v6437_v7 }
 0x437   : > { %v2504_v8 = vadd.f32 %v2503_v6, %v2294_v5  ;;  %5860 = vst [vmem:[%s7421_s11 + $0x508] sm:$0xff] %v5604_v3  ;;  %v6456_v5 = vld [vmem:[#allocation3 + $0x7d0] sm:$0xff] }
 0x438   : > { %v2712_v9 = vpop.f32.mrf.mxu2  ;;  %2341 = vmatmul.f32.gmra.mxu0 %v6438_v10 }
 0x439   : > { %2550 = vmatmul.f32.gmra.mxu1 %v6439_v11  ;;  %v2921_v12 = vpop.f32.mrf.mxu3  ;;  %v2713_v13 = vadd.f32 %v2712_v9, %v2504_v8  ;;  %v6457_v8 = vld [vmem:[#allocation3 + $0x7d8] sm:$0xff]  ;;  %v6458_v11 = vld [vmem:[#allocation3 + $0x7c0] sm:$0xff] }
 0x43b   : > { %v2922_v14 = vadd.f32 %v2921_v12, %v2713_v13  ;;  %v6459_v12 = vld [vmem:[#allocation3 + $0x7c8] sm:$0xff] }
 0x43d   : > { %v5608_v15 = vadd.f32 %v7613_v47, %v2922_v14  ;;  %2762 = vmatmul.f32.gmra.mxu2 %v6440_v16  ;;  %v2297_v17 = vpop.f32.mrf.mxu0 }
 0x43e   : > { %v2506_v18 = vpop.f32.mrf.mxu1  ;;  %2971 = vmatmul.f32.gmra.mxu3 %v6441_v19 }
 0x43f   : > { %v2507_v20 = vadd.f32 %v2506_v18, %v2297_v17  ;;  %5864 = vst [vmem:[%s7421_s11 + $0x528] sm:$0xff] %v5608_v15  ;;  %v6460_v17 = vld [vmem:[#allocation3 + $0x7f0] sm:$0xff] }
 0x440   : > { %v2715_v21 = vpop.f32.mrf.mxu2  ;;  %2344 = vmatmul.f32.gmra.mxu0 %v6442_v22 }
 0x441   : > { %2553 = vmatmul.f32.gmra.mxu1 %v6443_v23  ;;  %v2924_v24 = vpop.f32.mrf.mxu3  ;;  %v2716_v25 = vadd.f32 %v2715_v21, %v2507_v20  ;;  %v6461_v20 = vld [vmem:[#allocation3 + $0x7f8] sm:$0xff]  ;;  %v6462_v23 = vld [vmem:[#allocation3 + $0x7e0] sm:$0xff] }
 0x443   : > { %v2925_v26 = vadd.f32 %v2924_v24, %v2716_v25  ;;  %v6463_v24 = vld [vmem:[#allocation3 + $0x7e8] sm:$0xff] }
 0x445   : > { %v5612_v27 = vadd.f32 %v7613_v47, %v2925_v26  ;;  %2765 = vmatmul.f32.gmra.mxu2 %v6444_v28  ;;  %v2300_v29 = vpop.f32.mrf.mxu0 }
 0x446   : > { %v2509_v30 = vpop.f32.mrf.mxu1  ;;  %2974 = vmatmul.f32.gmra.mxu3 %v6445_v31 }
 0x447   : > { %v2510_v32 = vadd.f32 %v2509_v30, %v2300_v29  ;;  %5868 = vst [vmem:[%s7421_s11 + $0x548] sm:$0xff] %v5612_v27  ;;  %v6464_v29 = vld [vmem:[#allocation3 + $0x10] sm:$0xff] }
 0x448   : > { %v2718_v34 = vpop.f32.mrf.mxu2  ;;  %2347 = vmatmul.f32.gmra.mxu0 %v6446_v35  ;;  %v1249_v35 = vld [vmem:[%s7318_s6 + $0x5d8] sm:$0xff] }
 0x449   : > { %2556 = vmatmul.f32.gmra.mxu1 %v6447_v36  ;;  %v2927_v37 = vpop.f32.mrf.mxu3  ;;  %v2719_v38 = vadd.f32 %v2718_v34, %v2510_v32  ;;  %v6465_v32 = vld [vmem:[#allocation3 + $0x18] sm:$0xff]  ;;  %4245 = vmatpush.msrb.mxu2 %v1249_v35  ;;  %v6484_v35 = vld [vmem:[#allocation3 + $0xb0] sm:$0xff] }
 0x44a   : > { %v1313_v36 = vld [vmem:[%s7318_s6 + $0x7d8] sm:$0xff] }
 0x44b   : > { %v2928_v39 = vadd.f32 %v2927_v37, %v2719_v38  ;;  %v6466_v38 = vld [vmem:[#allocation3] sm:$0xff]  ;;  %4454 = vmatpush.msrb.mxu3 %v1313_v36 }
 0x44d   : > { %v5616_v40 = vadd.f32 %v7613_v47, %v2928_v39  ;;  %2768 = vmatmul.f32.gmra.mxu2 %v6448_v41  ;;  %v2303_v42 = vpop.f32.mrf.mxu0  ;;  %v6467_v39 = vld [vmem:[#allocation3 + $0x8] sm:$0xff] }
 0x44e   : > { %v2512_v43 = vpop.f32.mrf.mxu1  ;;  %2977 = vmatmul.f32.gmra.mxu3 %v6449_v44 }
 0x44f   : > { %v2513_v45 = vadd.f32 %v2512_v43, %v2303_v42  ;;  %5872 = vst [vmem:[%s7421_s11 + $0x568] sm:$0xff] %v5616_v40  ;;  %v1121_v42 = vld [vmem:[%s7318_s6 + $0x1d8] sm:$0xff] }
 0x450   : > { %v2721_v48 = vpop.f32.mrf.mxu2  ;;  %2350 = vmatmul.f32.gmra.mxu0 %v6450_v49  ;;  %v1185_v43 = vld [vmem:[%s7318_s6 + $0x3d8] sm:$0xff] }
 0x451   : > { %2559 = vmatmul.f32.gmra.mxu1 %v6451_v50  ;;  %v2930_v51 = vpop.f32.mrf.mxu3  ;;  %v2722_v52 = vadd.f32 %v2721_v48, %v2513_v45  ;;  %3827 = vmatpush.msrb.mxu0 %v1121_v42  ;;  %v6469_v49 = vld [vmem:[#allocation3 + $0x38] sm:$0xff]  ;;  %v6487_v42 = vld [vmem:[#allocation3 + $0xa8] sm:$0xff] }
 0x452   : > { %4036 = vmatpush.msrb.mxu1 %v1185_v43 }
 0x453   : > { %v2931_v55 = vadd.f32 %v2930_v51, %v2722_v52  ;;  %v6470_v52 = vld [vmem:[#allocation3 + $0x20] sm:$0xff] }
 0x455   : > { %v5620_v56 = vadd.f32 %v7613_v47, %v2931_v55  ;;  %2771 = vmatmul.f32.gmra.mxu2 %v6452_v57  ;;  %v2306_v58 = vpop.f32.mrf.mxu0 }
 0x456   : > { %v2515_v59 = vpop.f32.mrf.mxu1  ;;  %2980 = vmatmul.f32.gmra.mxu3 %v6453_v60 }
 0x457   : > { %v2516_v61 = vadd.f32 %v2515_v59, %v2306_v58  ;;  %5876 = vst [vmem:[%s7421_s11 + $0x588] sm:$0xff] %v5620_v56  ;;  %v6472_v58 = vld [vmem:[#allocation3 + $0x50] sm:$0xff] }
 0x458   : > { %v2724_v62 = vpop.f32.mrf.mxu2  ;;  %2353 = vmatmul.f32.gmra.mxu0 %v6454_v63 }
 0x459   : > { %2562 = vmatmul.f32.gmra.mxu1 %v6455_v0  ;;  %v2933_v1 = vpop.f32.mrf.mxu3  ;;  %v2725_v2 = vadd.f32 %v2724_v62, %v2516_v61  ;;  %v6473_v61 = vld [vmem:[#allocation3 + $0x58] sm:$0xff]  ;;  %v6474_v0 = vld [vmem:[#allocation3 + $0x40] sm:$0xff] }
 0x45b   : > { %v2934_v3 = vadd.f32 %v2933_v1, %v2725_v2  ;;  %v6475_v1 = vld [vmem:[#allocation3 + $0x48] sm:$0xff] }
 0x45d   : > { %v5624_v4 = vadd.f32 %v7613_v47, %v2934_v3  ;;  %2774 = vmatmul.f32.gmra.mxu2 %v6456_v5  ;;  %v2309_v6 = vpop.f32.mrf.mxu0 }
 0x45e   : > { %v2518_v7 = vpop.f32.mrf.mxu1  ;;  %2983 = vmatmul.f32.gmra.mxu3 %v6457_v8 }
 0x45f   : > { %v2519_v9 = vadd.f32 %v2518_v7, %v2309_v6  ;;  %5880 = vst [vmem:[%s7421_s11 + $0x5a8] sm:$0xff] %v5624_v4  ;;  %v6476_v6 = vld [vmem:[#allocation3 + $0x70] sm:$0xff] }
 0x460   : > { %v2727_v10 = vpop.f32.mrf.mxu2  ;;  %2356 = vmatmul.f32.gmra.mxu0 %v6458_v11 }
 0x461   : > { %2565 = vmatmul.f32.gmra.mxu1 %v6459_v12  ;;  %v2936_v13 = vpop.f32.mrf.mxu3  ;;  %v2728_v14 = vadd.f32 %v2727_v10, %v2519_v9  ;;  %v6477_v9 = vld [vmem:[#allocation3 + $0x78] sm:$0xff]  ;;  %v6478_v12 = vld [vmem:[#allocation3 + $0x60] sm:$0xff] }
 0x463   : > { %v2937_v15 = vadd.f32 %v2936_v13, %v2728_v14  ;;  %v6479_v13 = vld [vmem:[#allocation3 + $0x68] sm:$0xff] }
 0x465   : > { %v5628_v16 = vadd.f32 %v7613_v47, %v2937_v15  ;;  %2777 = vmatmul.f32.gmra.mxu2 %v6460_v17  ;;  %v2312_v18 = vpop.f32.mrf.mxu0 }
 0x466   : > { %v2521_v19 = vpop.f32.mrf.mxu1  ;;  %2986 = vmatmul.f32.gmra.mxu3 %v6461_v20 }
 0x467   : > { %v2522_v21 = vadd.f32 %v2521_v19, %v2312_v18  ;;  %5884 = vst [vmem:[%s7421_s11 + $0x5c8] sm:$0xff] %v5628_v16  ;;  %v6480_v18 = vld [vmem:[#allocation3 + $0x90] sm:$0xff] }
 0x468   : > { %v2730_v22 = vpop.f32.mrf.mxu2  ;;  %2359 = vmatmul.f32.gmra.mxu0 %v6462_v23  ;;  %v1245_v23 = vld [vmem:[%s7318_s6 + $0x5b8] sm:$0xff] }
 0x469   : > { %2568 = vmatmul.f32.gmra.mxu1 %v6463_v24  ;;  %v2939_v25 = vpop.f32.mrf.mxu3  ;;  %v2731_v26 = vadd.f32 %v2730_v22, %v2522_v21  ;;  %v6481_v21 = vld [vmem:[#allocation3 + $0x98] sm:$0xff]  ;;  %4246 = vmatpush.msrb.mxu2 %v1245_v23  ;;  %v6500_v23 = vld [vmem:[#allocation3 + $0x130] sm:$0xff] }
 0x46a   : > { %v1309_v24 = vld [vmem:[%s7318_s6 + $0x7b8] sm:$0xff] }
 0x46b   : > { %v2940_v27 = vadd.f32 %v2939_v25, %v2731_v26  ;;  %v6482_v26 = vld [vmem:[#allocation3 + $0x80] sm:$0xff]  ;;  %4455 = vmatpush.msrb.mxu3 %v1309_v24 }
 0x46d   : > { %v5632_v28 = vadd.f32 %v7613_v47, %v2940_v27  ;;  %3424 = vmatmul.f32.vlgmr.msra.gmra.mxu2 %v6464_v29  ;;  %v2315_v30 = vpop.f32.mrf.mxu0  ;;  %v6483_v27 = vld [vmem:[#allocation3 + $0x88] sm:$0xff] }
 0x46e   : > { %v2524_v31 = vpop.f32.mrf.mxu1  ;;  %3633 = vmatmul.f32.vlgmr.msra.gmra.mxu3 %v6465_v32 }
 0x46f   : > { %v2525_v34 = vadd.f32 %v2524_v31, %v2315_v30  ;;  %5888 = vst [vmem:[%s7421_s11 + $0x5e8] sm:$0xff] %v5632_v28  ;;  %v1117_v30 = vld [vmem:[%s7318_s6 + $0x1b8] sm:$0xff] }
 0x470   : > { %v2733_v37 = vpop.f32.mrf.mxu2  ;;  %3006 = vmatmul.f32.vlgmr.msra.gmra.mxu0 %v6466_v38  ;;  %v1181_v31 = vld [vmem:[%s7318_s6 + $0x3b8] sm:$0xff] }
 0x471   : > { %3215 = vmatmul.f32.vlgmr.msra.gmra.mxu1 %v6467_v39  ;;  %v2942_v40 = vpop.f32.mrf.mxu3  ;;  %v2734_v41 = vadd.f32 %v2733_v37, %v2525_v34  ;;  %3828 = vmatpush.msrb.mxu0 %v1117_v30  ;;  %v6485_v38 = vld [vmem:[#allocation3 + $0xb8] sm:$0xff]  ;;  %v6503_v30 = vld [vmem:[#allocation3 + $0x128] sm:$0xff] }
 0x472   : > { %4037 = vmatpush.msrb.mxu1 %v1181_v31 }
 0x473   : > { %v2943_v44 = vadd.f32 %v2942_v40, %v2734_v41  ;;  %v6486_v41 = vld [vmem:[#allocation3 + $0xa0] sm:$0xff] }
 0x475   : > { %v5636_v45 = vadd.f32 %v7613_v47, %v2943_v44  ;;  %3427 = vmatmul.f32.gmra.mxu2 %v6468_v33  ;;  %v2318_v46 = vpop.f32.mrf.mxu0 }
 0x476   : > { %v2527_v48 = vpop.f32.mrf.mxu1  ;;  %3636 = vmatmul.f32.gmra.mxu3 %v6469_v49 }
 0x477   : > { %v2528_v50 = vadd.f32 %v2527_v48, %v2318_v46  ;;  %5892 = vst [vmem:[%s7421_s11 + $0x608] sm:$0xff] %v5636_v45  ;;  %v6488_v46 = vld [vmem:[#allocation3 + $0xd0] sm:$0xff] }
 0x478   : > { %v2736_v51 = vpop.f32.mrf.mxu2  ;;  %3009 = vmatmul.f32.gmra.mxu0 %v6470_v52 }
 0x479   : > { %3218 = vmatmul.f32.gmra.mxu1 %v6471_v53  ;;  %v2945_v54 = vpop.f32.mrf.mxu3  ;;  %v2737_v55 = vadd.f32 %v2736_v51, %v2528_v50  ;;  %v6489_v50 = vld [vmem:[#allocation3 + $0xd8] sm:$0xff]  ;;  %v6490_v53 = vld [vmem:[#allocation3 + $0xc0] sm:$0xff] }
 0x47b   : > { %v2946_v56 = vadd.f32 %v2945_v54, %v2737_v55  ;;  %v6491_v54 = vld [vmem:[#allocation3 + $0xc8] sm:$0xff] }
 0x47d   : > { %v5640_v57 = vadd.f32 %v7613_v47, %v2946_v56  ;;  %3430 = vmatmul.f32.gmra.mxu2 %v6472_v58  ;;  %v2321_v59 = vpop.f32.mrf.mxu0 }
 0x47e   : > { %v2530_v60 = vpop.f32.mrf.mxu1  ;;  %3639 = vmatmul.f32.gmra.mxu3 %v6473_v61 }
 0x47f   : > { %v2531_v62 = vadd.f32 %v2530_v60, %v2321_v59  ;;  %5896 = vst [vmem:[%s7421_s11 + $0x628] sm:$0xff] %v5640_v57  ;;  %v6492_v59 = vld [vmem:[#allocation3 + $0xf0] sm:$0xff] }
 0x480   : > { %v2739_v63 = vpop.f32.mrf.mxu2  ;;  %3012 = vmatmul.f32.gmra.mxu0 %v6474_v0 }
 0x481   : > { %3221 = vmatmul.f32.gmra.mxu1 %v6475_v1  ;;  %v2948_v2 = vpop.f32.mrf.mxu3  ;;  %v2740_v3 = vadd.f32 %v2739_v63, %v2531_v62  ;;  %v6493_v62 = vld [vmem:[#allocation3 + $0xf8] sm:$0xff]  ;;  %v6494_v1 = vld [vmem:[#allocation3 + $0xe0] sm:$0xff] }
 0x483   : > { %v2949_v4 = vadd.f32 %v2948_v2, %v2740_v3  ;;  %v6495_v2 = vld [vmem:[#allocation3 + $0xe8] sm:$0xff] }
 0x485   : > { %v5644_v5 = vadd.f32 %v7613_v47, %v2949_v4  ;;  %3433 = vmatmul.f32.gmra.mxu2 %v6476_v6  ;;  %v2324_v7 = vpop.f32.mrf.mxu0 }
 0x486   : > { %v2533_v8 = vpop.f32.mrf.mxu1  ;;  %3642 = vmatmul.f32.gmra.mxu3 %v6477_v9 }
 0x487   : > { %v2534_v10 = vadd.f32 %v2533_v8, %v2324_v7  ;;  %5900 = vst [vmem:[%s7421_s11 + $0x648] sm:$0xff] %v5644_v5  ;;  %v6496_v7 = vld [vmem:[#allocation3 + $0x110] sm:$0xff] }
 0x488   : > { %v2742_v11 = vpop.f32.mrf.mxu2  ;;  %3015 = vmatmul.f32.gmra.mxu0 %v6478_v12  ;;  %v1241_v12 = vld [vmem:[%s7318_s6 + $0x598] sm:$0xff] }
 0x489   : > { %3224 = vmatmul.f32.gmra.mxu1 %v6479_v13  ;;  %v2951_v14 = vpop.f32.mrf.mxu3  ;;  %v2743_v15 = vadd.f32 %v2742_v11, %v2534_v10  ;;  %v6497_v10 = vld [vmem:[#allocation3 + $0x118] sm:$0xff]  ;;  %4247 = vmatpush.msrb.mxu2 %v1241_v12  ;;  %v6516_v12 = vld [vmem:[#allocation3 + $0x1b0] sm:$0xff] }
 0x48a   : > { %v1305_v13 = vld [vmem:[%s7318_s6 + $0x798] sm:$0xff] }
 0x48b   : > { %v2952_v16 = vadd.f32 %v2951_v14, %v2743_v15  ;;  %v6498_v15 = vld [vmem:[#allocation3 + $0x100] sm:$0xff]  ;;  %4456 = vmatpush.msrb.mxu3 %v1305_v13 }
 0x48d   : > { %v5648_v17 = vadd.f32 %v7613_v47, %v2952_v16  ;;  %3436 = vmatmul.f32.gmra.mxu2 %v6480_v18  ;;  %v2327_v19 = vpop.f32.mrf.mxu0  ;;  %v6499_v16 = vld [vmem:[#allocation3 + $0x108] sm:$0xff] }
 0x48e   : > { %v2536_v20 = vpop.f32.mrf.mxu1  ;;  %3645 = vmatmul.f32.gmra.mxu3 %v6481_v21 }
 0x48f   : > { %v2537_v22 = vadd.f32 %v2536_v20, %v2327_v19  ;;  %5904 = vst [vmem:[%s7421_s11 + $0x668] sm:$0xff] %v5648_v17  ;;  %v1113_v19 = vld [vmem:[%s7318_s6 + $0x198] sm:$0xff] }
 0x490   : > { %v2745_v25 = vpop.f32.mrf.mxu2  ;;  %3018 = vmatmul.f32.gmra.mxu0 %v6482_v26  ;;  %v1177_v20 = vld [vmem:[%s7318_s6 + $0x398] sm:$0xff] }
 0x491   : > { %3227 = vmatmul.f32.gmra.mxu1 %v6483_v27  ;;  %v2954_v28 = vpop.f32.mrf.mxu3  ;;  %v2746_v29 = vadd.f32 %v2745_v25, %v2537_v22  ;;  %3829 = vmatpush.msrb.mxu0 %v1113_v19  ;;  %v6501_v26 = vld [vmem:[#allocation3 + $0x138] sm:$0xff]  ;;  %v6519_v19 = vld [vmem:[#allocation3 + $0x1a8] sm:$0xff] }
 0x492   : > { %4038 = vmatpush.msrb.mxu1 %v1177_v20 }
 0x493   : > { %v2955_v32 = vadd.f32 %v2954_v28, %v2746_v29  ;;  %v6502_v29 = vld [vmem:[#allocation3 + $0x120] sm:$0xff] }
 0x495   : > { %v5652_v34 = vadd.f32 %v7613_v47, %v2955_v32  ;;  %3439 = vmatmul.f32.gmra.mxu2 %v6484_v35  ;;  %v2330_v36 = vpop.f32.mrf.mxu0 }
 0x496   : > { %v2539_v37 = vpop.f32.mrf.mxu1  ;;  %3648 = vmatmul.f32.gmra.mxu3 %v6485_v38 }
 0x497   : > { %v2540_v39 = vadd.f32 %v2539_v37, %v2330_v36  ;;  %5908 = vst [vmem:[%s7421_s11 + $0x688] sm:$0xff] %v5652_v34  ;;  %v6504_v36 = vld [vmem:[#allocation3 + $0x150] sm:$0xff] }
 0x498   : > { %v2748_v40 = vpop.f32.mrf.mxu2  ;;  %3021 = vmatmul.f32.gmra.mxu0 %v6486_v41 }
 0x499   : > { %3230 = vmatmul.f32.gmra.mxu1 %v6487_v42  ;;  %v2957_v43 = vpop.f32.mrf.mxu3  ;;  %v2749_v44 = vadd.f32 %v2748_v40, %v2540_v39  ;;  %v6505_v39 = vld [vmem:[#allocation3 + $0x158] sm:$0xff]  ;;  %v6506_v42 = vld [vmem:[#allocation3 + $0x140] sm:$0xff] }
 0x49b   : > { %v2958_v45 = vadd.f32 %v2957_v43, %v2749_v44  ;;  %v6507_v43 = vld [vmem:[#allocation3 + $0x148] sm:$0xff] }
 0x49d   : > { %v5656_v33 = vadd.f32 %v7613_v47, %v2958_v45  ;;  %3442 = vmatmul.f32.gmra.mxu2 %v6488_v46  ;;  %v2333_v48 = vpop.f32.mrf.mxu0 }
 0x49e   : > { %v2542_v49 = vpop.f32.mrf.mxu1  ;;  %3651 = vmatmul.f32.gmra.mxu3 %v6489_v50 }
 0x49f   : > { %v2543_v51 = vadd.f32 %v2542_v49, %v2333_v48  ;;  %5912 = vst [vmem:[%s7421_s11 + $0x6a8] sm:$0xff] %v5656_v33  ;;  %v6508_v48 = vld [vmem:[#allocation3 + $0x170] sm:$0xff] }
 0x4a0   : > { %v2751_v52 = vpop.f32.mrf.mxu2  ;;  %3024 = vmatmul.f32.gmra.mxu0 %v6490_v53 }
 0x4a1   : > { %3233 = vmatmul.f32.gmra.mxu1 %v6491_v54  ;;  %v2960_v55 = vpop.f32.mrf.mxu3  ;;  %v2752_v56 = vadd.f32 %v2751_v52, %v2543_v51  ;;  %v6509_v51 = vld [vmem:[#allocation3 + $0x178] sm:$0xff]  ;;  %v6510_v54 = vld [vmem:[#allocation3 + $0x160] sm:$0xff] }
 0x4a3   : > { %v2961_v57 = vadd.f32 %v2960_v55, %v2752_v56  ;;  %v6511_v55 = vld [vmem:[#allocation3 + $0x168] sm:$0xff] }
 0x4a5   : > { %v5660_v58 = vadd.f32 %v7613_v47, %v2961_v57  ;;  %3445 = vmatmul.f32.gmra.mxu2 %v6492_v59  ;;  %v2336_v60 = vpop.f32.mrf.mxu0 }
 0x4a6   : > { %v2545_v61 = vpop.f32.mrf.mxu1  ;;  %3654 = vmatmul.f32.gmra.mxu3 %v6493_v62 }
 0x4a7   : > { %v2546_v63 = vadd.f32 %v2545_v61, %v2336_v60  ;;  %5916 = vst [vmem:[%s7421_s11 + $0x6c8] sm:$0xff] %v5660_v58  ;;  %v6512_v60 = vld [vmem:[#allocation3 + $0x190] sm:$0xff] }
 0x4a8   : > { %v2754_v0 = vpop.f32.mrf.mxu2  ;;  %3027 = vmatmul.f32.gmra.mxu0 %v6494_v1  ;;  %v1237_v1 = vld [vmem:[%s7318_s6 + $0x578] sm:$0xff] }
 0x4a9   : > { %3236 = vmatmul.f32.gmra.mxu1 %v6495_v2  ;;  %v2963_v3 = vpop.f32.mrf.mxu3  ;;  %v2755_v4 = vadd.f32 %v2754_v0, %v2546_v63  ;;  %v6513_v63 = vld [vmem:[#allocation3 + $0x198] sm:$0xff]  ;;  %4248 = vmatpush.msrb.mxu2 %v1237_v1 }
 0x4aa   : > { %v1301_v2 = vld [vmem:[%s7318_s6 + $0x778] sm:$0xff] }
 0x4ab   : > { %v2964_v5 = vadd.f32 %v2963_v3, %v2755_v4  ;;  %v6514_v4 = vld [vmem:[#allocation3 + $0x180] sm:$0xff]  ;;  %4457 = vmatpush.msrb.mxu3 %v1301_v2  ;;  %v6533_v2 = vld [vmem:[#allocation3 + $0x230] sm:$0xff] }
 0x4ad   : > { %v5664_v6 = vadd.f32 %v7613_v47, %v2964_v5  ;;  %3448 = vmatmul.f32.gmra.mxu2 %v6496_v7  ;;  %v2339_v8 = vpop.f32.mrf.mxu0  ;;  %v6515_v5 = vld [vmem:[#allocation3 + $0x188] sm:$0xff] }
 0x4ae   : > { %v2548_v9 = vpop.f32.mrf.mxu1  ;;  %3657 = vmatmul.f32.gmra.mxu3 %v6497_v10 }
 0x4af   : > { %v2549_v11 = vadd.f32 %v2548_v9, %v2339_v8  ;;  %5920 = vst [vmem:[%s7421_s11 + $0x6e8] sm:$0xff] %v5664_v6  ;;  %v1109_v8 = vld [vmem:[%s7318_s6 + $0x178] sm:$0xff] }
 0x4b0   : > { %v2757_v14 = vpop.f32.mrf.mxu2  ;;  %3030 = vmatmul.f32.gmra.mxu0 %v6498_v15  ;;  %v1173_v9 = vld [vmem:[%s7318_s6 + $0x378] sm:$0xff] }
 0x4b1   : > { %3239 = vmatmul.f32.gmra.mxu1 %v6499_v16  ;;  %v2966_v17 = vpop.f32.mrf.mxu3  ;;  %v2758_v18 = vadd.f32 %v2757_v14, %v2549_v11  ;;  %3830 = vmatpush.msrb.mxu0 %v1109_v8  ;;  %v6517_v15 = vld [vmem:[#allocation3 + $0x1b8] sm:$0xff]  ;;  %v6535_v8 = vld [vmem:[#allocation3 + $0x220] sm:$0xff] }
 0x4b2   : > { %4039 = vmatpush.msrb.mxu1 %v1173_v9  ;;  %v6536_v9 = vld [vmem:[#allocation3 + $0x228] sm:$0xff] }
 0x4b3   : > { %v2967_v21 = vadd.f32 %v2966_v17, %v2758_v18  ;;  %v6518_v18 = vld [vmem:[#allocation3 + $0x1a0] sm:$0xff] }
 0x4b5   : > { %v5668_v22 = vadd.f32 %v7613_v47, %v2967_v21  ;;  %3451 = vmatmul.f32.gmra.mxu2 %v6500_v23  ;;  %v2342_v24 = vpop.f32.mrf.mxu0 }
 0x4b6   : > { %v2551_v25 = vpop.f32.mrf.mxu1  ;;  %3660 = vmatmul.f32.gmra.mxu3 %v6501_v26 }
 0x4b7   : > { %v2552_v27 = vadd.f32 %v2551_v25, %v2342_v24  ;;  %5924 = vst [vmem:[%s7421_s11 + $0x708] sm:$0xff] %v5668_v22  ;;  %v6520_v24 = vld [vmem:[#allocation3 + $0x1d0] sm:$0xff] }
 0x4b8   : > { %v2760_v28 = vpop.f32.mrf.mxu2  ;;  %3033 = vmatmul.f32.gmra.mxu0 %v6502_v29 }
 0x4b9   : > { %3242 = vmatmul.f32.gmra.mxu1 %v6503_v30  ;;  %v2969_v31 = vpop.f32.mrf.mxu3  ;;  %v2761_v32 = vadd.f32 %v2760_v28, %v2552_v27  ;;  %v6521_v27 = vld [vmem:[#allocation3 + $0x1d8] sm:$0xff]  ;;  %v6522_v30 = vld [vmem:[#allocation3 + $0x1c0] sm:$0xff] }
 0x4bb   : > { %v2970_v34 = vadd.f32 %v2969_v31, %v2761_v32  ;;  %v6523_v31 = vld [vmem:[#allocation3 + $0x1c8] sm:$0xff] }
 0x4bd   : > { %v5672_v35 = vadd.f32 %v7613_v47, %v2970_v34  ;;  %3454 = vmatmul.f32.gmra.mxu2 %v6504_v36  ;;  %v2345_v37 = vpop.f32.mrf.mxu0 }
 0x4be   : > { %v2554_v38 = vpop.f32.mrf.mxu1  ;;  %3663 = vmatmul.f32.gmra.mxu3 %v6505_v39 }
 0x4bf   : > { %v2555_v40 = vadd.f32 %v2554_v38, %v2345_v37  ;;  %5928 = vst [vmem:[%s7421_s11 + $0x728] sm:$0xff] %v5672_v35  ;;  %v6524_v37 = vld [vmem:[#allocation3 + $0x1f0] sm:$0xff] }
 0x4c0   : > { %v2763_v41 = vpop.f32.mrf.mxu2  ;;  %3036 = vmatmul.f32.gmra.mxu0 %v6506_v42 }
 0x4c1   : > { %3245 = vmatmul.f32.gmra.mxu1 %v6507_v43  ;;  %v2972_v44 = vpop.f32.mrf.mxu3  ;;  %v2764_v45 = vadd.f32 %v2763_v41, %v2555_v40  ;;  %v6525_v40 = vld [vmem:[#allocation3 + $0x1f8] sm:$0xff]  ;;  %v6526_v43 = vld [vmem:[#allocation3 + $0x1e0] sm:$0xff] }
 0x4c3   : > { %v2973_v33 = vadd.f32 %v2972_v44, %v2764_v45  ;;  %v6527_v44 = vld [vmem:[#allocation3 + $0x1e8] sm:$0xff] }
 0x4c5   : > { %v5676_v46 = vadd.f32 %v7613_v47, %v2973_v33  ;;  %3457 = vmatmul.f32.gmra.mxu2 %v6508_v48  ;;  %v2348_v49 = vpop.f32.mrf.mxu0 }
 0x4c6   : > { %v2557_v50 = vpop.f32.mrf.mxu1  ;;  %3666 = vmatmul.f32.gmra.mxu3 %v6509_v51 }
 0x4c7   : > { %v2558_v52 = vadd.f32 %v2557_v50, %v2348_v49  ;;  %5932 = vst [vmem:[%s7421_s11 + $0x748] sm:$0xff] %v5676_v46  ;;  %v6528_v49 = vld [vmem:[#allocation3 + $0x210] sm:$0xff] }
 0x4c8   : > { %v2766_v53 = vpop.f32.mrf.mxu2  ;;  %3039 = vmatmul.f32.gmra.mxu0 %v6510_v54  ;;  %v1233_v54 = vld [vmem:[%s7318_s6 + $0x558] sm:$0xff] }
 0x4c9   : > { %3248 = vmatmul.f32.gmra.mxu1 %v6511_v55  ;;  %v2975_v56 = vpop.f32.mrf.mxu3  ;;  %v2767_v57 = vadd.f32 %v2766_v53, %v2558_v52  ;;  %v6529_v52 = vld [vmem:[#allocation3 + $0x218] sm:$0xff]  ;;  %4249 = vmatpush.msrb.mxu2 %v1233_v54 }
 0x4ca   : > { %v1297_v55 = vld [vmem:[%s7318_s6 + $0x758] sm:$0xff] }
 0x4cb   : > { %v2976_v58 = vadd.f32 %v2975_v56, %v2767_v57  ;;  %v6530_v57 = vld [vmem:[#allocation3 + $0x200] sm:$0xff]  ;;  %4458 = vmatpush.msrb.mxu3 %v1297_v55  ;;  %v6549_v55 = vld [vmem:[#allocation3 + $0x2b0] sm:$0xff] }
 0x4cd   : > { %v5680_v59 = vadd.f32 %v7613_v47, %v2976_v58  ;;  %3460 = vmatmul.f32.gmra.mxu2 %v6512_v60  ;;  %v2351_v61 = vpop.f32.mrf.mxu0  ;;  %v6531_v58 = vld [vmem:[#allocation3 + $0x208] sm:$0xff]  ;;  %v6532_v60 = vld [vmem:[%s7409_s10] sm:$0xf] }
 0x4ce   : > { %v2560_v62 = vpop.f32.mrf.mxu1  ;;  %3669 = vmatmul.f32.gmra.mxu3 %v6513_v63  ;;  %v1169_v63 = vld [vmem:[%s7318_s6 + $0x358] sm:$0xff] }
 0x4cf   : > { %v2561_v0 = vadd.f32 %v2560_v62, %v2351_v61  ;;  %5936 = vst [vmem:[%s7421_s11 + $0x768] sm:$0xff] %v5680_v59  ;;  %v7808_v61 = vperm.slane %v6532_v60, 2  ;;  %v1105_v62 = vld [vmem:[%s7318_s6 + $0x158] sm:$0xff]  ;;  %4040 = vmatpush.msrb.mxu1 %v1169_v63  ;;  %v6551_v60 = vld [vmem:[#allocation3 + $0x2a0] sm:$0xff] }
 0x4d0   : > { %v2769_v3 = vpop.f32.mrf.mxu2  ;;  %3042 = vmatmul.f32.gmra.mxu0 %v6514_v4 }
 0x4d1   : > { %3251 = vmatmul.f32.gmra.mxu1 %v6515_v5  ;;  %v2978_v6 = vpop.f32.mrf.mxu3  ;;  %v2770_v7 = vadd.f32 %v2769_v3, %v2561_v0  ;;  %3831 = vmatpush.msrb.mxu0 %v1105_v62  ;;  %v6534_v5 = vld [vmem:[#allocation3 + $0x238] sm:$0xff]  ;;  %v6552_v62 = vld [vmem:[#allocation3 + $0x2a8] sm:$0xff] }
 0x4d3   : > { %v2979_v10 = vadd.f32 %v2978_v6, %v2770_v7 }
 0x4d5   : > { %v5684_v11 = vadd.f32 %v7613_v47, %v2979_v10  ;;  %3463 = vmatmul.f32.gmra.mxu2 %v6516_v12  ;;  %v2354_v13 = vpop.f32.mrf.mxu0 }
 0x4d6   : > { %v2563_v14 = vpop.f32.mrf.mxu1  ;;  %3672 = vmatmul.f32.gmra.mxu3 %v6517_v15 }
 0x4d7   : > { %v2564_v16 = vadd.f32 %v2563_v14, %v2354_v13  ;;  %5940 = vst [vmem:[%s7421_s11 + $0x788] sm:$0xff] %v5684_v11  ;;  %v6537_v14 = vld [vmem:[#allocation3 + $0x250] sm:$0xff] }
 0x4d8   : > { %v2772_v17 = vpop.f32.mrf.mxu2  ;;  %3045 = vmatmul.f32.gmra.mxu0 %v6518_v18 }
 0x4d9   : > { %3254 = vmatmul.f32.gmra.mxu1 %v6519_v19  ;;  %v2981_v20 = vpop.f32.mrf.mxu3  ;;  %v2773_v21 = vadd.f32 %v2772_v17, %v2564_v16  ;;  %v6538_v17 = vld [vmem:[#allocation3 + $0x258] sm:$0xff] }
 0x4db   : > { %v2982_v22 = vadd.f32 %v2981_v20, %v2773_v21  ;;  %v6539_v20 = vld [vmem:[#allocation3 + $0x240] sm:$0xff]  ;;  %v6540_v21 = vld [vmem:[#allocation3 + $0x248] sm:$0xff] }
 0x4dd   : > { %v5688_v23 = vadd.f32 %v7613_v47, %v2982_v22  ;;  %3466 = vmatmul.f32.gmra.mxu2 %v6520_v24  ;;  %v2357_v25 = vpop.f32.mrf.mxu0 }
 0x4de   : > { %v2566_v26 = vpop.f32.mrf.mxu1  ;;  %3675 = vmatmul.f32.gmra.mxu3 %v6521_v27 }
 0x4df   : > { %v2567_v28 = vadd.f32 %v2566_v26, %v2357_v25  ;;  %5944 = vst [vmem:[%s7421_s11 + $0x7a8] sm:$0xff] %v5688_v23  ;;  %v6541_v26 = vld [vmem:[#allocation3 + $0x270] sm:$0xff] }
 0x4e0   : > { %v2775_v29 = vpop.f32.mrf.mxu2  ;;  %3048 = vmatmul.f32.gmra.mxu0 %v6522_v30 }
 0x4e1   : > { %3257 = vmatmul.f32.gmra.mxu1 %v6523_v31  ;;  %v2984_v32 = vpop.f32.mrf.mxu3  ;;  %v2776_v34 = vadd.f32 %v2775_v29, %v2567_v28  ;;  %v6542_v29 = vld [vmem:[#allocation3 + $0x278] sm:$0xff] }
 0x4e3   : > { %v2985_v35 = vadd.f32 %v2984_v32, %v2776_v34  ;;  %v6543_v32 = vld [vmem:[#allocation3 + $0x260] sm:$0xff]  ;;  %v6544_v34 = vld [vmem:[#allocation3 + $0x268] sm:$0xff] }
 0x4e5   : > { %v5692_v36 = vadd.f32 %v7613_v47, %v2985_v35  ;;  %3469 = vmatmul.f32.gmra.mxu2 %v6524_v37  ;;  %v2360_v38 = vpop.f32.mrf.mxu0 }
 0x4e6   : > { %v2569_v39 = vpop.f32.mrf.mxu1  ;;  %3678 = vmatmul.f32.gmra.mxu3 %v6525_v40 }
 0x4e7   : > { %v2570_v41 = vadd.f32 %v2569_v39, %v2360_v38  ;;  %5948 = vst [vmem:[%s7421_s11 + $0x7c8] sm:$0xff] %v5692_v36  ;;  %v6545_v39 = vld [vmem:[#allocation3 + $0x290] sm:$0xff] }
 0x4e8   : > { %v2778_v42 = vpop.f32.mrf.mxu2  ;;  %3051 = vmatmul.f32.gmra.mxu0 %v6526_v43 }
 0x4e9   : > { %3260 = vmatmul.f32.gmra.mxu1 %v6527_v44  ;;  %v2987_v45 = vpop.f32.mrf.mxu3  ;;  %v2779_v33 = vadd.f32 %v2778_v42, %v2570_v41  ;;  %v6546_v42 = vld [vmem:[#allocation3 + $0x298] sm:$0xff] }
 0x4ea   : > { %v1229_v44 = vld [vmem:[%s7318_s6 + $0x538] sm:$0xff] }
 0x4eb   : > { %v2988_v46 = vadd.f32 %v2987_v45, %v2779_v33  ;;  %v1293_v45 = vld [vmem:[%s7318_s6 + $0x738] sm:$0xff]  ;;  %4250 = vmatpush.msrb.mxu2 %v1229_v44  ;;  %v6565_v44 = vld [vmem:[#allocation3 + $0x330] sm:$0xff] }
 0x4ec   : > { %4459 = vmatpush.msrb.mxu3 %v1293_v45 }
 0x4ed   : > { %v5696_v48 = vadd.f32 %v7613_v47, %v2988_v46  ;;  %3472 = vmatmul.f32.gmra.mxu2 %v6528_v49  ;;  %v3007_v50 = vpop.f32.mrf.mxu0  ;;  %v6547_v46 = vld [vmem:[#allocation3 + $0x280] sm:$0xff] }
 0x4ee   : > { %v3216_v51 = vpop.f32.mrf.mxu1  ;;  %3681 = vmatmul.f32.gmra.mxu3 %v6529_v52  ;;  %v1165_v52 = vld [vmem:[%s7318_s6 + $0x338] sm:$0xff] }
 0x4ef   : > { %v3217_v53 = vadd.f32 %v3216_v51, %v3007_v50  ;;  %5952 = vst [vmem:[%s7421_s11 + $0x7e8] sm:$0xff] %v5696_v48  ;;  %v6548_v48 = vld [vmem:[#allocation3 + $0x288] sm:$0xff]  ;;  %v1101_v51 = vld [vmem:[%s7318_s6 + $0x138] sm:$0xff]  ;;  %4041 = vmatpush.msrb.mxu1 %v1165_v52 }
 0x4f0   : > { %v3425_v56 = vpop.f32.mrf.mxu2  ;;  %3054 = vmatmul.f32.gmra.mxu0 %v6530_v57 }
 0x4f1   : > { %3263 = vmatmul.f32.gmra.mxu1 %v6531_v58  ;;  %v3634_v59 = vpop.f32.mrf.mxu3  ;;  %v3426_v47 = vadd.f32 %v3425_v56, %v3217_v53  ;;  %3832 = vmatpush.msrb.mxu0 %v1101_v51  ;;  %v6550_v58 = vld [vmem:[#allocation3 + $0x2b8] sm:$0xff]  ;;  %v6568_v51 = vld [vmem:[#allocation3 + $0x328] sm:$0xff] }
 0x4f3   : > { %v3635_v0 = vadd.f32 %v3634_v59, %v3426_v47 }
 0x4f5   : > { %v5445_v1 = vadd.f32 %v7808_v61, %v3635_v0  ;;  %3475 = vmatmul.f32.gmra.mxu2 %v6533_v2  ;;  %v3010_v3 = vpop.f32.mrf.mxu0 }
 0x4f6   : > { %v3219_v4 = vpop.f32.mrf.mxu1  ;;  %3684 = vmatmul.f32.gmra.mxu3 %v6534_v5 }
 0x4f7   : > { %v3220_v6 = vadd.f32 %v3219_v4, %v3010_v3  ;;  %5701 = vst [vmem:[%s7421_s11 + $0x10] sm:$0xff] %v5445_v1  ;;  %v6553_v3 = vld [vmem:[#allocation3 + $0x2d0] sm:$0xff] }
 0x4f8   : > { %v3428_v7 = vpop.f32.mrf.mxu2  ;;  %3057 = vmatmul.f32.gmra.mxu0 %v6535_v8 }
 0x4f9   : > { %3266 = vmatmul.f32.gmra.mxu1 %v6536_v9  ;;  %v3637_v10 = vpop.f32.mrf.mxu3  ;;  %v3429_v11 = vadd.f32 %v3428_v7, %v3220_v6  ;;  %v6554_v6 = vld [vmem:[#allocation3 + $0x2d8] sm:$0xff]  ;;  %v6555_v9 = vld [vmem:[#allocation3 + $0x2c0] sm:$0xff] }
 0x4fb   : > { %v3638_v12 = vadd.f32 %v3637_v10, %v3429_v11  ;;  %v6556_v10 = vld [vmem:[#allocation3 + $0x2c8] sm:$0xff] }
 0x4fd   : > { %v5449_v13 = vadd.f32 %v7808_v61, %v3638_v12  ;;  %3478 = vmatmul.f32.gmra.mxu2 %v6537_v14  ;;  %v3013_v15 = vpop.f32.mrf.mxu0 }
 0x4fe   : > { %v3222_v16 = vpop.f32.mrf.mxu1  ;;  %3687 = vmatmul.f32.gmra.mxu3 %v6538_v17 }
 0x4ff   : > { %v3223_v18 = vadd.f32 %v3222_v16, %v3013_v15  ;;  %5705 = vst [vmem:[%s7421_s11 + $0x30] sm:$0xff] %v5449_v13  ;;  %v6557_v15 = vld [vmem:[#allocation3 + $0x2f0] sm:$0xff] }
 0x500   : > { %v3431_v19 = vpop.f32.mrf.mxu2  ;;  %3060 = vmatmul.f32.gmra.mxu0 %v6539_v20 }
 0x501   : > { %3269 = vmatmul.f32.gmra.mxu1 %v6540_v21  ;;  %v3640_v22 = vpop.f32.mrf.mxu3  ;;  %v3432_v23 = vadd.f32 %v3431_v19, %v3223_v18  ;;  %v6558_v18 = vld [vmem:[#allocation3 + $0x2f8] sm:$0xff]  ;;  %v6559_v21 = vld [vmem:[#allocation3 + $0x2e0] sm:$0xff] }
 0x503   : > { %v3641_v24 = vadd.f32 %v3640_v22, %v3432_v23  ;;  %v6560_v22 = vld [vmem:[#allocation3 + $0x2e8] sm:$0xff] }
 0x505   : > { %v5453_v25 = vadd.f32 %v7808_v61, %v3641_v24  ;;  %3481 = vmatmul.f32.gmra.mxu2 %v6541_v26  ;;  %v3016_v27 = vpop.f32.mrf.mxu0 }
 0x506   : > { %v3225_v28 = vpop.f32.mrf.mxu1  ;;  %3690 = vmatmul.f32.gmra.mxu3 %v6542_v29 }
 0x507   : > { %v3226_v30 = vadd.f32 %v3225_v28, %v3016_v27  ;;  %5709 = vst [vmem:[%s7421_s11 + $0x50] sm:$0xff] %v5453_v25  ;;  %v6561_v27 = vld [vmem:[#allocation3 + $0x310] sm:$0xff] }
 0x508   : > { %v3434_v31 = vpop.f32.mrf.mxu2  ;;  %3063 = vmatmul.f32.gmra.mxu0 %v6543_v32  ;;  %v1225_v32 = vld [vmem:[%s7318_s6 + $0x518] sm:$0xff] }
 0x509   : > { %3272 = vmatmul.f32.gmra.mxu1 %v6544_v34  ;;  %v3643_v35 = vpop.f32.mrf.mxu3  ;;  %v3435_v36 = vadd.f32 %v3434_v31, %v3226_v30  ;;  %v6562_v30 = vld [vmem:[#allocation3 + $0x318] sm:$0xff]  ;;  %4251 = vmatpush.msrb.mxu2 %v1225_v32  ;;  %v6581_v32 = vld [vmem:[#allocation3 + $0x3b0] sm:$0xff] }
 0x50a   : > { %v1289_v34 = vld [vmem:[%s7318_s6 + $0x718] sm:$0xff] }
 0x50b   : > { %v3644_v37 = vadd.f32 %v3643_v35, %v3435_v36  ;;  %v6563_v36 = vld [vmem:[#allocation3 + $0x300] sm:$0xff]  ;;  %4460 = vmatpush.msrb.mxu3 %v1289_v34 }
 0x50d   : > { %v5457_v38 = vadd.f32 %v7808_v61, %v3644_v37  ;;  %3484 = vmatmul.f32.gmra.mxu2 %v6545_v39  ;;  %v3019_v40 = vpop.f32.mrf.mxu0  ;;  %v6564_v37 = vld [vmem:[#allocation3 + $0x308] sm:$0xff] }
 0x50e   : > { %v3228_v41 = vpop.f32.mrf.mxu1  ;;  %3693 = vmatmul.f32.gmra.mxu3 %v6546_v42 }
 0x50f   : > { %v3229_v43 = vadd.f32 %v3228_v41, %v3019_v40  ;;  %5713 = vst [vmem:[%s7421_s11 + $0x70] sm:$0xff] %v5457_v38  ;;  %v1097_v40 = vld [vmem:[%s7318_s6 + $0x118] sm:$0xff] }
 0x510   : > { %v3437_v33 = vpop.f32.mrf.mxu2  ;;  %3066 = vmatmul.f32.gmra.mxu0 %v6547_v46  ;;  %v1161_v41 = vld [vmem:[%s7318_s6 + $0x318] sm:$0xff] }
 0x511   : > { %3275 = vmatmul.f32.gmra.mxu1 %v6548_v48  ;;  %v3646_v49 = vpop.f32.mrf.mxu3  ;;  %v3438_v50 = vadd.f32 %v3437_v33, %v3229_v43  ;;  %3833 = vmatpush.msrb.mxu0 %v1097_v40  ;;  %v6566_v46 = vld [vmem:[#allocation3 + $0x338] sm:$0xff]  ;;  %v6584_v40 = vld [vmem:[#allocation3 + $0x3a8] sm:$0xff] }
 0x512   : > { %4042 = vmatpush.msrb.mxu1 %v1161_v41 }
 0x513   : > { %v3647_v53 = vadd.f32 %v3646_v49, %v3438_v50  ;;  %v6567_v50 = vld [vmem:[#allocation3 + $0x320] sm:$0xff] }
 0x515   : > { %v5461_v54 = vadd.f32 %v7808_v61, %v3647_v53  ;;  %3487 = vmatmul.f32.gmra.mxu2 %v6549_v55  ;;  %v3022_v56 = vpop.f32.mrf.mxu0 }
 0x516   : > { %v3231_v57 = vpop.f32.mrf.mxu1  ;;  %3696 = vmatmul.f32.gmra.mxu3 %v6550_v58 }
 0x517   : > { %v3232_v59 = vadd.f32 %v3231_v57, %v3022_v56  ;;  %5717 = vst [vmem:[%s7421_s11 + $0x90] sm:$0xff] %v5461_v54  ;;  %v6569_v56 = vld [vmem:[#allocation3 + $0x350] sm:$0xff] }
 0x518   : > { %v3440_v47 = vpop.f32.mrf.mxu2  ;;  %3069 = vmatmul.f32.gmra.mxu0 %v6551_v60 }
 0x519   : > { %3278 = vmatmul.f32.gmra.mxu1 %v6552_v62  ;;  %v3649_v63 = vpop.f32.mrf.mxu3  ;;  %v3441_v0 = vadd.f32 %v3440_v47, %v3232_v59  ;;  %v6570_v59 = vld [vmem:[#allocation3 + $0x358] sm:$0xff]  ;;  %v6571_v62 = vld [vmem:[#allocation3 + $0x340] sm:$0xff] }
 0x51b   : > { %v3650_v1 = vadd.f32 %v3649_v63, %v3441_v0  ;;  %v6572_v63 = vld [vmem:[#allocation3 + $0x348] sm:$0xff] }
 0x51d   : > { %v5465_v2 = vadd.f32 %v7808_v61, %v3650_v1  ;;  %3490 = vmatmul.f32.gmra.mxu2 %v6553_v3  ;;  %v3025_v4 = vpop.f32.mrf.mxu0 }
 0x51e   : > { %v3234_v5 = vpop.f32.mrf.mxu1  ;;  %3699 = vmatmul.f32.gmra.mxu3 %v6554_v6 }
 0x51f   : > { %v3235_v7 = vadd.f32 %v3234_v5, %v3025_v4  ;;  %5721 = vst [vmem:[%s7421_s11 + $0xb0] sm:$0xff] %v5465_v2  ;;  %v6573_v4 = vld [vmem:[#allocation3 + $0x370] sm:$0xff] }
 0x520   : > { %v3443_v8 = vpop.f32.mrf.mxu2  ;;  %3072 = vmatmul.f32.gmra.mxu0 %v6555_v9 }
 0x521   : > { %3281 = vmatmul.f32.gmra.mxu1 %v6556_v10  ;;  %v3652_v11 = vpop.f32.mrf.mxu3  ;;  %v3444_v12 = vadd.f32 %v3443_v8, %v3235_v7  ;;  %v6574_v7 = vld [vmem:[#allocation3 + $0x378] sm:$0xff]  ;;  %v6575_v10 = vld [vmem:[#allocation3 + $0x360] sm:$0xff] }
 0x523   : > { %v3653_v13 = vadd.f32 %v3652_v11, %v3444_v12  ;;  %v6576_v11 = vld [vmem:[#allocation3 + $0x368] sm:$0xff] }
 0x525   : > { %v5469_v14 = vadd.f32 %v7808_v61, %v3653_v13  ;;  %3493 = vmatmul.f32.gmra.mxu2 %v6557_v15  ;;  %v3028_v16 = vpop.f32.mrf.mxu0 }
 0x526   : > { %v3237_v17 = vpop.f32.mrf.mxu1  ;;  %3702 = vmatmul.f32.gmra.mxu3 %v6558_v18 }
 0x527   : > { %v3238_v19 = vadd.f32 %v3237_v17, %v3028_v16  ;;  %5725 = vst [vmem:[%s7421_s11 + $0xd0] sm:$0xff] %v5469_v14  ;;  %v6577_v16 = vld [vmem:[#allocation3 + $0x390] sm:$0xff] }
 0x528   : > { %v3446_v20 = vpop.f32.mrf.mxu2  ;;  %3075 = vmatmul.f32.gmra.mxu0 %v6559_v21  ;;  %v1221_v21 = vld [vmem:[%s7318_s6 + $0x4f8] sm:$0xff] }
 0x529   : > { %3284 = vmatmul.f32.gmra.mxu1 %v6560_v22  ;;  %v3655_v23 = vpop.f32.mrf.mxu3  ;;  %v3447_v24 = vadd.f32 %v3446_v20, %v3238_v19  ;;  %v6578_v19 = vld [vmem:[#allocation3 + $0x398] sm:$0xff]  ;;  %4252 = vmatpush.msrb.mxu2 %v1221_v21  ;;  %v6597_v21 = vld [vmem:[#allocation3 + $0x430] sm:$0xff] }
 0x52a   : > { %v1285_v22 = vld [vmem:[%s7318_s6 + $0x6f8] sm:$0xff] }
 0x52b   : > { %v3656_v25 = vadd.f32 %v3655_v23, %v3447_v24  ;;  %v6579_v24 = vld [vmem:[#allocation3 + $0x380] sm:$0xff]  ;;  %4461 = vmatpush.msrb.mxu3 %v1285_v22 }
 0x52d   : > { %v5473_v26 = vadd.f32 %v7808_v61, %v3656_v25  ;;  %3496 = vmatmul.f32.gmra.mxu2 %v6561_v27  ;;  %v3031_v28 = vpop.f32.mrf.mxu0  ;;  %v6580_v25 = vld [vmem:[#allocation3 + $0x388] sm:$0xff] }
 0x52e   : > { %v3240_v29 = vpop.f32.mrf.mxu1  ;;  %3705 = vmatmul.f32.gmra.mxu3 %v6562_v30 }
 0x52f   : > { %v3241_v31 = vadd.f32 %v3240_v29, %v3031_v28  ;;  %5729 = vst [vmem:[%s7421_s11 + $0xf0] sm:$0xff] %v5473_v26  ;;  %v1093_v28 = vld [vmem:[%s7318_s6 + $0xf8] sm:$0xff] }
 0x530   : > { %v3449_v35 = vpop.f32.mrf.mxu2  ;;  %3078 = vmatmul.f32.gmra.mxu0 %v6563_v36  ;;  %v1157_v29 = vld [vmem:[%s7318_s6 + $0x2f8] sm:$0xff] }
 0x531   : > { %3287 = vmatmul.f32.gmra.mxu1 %v6564_v37  ;;  %v3658_v38 = vpop.f32.mrf.mxu3  ;;  %v3450_v39 = vadd.f32 %v3449_v35, %v3241_v31  ;;  %3834 = vmatpush.msrb.mxu0 %v1093_v28  ;;  %v6582_v36 = vld [vmem:[#allocation3 + $0x3b8] sm:$0xff]  ;;  %v6600_v28 = vld [vmem:[#allocation3 + $0x428] sm:$0xff] }
 0x532   : > { %4043 = vmatpush.msrb.mxu1 %v1157_v29 }
 0x533   : > { %v3659_v42 = vadd.f32 %v3658_v38, %v3450_v39  ;;  %v6583_v39 = vld [vmem:[#allocation3 + $0x3a0] sm:$0xff] }
 0x535   : > { %v5477_v43 = vadd.f32 %v7808_v61, %v3659_v42  ;;  %3499 = vmatmul.f32.gmra.mxu2 %v6565_v44  ;;  %v3034_v45 = vpop.f32.mrf.mxu0 }
 0x536   : > { %v3243_v33 = vpop.f32.mrf.mxu1  ;;  %3708 = vmatmul.f32.gmra.mxu3 %v6566_v46 }
 0x537   : > { %v3244_v48 = vadd.f32 %v3243_v33, %v3034_v45  ;;  %5733 = vst [vmem:[%s7421_s11 + $0x110] sm:$0xff] %v5477_v43  ;;  %v6585_v45 = vld [vmem:[#allocation3 + $0x3d0] sm:$0xff] }
 0x538   : > { %v3452_v49 = vpop.f32.mrf.mxu2  ;;  %3081 = vmatmul.f32.gmra.mxu0 %v6567_v50 }
 0x539   : > { %3290 = vmatmul.f32.gmra.mxu1 %v6568_v51  ;;  %v3661_v52 = vpop.f32.mrf.mxu3  ;;  %v3453_v53 = vadd.f32 %v3452_v49, %v3244_v48  ;;  %v6586_v48 = vld [vmem:[#allocation3 + $0x3d8] sm:$0xff]  ;;  %v6587_v51 = vld [vmem:[#allocation3 + $0x3c0] sm:$0xff] }
 0x53b   : > { %v3662_v54 = vadd.f32 %v3661_v52, %v3453_v53  ;;  %v6588_v52 = vld [vmem:[#allocation3 + $0x3c8] sm:$0xff] }
 0x53d   : > { %v5481_v55 = vadd.f32 %v7808_v61, %v3662_v54  ;;  %3502 = vmatmul.f32.gmra.mxu2 %v6569_v56  ;;  %v3037_v57 = vpop.f32.mrf.mxu0 }
 0x53e   : > { %v3246_v58 = vpop.f32.mrf.mxu1  ;;  %3711 = vmatmul.f32.gmra.mxu3 %v6570_v59 }
 0x53f   : > { %v3247_v47 = vadd.f32 %v3246_v58, %v3037_v57  ;;  %5737 = vst [vmem:[%s7421_s11 + $0x130] sm:$0xff] %v5481_v55  ;;  %v6589_v57 = vld [vmem:[#allocation3 + $0x3f0] sm:$0xff] }
 0x540   : > { %v3455_v60 = vpop.f32.mrf.mxu2  ;;  %3084 = vmatmul.f32.gmra.mxu0 %v6571_v62 }
 0x541   : > { %3293 = vmatmul.f32.gmra.mxu1 %v6572_v63  ;;  %v3664_v0 = vpop.f32.mrf.mxu3  ;;  %v3456_v1 = vadd.f32 %v3455_v60, %v3247_v47  ;;  %v6590_v47 = vld [vmem:[#allocation3 + $0x3f8] sm:$0xff]  ;;  %v6591_v63 = vld [vmem:[#allocation3 + $0x3e0] sm:$0xff] }
 0x543   : > { %v3665_v2 = vadd.f32 %v3664_v0, %v3456_v1  ;;  %v6592_v0 = vld [vmem:[#allocation3 + $0x3e8] sm:$0xff] }
 0x545   : > { %v5485_v3 = vadd.f32 %v7808_v61, %v3665_v2  ;;  %3505 = vmatmul.f32.gmra.mxu2 %v6573_v4  ;;  %v3040_v5 = vpop.f32.mrf.mxu0 }
 0x546   : > { %v3249_v6 = vpop.f32.mrf.mxu1  ;;  %3714 = vmatmul.f32.gmra.mxu3 %v6574_v7 }
 0x547   : > { %v3250_v8 = vadd.f32 %v3249_v6, %v3040_v5  ;;  %5741 = vst [vmem:[%s7421_s11 + $0x150] sm:$0xff] %v5485_v3  ;;  %v6593_v5 = vld [vmem:[#allocation3 + $0x410] sm:$0xff] }
 0x548   : > { %v3458_v9 = vpop.f32.mrf.mxu2  ;;  %3087 = vmatmul.f32.gmra.mxu0 %v6575_v10  ;;  %v1217_v10 = vld [vmem:[%s7318_s6 + $0x4d8] sm:$0xff] }
 0x549   : > { %3296 = vmatmul.f32.gmra.mxu1 %v6576_v11  ;;  %v3667_v12 = vpop.f32.mrf.mxu3  ;;  %v3459_v13 = vadd.f32 %v3458_v9, %v3250_v8  ;;  %v6594_v8 = vld [vmem:[#allocation3 + $0x418] sm:$0xff]  ;;  %4253 = vmatpush.msrb.mxu2 %v1217_v10  ;;  %v6613_v10 = vld [vmem:[#allocation3 + $0x4b0] sm:$0xff] }
 0x54a   : > { %v1281_v11 = vld [vmem:[%s7318_s6 + $0x6d8] sm:$0xff] }
 0x54b   : > { %v3668_v14 = vadd.f32 %v3667_v12, %v3459_v13  ;;  %v6595_v13 = vld [vmem:[#allocation3 + $0x400] sm:$0xff]  ;;  %4462 = vmatpush.msrb.mxu3 %v1281_v11 }
 0x54d   : > { %v5489_v15 = vadd.f32 %v7808_v61, %v3668_v14  ;;  %3508 = vmatmul.f32.gmra.mxu2 %v6577_v16  ;;  %v3043_v17 = vpop.f32.mrf.mxu0  ;;  %v6596_v14 = vld [vmem:[#allocation3 + $0x408] sm:$0xff] }
 0x54e   : > { %v3252_v18 = vpop.f32.mrf.mxu1  ;;  %3717 = vmatmul.f32.gmra.mxu3 %v6578_v19 }
 0x54f   : > { %v3253_v20 = vadd.f32 %v3252_v18, %v3043_v17  ;;  %5745 = vst [vmem:[%s7421_s11 + $0x170] sm:$0xff] %v5489_v15  ;;  %v1089_v17 = vld [vmem:[%s7318_s6 + $0xd8] sm:$0xff] }
 0x550   : > { %v3461_v23 = vpop.f32.mrf.mxu2  ;;  %3090 = vmatmul.f32.gmra.mxu0 %v6579_v24  ;;  %v1153_v18 = vld [vmem:[%s7318_s6 + $0x2d8] sm:$0xff] }
 0x551   : > { %3299 = vmatmul.f32.gmra.mxu1 %v6580_v25  ;;  %v3670_v26 = vpop.f32.mrf.mxu3  ;;  %v3462_v27 = vadd.f32 %v3461_v23, %v3253_v20  ;;  %3835 = vmatpush.msrb.mxu0 %v1089_v17  ;;  %v6598_v24 = vld [vmem:[#allocation3 + $0x438] sm:$0xff]  ;;  %v6616_v17 = vld [vmem:[#allocation3 + $0x4a8] sm:$0xff] }
 0x552   : > { %4044 = vmatpush.msrb.mxu1 %v1153_v18 }
 0x553   : > { %v3671_v30 = vadd.f32 %v3670_v26, %v3462_v27  ;;  %v6599_v27 = vld [vmem:[#allocation3 + $0x420] sm:$0xff] }
 0x555   : > { %v5493_v31 = vadd.f32 %v7808_v61, %v3671_v30  ;;  %3511 = vmatmul.f32.gmra.mxu2 %v6581_v32  ;;  %v3046_v34 = vpop.f32.mrf.mxu0 }
 0x556   : > { %v3255_v35 = vpop.f32.mrf.mxu1  ;;  %3720 = vmatmul.f32.gmra.mxu3 %v6582_v36 }
 0x557   : > { %v3256_v37 = vadd.f32 %v3255_v35, %v3046_v34  ;;  %5749 = vst [vmem:[%s7421_s11 + $0x190] sm:$0xff] %v5493_v31  ;;  %v6601_v34 = vld [vmem:[#allocation3 + $0x450] sm:$0xff] }
 0x558   : > { %v3464_v38 = vpop.f32.mrf.mxu2  ;;  %3093 = vmatmul.f32.gmra.mxu0 %v6583_v39 }
 0x559   : > { %3302 = vmatmul.f32.gmra.mxu1 %v6584_v40  ;;  %v3673_v41 = vpop.f32.mrf.mxu3  ;;  %v3465_v42 = vadd.f32 %v3464_v38, %v3256_v37  ;;  %v6602_v37 = vld [vmem:[#allocation3 + $0x458] sm:$0xff]  ;;  %v6603_v40 = vld [vmem:[#allocation3 + $0x440] sm:$0xff] }
 0x55b   : > { %v3674_v43 = vadd.f32 %v3673_v41, %v3465_v42  ;;  %v6604_v41 = vld [vmem:[#allocation3 + $0x448] sm:$0xff] }
 0x55d   : > { %v5497_v44 = vadd.f32 %v7808_v61, %v3674_v43  ;;  %3514 = vmatmul.f32.gmra.mxu2 %v6585_v45  ;;  %v3049_v33 = vpop.f32.mrf.mxu0 }
 0x55e   : > { %v3258_v46 = vpop.f32.mrf.mxu1  ;;  %3723 = vmatmul.f32.gmra.mxu3 %v6586_v48 }
 0x55f   : > { %v3259_v49 = vadd.f32 %v3258_v46, %v3049_v33  ;;  %5753 = vst [vmem:[%s7421_s11 + $0x1b0] sm:$0xff] %v5497_v44  ;;  %v6605_v33 = vld [vmem:[#allocation3 + $0x470] sm:$0xff] }
 0x560   : > { %v3467_v50 = vpop.f32.mrf.mxu2  ;;  %3096 = vmatmul.f32.gmra.mxu0 %v6587_v51 }
 0x561   : > { %3305 = vmatmul.f32.gmra.mxu1 %v6588_v52  ;;  %v3676_v53 = vpop.f32.mrf.mxu3  ;;  %v3468_v54 = vadd.f32 %v3467_v50, %v3259_v49  ;;  %v6606_v49 = vld [vmem:[#allocation3 + $0x478] sm:$0xff]  ;;  %v6607_v52 = vld [vmem:[#allocation3 + $0x460] sm:$0xff] }
 0x563   : > { %v3677_v55 = vadd.f32 %v3676_v53, %v3468_v54  ;;  %v6608_v53 = vld [vmem:[#allocation3 + $0x468] sm:$0xff] }
 0x565   : > { %v5501_v56 = vadd.f32 %v7808_v61, %v3677_v55  ;;  %3517 = vmatmul.f32.gmra.mxu2 %v6589_v57  ;;  %v3052_v58 = vpop.f32.mrf.mxu0 }
 0x566   : > { %v3261_v59 = vpop.f32.mrf.mxu1  ;;  %3726 = vmatmul.f32.gmra.mxu3 %v6590_v47 }
 0x567   : > { %v3262_v60 = vadd.f32 %v3261_v59, %v3052_v58  ;;  %5757 = vst [vmem:[%s7421_s11 + $0x1d0] sm:$0xff] %v5501_v56  ;;  %v6609_v58 = vld [vmem:[#allocation3 + $0x490] sm:$0xff] }
 0x568   : > { %v3470_v62 = vpop.f32.mrf.mxu2  ;;  %3099 = vmatmul.f32.gmra.mxu0 %v6591_v63  ;;  %v1213_v63 = vld [vmem:[%s7318_s6 + $0x4b8] sm:$0xff] }
 0x569   : > { %3308 = vmatmul.f32.gmra.mxu1 %v6592_v0  ;;  %v3679_v1 = vpop.f32.mrf.mxu3  ;;  %v3471_v2 = vadd.f32 %v3470_v62, %v3262_v60  ;;  %v6610_v60 = vld [vmem:[#allocation3 + $0x498] sm:$0xff]  ;;  %4254 = vmatpush.msrb.mxu2 %v1213_v63  ;;  %v6629_v63 = vld [vmem:[#allocation3 + $0x530] sm:$0xff] }
 0x56a   : > { %v1277_v0 = vld [vmem:[%s7318_s6 + $0x6b8] sm:$0xff] }
 0x56b   : > { %v3680_v3 = vadd.f32 %v3679_v1, %v3471_v2  ;;  %v6611_v2 = vld [vmem:[#allocation3 + $0x480] sm:$0xff]  ;;  %4463 = vmatpush.msrb.mxu3 %v1277_v0 }
 0x56d   : > { %v5505_v4 = vadd.f32 %v7808_v61, %v3680_v3  ;;  %3520 = vmatmul.f32.gmra.mxu2 %v6593_v5  ;;  %v3055_v6 = vpop.f32.mrf.mxu0  ;;  %v6612_v3 = vld [vmem:[#allocation3 + $0x488] sm:$0xff] }
 0x56e   : > { %v3264_v7 = vpop.f32.mrf.mxu1  ;;  %3729 = vmatmul.f32.gmra.mxu3 %v6594_v8 }
 0x56f   : > { %v3265_v9 = vadd.f32 %v3264_v7, %v3055_v6  ;;  %5761 = vst [vmem:[%s7421_s11 + $0x1f0] sm:$0xff] %v5505_v4  ;;  %v1085_v6 = vld [vmem:[%s7318_s6 + $0xb8] sm:$0xff] }
 0x570   : > { %v3473_v12 = vpop.f32.mrf.mxu2  ;;  %3102 = vmatmul.f32.gmra.mxu0 %v6595_v13  ;;  %v1149_v7 = vld [vmem:[%s7318_s6 + $0x2b8] sm:$0xff] }
 0x571   : > { %3311 = vmatmul.f32.gmra.mxu1 %v6596_v14  ;;  %v3682_v15 = vpop.f32.mrf.mxu3  ;;  %v3474_v16 = vadd.f32 %v3473_v12, %v3265_v9  ;;  %3836 = vmatpush.msrb.mxu0 %v1085_v6  ;;  %v6614_v13 = vld [vmem:[#allocation3 + $0x4b8] sm:$0xff]  ;;  %v6632_v6 = vld [vmem:[#allocation3 + $0x528] sm:$0xff] }
 0x572   : > { %4045 = vmatpush.msrb.mxu1 %v1149_v7 }
 0x573   : > { %v3683_v19 = vadd.f32 %v3682_v15, %v3474_v16  ;;  %v6615_v16 = vld [vmem:[#allocation3 + $0x4a0] sm:$0xff] }
 0x575   : > { %v5509_v20 = vadd.f32 %v7808_v61, %v3683_v19  ;;  %3523 = vmatmul.f32.gmra.mxu2 %v6597_v21  ;;  %v3058_v22 = vpop.f32.mrf.mxu0 }
 0x576   : > { %v3267_v23 = vpop.f32.mrf.mxu1  ;;  %3732 = vmatmul.f32.gmra.mxu3 %v6598_v24 }
 0x577   : > { %v3268_v25 = vadd.f32 %v3267_v23, %v3058_v22  ;;  %5765 = vst [vmem:[%s7421_s11 + $0x210] sm:$0xff] %v5509_v20  ;;  %v6617_v22 = vld [vmem:[#allocation3 + $0x4d0] sm:$0xff] }
 0x578   : > { %v3476_v26 = vpop.f32.mrf.mxu2  ;;  %3105 = vmatmul.f32.gmra.mxu0 %v6599_v27 }
 0x579   : > { %3314 = vmatmul.f32.gmra.mxu1 %v6600_v28  ;;  %v3685_v29 = vpop.f32.mrf.mxu3  ;;  %v3477_v30 = vadd.f32 %v3476_v26, %v3268_v25  ;;  %v6618_v25 = vld [vmem:[#allocation3 + $0x4d8] sm:$0xff]  ;;  %v6619_v28 = vld [vmem:[#allocation3 + $0x4c0] sm:$0xff] }
 0x57b   : > { %v3686_v31 = vadd.f32 %v3685_v29, %v3477_v30  ;;  %v6620_v29 = vld [vmem:[#allocation3 + $0x4c8] sm:$0xff] }
 0x57d   : > { %v5513_v32 = vadd.f32 %v7808_v61, %v3686_v31  ;;  %3526 = vmatmul.f32.gmra.mxu2 %v6601_v34  ;;  %v3061_v35 = vpop.f32.mrf.mxu0 }
 0x57e   : > { %v3270_v36 = vpop.f32.mrf.mxu1  ;;  %3735 = vmatmul.f32.gmra.mxu3 %v6602_v37 }
 0x57f   : > { %v3271_v38 = vadd.f32 %v3270_v36, %v3061_v35  ;;  %5769 = vst [vmem:[%s7421_s11 + $0x230] sm:$0xff] %v5513_v32  ;;  %v6621_v35 = vld [vmem:[#allocation3 + $0x4f0] sm:$0xff] }
 0x580   : > { %v3479_v39 = vpop.f32.mrf.mxu2  ;;  %3108 = vmatmul.f32.gmra.mxu0 %v6603_v40 }
 0x581   : > { %3317 = vmatmul.f32.gmra.mxu1 %v6604_v41  ;;  %v3688_v42 = vpop.f32.mrf.mxu3  ;;  %v3480_v43 = vadd.f32 %v3479_v39, %v3271_v38  ;;  %v6622_v38 = vld [vmem:[#allocation3 + $0x4f8] sm:$0xff]  ;;  %v6623_v41 = vld [vmem:[#allocation3 + $0x4e0] sm:$0xff] }
 0x583   : > { %v3689_v44 = vadd.f32 %v3688_v42, %v3480_v43  ;;  %v6624_v42 = vld [vmem:[#allocation3 + $0x4e8] sm:$0xff] }
 0x585   : > { %v5517_v45 = vadd.f32 %v7808_v61, %v3689_v44  ;;  %3529 = vmatmul.f32.gmra.mxu2 %v6605_v33  ;;  %v3064_v46 = vpop.f32.mrf.mxu0 }
 0x586   : > { %v3273_v48 = vpop.f32.mrf.mxu1  ;;  %3738 = vmatmul.f32.gmra.mxu3 %v6606_v49 }
 0x587   : > { %v3274_v50 = vadd.f32 %v3273_v48, %v3064_v46  ;;  %5773 = vst [vmem:[%s7421_s11 + $0x250] sm:$0xff] %v5517_v45  ;;  %v6625_v46 = vld [vmem:[#allocation3 + $0x510] sm:$0xff] }
 0x588   : > { %v3482_v51 = vpop.f32.mrf.mxu2  ;;  %3111 = vmatmul.f32.gmra.mxu0 %v6607_v52  ;;  %v1209_v52 = vld [vmem:[%s7318_s6 + $0x498] sm:$0xff] }
 0x589   : > { %3320 = vmatmul.f32.gmra.mxu1 %v6608_v53  ;;  %v3691_v54 = vpop.f32.mrf.mxu3  ;;  %v3483_v55 = vadd.f32 %v3482_v51, %v3274_v50  ;;  %v6626_v50 = vld [vmem:[#allocation3 + $0x518] sm:$0xff]  ;;  %4255 = vmatpush.msrb.mxu2 %v1209_v52  ;;  %v6645_v52 = vld [vmem:[#allocation3 + $0x5b0] sm:$0xff] }
 0x58a   : > { %v1273_v53 = vld [vmem:[%s7318_s6 + $0x698] sm:$0xff] }
 0x58b   : > { %v3692_v56 = vadd.f32 %v3691_v54, %v3483_v55  ;;  %v6627_v55 = vld [vmem:[#allocation3 + $0x500] sm:$0xff]  ;;  %4464 = vmatpush.msrb.mxu3 %v1273_v53 }
 0x58d   : > { %v5521_v57 = vadd.f32 %v7808_v61, %v3692_v56  ;;  %3532 = vmatmul.f32.gmra.mxu2 %v6609_v58  ;;  %v3067_v59 = vpop.f32.mrf.mxu0  ;;  %v6628_v56 = vld [vmem:[#allocation3 + $0x508] sm:$0xff] }
 0x58e   : > { %v3276_v47 = vpop.f32.mrf.mxu1  ;;  %3741 = vmatmul.f32.gmra.mxu3 %v6610_v60 }
 0x58f   : > { %v3277_v62 = vadd.f32 %v3276_v47, %v3067_v59  ;;  %5777 = vst [vmem:[%s7421_s11 + $0x270] sm:$0xff] %v5521_v57  ;;  %v1081_v59 = vld [vmem:[%s7318_s6 + $0x98] sm:$0xff] }
 0x590   : > { %v3485_v1 = vpop.f32.mrf.mxu2  ;;  %3114 = vmatmul.f32.gmra.mxu0 %v6611_v2  ;;  %v1145_v47 = vld [vmem:[%s7318_s6 + $0x298] sm:$0xff] }
 0x591   : > { %3323 = vmatmul.f32.gmra.mxu1 %v6612_v3  ;;  %v3694_v4 = vpop.f32.mrf.mxu3  ;;  %v3486_v5 = vadd.f32 %v3485_v1, %v3277_v62  ;;  %3837 = vmatpush.msrb.mxu0 %v1081_v59  ;;  %v6630_v2 = vld [vmem:[#allocation3 + $0x538] sm:$0xff]  ;;  %v6648_v59 = vld [vmem:[#allocation3 + $0x5a8] sm:$0xff] }
 0x592   : > { %4046 = vmatpush.msrb.mxu1 %v1145_v47 }
 0x593   : > { %v3695_v8 = vadd.f32 %v3694_v4, %v3486_v5  ;;  %v6631_v5 = vld [vmem:[#allocation3 + $0x520] sm:$0xff] }
 0x595   : > { %v5525_v9 = vadd.f32 %v7808_v61, %v3695_v8  ;;  %3535 = vmatmul.f32.gmra.mxu2 %v6613_v10  ;;  %v3070_v11 = vpop.f32.mrf.mxu0 }
 0x596   : > { %v3279_v12 = vpop.f32.mrf.mxu1  ;;  %3744 = vmatmul.f32.gmra.mxu3 %v6614_v13 }
 0x597   : > { %v3280_v14 = vadd.f32 %v3279_v12, %v3070_v11  ;;  %5781 = vst [vmem:[%s7421_s11 + $0x290] sm:$0xff] %v5525_v9  ;;  %v6633_v11 = vld [vmem:[#allocation3 + $0x550] sm:$0xff] }
 0x598   : > { %v3488_v15 = vpop.f32.mrf.mxu2  ;;  %3117 = vmatmul.f32.gmra.mxu0 %v6615_v16 }
 0x599   : > { %3326 = vmatmul.f32.gmra.mxu1 %v6616_v17  ;;  %v3697_v18 = vpop.f32.mrf.mxu3  ;;  %v3489_v19 = vadd.f32 %v3488_v15, %v3280_v14  ;;  %v6634_v14 = vld [vmem:[#allocation3 + $0x558] sm:$0xff]  ;;  %v6635_v17 = vld [vmem:[#allocation3 + $0x540] sm:$0xff] }
 0x59b   : > { %v3698_v20 = vadd.f32 %v3697_v18, %v3489_v19  ;;  %v6636_v18 = vld [vmem:[#allocation3 + $0x548] sm:$0xff] }
 0x59d   : > { %v5529_v21 = vadd.f32 %v7808_v61, %v3698_v20  ;;  %3538 = vmatmul.f32.gmra.mxu2 %v6617_v22  ;;  %v3073_v23 = vpop.f32.mrf.mxu0 }
 0x59e   : > { %v3282_v24 = vpop.f32.mrf.mxu1  ;;  %3747 = vmatmul.f32.gmra.mxu3 %v6618_v25 }
 0x59f   : > { %v3283_v26 = vadd.f32 %v3282_v24, %v3073_v23  ;;  %5785 = vst [vmem:[%s7421_s11 + $0x2b0] sm:$0xff] %v5529_v21  ;;  %v6637_v23 = vld [vmem:[#allocation3 + $0x570] sm:$0xff] }
 0x5a0   : > { %v3491_v27 = vpop.f32.mrf.mxu2  ;;  %3120 = vmatmul.f32.gmra.mxu0 %v6619_v28 }
 0x5a1   : > { %3329 = vmatmul.f32.gmra.mxu1 %v6620_v29  ;;  %v3700_v30 = vpop.f32.mrf.mxu3  ;;  %v3492_v31 = vadd.f32 %v3491_v27, %v3283_v26  ;;  %v6638_v26 = vld [vmem:[#allocation3 + $0x578] sm:$0xff]  ;;  %v6639_v29 = vld [vmem:[#allocation3 + $0x560] sm:$0xff] }
 0x5a3   : > { %v3701_v32 = vadd.f32 %v3700_v30, %v3492_v31  ;;  %v6640_v30 = vld [vmem:[#allocation3 + $0x568] sm:$0xff] }
 0x5a5   : > { %v5533_v34 = vadd.f32 %v7808_v61, %v3701_v32  ;;  %3541 = vmatmul.f32.gmra.mxu2 %v6621_v35  ;;  %v3076_v36 = vpop.f32.mrf.mxu0 }
 0x5a6   : > { %v3285_v37 = vpop.f32.mrf.mxu1  ;;  %3750 = vmatmul.f32.gmra.mxu3 %v6622_v38 }
 0x5a7   : > { %v3286_v39 = vadd.f32 %v3285_v37, %v3076_v36  ;;  %5789 = vst [vmem:[%s7421_s11 + $0x2d0] sm:$0xff] %v5533_v34  ;;  %v6641_v36 = vld [vmem:[#allocation3 + $0x590] sm:$0xff] }
 0x5a8   : > { %v3494_v40 = vpop.f32.mrf.mxu2  ;;  %3123 = vmatmul.f32.gmra.mxu0 %v6623_v41  ;;  %v1205_v41 = vld [vmem:[%s7318_s6 + $0x478] sm:$0xff] }
 0x5a9   : > { %3332 = vmatmul.f32.gmra.mxu1 %v6624_v42  ;;  %v3703_v43 = vpop.f32.mrf.mxu3  ;;  %v3495_v44 = vadd.f32 %v3494_v40, %v3286_v39  ;;  %v6642_v39 = vld [vmem:[#allocation3 + $0x598] sm:$0xff]  ;;  %4256 = vmatpush.msrb.mxu2 %v1205_v41  ;;  %v6661_v41 = vld [vmem:[#allocation3 + $0x630] sm:$0xff] }
 0x5aa   : > { %v1269_v42 = vld [vmem:[%s7318_s6 + $0x678] sm:$0xff] }
 0x5ab   : > { %v3704_v45 = vadd.f32 %v3703_v43, %v3495_v44  ;;  %v6643_v44 = vld [vmem:[#allocation3 + $0x580] sm:$0xff]  ;;  %4465 = vmatpush.msrb.mxu3 %v1269_v42 }
 0x5ad   : > { %v5537_v33 = vadd.f32 %v7808_v61, %v3704_v45  ;;  %3544 = vmatmul.f32.gmra.mxu2 %v6625_v46  ;;  %v3079_v48 = vpop.f32.mrf.mxu0  ;;  %v6644_v45 = vld [vmem:[#allocation3 + $0x588] sm:$0xff] }
 0x5ae   : > { %v3288_v49 = vpop.f32.mrf.mxu1  ;;  %3753 = vmatmul.f32.gmra.mxu3 %v6626_v50 }
 0x5af   : > { %v3289_v51 = vadd.f32 %v3288_v49, %v3079_v48  ;;  %5793 = vst [vmem:[%s7421_s11 + $0x2f0] sm:$0xff] %v5537_v33  ;;  %v1077_v48 = vld [vmem:[%s7318_s6 + $0x78] sm:$0xff] }
 0x5b0   : > { %v3497_v54 = vpop.f32.mrf.mxu2  ;;  %3126 = vmatmul.f32.gmra.mxu0 %v6627_v55  ;;  %v1141_v49 = vld [vmem:[%s7318_s6 + $0x278] sm:$0xff] }
 0x5b1   : > { %3335 = vmatmul.f32.gmra.mxu1 %v6628_v56  ;;  %v3706_v57 = vpop.f32.mrf.mxu3  ;;  %v3498_v58 = vadd.f32 %v3497_v54, %v3289_v51  ;;  %3838 = vmatpush.msrb.mxu0 %v1077_v48  ;;  %v6646_v55 = vld [vmem:[#allocation3 + $0x5b8] sm:$0xff]  ;;  %v6664_v48 = vld [vmem:[#allocation3 + $0x628] sm:$0xff] }
 0x5b2   : > { %4047 = vmatpush.msrb.mxu1 %v1141_v49 }
 0x5b3   : > { %v3707_v60 = vadd.f32 %v3706_v57, %v3498_v58  ;;  %v6647_v58 = vld [vmem:[#allocation3 + $0x5a0] sm:$0xff] }
 0x5b5   : > { %v5541_v62 = vadd.f32 %v7808_v61, %v3707_v60  ;;  %3547 = vmatmul.f32.gmra.mxu2 %v6629_v63  ;;  %v3082_v0 = vpop.f32.mrf.mxu0 }
 0x5b6   : > { %v3291_v1 = vpop.f32.mrf.mxu1  ;;  %3756 = vmatmul.f32.gmra.mxu3 %v6630_v2 }
 0x5b7   : > { %v3292_v3 = vadd.f32 %v3291_v1, %v3082_v0  ;;  %5797 = vst [vmem:[%s7421_s11 + $0x310] sm:$0xff] %v5541_v62  ;;  %v6649_v0 = vld [vmem:[#allocation3 + $0x5d0] sm:$0xff] }
 0x5b8   : > { %v3500_v4 = vpop.f32.mrf.mxu2  ;;  %3129 = vmatmul.f32.gmra.mxu0 %v6631_v5 }
 0x5b9   : > { %3338 = vmatmul.f32.gmra.mxu1 %v6632_v6  ;;  %v3709_v7 = vpop.f32.mrf.mxu3  ;;  %v3501_v8 = vadd.f32 %v3500_v4, %v3292_v3  ;;  %v6650_v3 = vld [vmem:[#allocation3 + $0x5d8] sm:$0xff]  ;;  %v6651_v6 = vld [vmem:[#allocation3 + $0x5c0] sm:$0xff] }
 0x5bb   : > { %v3710_v9 = vadd.f32 %v3709_v7, %v3501_v8  ;;  %v6652_v7 = vld [vmem:[#allocation3 + $0x5c8] sm:$0xff] }
 0x5bd   : > { %v5545_v10 = vadd.f32 %v7808_v61, %v3710_v9  ;;  %3550 = vmatmul.f32.gmra.mxu2 %v6633_v11  ;;  %v3085_v12 = vpop.f32.mrf.mxu0 }
 0x5be   : > { %v3294_v13 = vpop.f32.mrf.mxu1  ;;  %3759 = vmatmul.f32.gmra.mxu3 %v6634_v14 }
 0x5bf   : > { %v3295_v15 = vadd.f32 %v3294_v13, %v3085_v12  ;;  %5801 = vst [vmem:[%s7421_s11 + $0x330] sm:$0xff] %v5545_v10  ;;  %v6653_v12 = vld [vmem:[#allocation3 + $0x5f0] sm:$0xff] }
 0x5c0   : > { %v3503_v16 = vpop.f32.mrf.mxu2  ;;  %3132 = vmatmul.f32.gmra.mxu0 %v6635_v17 }
 0x5c1   : > { %3341 = vmatmul.f32.gmra.mxu1 %v6636_v18  ;;  %v3712_v19 = vpop.f32.mrf.mxu3  ;;  %v3504_v20 = vadd.f32 %v3503_v16, %v3295_v15  ;;  %v6654_v15 = vld [vmem:[#allocation3 + $0x5f8] sm:$0xff]  ;;  %v6655_v18 = vld [vmem:[#allocation3 + $0x5e0] sm:$0xff] }
 0x5c3   : > { %v3713_v21 = vadd.f32 %v3712_v19, %v3504_v20  ;;  %v6656_v19 = vld [vmem:[#allocation3 + $0x5e8] sm:$0xff] }
 0x5c5   : > { %v5549_v22 = vadd.f32 %v7808_v61, %v3713_v21  ;;  %3553 = vmatmul.f32.gmra.mxu2 %v6637_v23  ;;  %v3088_v24 = vpop.f32.mrf.mxu0 }
 0x5c6   : > { %v3297_v25 = vpop.f32.mrf.mxu1  ;;  %3762 = vmatmul.f32.gmra.mxu3 %v6638_v26 }
 0x5c7   : > { %v3298_v27 = vadd.f32 %v3297_v25, %v3088_v24  ;;  %5805 = vst [vmem:[%s7421_s11 + $0x350] sm:$0xff] %v5549_v22  ;;  %v6657_v24 = vld [vmem:[#allocation3 + $0x610] sm:$0xff] }
 0x5c8   : > { %v3506_v28 = vpop.f32.mrf.mxu2  ;;  %3135 = vmatmul.f32.gmra.mxu0 %v6639_v29  ;;  %v1201_v29 = vld [vmem:[%s7318_s6 + $0x458] sm:$0xff] }
 0x5c9   : > { %3344 = vmatmul.f32.gmra.mxu1 %v6640_v30  ;;  %v3715_v31 = vpop.f32.mrf.mxu3  ;;  %v3507_v32 = vadd.f32 %v3506_v28, %v3298_v27  ;;  %v6658_v27 = vld [vmem:[#allocation3 + $0x618] sm:$0xff]  ;;  %4257 = vmatpush.msrb.mxu2 %v1201_v29  ;;  %v6677_v29 = vld [vmem:[#allocation3 + $0x6b0] sm:$0xff] }
 0x5ca   : > { %v1265_v30 = vld [vmem:[%s7318_s6 + $0x658] sm:$0xff] }
 0x5cb   : > { %v3716_v34 = vadd.f32 %v3715_v31, %v3507_v32  ;;  %v6659_v32 = vld [vmem:[#allocation3 + $0x600] sm:$0xff]  ;;  %4466 = vmatpush.msrb.mxu3 %v1265_v30 }
 0x5cd   : > { %v5553_v35 = vadd.f32 %v7808_v61, %v3716_v34  ;;  %3556 = vmatmul.f32.gmra.mxu2 %v6641_v36  ;;  %v3091_v37 = vpop.f32.mrf.mxu0  ;;  %v6660_v34 = vld [vmem:[#allocation3 + $0x608] sm:$0xff] }
 0x5ce   : > { %v3300_v38 = vpop.f32.mrf.mxu1  ;;  %3765 = vmatmul.f32.gmra.mxu3 %v6642_v39 }
 0x5cf   : > { %v3301_v40 = vadd.f32 %v3300_v38, %v3091_v37  ;;  %5809 = vst [vmem:[%s7421_s11 + $0x370] sm:$0xff] %v5553_v35  ;;  %v1073_v37 = vld [vmem:[%s7318_s6 + $0x58] sm:$0xff] }
 0x5d0   : > { %v3509_v43 = vpop.f32.mrf.mxu2  ;;  %3138 = vmatmul.f32.gmra.mxu0 %v6643_v44  ;;  %v1137_v38 = vld [vmem:[%s7318_s6 + $0x258] sm:$0xff] }
 0x5d1   : > { %3347 = vmatmul.f32.gmra.mxu1 %v6644_v45  ;;  %v3718_v33 = vpop.f32.mrf.mxu3  ;;  %v3510_v46 = vadd.f32 %v3509_v43, %v3301_v40  ;;  %3839 = vmatpush.msrb.mxu0 %v1073_v37  ;;  %v6662_v44 = vld [vmem:[#allocation3 + $0x638] sm:$0xff]  ;;  %v6680_v37 = vld [vmem:[#allocation3 + $0x6a8] sm:$0xff] }
 0x5d2   : > { %4048 = vmatpush.msrb.mxu1 %v1137_v38 }
 0x5d3   : > { %v3719_v50 = vadd.f32 %v3718_v33, %v3510_v46  ;;  %v6663_v46 = vld [vmem:[#allocation3 + $0x620] sm:$0xff] }
 0x5d5   : > { %v5557_v51 = vadd.f32 %v7808_v61, %v3719_v50  ;;  %3559 = vmatmul.f32.gmra.mxu2 %v6645_v52  ;;  %v3094_v53 = vpop.f32.mrf.mxu0 }
 0x5d6   : > { %v3303_v54 = vpop.f32.mrf.mxu1  ;;  %3768 = vmatmul.f32.gmra.mxu3 %v6646_v55 }
 0x5d7   : > { %v3304_v56 = vadd.f32 %v3303_v54, %v3094_v53  ;;  %5813 = vst [vmem:[%s7421_s11 + $0x390] sm:$0xff] %v5557_v51  ;;  %v6665_v53 = vld [vmem:[#allocation3 + $0x650] sm:$0xff] }
 0x5d8   : > { %v3512_v57 = vpop.f32.mrf.mxu2  ;;  %3141 = vmatmul.f32.gmra.mxu0 %v6647_v58 }
 0x5d9   : > { %3350 = vmatmul.f32.gmra.mxu1 %v6648_v59  ;;  %v3721_v47 = vpop.f32.mrf.mxu3  ;;  %v3513_v60 = vadd.f32 %v3512_v57, %v3304_v56  ;;  %v6666_v56 = vld [vmem:[#allocation3 + $0x658] sm:$0xff]  ;;  %v6667_v59 = vld [vmem:[#allocation3 + $0x640] sm:$0xff] }
 0x5db   : > { %v3722_v62 = vadd.f32 %v3721_v47, %v3513_v60  ;;  %v6668_v47 = vld [vmem:[#allocation3 + $0x648] sm:$0xff] }
 0x5dd   : > { %v5561_v63 = vadd.f32 %v7808_v61, %v3722_v62  ;;  %3562 = vmatmul.f32.gmra.mxu2 %v6649_v0  ;;  %v3097_v1 = vpop.f32.mrf.mxu0 }
 0x5de   : > { %v3306_v2 = vpop.f32.mrf.mxu1  ;;  %3771 = vmatmul.f32.gmra.mxu3 %v6650_v3 }
 0x5df   : > { %v3307_v4 = vadd.f32 %v3306_v2, %v3097_v1  ;;  %5817 = vst [vmem:[%s7421_s11 + $0x3b0] sm:$0xff] %v5561_v63  ;;  %v6669_v1 = vld [vmem:[#allocation3 + $0x670] sm:$0xff] }
 0x5e0   : > { %v3515_v5 = vpop.f32.mrf.mxu2  ;;  %3144 = vmatmul.f32.gmra.mxu0 %v6651_v6 }
 0x5e1   : > { %3353 = vmatmul.f32.gmra.mxu1 %v6652_v7  ;;  %v3724_v8 = vpop.f32.mrf.mxu3  ;;  %v3516_v9 = vadd.f32 %v3515_v5, %v3307_v4  ;;  %v6670_v4 = vld [vmem:[#allocation3 + $0x678] sm:$0xff]  ;;  %v6671_v7 = vld [vmem:[#allocation3 + $0x660] sm:$0xff] }
 0x5e3   : > { %v3725_v10 = vadd.f32 %v3724_v8, %v3516_v9  ;;  %v6672_v8 = vld [vmem:[#allocation3 + $0x668] sm:$0xff] }
 0x5e5   : > { %v5565_v11 = vadd.f32 %v7808_v61, %v3725_v10  ;;  %3565 = vmatmul.f32.gmra.mxu2 %v6653_v12  ;;  %v3100_v13 = vpop.f32.mrf.mxu0 }
 0x5e6   : > { %v3309_v14 = vpop.f32.mrf.mxu1  ;;  %3774 = vmatmul.f32.gmra.mxu3 %v6654_v15 }
 0x5e7   : > { %v3310_v16 = vadd.f32 %v3309_v14, %v3100_v13  ;;  %5821 = vst [vmem:[%s7421_s11 + $0x3d0] sm:$0xff] %v5565_v11  ;;  %v6673_v13 = vld [vmem:[#allocation3 + $0x690] sm:$0xff] }
 0x5e8   : > { %v3518_v17 = vpop.f32.mrf.mxu2  ;;  %3147 = vmatmul.f32.gmra.mxu0 %v6655_v18  ;;  %v1197_v18 = vld [vmem:[%s7318_s6 + $0x438] sm:$0xff] }
 0x5e9   : > { %3356 = vmatmul.f32.gmra.mxu1 %v6656_v19  ;;  %v3727_v20 = vpop.f32.mrf.mxu3  ;;  %v3519_v21 = vadd.f32 %v3518_v17, %v3310_v16  ;;  %v6674_v16 = vld [vmem:[#allocation3 + $0x698] sm:$0xff]  ;;  %4258 = vmatpush.msrb.mxu2 %v1197_v18  ;;  %v6693_v18 = vld [vmem:[#allocation3 + $0x730] sm:$0xff] }
 0x5ea   : > { %v1261_v19 = vld [vmem:[%s7318_s6 + $0x638] sm:$0xff] }
 0x5eb   : > { %v3728_v22 = vadd.f32 %v3727_v20, %v3519_v21  ;;  %v6675_v21 = vld [vmem:[#allocation3 + $0x680] sm:$0xff]  ;;  %4467 = vmatpush.msrb.mxu3 %v1261_v19 }
 0x5ed   : > { %v5569_v23 = vadd.f32 %v7808_v61, %v3728_v22  ;;  %3568 = vmatmul.f32.gmra.mxu2 %v6657_v24  ;;  %v3103_v25 = vpop.f32.mrf.mxu0  ;;  %v6676_v22 = vld [vmem:[#allocation3 + $0x688] sm:$0xff] }
 0x5ee   : > { %v3312_v26 = vpop.f32.mrf.mxu1  ;;  %3777 = vmatmul.f32.gmra.mxu3 %v6658_v27 }
 0x5ef   : > { %v3313_v28 = vadd.f32 %v3312_v26, %v3103_v25  ;;  %5825 = vst [vmem:[%s7421_s11 + $0x3f0] sm:$0xff] %v5569_v23  ;;  %v1069_v25 = vld [vmem:[%s7318_s6 + $0x38] sm:$0xff] }
 0x5f0   : > { %v3521_v31 = vpop.f32.mrf.mxu2  ;;  %3150 = vmatmul.f32.gmra.mxu0 %v6659_v32  ;;  %v1133_v26 = vld [vmem:[%s7318_s6 + $0x238] sm:$0xff] }
 0x5f1   : > { %3359 = vmatmul.f32.gmra.mxu1 %v6660_v34  ;;  %v3730_v35 = vpop.f32.mrf.mxu3  ;;  %v3522_v36 = vadd.f32 %v3521_v31, %v3313_v28  ;;  %3840 = vmatpush.msrb.mxu0 %v1069_v25  ;;  %v6678_v32 = vld [vmem:[#allocation3 + $0x6b8] sm:$0xff]  ;;  %v6696_v25 = vld [vmem:[#allocation3 + $0x728] sm:$0xff] }
 0x5f2   : > { %4049 = vmatpush.msrb.mxu1 %v1133_v26 }
 0x5f3   : > { %v3731_v39 = vadd.f32 %v3730_v35, %v3522_v36  ;;  %v6679_v36 = vld [vmem:[#allocation3 + $0x6a0] sm:$0xff] }
 0x5f5   : > { %v5573_v40 = vadd.f32 %v7808_v61, %v3731_v39  ;;  %3571 = vmatmul.f32.gmra.mxu2 %v6661_v41  ;;  %v3106_v42 = vpop.f32.mrf.mxu0 }
 0x5f6   : > { %v3315_v43 = vpop.f32.mrf.mxu1  ;;  %3780 = vmatmul.f32.gmra.mxu3 %v6662_v44 }
 0x5f7   : > { %v3316_v45 = vadd.f32 %v3315_v43, %v3106_v42  ;;  %5829 = vst [vmem:[%s7421_s11 + $0x410] sm:$0xff] %v5573_v40  ;;  %v6681_v42 = vld [vmem:[#allocation3 + $0x6d0] sm:$0xff] }
 0x5f8   : > { %v3524_v33 = vpop.f32.mrf.mxu2  ;;  %3153 = vmatmul.f32.gmra.mxu0 %v6663_v46 }
 0x5f9   : > { %3362 = vmatmul.f32.gmra.mxu1 %v6664_v48  ;;  %v3733_v49 = vpop.f32.mrf.mxu3  ;;  %v3525_v50 = vadd.f32 %v3524_v33, %v3316_v45  ;;  %v6682_v45 = vld [vmem:[#allocation3 + $0x6d8] sm:$0xff]  ;;  %v6683_v48 = vld [vmem:[#allocation3 + $0x6c0] sm:$0xff] }
 0x5fb   : > { %v3734_v51 = vadd.f32 %v3733_v49, %v3525_v50  ;;  %v6684_v49 = vld [vmem:[#allocation3 + $0x6c8] sm:$0xff] }
 0x5fd   : > { %v5577_v52 = vadd.f32 %v7808_v61, %v3734_v51  ;;  %3574 = vmatmul.f32.gmra.mxu2 %v6665_v53  ;;  %v3109_v54 = vpop.f32.mrf.mxu0 }
 0x5fe   : > { %v3318_v55 = vpop.f32.mrf.mxu1  ;;  %3783 = vmatmul.f32.gmra.mxu3 %v6666_v56 }
 0x5ff   : > { %v3319_v57 = vadd.f32 %v3318_v55, %v3109_v54  ;;  %5833 = vst [vmem:[%s7421_s11 + $0x430] sm:$0xff] %v5577_v52  ;;  %v6685_v54 = vld [vmem:[#allocation3 + $0x6f0] sm:$0xff] }
 0x600   : > { %v3527_v58 = vpop.f32.mrf.mxu2  ;;  %3156 = vmatmul.f32.gmra.mxu0 %v6667_v59 }
 0x601   : > { %3365 = vmatmul.f32.gmra.mxu1 %v6668_v47  ;;  %v3736_v60 = vpop.f32.mrf.mxu3  ;;  %v3528_v62 = vadd.f32 %v3527_v58, %v3319_v57  ;;  %v6686_v57 = vld [vmem:[#allocation3 + $0x6f8] sm:$0xff]  ;;  %v6687_v47 = vld [vmem:[#allocation3 + $0x6e0] sm:$0xff] }
 0x603   : > { %v3737_v63 = vadd.f32 %v3736_v60, %v3528_v62  ;;  %v6688_v60 = vld [vmem:[#allocation3 + $0x6e8] sm:$0xff] }
 0x605   : > { %v5581_v0 = vadd.f32 %v7808_v61, %v3737_v63  ;;  %3577 = vmatmul.f32.gmra.mxu2 %v6669_v1  ;;  %v3112_v2 = vpop.f32.mrf.mxu0 }
 0x606   : > { %v3321_v3 = vpop.f32.mrf.mxu1  ;;  %3786 = vmatmul.f32.gmra.mxu3 %v6670_v4 }
 0x607   : > { %v3322_v5 = vadd.f32 %v3321_v3, %v3112_v2  ;;  %5837 = vst [vmem:[%s7421_s11 + $0x450] sm:$0xff] %v5581_v0  ;;  %v6689_v2 = vld [vmem:[#allocation3 + $0x710] sm:$0xff] }
 0x608   : > { %v3530_v6 = vpop.f32.mrf.mxu2  ;;  %3159 = vmatmul.f32.gmra.mxu0 %v6671_v7  ;;  %v1193_v7 = vld [vmem:[%s7318_s6 + $0x418] sm:$0xff] }
 0x609   : > { %3368 = vmatmul.f32.gmra.mxu1 %v6672_v8  ;;  %v3739_v9 = vpop.f32.mrf.mxu3  ;;  %v3531_v10 = vadd.f32 %v3530_v6, %v3322_v5  ;;  %v6690_v5 = vld [vmem:[#allocation3 + $0x718] sm:$0xff]  ;;  %4259 = vmatpush.msrb.mxu2 %v1193_v7 }
 0x60a   : > { %v1257_v8 = vld [vmem:[%s7318_s6 + $0x618] sm:$0xff] }
 0x60b   : > { %v3740_v11 = vadd.f32 %v3739_v9, %v3531_v10  ;;  %v6691_v10 = vld [vmem:[#allocation3 + $0x700] sm:$0xff]  ;;  %4468 = vmatpush.msrb.mxu3 %v1257_v8 }
 0x60d   : > { %v5585_v12 = vadd.f32 %v7808_v61, %v3740_v11  ;;  %3580 = vmatmul.f32.gmra.mxu2 %v6673_v13  ;;  %v3115_v14 = vpop.f32.mrf.mxu0  ;;  %v6692_v11 = vld [vmem:[#allocation3 + $0x708] sm:$0xff] }
 0x60e   : > { %v3324_v15 = vpop.f32.mrf.mxu1  ;;  %3789 = vmatmul.f32.gmra.mxu3 %v6674_v16 }
 0x60f   : > { %v3325_v17 = vadd.f32 %v3324_v15, %v3115_v14  ;;  %5841 = vst [vmem:[%s7421_s11 + $0x470] sm:$0xff] %v5585_v12  ;;  %v1065_v14 = vld [vmem:[%s7318_s6 + $0x18] sm:$0xff] }
 0x610   : > { %v3533_v20 = vpop.f32.mrf.mxu2  ;;  %3162 = vmatmul.f32.gmra.mxu0 %v6675_v21  ;;  %v1129_v15 = vld [vmem:[%s7318_s6 + $0x218] sm:$0xff] }
 0x611   : > { %3371 = vmatmul.f32.gmra.mxu1 %v6676_v22  ;;  %v3742_v23 = vpop.f32.mrf.mxu3  ;;  %v3534_v24 = vadd.f32 %v3533_v20, %v3325_v17  ;;  %3841 = vmatpush.msrb.mxu0 %v1065_v14  ;;  %v6694_v21 = vld [vmem:[#allocation3 + $0x738] sm:$0xff] }
 0x612   : > { %4050 = vmatpush.msrb.mxu1 %v1129_v15  ;;  %v6713_v15 = vld [vmem:[#allocation3 + $0x7d0] sm:$0xff] }
 0x613   : > { %v3743_v27 = vadd.f32 %v3742_v23, %v3534_v24  ;;  %v6695_v24 = vld [vmem:[#allocation3 + $0x720] sm:$0xff] }
 0x615   : > { %v5589_v28 = vadd.f32 %v7808_v61, %v3743_v27  ;;  %3583 = vmatmul.f32.gmra.mxu2 %v6677_v29  ;;  %v3118_v30 = vpop.f32.mrf.mxu0 }
 0x616   : > { %v3327_v31 = vpop.f32.mrf.mxu1  ;;  %3792 = vmatmul.f32.gmra.mxu3 %v6678_v32 }
 0x617   : > { %v3328_v34 = vadd.f32 %v3327_v31, %v3118_v30  ;;  %5845 = vst [vmem:[%s7421_s11 + $0x490] sm:$0xff] %v5589_v28  ;;  %v6697_v30 = vld [vmem:[#allocation3 + $0x750] sm:$0xff] }
 0x618   : > { %v3536_v35 = vpop.f32.mrf.mxu2  ;;  %3165 = vmatmul.f32.gmra.mxu0 %v6679_v36 }
 0x619   : > { %3374 = vmatmul.f32.gmra.mxu1 %v6680_v37  ;;  %v3745_v38 = vpop.f32.mrf.mxu3  ;;  %v3537_v39 = vadd.f32 %v3536_v35, %v3328_v34  ;;  %v6698_v34 = vld [vmem:[#allocation3 + $0x758] sm:$0xff]  ;;  %v6699_v37 = vld [vmem:[#allocation3 + $0x740] sm:$0xff] }
 0x61b   : > { %v3746_v40 = vadd.f32 %v3745_v38, %v3537_v39  ;;  %v6700_v38 = vld [vmem:[#allocation3 + $0x748] sm:$0xff] }
 0x61d   : > { %v5593_v41 = vadd.f32 %v7808_v61, %v3746_v40  ;;  %3586 = vmatmul.f32.gmra.mxu2 %v6681_v42  ;;  %v3121_v43 = vpop.f32.mrf.mxu0 }
 0x61e   : > { %v3330_v44 = vpop.f32.mrf.mxu1  ;;  %3795 = vmatmul.f32.gmra.mxu3 %v6682_v45 }
 0x61f   : > { %v3331_v33 = vadd.f32 %v3330_v44, %v3121_v43  ;;  %5849 = vst [vmem:[%s7421_s11 + $0x4b0] sm:$0xff] %v5593_v41  ;;  %v6701_v43 = vld [vmem:[#allocation3 + $0x770] sm:$0xff] }
 0x620   : > { %v3539_v46 = vpop.f32.mrf.mxu2  ;;  %3168 = vmatmul.f32.gmra.mxu0 %v6683_v48 }
 0x621   : > { %3377 = vmatmul.f32.gmra.mxu1 %v6684_v49  ;;  %v3748_v50 = vpop.f32.mrf.mxu3  ;;  %v3540_v51 = vadd.f32 %v3539_v46, %v3331_v33  ;;  %v6702_v33 = vld [vmem:[#allocation3 + $0x778] sm:$0xff]  ;;  %v6703_v49 = vld [vmem:[#allocation3 + $0x760] sm:$0xff] }
 0x623   : > { %v3749_v52 = vadd.f32 %v3748_v50, %v3540_v51  ;;  %v6704_v50 = vld [vmem:[#allocation3 + $0x768] sm:$0xff] }
 0x625   : > { %v5597_v53 = vadd.f32 %v7808_v61, %v3749_v52  ;;  %3589 = vmatmul.f32.gmra.mxu2 %v6685_v54  ;;  %v3124_v55 = vpop.f32.mrf.mxu0 }
 0x626   : > { %v3333_v56 = vpop.f32.mrf.mxu1  ;;  %3798 = vmatmul.f32.gmra.mxu3 %v6686_v57 }
 0x627   : > { %v3334_v58 = vadd.f32 %v3333_v56, %v3124_v55  ;;  %5853 = vst [vmem:[%s7421_s11 + $0x4d0] sm:$0xff] %v5597_v53  ;;  %v6705_v55 = vld [vmem:[#allocation3 + $0x790] sm:$0xff] }
 0x628   : > { %v3542_v59 = vpop.f32.mrf.mxu2  ;;  %3171 = vmatmul.f32.gmra.mxu0 %v6687_v47 }
 0x629   : > { %3380 = vmatmul.f32.gmra.mxu1 %v6688_v60  ;;  %v3751_v62 = vpop.f32.mrf.mxu3  ;;  %v3543_v63 = vadd.f32 %v3542_v59, %v3334_v58  ;;  %v6706_v58 = vld [vmem:[#allocation3 + $0x798] sm:$0xff]  ;;  %v6707_v60 = vld [vmem:[#allocation3 + $0x780] sm:$0xff] }
 0x62b   : > { %v3752_v0 = vadd.f32 %v3751_v62, %v3543_v63  ;;  %v6708_v62 = vld [vmem:[#allocation3 + $0x788] sm:$0xff] }
 0x62d   : > { %v5601_v1 = vadd.f32 %v7808_v61, %v3752_v0  ;;  %3592 = vmatmul.f32.gmra.mxu2 %v6689_v2  ;;  %v3127_v3 = vpop.f32.mrf.mxu0 }
 0x62e   : > { %v3336_v4 = vpop.f32.mrf.mxu1  ;;  %3801 = vmatmul.f32.gmra.mxu3 %v6690_v5 }
 0x62f   : > { %v3337_v6 = vadd.f32 %v3336_v4, %v3127_v3  ;;  %5857 = vst [vmem:[%s7421_s11 + $0x4f0] sm:$0xff] %v5601_v1  ;;  %v6709_v3 = vld [vmem:[#allocation3 + $0x7b0] sm:$0xff] }
 0x630   : > { %v3545_v9 = vpop.f32.mrf.mxu2  ;;  %3174 = vmatmul.f32.gmra.mxu0 %v6691_v10  ;;  %v6712_v10 = vld [vmem:[#allocation3 + $0x7a8] sm:$0xff] }
 0x631   : > { %3383 = vmatmul.f32.gmra.mxu1 %v6692_v11  ;;  %v3754_v12 = vpop.f32.mrf.mxu3  ;;  %v3546_v13 = vadd.f32 %v3545_v9, %v3337_v6  ;;  %v6710_v6 = vld [vmem:[#allocation3 + $0x7b8] sm:$0xff]  ;;  %v6711_v9 = vld [vmem:[#allocation3 + $0x7a0] sm:$0xff] }
 0x633   : > { %v3755_v16 = vadd.f32 %v3754_v12, %v3546_v13 }
 0x635   : > { %v5605_v17 = vadd.f32 %v7808_v61, %v3755_v16  ;;  %3595 = vmatmul.f32.gmra.mxu2 %v6693_v18  ;;  %v3130_v19 = vpop.f32.mrf.mxu0  ;;  %v6714_v18 = vld [vmem:[#allocation3 + $0x7d8] sm:$0xff] }
 0x636   : > { %v3339_v20 = vpop.f32.mrf.mxu1  ;;  %3804 = vmatmul.f32.gmra.mxu3 %v6694_v21  ;;  %v6715_v21 = vld [vmem:[#allocation3 + $0x7c0] sm:$0xff] }
 0x637   : > { %v3340_v22 = vadd.f32 %v3339_v20, %v3130_v19  ;;  %5861 = vst [vmem:[%s7421_s11 + $0x510] sm:$0xff] %v5605_v17 }
 0x638   : > { %v3548_v23 = vpop.f32.mrf.mxu2  ;;  %3177 = vmatmul.f32.gmra.mxu0 %v6695_v24 }
 0x639   : > { %3386 = vmatmul.f32.gmra.mxu1 %v6696_v25  ;;  %v3757_v26 = vpop.f32.mrf.mxu3  ;;  %v3549_v27 = vadd.f32 %v3548_v23, %v3340_v22  ;;  %v6716_v22 = vld [vmem:[#allocation3 + $0x7c8] sm:$0xff] }
 0x63b   : > { %v3758_v28 = vadd.f32 %v3757_v26, %v3549_v27  ;;  %v6717_v27 = vld [vmem:[#allocation3 + $0x7f0] sm:$0xff] }
 0x63d   : > { %v5609_v29 = vadd.f32 %v7808_v61, %v3758_v28  ;;  %3598 = vmatmul.f32.gmra.mxu2 %v6697_v30  ;;  %v3133_v31 = vpop.f32.mrf.mxu0  ;;  %v6718_v30 = vld [vmem:[#allocation3 + $0x7f8] sm:$0xff] }
 0x63e   : > { %v3342_v32 = vpop.f32.mrf.mxu1  ;;  %3807 = vmatmul.f32.gmra.mxu3 %v6698_v34  ;;  %v6719_v34 = vld [vmem:[#allocation3 + $0x7e0] sm:$0xff] }
 0x63f   : > { %v3343_v35 = vadd.f32 %v3342_v32, %v3133_v31  ;;  %5865 = vst [vmem:[%s7421_s11 + $0x530] sm:$0xff] %v5609_v29 }
 0x640   : > { %v3551_v36 = vpop.f32.mrf.mxu2  ;;  %3180 = vmatmul.f32.gmra.mxu0 %v6699_v37 }
 0x641   : > { %3389 = vmatmul.f32.gmra.mxu1 %v6700_v38  ;;  %v3760_v39 = vpop.f32.mrf.mxu3  ;;  %v3552_v40 = vadd.f32 %v3551_v36, %v3343_v35  ;;  %v6720_v35 = vld [vmem:[#allocation3 + $0x7e8] sm:$0xff] }
 0x643   : > { %v3761_v41 = vadd.f32 %v3760_v39, %v3552_v40  ;;  %v6721_v40 = vld [vmem:[#allocation3 + $0x10] sm:$0xff] }
 0x645   : > { %v5613_v42 = vadd.f32 %v7808_v61, %v3761_v41  ;;  %3601 = vmatmul.f32.gmra.mxu2 %v6701_v43  ;;  %v3136_v44 = vpop.f32.mrf.mxu0  ;;  %v6722_v43 = vld [vmem:[#allocation3 + $0x18] sm:$0xff] }
 0x646   : > { %v3345_v45 = vpop.f32.mrf.mxu1  ;;  %3810 = vmatmul.f32.gmra.mxu3 %v6702_v33  ;;  %v6723_v33 = vld [vmem:[#allocation3] sm:$0xff] }
 0x647   : > { %v3346_v46 = vadd.f32 %v3345_v45, %v3136_v44  ;;  %5869 = vst [vmem:[%s7421_s11 + $0x550] sm:$0xff] %v5613_v42 }
 0x648   : > { %v3554_v48 = vpop.f32.mrf.mxu2  ;;  %3183 = vmatmul.f32.gmra.mxu0 %v6703_v49 }
 0x649   : > { %3392 = vmatmul.f32.gmra.mxu1 %v6704_v50  ;;  %v3763_v51 = vpop.f32.mrf.mxu3  ;;  %v3555_v52 = vadd.f32 %v3554_v48, %v3346_v46  ;;  %v6724_v46 = vld [vmem:[#allocation3 + $0x8] sm:$0xff] }
 0x64b   : > { %v3764_v53 = vadd.f32 %v3763_v51, %v3555_v52  ;;  %v6725_v52 = vld [vmem:[#allocation3 + $0x30] sm:$0xff] }
 0x64d   : > { %v5617_v54 = vadd.f32 %v7808_v61, %v3764_v53  ;;  %3604 = vmatmul.f32.gmra.mxu2 %v6705_v55  ;;  %v3139_v56 = vpop.f32.mrf.mxu0  ;;  %v6726_v55 = vld [vmem:[#allocation3 + $0x38] sm:$0xff] }
 0x64e   : > { %v3348_v57 = vpop.f32.mrf.mxu1  ;;  %3813 = vmatmul.f32.gmra.mxu3 %v6706_v58  ;;  %v6727_v58 = vld [vmem:[#allocation3 + $0x20] sm:$0xff] }
 0x64f   : > { %v3349_v59 = vadd.f32 %v3348_v57, %v3139_v56  ;;  %5873 = vst [vmem:[%s7421_s11 + $0x570] sm:$0xff] %v5617_v54 }
 0x650   : > { %v3557_v47 = vpop.f32.mrf.mxu2  ;;  %3186 = vmatmul.f32.gmra.mxu0 %v6707_v60 }
 0x651   : > { %3395 = vmatmul.f32.gmra.mxu1 %v6708_v62  ;;  %v3766_v63 = vpop.f32.mrf.mxu3  ;;  %v3558_v0 = vadd.f32 %v3557_v47, %v3349_v59  ;;  %v6728_v59 = vld [vmem:[#allocation3 + $0x28] sm:$0xff] }
 0x653   : > { %v3767_v1 = vadd.f32 %v3766_v63, %v3558_v0  ;;  %v6729_v0 = vld [vmem:[#allocation3 + $0x50] sm:$0xff] }
 0x655   : > { %v5621_v2 = vadd.f32 %v7808_v61, %v3767_v1  ;;  %3607 = vmatmul.f32.gmra.mxu2 %v6709_v3  ;;  %v3142_v4 = vpop.f32.mrf.mxu0  ;;  %v6730_v3 = vld [vmem:[#allocation3 + $0x58] sm:$0xff] }
 0x656   : > { %v3351_v5 = vpop.f32.mrf.mxu1  ;;  %3816 = vmatmul.f32.gmra.mxu3 %v6710_v6  ;;  %v6731_v6 = vld [vmem:[#allocation3 + $0x40] sm:$0xff] }
 0x657   : > { %v3352_v7 = vadd.f32 %v3351_v5, %v3142_v4  ;;  %5877 = vst [vmem:[%s7421_s11 + $0x590] sm:$0xff] %v5621_v2 }
 0x658   : > { %v3560_v8 = vpop.f32.mrf.mxu2  ;;  %3189 = vmatmul.f32.gmra.mxu0 %v6711_v9 }
 0x659   : > { %3398 = vmatmul.f32.gmra.mxu1 %v6712_v10  ;;  %v3769_v11 = vpop.f32.mrf.mxu3  ;;  %v3561_v12 = vadd.f32 %v3560_v8, %v3352_v7  ;;  %v6732_v7 = vld [vmem:[#allocation3 + $0x48] sm:$0xff] }
 0x65b   : > { %v3770_v13 = vadd.f32 %v3769_v11, %v3561_v12  ;;  %v6733_v12 = vld [vmem:[#allocation3 + $0x70] sm:$0xff] }
 0x65d   : > { %v5625_v14 = vadd.f32 %v7808_v61, %v3770_v13  ;;  %3610 = vmatmul.f32.gmra.mxu2 %v6713_v15  ;;  %v3145_v16 = vpop.f32.mrf.mxu0  ;;  %v6734_v15 = vld [vmem:[#allocation3 + $0x78] sm:$0xff] }
 0x65e   : > { %v3354_v17 = vpop.f32.mrf.mxu1  ;;  %3819 = vmatmul.f32.gmra.mxu3 %v6714_v18  ;;  %v6735_v18 = vld [vmem:[#allocation3 + $0x60] sm:$0xff] }
 0x65f   : > { %v3355_v19 = vadd.f32 %v3354_v17, %v3145_v16  ;;  %5881 = vst [vmem:[%s7421_s11 + $0x5b0] sm:$0xff] %v5625_v14 }
 0x660   : > { %v3563_v20 = vpop.f32.mrf.mxu2  ;;  %3192 = vmatmul.f32.gmra.mxu0 %v6715_v21 }
 0x661   : > { %3401 = vmatmul.f32.gmra.mxu1 %v6716_v22  ;;  %v3772_v23 = vpop.f32.mrf.mxu3  ;;  %v3564_v24 = vadd.f32 %v3563_v20, %v3355_v19  ;;  %v6736_v19 = vld [vmem:[#allocation3 + $0x68] sm:$0xff] }
 0x663   : > { %v3773_v25 = vadd.f32 %v3772_v23, %v3564_v24  ;;  %v6737_v24 = vld [vmem:[#allocation3 + $0x90] sm:$0xff] }
 0x665   : > { %v5629_v26 = vadd.f32 %v7808_v61, %v3773_v25  ;;  %3613 = vmatmul.f32.gmra.mxu2 %v6717_v27  ;;  %v3148_v28 = vpop.f32.mrf.mxu0  ;;  %v6738_v27 = vld [vmem:[#allocation3 + $0x98] sm:$0xff] }
 0x666   : > { %v3357_v29 = vpop.f32.mrf.mxu1  ;;  %3822 = vmatmul.f32.gmra.mxu3 %v6718_v30  ;;  %v6739_v30 = vld [vmem:[#allocation3 + $0x80] sm:$0xff] }
 0x667   : > { %v3358_v31 = vadd.f32 %v3357_v29, %v3148_v28  ;;  %5885 = vst [vmem:[%s7421_s11 + $0x5d0] sm:$0xff] %v5629_v26 }
 0x668   : > { %v3566_v32 = vpop.f32.mrf.mxu2  ;;  %3195 = vmatmul.f32.gmra.mxu0 %v6719_v34 }
 0x669   : > { %3404 = vmatmul.f32.gmra.mxu1 %v6720_v35  ;;  %v3775_v36 = vpop.f32.mrf.mxu3  ;;  %v3567_v37 = vadd.f32 %v3566_v32, %v3358_v31  ;;  %v6740_v31 = vld [vmem:[#allocation3 + $0x88] sm:$0xff] }
 0x66b   : > { %v3776_v38 = vadd.f32 %v3775_v36, %v3567_v37  ;;  %v6741_v37 = vld [vmem:[#allocation3 + $0xb0] sm:$0xff] }
 0x66d   : > { %v5633_v39 = vadd.f32 %v7808_v61, %v3776_v38  ;;  %4260 = vmatmul.f32.vlgmr.msrb.gmra.mxu2 %v6721_v40  ;;  %v3151_v41 = vpop.f32.mrf.mxu0  ;;  %v6742_v40 = vld [vmem:[#allocation3 + $0xb8] sm:$0xff] }
 0x66e   : > { %v3360_v42 = vpop.f32.mrf.mxu1  ;;  %4469 = vmatmul.f32.vlgmr.msrb.gmra.mxu3 %v6722_v43  ;;  %v6743_v43 = vld [vmem:[#allocation3 + $0xa0] sm:$0xff] }
 0x66f   : > { %v3361_v44 = vadd.f32 %v3360_v42, %v3151_v41  ;;  %5889 = vst [vmem:[%s7421_s11 + $0x5f0] sm:$0xff] %v5633_v39 }
 0x670   : > { %v3569_v45 = vpop.f32.mrf.mxu2  ;;  %3842 = vmatmul.f32.vlgmr.msrb.gmra.mxu0 %v6723_v33 }
 0x671   : > { %4051 = vmatmul.f32.vlgmr.msrb.gmra.mxu1 %v6724_v46  ;;  %v3778_v48 = vpop.f32.mrf.mxu3  ;;  %v3570_v49 = vadd.f32 %v3569_v45, %v3361_v44  ;;  %v6744_v44 = vld [vmem:[#allocation3 + $0xa8] sm:$0xff] }
 0x673   : > { %v3779_v50 = vadd.f32 %v3778_v48, %v3570_v49  ;;  %v6745_v49 = vld [vmem:[#allocation3 + $0xd0] sm:$0xff] }
 0x675   : > { %v5637_v51 = vadd.f32 %v7808_v61, %v3779_v50  ;;  %4263 = vmatmul.f32.gmra.mxu2 %v6725_v52  ;;  %v3154_v53 = vpop.f32.mrf.mxu0  ;;  %v6746_v52 = vld [vmem:[#allocation3 + $0xd8] sm:$0xff] }
 0x676   : > { %v3363_v54 = vpop.f32.mrf.mxu1  ;;  %4472 = vmatmul.f32.gmra.mxu3 %v6726_v55  ;;  %v6747_v55 = vld [vmem:[#allocation3 + $0xc0] sm:$0xff] }
 0x677   : > { %v3364_v56 = vadd.f32 %v3363_v54, %v3154_v53  ;;  %5893 = vst [vmem:[%s7421_s11 + $0x610] sm:$0xff] %v5637_v51 }
 0x678   : > { %v3572_v57 = vpop.f32.mrf.mxu2  ;;  %3845 = vmatmul.f32.gmra.mxu0 %v6727_v58 }
 0x679   : > { %4054 = vmatmul.f32.gmra.mxu1 %v6728_v59  ;;  %v3781_v47 = vpop.f32.mrf.mxu3  ;;  %v3573_v60 = vadd.f32 %v3572_v57, %v3364_v56  ;;  %v6748_v56 = vld [vmem:[#allocation3 + $0xc8] sm:$0xff] }
 0x67b   : > { %v3782_v62 = vadd.f32 %v3781_v47, %v3573_v60  ;;  %v6749_v60 = vld [vmem:[#allocation3 + $0xf0] sm:$0xff] }
 0x67d   : > { %v5641_v63 = vadd.f32 %v7808_v61, %v3782_v62  ;;  %4266 = vmatmul.f32.gmra.mxu2 %v6729_v0  ;;  %v3157_v1 = vpop.f32.mrf.mxu0  ;;  %v6750_v0 = vld [vmem:[#allocation3 + $0xf8] sm:$0xff] }
 0x67e   : > { %v3366_v2 = vpop.f32.mrf.mxu1  ;;  %4475 = vmatmul.f32.gmra.mxu3 %v6730_v3  ;;  %v6751_v3 = vld [vmem:[#allocation3 + $0xe0] sm:$0xff] }
 0x67f   : > { %v3367_v4 = vadd.f32 %v3366_v2, %v3157_v1  ;;  %5897 = vst [vmem:[%s7421_s11 + $0x630] sm:$0xff] %v5641_v63 }
 0x680   : > { %v3575_v5 = vpop.f32.mrf.mxu2  ;;  %3848 = vmatmul.f32.gmra.mxu0 %v6731_v6 }
 0x681   : > { %4057 = vmatmul.f32.gmra.mxu1 %v6732_v7  ;;  %v3784_v8 = vpop.f32.mrf.mxu3  ;;  %v3576_v9 = vadd.f32 %v3575_v5, %v3367_v4  ;;  %v6752_v4 = vld [vmem:[#allocation3 + $0xe8] sm:$0xff] }
 0x683   : > { %v3785_v10 = vadd.f32 %v3784_v8, %v3576_v9  ;;  %v6753_v9 = vld [vmem:[#allocation3 + $0x110] sm:$0xff] }
 0x685   : > { %v5645_v11 = vadd.f32 %v7808_v61, %v3785_v10  ;;  %4269 = vmatmul.f32.gmra.mxu2 %v6733_v12  ;;  %v3160_v13 = vpop.f32.mrf.mxu0  ;;  %v6754_v12 = vld [vmem:[#allocation3 + $0x118] sm:$0xff] }
 0x686   : > { %v3369_v14 = vpop.f32.mrf.mxu1  ;;  %4478 = vmatmul.f32.gmra.mxu3 %v6734_v15  ;;  %v6755_v15 = vld [vmem:[#allocation3 + $0x100] sm:$0xff] }
 0x687   : > { %v3370_v16 = vadd.f32 %v3369_v14, %v3160_v13  ;;  %5901 = vst [vmem:[%s7421_s11 + $0x650] sm:$0xff] %v5645_v11 }
 0x688   : > { %v3578_v17 = vpop.f32.mrf.mxu2  ;;  %3851 = vmatmul.f32.gmra.mxu0 %v6735_v18 }
 0x689   : > { %4060 = vmatmul.f32.gmra.mxu1 %v6736_v19  ;;  %v3787_v20 = vpop.f32.mrf.mxu3  ;;  %v3579_v21 = vadd.f32 %v3578_v17, %v3370_v16  ;;  %v6756_v16 = vld [vmem:[#allocation3 + $0x108] sm:$0xff] }
 0x68b   : > { %v3788_v22 = vadd.f32 %v3787_v20, %v3579_v21  ;;  %v6757_v21 = vld [vmem:[#allocation3 + $0x130] sm:$0xff] }
 0x68d   : > { %v5649_v23 = vadd.f32 %v7808_v61, %v3788_v22  ;;  %4272 = vmatmul.f32.gmra.mxu2 %v6737_v24  ;;  %v3163_v25 = vpop.f32.mrf.mxu0  ;;  %v6758_v24 = vld [vmem:[#allocation3 + $0x138] sm:$0xff] }
 0x68e   : > { %v3372_v26 = vpop.f32.mrf.mxu1  ;;  %4481 = vmatmul.f32.gmra.mxu3 %v6738_v27  ;;  %v6759_v27 = vld [vmem:[#allocation3 + $0x120] sm:$0xff] }
 0x68f   : > { %v3373_v28 = vadd.f32 %v3372_v26, %v3163_v25  ;;  %5905 = vst [vmem:[%s7421_s11 + $0x670] sm:$0xff] %v5649_v23 }
 0x690   : > { %v3581_v29 = vpop.f32.mrf.mxu2  ;;  %3854 = vmatmul.f32.gmra.mxu0 %v6739_v30 }
 0x691   : > { %4063 = vmatmul.f32.gmra.mxu1 %v6740_v31  ;;  %v3790_v32 = vpop.f32.mrf.mxu3  ;;  %v3582_v34 = vadd.f32 %v3581_v29, %v3373_v28  ;;  %v6760_v28 = vld [vmem:[#allocation3 + $0x128] sm:$0xff] }
 0x693   : > { %v3791_v35 = vadd.f32 %v3790_v32, %v3582_v34  ;;  %v6761_v34 = vld [vmem:[#allocation3 + $0x150] sm:$0xff] }
 0x695   : > { %v5653_v36 = vadd.f32 %v7808_v61, %v3791_v35  ;;  %4275 = vmatmul.f32.gmra.mxu2 %v6741_v37  ;;  %v3166_v38 = vpop.f32.mrf.mxu0  ;;  %v6762_v37 = vld [vmem:[#allocation3 + $0x158] sm:$0xff] }
 0x696   : > { %v3375_v39 = vpop.f32.mrf.mxu1  ;;  %4484 = vmatmul.f32.gmra.mxu3 %v6742_v40  ;;  %v6763_v40 = vld [vmem:[#allocation3 + $0x140] sm:$0xff] }
 0x697   : > { %v3376_v41 = vadd.f32 %v3375_v39, %v3166_v38  ;;  %5909 = vst [vmem:[%s7421_s11 + $0x690] sm:$0xff] %v5653_v36 }
 0x698   : > { %v3584_v42 = vpop.f32.mrf.mxu2  ;;  %3857 = vmatmul.f32.gmra.mxu0 %v6743_v43 }
 0x699   : > { %4066 = vmatmul.f32.gmra.mxu1 %v6744_v44  ;;  %v3793_v45 = vpop.f32.mrf.mxu3  ;;  %v3585_v33 = vadd.f32 %v3584_v42, %v3376_v41  ;;  %v6764_v41 = vld [vmem:[#allocation3 + $0x148] sm:$0xff] }
 0x69b   : > { %v3794_v46 = vadd.f32 %v3793_v45, %v3585_v33  ;;  %v6765_v33 = vld [vmem:[#allocation3 + $0x170] sm:$0xff] }
 0x69d   : > { %v5657_v48 = vadd.f32 %v7808_v61, %v3794_v46  ;;  %4278 = vmatmul.f32.gmra.mxu2 %v6745_v49  ;;  %v3169_v50 = vpop.f32.mrf.mxu0  ;;  %v6766_v49 = vld [vmem:[#allocation3 + $0x178] sm:$0xff] }
 0x69e   : > { %v3378_v51 = vpop.f32.mrf.mxu1  ;;  %4487 = vmatmul.f32.gmra.mxu3 %v6746_v52  ;;  %v6767_v52 = vld [vmem:[#allocation3 + $0x160] sm:$0xff] }
 0x69f   : > { %v3379_v53 = vadd.f32 %v3378_v51, %v3169_v50  ;;  %5913 = vst [vmem:[%s7421_s11 + $0x6b0] sm:$0xff] %v5657_v48 }
 0x6a0   : > { %v3587_v54 = vpop.f32.mrf.mxu2  ;;  %3860 = vmatmul.f32.gmra.mxu0 %v6747_v55 }
 0x6a1   : > { %4069 = vmatmul.f32.gmra.mxu1 %v6748_v56  ;;  %v3796_v57 = vpop.f32.mrf.mxu3  ;;  %v3588_v58 = vadd.f32 %v3587_v54, %v3379_v53  ;;  %v6768_v53 = vld [vmem:[#allocation3 + $0x168] sm:$0xff] }
 0x6a3   : > { %v3797_v59 = vadd.f32 %v3796_v57, %v3588_v58  ;;  %v6769_v58 = vld [vmem:[#allocation3 + $0x190] sm:$0xff] }
 0x6a5   : > { %v5661_v47 = vadd.f32 %v7808_v61, %v3797_v59  ;;  %4281 = vmatmul.f32.gmra.mxu2 %v6749_v60  ;;  %v3172_v62 = vpop.f32.mrf.mxu0  ;;  %v6770_v60 = vld [vmem:[#allocation3 + $0x198] sm:$0xff] }
 0x6a6   : > { %v3381_v63 = vpop.f32.mrf.mxu1  ;;  %4490 = vmatmul.f32.gmra.mxu3 %v6750_v0  ;;  %v6771_v0 = vld [vmem:[#allocation3 + $0x180] sm:$0xff] }
 0x6a7   : > { %v3382_v1 = vadd.f32 %v3381_v63, %v3172_v62  ;;  %5917 = vst [vmem:[%s7421_s11 + $0x6d0] sm:$0xff] %v5661_v47 }
 0x6a8   : > { %v3590_v2 = vpop.f32.mrf.mxu2  ;;  %3863 = vmatmul.f32.gmra.mxu0 %v6751_v3 }
 0x6a9   : > { %4072 = vmatmul.f32.gmra.mxu1 %v6752_v4  ;;  %v3799_v5 = vpop.f32.mrf.mxu3  ;;  %v3591_v6 = vadd.f32 %v3590_v2, %v3382_v1  ;;  %v6772_v1 = vld [vmem:[#allocation3 + $0x188] sm:$0xff] }
 0x6ab   : > { %v3800_v7 = vadd.f32 %v3799_v5, %v3591_v6  ;;  %v6773_v6 = vld [vmem:[#allocation3 + $0x1b0] sm:$0xff] }
 0x6ad   : > { %v5665_v8 = vadd.f32 %v7808_v61, %v3800_v7  ;;  %4284 = vmatmul.f32.gmra.mxu2 %v6753_v9  ;;  %v3175_v10 = vpop.f32.mrf.mxu0  ;;  %v6774_v9 = vld [vmem:[#allocation3 + $0x1b8] sm:$0xff] }
 0x6ae   : > { %v3384_v11 = vpop.f32.mrf.mxu1  ;;  %4493 = vmatmul.f32.gmra.mxu3 %v6754_v12  ;;  %v6775_v12 = vld [vmem:[#allocation3 + $0x1a0] sm:$0xff] }
 0x6af   : > { %v3385_v13 = vadd.f32 %v3384_v11, %v3175_v10  ;;  %5921 = vst [vmem:[%s7421_s11 + $0x6f0] sm:$0xff] %v5665_v8 }
 0x6b0   : > { %v3593_v14 = vpop.f32.mrf.mxu2  ;;  %3866 = vmatmul.f32.gmra.mxu0 %v6755_v15 }
 0x6b1   : > { %4075 = vmatmul.f32.gmra.mxu1 %v6756_v16  ;;  %v3802_v17 = vpop.f32.mrf.mxu3  ;;  %v3594_v18 = vadd.f32 %v3593_v14, %v3385_v13  ;;  %v6776_v13 = vld [vmem:[#allocation3 + $0x1a8] sm:$0xff] }
 0x6b3   : > { %v3803_v19 = vadd.f32 %v3802_v17, %v3594_v18  ;;  %v6777_v18 = vld [vmem:[#allocation3 + $0x1d0] sm:$0xff] }
 0x6b5   : > { %v5669_v20 = vadd.f32 %v7808_v61, %v3803_v19  ;;  %4287 = vmatmul.f32.gmra.mxu2 %v6757_v21  ;;  %v3178_v22 = vpop.f32.mrf.mxu0  ;;  %v6778_v21 = vld [vmem:[#allocation3 + $0x1d8] sm:$0xff] }
 0x6b6   : > { %v3387_v23 = vpop.f32.mrf.mxu1  ;;  %4496 = vmatmul.f32.gmra.mxu3 %v6758_v24  ;;  %v6779_v24 = vld [vmem:[#allocation3 + $0x1c0] sm:$0xff] }
 0x6b7   : > { %v3388_v25 = vadd.f32 %v3387_v23, %v3178_v22  ;;  %5925 = vst [vmem:[%s7421_s11 + $0x710] sm:$0xff] %v5669_v20 }
 0x6b8   : > { %v3596_v26 = vpop.f32.mrf.mxu2  ;;  %3869 = vmatmul.f32.gmra.mxu0 %v6759_v27 }
 0x6b9   : > { %4078 = vmatmul.f32.gmra.mxu1 %v6760_v28  ;;  %v3805_v29 = vpop.f32.mrf.mxu3  ;;  %v3597_v30 = vadd.f32 %v3596_v26, %v3388_v25  ;;  %v6780_v25 = vld [vmem:[#allocation3 + $0x1c8] sm:$0xff] }
 0x6bb   : > { %v3806_v31 = vadd.f32 %v3805_v29, %v3597_v30  ;;  %v6781_v30 = vld [vmem:[#allocation3 + $0x1f0] sm:$0xff] }
 0x6bd   : > { %v5673_v32 = vadd.f32 %v7808_v61, %v3806_v31  ;;  %4290 = vmatmul.f32.gmra.mxu2 %v6761_v34  ;;  %v3181_v35 = vpop.f32.mrf.mxu0  ;;  %v6782_v34 = vld [vmem:[#allocation3 + $0x1f8] sm:$0xff] }
 0x6be   : > { %v3390_v36 = vpop.f32.mrf.mxu1  ;;  %4499 = vmatmul.f32.gmra.mxu3 %v6762_v37  ;;  %v6783_v37 = vld [vmem:[#allocation3 + $0x1e0] sm:$0xff] }
 0x6bf   : > { %v3391_v38 = vadd.f32 %v3390_v36, %v3181_v35  ;;  %5929 = vst [vmem:[%s7421_s11 + $0x730] sm:$0xff] %v5673_v32 }
 0x6c0   : > { %v3599_v39 = vpop.f32.mrf.mxu2  ;;  %3872 = vmatmul.f32.gmra.mxu0 %v6763_v40 }
 0x6c1   : > { %4081 = vmatmul.f32.gmra.mxu1 %v6764_v41  ;;  %v3808_v42 = vpop.f32.mrf.mxu3  ;;  %v3600_v43 = vadd.f32 %v3599_v39, %v3391_v38  ;;  %v6784_v38 = vld [vmem:[#allocation3 + $0x1e8] sm:$0xff] }
 0x6c3   : > { %v3809_v44 = vadd.f32 %v3808_v42, %v3600_v43  ;;  %v6785_v43 = vld [vmem:[#allocation3 + $0x210] sm:$0xff] }
 0x6c5   : > { %v5677_v45 = vadd.f32 %v7808_v61, %v3809_v44  ;;  %4293 = vmatmul.f32.gmra.mxu2 %v6765_v33  ;;  %v3184_v46 = vpop.f32.mrf.mxu0  ;;  %v6786_v33 = vld [vmem:[#allocation3 + $0x218] sm:$0xff] }
 0x6c6   : > { %v3393_v48 = vpop.f32.mrf.mxu1  ;;  %4502 = vmatmul.f32.gmra.mxu3 %v6766_v49  ;;  %v6787_v49 = vld [vmem:[#allocation3 + $0x200] sm:$0xff] }
 0x6c7   : > { %v3394_v50 = vadd.f32 %v3393_v48, %v3184_v46  ;;  %5933 = vst [vmem:[%s7421_s11 + $0x750] sm:$0xff] %v5677_v45 }
 0x6c8   : > { %v3602_v51 = vpop.f32.mrf.mxu2  ;;  %3875 = vmatmul.f32.gmra.mxu0 %v6767_v52 }
 0x6c9   : > { %4084 = vmatmul.f32.gmra.mxu1 %v6768_v53  ;;  %v3811_v54 = vpop.f32.mrf.mxu3  ;;  %v3603_v55 = vadd.f32 %v3602_v51, %v3394_v50  ;;  %v6788_v50 = vld [vmem:[#allocation3 + $0x208] sm:$0xff]  ;;  %v6789_v53 = vld [vmem:[%s7409_s10] sm:$0xf] }
 0x6cb   : > { %v3812_v56 = vadd.f32 %v3811_v54, %v3603_v55  ;;  %v7981_v54 = vperm.slane %v6789_v53, 3  ;;  %v6810_v53 = vld [vmem:[#allocation3 + $0x2d0] sm:$0xff] }
 0x6cd   : > { %v5681_v57 = vadd.f32 %v7808_v61, %v3812_v56  ;;  %4296 = vmatmul.f32.gmra.mxu2 %v6769_v58  ;;  %v3187_v59 = vpop.f32.mrf.mxu0  ;;  %v6790_v56 = vld [vmem:[#allocation3 + $0x230] sm:$0xff] }
 0x6ce   : > { %v3396_v47 = vpop.f32.mrf.mxu1  ;;  %4505 = vmatmul.f32.gmra.mxu3 %v6770_v60 }
 0x6cf   : > { %v3397_v62 = vadd.f32 %v3396_v47, %v3187_v59  ;;  %5937 = vst [vmem:[%s7421_s11 + $0x770] sm:$0xff] %v5681_v57  ;;  %v6791_v59 = vld [vmem:[#allocation3 + $0x238] sm:$0xff] }
 0x6d0   : > { %v3605_v63 = vpop.f32.mrf.mxu2  ;;  %3878 = vmatmul.f32.gmra.mxu0 %v6771_v0 }
 0x6d1   : > { %4087 = vmatmul.f32.gmra.mxu1 %v6772_v1  ;;  %v3814_v2 = vpop.f32.mrf.mxu3  ;;  %v3606_v3 = vadd.f32 %v3605_v63, %v3397_v62  ;;  %v6792_v62 = vld [vmem:[#allocation3 + $0x220] sm:$0xff]  ;;  %v6793_v63 = vld [vmem:[#allocation3 + $0x228] sm:$0xff] }
 0x6d3   : > { %v3815_v4 = vadd.f32 %v3814_v2, %v3606_v3 }
 0x6d5   : > { %v5685_v5 = vadd.f32 %v7808_v61, %v3815_v4  ;;  %4299 = vmatmul.f32.gmra.mxu2 %v6773_v6  ;;  %v3190_v7 = vpop.f32.mrf.mxu0  ;;  %v6794_v4 = vld [vmem:[#allocation3 + $0x250] sm:$0xff] }
 0x6d6   : > { %v3399_v8 = vpop.f32.mrf.mxu1  ;;  %4508 = vmatmul.f32.gmra.mxu3 %v6774_v9 }
 0x6d7   : > { %v3400_v10 = vadd.f32 %v3399_v8, %v3190_v7  ;;  %5941 = vst [vmem:[%s7421_s11 + $0x790] sm:$0xff] %v5685_v5  ;;  %v6795_v7 = vld [vmem:[#allocation3 + $0x258] sm:$0xff] }
 0x6d8   : > { %v3608_v11 = vpop.f32.mrf.mxu2  ;;  %3881 = vmatmul.f32.gmra.mxu0 %v6775_v12 }
 0x6d9   : > { %4090 = vmatmul.f32.gmra.mxu1 %v6776_v13  ;;  %v3817_v14 = vpop.f32.mrf.mxu3  ;;  %v3609_v15 = vadd.f32 %v3608_v11, %v3400_v10  ;;  %v6796_v10 = vld [vmem:[#allocation3 + $0x240] sm:$0xff]  ;;  %v6797_v11 = vld [vmem:[#allocation3 + $0x248] sm:$0xff] }
 0x6db   : > { %v3818_v16 = vadd.f32 %v3817_v14, %v3609_v15 }
 0x6dd   : > { %v5689_v17 = vadd.f32 %v7808_v61, %v3818_v16  ;;  %4302 = vmatmul.f32.gmra.mxu2 %v6777_v18  ;;  %v3193_v19 = vpop.f32.mrf.mxu0  ;;  %v6798_v16 = vld [vmem:[#allocation3 + $0x270] sm:$0xff] }
 0x6de   : > { %v3402_v20 = vpop.f32.mrf.mxu1  ;;  %4511 = vmatmul.f32.gmra.mxu3 %v6778_v21 }
 0x6df   : > { %v3403_v22 = vadd.f32 %v3402_v20, %v3193_v19  ;;  %5945 = vst [vmem:[%s7421_s11 + $0x7b0] sm:$0xff] %v5689_v17  ;;  %v6799_v19 = vld [vmem:[#allocation3 + $0x278] sm:$0xff] }
 0x6e0   : > { %v3611_v23 = vpop.f32.mrf.mxu2  ;;  %3884 = vmatmul.f32.gmra.mxu0 %v6779_v24 }
 0x6e1   : > { %4093 = vmatmul.f32.gmra.mxu1 %v6780_v25  ;;  %v3820_v26 = vpop.f32.mrf.mxu3  ;;  %v3612_v27 = vadd.f32 %v3611_v23, %v3403_v22  ;;  %v6800_v22 = vld [vmem:[#allocation3 + $0x260] sm:$0xff]  ;;  %v6801_v23 = vld [vmem:[#allocation3 + $0x268] sm:$0xff] }
 0x6e3   : > { %v3821_v28 = vadd.f32 %v3820_v26, %v3612_v27 }
 0x6e5   : > { %v5693_v29 = vadd.f32 %v7808_v61, %v3821_v28  ;;  %4305 = vmatmul.f32.gmra.mxu2 %v6781_v30  ;;  %v3196_v31 = vpop.f32.mrf.mxu0  ;;  %v6802_v28 = vld [vmem:[#allocation3 + $0x290] sm:$0xff] }
 0x6e6   : > { %v3405_v32 = vpop.f32.mrf.mxu1  ;;  %4514 = vmatmul.f32.gmra.mxu3 %v6782_v34 }
 0x6e7   : > { %v3406_v35 = vadd.f32 %v3405_v32, %v3196_v31  ;;  %5949 = vst [vmem:[%s7421_s11 + $0x7d0] sm:$0xff] %v5693_v29  ;;  %v6803_v31 = vld [vmem:[#allocation3 + $0x298] sm:$0xff] }
 0x6e8   : > { %v3614_v36 = vpop.f32.mrf.mxu2  ;;  %3887 = vmatmul.f32.gmra.mxu0 %v6783_v37 }
 0x6e9   : > { %4096 = vmatmul.f32.gmra.mxu1 %v6784_v38  ;;  %v3823_v39 = vpop.f32.mrf.mxu3  ;;  %v3615_v40 = vadd.f32 %v3614_v36, %v3406_v35  ;;  %v6804_v35 = vld [vmem:[#allocation3 + $0x280] sm:$0xff]  ;;  %v6805_v36 = vld [vmem:[#allocation3 + $0x288] sm:$0xff] }
 0x6eb   : > { %v3824_v41 = vadd.f32 %v3823_v39, %v3615_v40 }
 0x6ed   : > { %v5697_v42 = vadd.f32 %v7808_v61, %v3824_v41  ;;  %4308 = vmatmul.f32.gmra.mxu2 %v6785_v43  ;;  %v3843_v44 = vpop.f32.mrf.mxu0  ;;  %v6806_v41 = vld [vmem:[#allocation3 + $0x2b0] sm:$0xff] }
 0x6ee   : > { %v4052_v45 = vpop.f32.mrf.mxu1  ;;  %4517 = vmatmul.f32.gmra.mxu3 %v6786_v33 }
 0x6ef   : > { %v4053_v46 = vadd.f32 %v4052_v45, %v3843_v44  ;;  %5953 = vst [vmem:[%s7421_s11 + $0x7f0] sm:$0xff] %v5697_v42  ;;  %v6807_v44 = vld [vmem:[#allocation3 + $0x2b8] sm:$0xff] }
 0x6f0   : > { %v4261_v48 = vpop.f32.mrf.mxu2  ;;  %3890 = vmatmul.f32.gmra.mxu0 %v6787_v49 }
 0x6f1   : > { %4099 = vmatmul.f32.gmra.mxu1 %v6788_v50  ;;  %v4470_v51 = vpop.f32.mrf.mxu3  ;;  %v4262_v52 = vadd.f32 %v4261_v48, %v4053_v46  ;;  %v6808_v46 = vld [vmem:[#allocation3 + $0x2a0] sm:$0xff]  ;;  %v6809_v48 = vld [vmem:[#allocation3 + $0x2a8] sm:$0xff] }
 0x6f3   : > { %v4471_v61 = vadd.f32 %v4470_v51, %v4262_v52 }
 0x6f5   : > { %v5446_v55 = vadd.f32 %v7981_v54, %v4471_v61  ;;  %4311 = vmatmul.f32.gmra.mxu2 %v6790_v56  ;;  %v3846_v57 = vpop.f32.mrf.mxu0  ;;  %v6811_v56 = vld [vmem:[#allocation3 + $0x2d8] sm:$0xff] }
 0x6f6   : > { %v4055_v58 = vpop.f32.mrf.mxu1  ;;  %4520 = vmatmul.f32.gmra.mxu3 %v6791_v59  ;;  %v6812_v59 = vld [vmem:[#allocation3 + $0x2c0] sm:$0xff] }
 0x6f7   : > { %v4056_v47 = vadd.f32 %v4055_v58, %v3846_v57  ;;  %5702 = vst [vmem:[%s7421_s11 + $0x18] sm:$0xff] %v5446_v55 }
 0x6f8   : > { %v4264_v60 = vpop.f32.mrf.mxu2  ;;  %3893 = vmatmul.f32.gmra.mxu0 %v6792_v62 }
 0x6f9   : > { %4102 = vmatmul.f32.gmra.mxu1 %v6793_v63  ;;  %v4473_v0 = vpop.f32.mrf.mxu3  ;;  %v4265_v1 = vadd.f32 %v4264_v60, %v4056_v47  ;;  %v6813_v47 = vld [vmem:[#allocation3 + $0x2c8] sm:$0xff] }
 0x6fb   : > { %v4474_v2 = vadd.f32 %v4473_v0, %v4265_v1  ;;  %v6814_v1 = vld [vmem:[#allocation3 + $0x2f0] sm:$0xff] }
 0x6fd   : > { %v5450_v3 = vadd.f32 %v7981_v54, %v4474_v2  ;;  %4314 = vmatmul.f32.gmra.mxu2 %v6794_v4  ;;  %v3849_v5 = vpop.f32.mrf.mxu0  ;;  %v6815_v4 = vld [vmem:[#allocation3 + $0x2f8] sm:$0xff] }
 0x6fe   : > { %v4058_v6 = vpop.f32.mrf.mxu1  ;;  %4523 = vmatmul.f32.gmra.mxu3 %v6795_v7  ;;  %v6816_v7 = vld [vmem:[#allocation3 + $0x2e0] sm:$0xff] }
 0x6ff   : > { %v4059_v8 = vadd.f32 %v4058_v6, %v3849_v5  ;;  %5706 = vst [vmem:[%s7421_s11 + $0x38] sm:$0xff] %v5450_v3 }
 0x700   : > { %v4267_v9 = vpop.f32.mrf.mxu2  ;;  %3896 = vmatmul.f32.gmra.mxu0 %v6796_v10 }
 0x701   : > { %4105 = vmatmul.f32.gmra.mxu1 %v6797_v11  ;;  %v4476_v12 = vpop.f32.mrf.mxu3  ;;  %v4268_v13 = vadd.f32 %v4267_v9, %v4059_v8  ;;  %v6817_v8 = vld [vmem:[#allocation3 + $0x2e8] sm:$0xff] }
 0x703   : > { %v4477_v14 = vadd.f32 %v4476_v12, %v4268_v13  ;;  %v6818_v13 = vld [vmem:[#allocation3 + $0x310] sm:$0xff] }
 0x705   : > { %v5454_v15 = vadd.f32 %v7981_v54, %v4477_v14  ;;  %4317 = vmatmul.f32.gmra.mxu2 %v6798_v16  ;;  %v3852_v17 = vpop.f32.mrf.mxu0  ;;  %v6819_v16 = vld [vmem:[#allocation3 + $0x318] sm:$0xff] }
 0x706   : > { %v4061_v18 = vpop.f32.mrf.mxu1  ;;  %4526 = vmatmul.f32.gmra.mxu3 %v6799_v19  ;;  %v6820_v19 = vld [vmem:[#allocation3 + $0x300] sm:$0xff] }
 0x707   : > { %v4062_v20 = vadd.f32 %v4061_v18, %v3852_v17  ;;  %5710 = vst [vmem:[%s7421_s11 + $0x58] sm:$0xff] %v5454_v15 }
 0x708   : > { %v4270_v21 = vpop.f32.mrf.mxu2  ;;  %3899 = vmatmul.f32.gmra.mxu0 %v6800_v22 }
 0x709   : > { %4108 = vmatmul.f32.gmra.mxu1 %v6801_v23  ;;  %v4479_v24 = vpop.f32.mrf.mxu3  ;;  %v4271_v25 = vadd.f32 %v4270_v21, %v4062_v20  ;;  %v6821_v20 = vld [vmem:[#allocation3 + $0x308] sm:$0xff] }
 0x70b   : > { %v4480_v26 = vadd.f32 %v4479_v24, %v4271_v25  ;;  %v6822_v25 = vld [vmem:[#allocation3 + $0x330] sm:$0xff] }
 0x70d   : > { %v5458_v27 = vadd.f32 %v7981_v54, %v4480_v26  ;;  %4320 = vmatmul.f32.gmra.mxu2 %v6802_v28  ;;  %v3855_v29 = vpop.f32.mrf.mxu0  ;;  %v6823_v28 = vld [vmem:[#allocation3 + $0x338] sm:$0xff] }
 0x70e   : > { %v4064_v30 = vpop.f32.mrf.mxu1  ;;  %4529 = vmatmul.f32.gmra.mxu3 %v6803_v31  ;;  %v6824_v31 = vld [vmem:[#allocation3 + $0x320] sm:$0xff] }
 0x70f   : > { %v4065_v32 = vadd.f32 %v4064_v30, %v3855_v29  ;;  %5714 = vst [vmem:[%s7421_s11 + $0x78] sm:$0xff] %v5458_v27 }
 0x710   : > { %v4273_v34 = vpop.f32.mrf.mxu2  ;;  %3902 = vmatmul.f32.gmra.mxu0 %v6804_v35 }
 0x711   : > { %4111 = vmatmul.f32.gmra.mxu1 %v6805_v36  ;;  %v4482_v37 = vpop.f32.mrf.mxu3  ;;  %v4274_v38 = vadd.f32 %v4273_v34, %v4065_v32  ;;  %v6825_v32 = vld [vmem:[#allocation3 + $0x328] sm:$0xff] }
 0x713   : > { %v4483_v39 = vadd.f32 %v4482_v37, %v4274_v38  ;;  %v6826_v38 = vld [vmem:[#allocation3 + $0x350] sm:$0xff] }
 0x715   : > { %v5462_v40 = vadd.f32 %v7981_v54, %v4483_v39  ;;  %4323 = vmatmul.f32.gmra.mxu2 %v6806_v41  ;;  %v3858_v42 = vpop.f32.mrf.mxu0  ;;  %v6827_v41 = vld [vmem:[#allocation3 + $0x358] sm:$0xff] }
 0x716   : > { %v4067_v43 = vpop.f32.mrf.mxu1  ;;  %4532 = vmatmul.f32.gmra.mxu3 %v6807_v44  ;;  %v6828_v44 = vld [vmem:[#allocation3 + $0x340] sm:$0xff] }
 0x717   : > { %v4068_v45 = vadd.f32 %v4067_v43, %v3858_v42  ;;  %5718 = vst [vmem:[%s7421_s11 + $0x98] sm:$0xff] %v5462_v40 }
 0x718   : > { %v4276_v33 = vpop.f32.mrf.mxu2  ;;  %3905 = vmatmul.f32.gmra.mxu0 %v6808_v46 }
 0x719   : > { %4114 = vmatmul.f32.gmra.mxu1 %v6809_v48  ;;  %v4485_v49 = vpop.f32.mrf.mxu3  ;;  %v4277_v50 = vadd.f32 %v4276_v33, %v4068_v45  ;;  %v6829_v45 = vld [vmem:[#allocation3 + $0x348] sm:$0xff] }
 0x71b   : > { %v4486_v51 = vadd.f32 %v4485_v49, %v4277_v50  ;;  %v6830_v50 = vld [vmem:[#allocation3 + $0x370] sm:$0xff] }
 0x71d   : > { %v5466_v52 = vadd.f32 %v7981_v54, %v4486_v51  ;;  %4326 = vmatmul.f32.gmra.mxu2 %v6810_v53  ;;  %v3861_v61 = vpop.f32.mrf.mxu0  ;;  %v6831_v53 = vld [vmem:[#allocation3 + $0x378] sm:$0xff] }
 0x71e   : > { %v4070_v55 = vpop.f32.mrf.mxu1  ;;  %4535 = vmatmul.f32.gmra.mxu3 %v6811_v56  ;;  %v6832_v56 = vld [vmem:[#allocation3 + $0x360] sm:$0xff] }
 0x71f   : > { %v4071_v57 = vadd.f32 %v4070_v55, %v3861_v61  ;;  %5722 = vst [vmem:[%s7421_s11 + $0xb8] sm:$0xff] %v5466_v52 }
 0x720   : > { %v4279_v58 = vpop.f32.mrf.mxu2  ;;  %3908 = vmatmul.f32.gmra.mxu0 %v6812_v59 }
 0x721   : > { %4117 = vmatmul.f32.gmra.mxu1 %v6813_v47  ;;  %v4488_v60 = vpop.f32.mrf.mxu3  ;;  %v4280_v62 = vadd.f32 %v4279_v58, %v4071_v57  ;;  %v6833_v57 = vld [vmem:[#allocation3 + $0x368] sm:$0xff] }
 0x723   : > { %v4489_v63 = vadd.f32 %v4488_v60, %v4280_v62  ;;  %v6834_v62 = vld [vmem:[#allocation3 + $0x390] sm:$0xff] }
 0x725   : > { %v5470_v0 = vadd.f32 %v7981_v54, %v4489_v63  ;;  %4329 = vmatmul.f32.gmra.mxu2 %v6814_v1  ;;  %v3864_v2 = vpop.f32.mrf.mxu0  ;;  %v6835_v1 = vld [vmem:[#allocation3 + $0x398] sm:$0xff] }
 0x726   : > { %v4073_v3 = vpop.f32.mrf.mxu1  ;;  %4538 = vmatmul.f32.gmra.mxu3 %v6815_v4  ;;  %v6836_v4 = vld [vmem:[#allocation3 + $0x380] sm:$0xff] }
 0x727   : > { %v4074_v5 = vadd.f32 %v4073_v3, %v3864_v2  ;;  %5726 = vst [vmem:[%s7421_s11 + $0xd8] sm:$0xff] %v5470_v0 }
 0x728   : > { %v4282_v6 = vpop.f32.mrf.mxu2  ;;  %3911 = vmatmul.f32.gmra.mxu0 %v6816_v7 }
 0x729   : > { %4120 = vmatmul.f32.gmra.mxu1 %v6817_v8  ;;  %v4491_v9 = vpop.f32.mrf.mxu3  ;;  %v4283_v10 = vadd.f32 %v4282_v6, %v4074_v5  ;;  %v6837_v5 = vld [vmem:[#allocation3 + $0x388] sm:$0xff] }
 0x72b   : > { %v4492_v11 = vadd.f32 %v4491_v9, %v4283_v10  ;;  %v6838_v10 = vld [vmem:[#allocation3 + $0x3b0] sm:$0xff] }
 0x72d   : > { %v5474_v12 = vadd.f32 %v7981_v54, %v4492_v11  ;;  %4332 = vmatmul.f32.gmra.mxu2 %v6818_v13  ;;  %v3867_v14 = vpop.f32.mrf.mxu0  ;;  %v6839_v13 = vld [vmem:[#allocation3 + $0x3b8] sm:$0xff] }
 0x72e   : > { %v4076_v15 = vpop.f32.mrf.mxu1  ;;  %4541 = vmatmul.f32.gmra.mxu3 %v6819_v16  ;;  %v6840_v16 = vld [vmem:[#allocation3 + $0x3a0] sm:$0xff] }
 0x72f   : > { %v4077_v17 = vadd.f32 %v4076_v15, %v3867_v14  ;;  %5730 = vst [vmem:[%s7421_s11 + $0xf8] sm:$0xff] %v5474_v12 }
 0x730   : > { %v4285_v18 = vpop.f32.mrf.mxu2  ;;  %3914 = vmatmul.f32.gmra.mxu0 %v6820_v19 }
 0x731   : > { %4123 = vmatmul.f32.gmra.mxu1 %v6821_v20  ;;  %v4494_v21 = vpop.f32.mrf.mxu3  ;;  %v4286_v22 = vadd.f32 %v4285_v18, %v4077_v17  ;;  %v6841_v17 = vld [vmem:[#allocation3 + $0x3a8] sm:$0xff] }
 0x733   : > { %v4495_v23 = vadd.f32 %v4494_v21, %v4286_v22  ;;  %v6842_v22 = vld [vmem:[#allocation3 + $0x3d0] sm:$0xff] }
 0x735   : > { %v5478_v24 = vadd.f32 %v7981_v54, %v4495_v23  ;;  %4335 = vmatmul.f32.gmra.mxu2 %v6822_v25  ;;  %v3870_v26 = vpop.f32.mrf.mxu0  ;;  %v6843_v25 = vld [vmem:[#allocation3 + $0x3d8] sm:$0xff] }
 0x736   : > { %v4079_v27 = vpop.f32.mrf.mxu1  ;;  %4544 = vmatmul.f32.gmra.mxu3 %v6823_v28  ;;  %v6844_v28 = vld [vmem:[#allocation3 + $0x3c0] sm:$0xff] }
 0x737   : > { %v4080_v29 = vadd.f32 %v4079_v27, %v3870_v26  ;;  %5734 = vst [vmem:[%s7421_s11 + $0x118] sm:$0xff] %v5478_v24 }
 0x738   : > { %v4288_v30 = vpop.f32.mrf.mxu2  ;;  %3917 = vmatmul.f32.gmra.mxu0 %v6824_v31 }
 0x739   : > { %4126 = vmatmul.f32.gmra.mxu1 %v6825_v32  ;;  %v4497_v34 = vpop.f32.mrf.mxu3  ;;  %v4289_v35 = vadd.f32 %v4288_v30, %v4080_v29  ;;  %v6845_v29 = vld [vmem:[#allocation3 + $0x3c8] sm:$0xff] }
 0x73b   : > { %v4498_v36 = vadd.f32 %v4497_v34, %v4289_v35  ;;  %v6846_v35 = vld [vmem:[#allocation3 + $0x3f0] sm:$0xff] }
 0x73d   : > { %v5482_v37 = vadd.f32 %v7981_v54, %v4498_v36  ;;  %4338 = vmatmul.f32.gmra.mxu2 %v6826_v38  ;;  %v3873_v39 = vpop.f32.mrf.mxu0  ;;  %v6847_v38 = vld [vmem:[#allocation3 + $0x3f8] sm:$0xff] }
 0x73e   : > { %v4082_v40 = vpop.f32.mrf.mxu1  ;;  %4547 = vmatmul.f32.gmra.mxu3 %v6827_v41  ;;  %v6848_v41 = vld [vmem:[#allocation3 + $0x3e0] sm:$0xff] }
 0x73f   : > { %v4083_v42 = vadd.f32 %v4082_v40, %v3873_v39  ;;  %5738 = vst [vmem:[%s7421_s11 + $0x138] sm:$0xff] %v5482_v37 }
 0x740   : > { %v4291_v43 = vpop.f32.mrf.mxu2  ;;  %3920 = vmatmul.f32.gmra.mxu0 %v6828_v44 }
 0x741   : > { %4129 = vmatmul.f32.gmra.mxu1 %v6829_v45  ;;  %v4500_v33 = vpop.f32.mrf.mxu3  ;;  %v4292_v46 = vadd.f32 %v4291_v43, %v4083_v42  ;;  %v6849_v42 = vld [vmem:[#allocation3 + $0x3e8] sm:$0xff] }
 0x743   : > { %v4501_v48 = vadd.f32 %v4500_v33, %v4292_v46  ;;  %v6850_v46 = vld [vmem:[#allocation3 + $0x410] sm:$0xff] }
 0x745   : > { %v5486_v49 = vadd.f32 %v7981_v54, %v4501_v48  ;;  %4341 = vmatmul.f32.gmra.mxu2 %v6830_v50  ;;  %v3876_v51 = vpop.f32.mrf.mxu0  ;;  %v6851_v50 = vld [vmem:[#allocation3 + $0x418] sm:$0xff] }
 0x746   : > { %v4085_v52 = vpop.f32.mrf.mxu1  ;;  %4550 = vmatmul.f32.gmra.mxu3 %v6831_v53  ;;  %v6852_v53 = vld [vmem:[#allocation3 + $0x400] sm:$0xff] }
 0x747   : > { %v4086_v61 = vadd.f32 %v4085_v52, %v3876_v51  ;;  %5742 = vst [vmem:[%s7421_s11 + $0x158] sm:$0xff] %v5486_v49 }
 0x748   : > { %v4294_v55 = vpop.f32.mrf.mxu2  ;;  %3923 = vmatmul.f32.gmra.mxu0 %v6832_v56 }
 0x749   : > { %4132 = vmatmul.f32.gmra.mxu1 %v6833_v57  ;;  %v4503_v58 = vpop.f32.mrf.mxu3  ;;  %v4295_v59 = vadd.f32 %v4294_v55, %v4086_v61  ;;  %v6853_v61 = vld [vmem:[#allocation3 + $0x408] sm:$0xff] }
 0x74b   : > { %v4504_v47 = vadd.f32 %v4503_v58, %v4295_v59  ;;  %v6854_v59 = vld [vmem:[#allocation3 + $0x430] sm:$0xff] }
 0x74d   : > { %v5490_v60 = vadd.f32 %v7981_v54, %v4504_v47  ;;  %4344 = vmatmul.f32.gmra.mxu2 %v6834_v62  ;;  %v3879_v63 = vpop.f32.mrf.mxu0  ;;  %v6855_v62 = vld [vmem:[#allocation3 + $0x438] sm:$0xff] }
 0x74e   : > { %v4088_v0 = vpop.f32.mrf.mxu1  ;;  %4553 = vmatmul.f32.gmra.mxu3 %v6835_v1  ;;  %v6856_v1 = vld [vmem:[#allocation3 + $0x420] sm:$0xff] }
 0x74f   : > { %v4089_v2 = vadd.f32 %v4088_v0, %v3879_v63  ;;  %5746 = vst [vmem:[%s7421_s11 + $0x178] sm:$0xff] %v5490_v60 }
 0x750   : > { %v4297_v3 = vpop.f32.mrf.mxu2  ;;  %3926 = vmatmul.f32.gmra.mxu0 %v6836_v4 }
 0x751   : > { %4135 = vmatmul.f32.gmra.mxu1 %v6837_v5  ;;  %v4506_v6 = vpop.f32.mrf.mxu3  ;;  %v4298_v7 = vadd.f32 %v4297_v3, %v4089_v2  ;;  %v6857_v2 = vld [vmem:[#allocation3 + $0x428] sm:$0xff] }
 0x753   : > { %v4507_v8 = vadd.f32 %v4506_v6, %v4298_v7  ;;  %v6858_v7 = vld [vmem:[#allocation3 + $0x450] sm:$0xff] }
 0x755   : > { %v5494_v9 = vadd.f32 %v7981_v54, %v4507_v8  ;;  %4347 = vmatmul.f32.gmra.mxu2 %v6838_v10  ;;  %v3882_v11 = vpop.f32.mrf.mxu0  ;;  %v6859_v10 = vld [vmem:[#allocation3 + $0x458] sm:$0xff] }
 0x756   : > { %v4091_v12 = vpop.f32.mrf.mxu1  ;;  %4556 = vmatmul.f32.gmra.mxu3 %v6839_v13  ;;  %v6860_v13 = vld [vmem:[#allocation3 + $0x440] sm:$0xff] }
 0x757   : > { %v4092_v14 = vadd.f32 %v4091_v12, %v3882_v11  ;;  %5750 = vst [vmem:[%s7421_s11 + $0x198] sm:$0xff] %v5494_v9 }
 0x758   : > { %v4300_v15 = vpop.f32.mrf.mxu2  ;;  %3929 = vmatmul.f32.gmra.mxu0 %v6840_v16 }
 0x759   : > { %4138 = vmatmul.f32.gmra.mxu1 %v6841_v17  ;;  %v4509_v18 = vpop.f32.mrf.mxu3  ;;  %v4301_v19 = vadd.f32 %v4300_v15, %v4092_v14  ;;  %v6861_v14 = vld [vmem:[#allocation3 + $0x448] sm:$0xff] }
 0x75b   : > { %v4510_v20 = vadd.f32 %v4509_v18, %v4301_v19  ;;  %v6862_v19 = vld [vmem:[#allocation3 + $0x470] sm:$0xff] }
 0x75d   : > { %v5498_v21 = vadd.f32 %v7981_v54, %v4510_v20  ;;  %4350 = vmatmul.f32.gmra.mxu2 %v6842_v22  ;;  %v3885_v23 = vpop.f32.mrf.mxu0  ;;  %v6863_v22 = vld [vmem:[#allocation3 + $0x478] sm:$0xff] }
 0x75e   : > { %v4094_v24 = vpop.f32.mrf.mxu1  ;;  %4559 = vmatmul.f32.gmra.mxu3 %v6843_v25  ;;  %v6864_v25 = vld [vmem:[#allocation3 + $0x460] sm:$0xff] }
 0x75f   : > { %v4095_v26 = vadd.f32 %v4094_v24, %v3885_v23  ;;  %5754 = vst [vmem:[%s7421_s11 + $0x1b8] sm:$0xff] %v5498_v21 }
 0x760   : > { %v4303_v27 = vpop.f32.mrf.mxu2  ;;  %3932 = vmatmul.f32.gmra.mxu0 %v6844_v28 }
 0x761   : > { %4141 = vmatmul.f32.gmra.mxu1 %v6845_v29  ;;  %v4512_v30 = vpop.f32.mrf.mxu3  ;;  %v4304_v31 = vadd.f32 %v4303_v27, %v4095_v26  ;;  %v6865_v26 = vld [vmem:[#allocation3 + $0x468] sm:$0xff] }
 0x763   : > { %v4513_v32 = vadd.f32 %v4512_v30, %v4304_v31  ;;  %v6866_v31 = vld [vmem:[#allocation3 + $0x490] sm:$0xff] }
 0x765   : > { %v5502_v34 = vadd.f32 %v7981_v54, %v4513_v32  ;;  %4353 = vmatmul.f32.gmra.mxu2 %v6846_v35  ;;  %v3888_v36 = vpop.f32.mrf.mxu0  ;;  %v6867_v35 = vld [vmem:[#allocation3 + $0x498] sm:$0xff] }
 0x766   : > { %v4097_v37 = vpop.f32.mrf.mxu1  ;;  %4562 = vmatmul.f32.gmra.mxu3 %v6847_v38  ;;  %v6868_v38 = vld [vmem:[#allocation3 + $0x480] sm:$0xff] }
 0x767   : > { %v4098_v39 = vadd.f32 %v4097_v37, %v3888_v36  ;;  %5758 = vst [vmem:[%s7421_s11 + $0x1d8] sm:$0xff] %v5502_v34 }
 0x768   : > { %v4306_v40 = vpop.f32.mrf.mxu2  ;;  %3935 = vmatmul.f32.gmra.mxu0 %v6848_v41 }
 0x769   : > { %4144 = vmatmul.f32.gmra.mxu1 %v6849_v42  ;;  %v4515_v43 = vpop.f32.mrf.mxu3  ;;  %v4307_v44 = vadd.f32 %v4306_v40, %v4098_v39  ;;  %v6869_v39 = vld [vmem:[#allocation3 + $0x488] sm:$0xff] }
 0x76b   : > { %v4516_v45 = vadd.f32 %v4515_v43, %v4307_v44  ;;  %v6870_v44 = vld [vmem:[#allocation3 + $0x4b0] sm:$0xff] }
 0x76d   : > { %v5506_v33 = vadd.f32 %v7981_v54, %v4516_v45  ;;  %4356 = vmatmul.f32.gmra.mxu2 %v6850_v46  ;;  %v3891_v48 = vpop.f32.mrf.mxu0  ;;  %v6871_v46 = vld [vmem:[#allocation3 + $0x4b8] sm:$0xff] }
 0x76e   : > { %v4100_v49 = vpop.f32.mrf.mxu1  ;;  %4565 = vmatmul.f32.gmra.mxu3 %v6851_v50  ;;  %v6872_v50 = vld [vmem:[#allocation3 + $0x4a0] sm:$0xff] }
 0x76f   : > { %v4101_v51 = vadd.f32 %v4100_v49, %v3891_v48  ;;  %5762 = vst [vmem:[%s7421_s11 + $0x1f8] sm:$0xff] %v5506_v33 }
 0x770   : > { %v4309_v52 = vpop.f32.mrf.mxu2  ;;  %3938 = vmatmul.f32.gmra.mxu0 %v6852_v53 }
 0x771   : > { %4147 = vmatmul.f32.gmra.mxu1 %v6853_v61  ;;  %v4518_v55 = vpop.f32.mrf.mxu3  ;;  %v4310_v56 = vadd.f32 %v4309_v52, %v4101_v51  ;;  %v6873_v51 = vld [vmem:[#allocation3 + $0x4a8] sm:$0xff] }
 0x773   : > { %v4519_v57 = vadd.f32 %v4518_v55, %v4310_v56  ;;  %v6874_v56 = vld [vmem:[#allocation3 + $0x4d0] sm:$0xff] }
 0x775   : > { %v5510_v58 = vadd.f32 %v7981_v54, %v4519_v57  ;;  %4359 = vmatmul.f32.gmra.mxu2 %v6854_v59  ;;  %v3894_v47 = vpop.f32.mrf.mxu0  ;;  %v6875_v59 = vld [vmem:[#allocation3 + $0x4d8] sm:$0xff] }
 0x776   : > { %v4103_v60 = vpop.f32.mrf.mxu1  ;;  %4568 = vmatmul.f32.gmra.mxu3 %v6855_v62  ;;  %v6876_v62 = vld [vmem:[#allocation3 + $0x4c0] sm:$0xff] }
 0x777   : > { %v4104_v63 = vadd.f32 %v4103_v60, %v3894_v47  ;;  %5766 = vst [vmem:[%s7421_s11 + $0x218] sm:$0xff] %v5510_v58 }
 0x778   : > { %v4312_v0 = vpop.f32.mrf.mxu2  ;;  %3941 = vmatmul.f32.gmra.mxu0 %v6856_v1 }
 0x779   : > { %4150 = vmatmul.f32.gmra.mxu1 %v6857_v2  ;;  %v4521_v3 = vpop.f32.mrf.mxu3  ;;  %v4313_v4 = vadd.f32 %v4312_v0, %v4104_v63  ;;  %v6877_v63 = vld [vmem:[#allocation3 + $0x4c8] sm:$0xff] }
 0x77b   : > { %v4522_v5 = vadd.f32 %v4521_v3, %v4313_v4  ;;  %v6878_v4 = vld [vmem:[#allocation3 + $0x4f0] sm:$0xff] }
 0x77d   : > { %v5514_v6 = vadd.f32 %v7981_v54, %v4522_v5  ;;  %4362 = vmatmul.f32.gmra.mxu2 %v6858_v7  ;;  %v3897_v8 = vpop.f32.mrf.mxu0  ;;  %v6879_v7 = vld [vmem:[#allocation3 + $0x4f8] sm:$0xff] }
 0x77e   : > { %v4106_v9 = vpop.f32.mrf.mxu1  ;;  %4571 = vmatmul.f32.gmra.mxu3 %v6859_v10  ;;  %v6880_v10 = vld [vmem:[#allocation3 + $0x4e0] sm:$0xff] }
 0x77f   : > { %v4107_v11 = vadd.f32 %v4106_v9, %v3897_v8  ;;  %5770 = vst [vmem:[%s7421_s11 + $0x238] sm:$0xff] %v5514_v6 }
 0x780   : > { %v4315_v12 = vpop.f32.mrf.mxu2  ;;  %3944 = vmatmul.f32.gmra.mxu0 %v6860_v13 }
 0x781   : > { %4153 = vmatmul.f32.gmra.mxu1 %v6861_v14  ;;  %v4524_v15 = vpop.f32.mrf.mxu3  ;;  %v4316_v16 = vadd.f32 %v4315_v12, %v4107_v11  ;;  %v6881_v11 = vld [vmem:[#allocation3 + $0x4e8] sm:$0xff] }
 0x783   : > { %v4525_v17 = vadd.f32 %v4524_v15, %v4316_v16  ;;  %v6882_v16 = vld [vmem:[#allocation3 + $0x510] sm:$0xff] }
 0x785   : > { %v5518_v18 = vadd.f32 %v7981_v54, %v4525_v17  ;;  %4365 = vmatmul.f32.gmra.mxu2 %v6862_v19  ;;  %v3900_v20 = vpop.f32.mrf.mxu0  ;;  %v6883_v19 = vld [vmem:[#allocation3 + $0x518] sm:$0xff] }
 0x786   : > { %v4109_v21 = vpop.f32.mrf.mxu1  ;;  %4574 = vmatmul.f32.gmra.mxu3 %v6863_v22  ;;  %v6884_v22 = vld [vmem:[#allocation3 + $0x500] sm:$0xff] }
 0x787   : > { %v4110_v23 = vadd.f32 %v4109_v21, %v3900_v20  ;;  %5774 = vst [vmem:[%s7421_s11 + $0x258] sm:$0xff] %v5518_v18 }
 0x788   : > { %v4318_v24 = vpop.f32.mrf.mxu2  ;;  %3947 = vmatmul.f32.gmra.mxu0 %v6864_v25 }
 0x789   : > { %4156 = vmatmul.f32.gmra.mxu1 %v6865_v26  ;;  %v4527_v27 = vpop.f32.mrf.mxu3  ;;  %v4319_v28 = vadd.f32 %v4318_v24, %v4110_v23  ;;  %v6885_v23 = vld [vmem:[#allocation3 + $0x508] sm:$0xff] }
 0x78b   : > { %v4528_v29 = vadd.f32 %v4527_v27, %v4319_v28  ;;  %v6886_v28 = vld [vmem:[#allocation3 + $0x530] sm:$0xff] }
 0x78d   : > { %v5522_v30 = vadd.f32 %v7981_v54, %v4528_v29  ;;  %4368 = vmatmul.f32.gmra.mxu2 %v6866_v31  ;;  %v3903_v32 = vpop.f32.mrf.mxu0  ;;  %v6887_v31 = vld [vmem:[#allocation3 + $0x538] sm:$0xff] }
 0x78e   : > { %v4112_v34 = vpop.f32.mrf.mxu1  ;;  %4577 = vmatmul.f32.gmra.mxu3 %v6867_v35  ;;  %v6888_v35 = vld [vmem:[#allocation3 + $0x520] sm:$0xff] }
 0x78f   : > { %v4113_v36 = vadd.f32 %v4112_v34, %v3903_v32  ;;  %5778 = vst [vmem:[%s7421_s11 + $0x278] sm:$0xff] %v5522_v30 }
 0x790   : > { %v4321_v37 = vpop.f32.mrf.mxu2  ;;  %3950 = vmatmul.f32.gmra.mxu0 %v6868_v38 }
 0x791   : > { %4159 = vmatmul.f32.gmra.mxu1 %v6869_v39  ;;  %v4530_v40 = vpop.f32.mrf.mxu3  ;;  %v4322_v41 = vadd.f32 %v4321_v37, %v4113_v36  ;;  %v6889_v36 = vld [vmem:[#allocation3 + $0x528] sm:$0xff] }
 0x793   : > { %v4531_v42 = vadd.f32 %v4530_v40, %v4322_v41  ;;  %v6890_v41 = vld [vmem:[#allocation3 + $0x550] sm:$0xff] }
 0x795   : > { %v5526_v43 = vadd.f32 %v7981_v54, %v4531_v42  ;;  %4371 = vmatmul.f32.gmra.mxu2 %v6870_v44  ;;  %v3906_v45 = vpop.f32.mrf.mxu0  ;;  %v6891_v44 = vld [vmem:[#allocation3 + $0x558] sm:$0xff] }
 0x796   : > { %v4115_v33 = vpop.f32.mrf.mxu1  ;;  %4580 = vmatmul.f32.gmra.mxu3 %v6871_v46  ;;  %v6892_v46 = vld [vmem:[#allocation3 + $0x540] sm:$0xff] }
 0x797   : > { %v4116_v48 = vadd.f32 %v4115_v33, %v3906_v45  ;;  %5782 = vst [vmem:[%s7421_s11 + $0x298] sm:$0xff] %v5526_v43 }
 0x798   : > { %v4324_v49 = vpop.f32.mrf.mxu2  ;;  %3953 = vmatmul.f32.gmra.mxu0 %v6872_v50 }
 0x799   : > { %4162 = vmatmul.f32.gmra.mxu1 %v6873_v51  ;;  %v4533_v52 = vpop.f32.mrf.mxu3  ;;  %v4325_v53 = vadd.f32 %v4324_v49, %v4116_v48  ;;  %v6893_v48 = vld [vmem:[#allocation3 + $0x548] sm:$0xff] }
 0x79b   : > { %v4534_v61 = vadd.f32 %v4533_v52, %v4325_v53  ;;  %v6894_v53 = vld [vmem:[#allocation3 + $0x570] sm:$0xff] }
 0x79d   : > { %v5530_v55 = vadd.f32 %v7981_v54, %v4534_v61  ;;  %4374 = vmatmul.f32.gmra.mxu2 %v6874_v56  ;;  %v3909_v57 = vpop.f32.mrf.mxu0  ;;  %v6895_v56 = vld [vmem:[#allocation3 + $0x578] sm:$0xff] }
 0x79e   : > { %v4118_v58 = vpop.f32.mrf.mxu1  ;;  %4583 = vmatmul.f32.gmra.mxu3 %v6875_v59  ;;  %v6896_v59 = vld [vmem:[#allocation3 + $0x560] sm:$0xff] }
 0x79f   : > { %v4119_v47 = vadd.f32 %v4118_v58, %v3909_v57  ;;  %5786 = vst [vmem:[%s7421_s11 + $0x2b8] sm:$0xff] %v5530_v55 }
 0x7a0   : > { %v4327_v60 = vpop.f32.mrf.mxu2  ;;  %3956 = vmatmul.f32.gmra.mxu0 %v6876_v62 }
 0x7a1   : > { %4165 = vmatmul.f32.gmra.mxu1 %v6877_v63  ;;  %v4536_v0 = vpop.f32.mrf.mxu3  ;;  %v4328_v1 = vadd.f32 %v4327_v60, %v4119_v47  ;;  %v6897_v47 = vld [vmem:[#allocation3 + $0x568] sm:$0xff] }
 0x7a3   : > { %v4537_v2 = vadd.f32 %v4536_v0, %v4328_v1  ;;  %v6898_v1 = vld [vmem:[#allocation3 + $0x590] sm:$0xff] }
 0x7a5   : > { %v5534_v3 = vadd.f32 %v7981_v54, %v4537_v2  ;;  %4377 = vmatmul.f32.gmra.mxu2 %v6878_v4  ;;  %v3912_v5 = vpop.f32.mrf.mxu0  ;;  %v6899_v4 = vld [vmem:[#allocation3 + $0x598] sm:$0xff] }
 0x7a6   : > { %v4121_v6 = vpop.f32.mrf.mxu1  ;;  %4586 = vmatmul.f32.gmra.mxu3 %v6879_v7  ;;  %v6900_v7 = vld [vmem:[#allocation3 + $0x580] sm:$0xff] }
 0x7a7   : > { %v4122_v8 = vadd.f32 %v4121_v6, %v3912_v5  ;;  %5790 = vst [vmem:[%s7421_s11 + $0x2d8] sm:$0xff] %v5534_v3 }
 0x7a8   : > { %v4330_v9 = vpop.f32.mrf.mxu2  ;;  %3959 = vmatmul.f32.gmra.mxu0 %v6880_v10 }
 0x7a9   : > { %4168 = vmatmul.f32.gmra.mxu1 %v6881_v11  ;;  %v4539_v12 = vpop.f32.mrf.mxu3  ;;  %v4331_v13 = vadd.f32 %v4330_v9, %v4122_v8  ;;  %v6901_v8 = vld [vmem:[#allocation3 + $0x588] sm:$0xff] }
 0x7ab   : > { %v4540_v14 = vadd.f32 %v4539_v12, %v4331_v13  ;;  %v6902_v13 = vld [vmem:[#allocation3 + $0x5b0] sm:$0xff] }
 0x7ad   : > { %v5538_v15 = vadd.f32 %v7981_v54, %v4540_v14  ;;  %4380 = vmatmul.f32.gmra.mxu2 %v6882_v16  ;;  %v3915_v17 = vpop.f32.mrf.mxu0  ;;  %v6903_v16 = vld [vmem:[#allocation3 + $0x5b8] sm:$0xff] }
 0x7ae   : > { %v4124_v18 = vpop.f32.mrf.mxu1  ;;  %4589 = vmatmul.f32.gmra.mxu3 %v6883_v19  ;;  %v6904_v19 = vld [vmem:[#allocation3 + $0x5a0] sm:$0xff] }
 0x7af   : > { %v4125_v20 = vadd.f32 %v4124_v18, %v3915_v17  ;;  %5794 = vst [vmem:[%s7421_s11 + $0x2f8] sm:$0xff] %v5538_v15 }
 0x7b0   : > { %v4333_v21 = vpop.f32.mrf.mxu2  ;;  %3962 = vmatmul.f32.gmra.mxu0 %v6884_v22 }
 0x7b1   : > { %4171 = vmatmul.f32.gmra.mxu1 %v6885_v23  ;;  %v4542_v24 = vpop.f32.mrf.mxu3  ;;  %v4334_v25 = vadd.f32 %v4333_v21, %v4125_v20  ;;  %v6905_v20 = vld [vmem:[#allocation3 + $0x5a8] sm:$0xff] }
 0x7b3   : > { %v4543_v26 = vadd.f32 %v4542_v24, %v4334_v25  ;;  %v6906_v25 = vld [vmem:[#allocation3 + $0x5d0] sm:$0xff] }
 0x7b5   : > { %v5542_v27 = vadd.f32 %v7981_v54, %v4543_v26  ;;  %4383 = vmatmul.f32.gmra.mxu2 %v6886_v28  ;;  %v3918_v29 = vpop.f32.mrf.mxu0  ;;  %v6907_v28 = vld [vmem:[#allocation3 + $0x5d8] sm:$0xff] }
 0x7b6   : > { %v4127_v30 = vpop.f32.mrf.mxu1  ;;  %4592 = vmatmul.f32.gmra.mxu3 %v6887_v31  ;;  %v6908_v31 = vld [vmem:[#allocation3 + $0x5c0] sm:$0xff] }
 0x7b7   : > { %v4128_v32 = vadd.f32 %v4127_v30, %v3918_v29  ;;  %5798 = vst [vmem:[%s7421_s11 + $0x318] sm:$0xff] %v5542_v27 }
 0x7b8   : > { %v4336_v34 = vpop.f32.mrf.mxu2  ;;  %3965 = vmatmul.f32.gmra.mxu0 %v6888_v35 }
 0x7b9   : > { %4174 = vmatmul.f32.gmra.mxu1 %v6889_v36  ;;  %v4545_v37 = vpop.f32.mrf.mxu3  ;;  %v4337_v38 = vadd.f32 %v4336_v34, %v4128_v32  ;;  %v6909_v32 = vld [vmem:[#allocation3 + $0x5c8] sm:$0xff] }
 0x7bb   : > { %v4546_v39 = vadd.f32 %v4545_v37, %v4337_v38  ;;  %v6910_v38 = vld [vmem:[#allocation3 + $0x5f0] sm:$0xff] }
 0x7bd   : > { %v5546_v40 = vadd.f32 %v7981_v54, %v4546_v39  ;;  %4386 = vmatmul.f32.gmra.mxu2 %v6890_v41  ;;  %v3921_v42 = vpop.f32.mrf.mxu0  ;;  %v6911_v41 = vld [vmem:[#allocation3 + $0x5f8] sm:$0xff] }
 0x7be   : > { %v4130_v43 = vpop.f32.mrf.mxu1  ;;  %4595 = vmatmul.f32.gmra.mxu3 %v6891_v44  ;;  %v6912_v44 = vld [vmem:[#allocation3 + $0x5e0] sm:$0xff] }
 0x7bf   : > { %v4131_v45 = vadd.f32 %v4130_v43, %v3921_v42  ;;  %5802 = vst [vmem:[%s7421_s11 + $0x338] sm:$0xff] %v5546_v40 }
 0x7c0   : > { %v4339_v33 = vpop.f32.mrf.mxu2  ;;  %3968 = vmatmul.f32.gmra.mxu0 %v6892_v46 }
 0x7c1   : > { %4177 = vmatmul.f32.gmra.mxu1 %v6893_v48  ;;  %v4548_v49 = vpop.f32.mrf.mxu3  ;;  %v4340_v50 = vadd.f32 %v4339_v33, %v4131_v45  ;;  %v6913_v45 = vld [vmem:[#allocation3 + $0x5e8] sm:$0xff] }
 0x7c3   : > { %v4549_v51 = vadd.f32 %v4548_v49, %v4340_v50  ;;  %v6914_v50 = vld [vmem:[#allocation3 + $0x610] sm:$0xff] }
 0x7c5   : > { %v5550_v52 = vadd.f32 %v7981_v54, %v4549_v51  ;;  %4389 = vmatmul.f32.gmra.mxu2 %v6894_v53  ;;  %v3924_v61 = vpop.f32.mrf.mxu0  ;;  %v6915_v53 = vld [vmem:[#allocation3 + $0x618] sm:$0xff] }
 0x7c6   : > { %v4133_v55 = vpop.f32.mrf.mxu1  ;;  %4598 = vmatmul.f32.gmra.mxu3 %v6895_v56  ;;  %v6916_v56 = vld [vmem:[#allocation3 + $0x600] sm:$0xff] }
 0x7c7   : > { %v4134_v57 = vadd.f32 %v4133_v55, %v3924_v61  ;;  %5806 = vst [vmem:[%s7421_s11 + $0x358] sm:$0xff] %v5550_v52 }
 0x7c8   : > { %v4342_v58 = vpop.f32.mrf.mxu2  ;;  %3971 = vmatmul.f32.gmra.mxu0 %v6896_v59 }
 0x7c9   : > { %4180 = vmatmul.f32.gmra.mxu1 %v6897_v47  ;;  %v4551_v60 = vpop.f32.mrf.mxu3  ;;  %v4343_v62 = vadd.f32 %v4342_v58, %v4134_v57  ;;  %v6917_v57 = vld [vmem:[#allocation3 + $0x608] sm:$0xff] }
 0x7cb   : > { %v4552_v63 = vadd.f32 %v4551_v60, %v4343_v62  ;;  %v6918_v62 = vld [vmem:[#allocation3 + $0x630] sm:$0xff] }
 0x7cd   : > { %v5554_v0 = vadd.f32 %v7981_v54, %v4552_v63  ;;  %4392 = vmatmul.f32.gmra.mxu2 %v6898_v1  ;;  %v3927_v2 = vpop.f32.mrf.mxu0  ;;  %v6919_v1 = vld [vmem:[#allocation3 + $0x638] sm:$0xff] }
 0x7ce   : > { %v4136_v3 = vpop.f32.mrf.mxu1  ;;  %4601 = vmatmul.f32.gmra.mxu3 %v6899_v4  ;;  %v6920_v4 = vld [vmem:[#allocation3 + $0x620] sm:$0xff] }
 0x7cf   : > { %v4137_v5 = vadd.f32 %v4136_v3, %v3927_v2  ;;  %5810 = vst [vmem:[%s7421_s11 + $0x378] sm:$0xff] %v5554_v0 }
 0x7d0   : > { %v4345_v6 = vpop.f32.mrf.mxu2  ;;  %3974 = vmatmul.f32.gmra.mxu0 %v6900_v7 }
 0x7d1   : > { %4183 = vmatmul.f32.gmra.mxu1 %v6901_v8  ;;  %v4554_v9 = vpop.f32.mrf.mxu3  ;;  %v4346_v10 = vadd.f32 %v4345_v6, %v4137_v5  ;;  %v6921_v5 = vld [vmem:[#allocation3 + $0x628] sm:$0xff] }
 0x7d3   : > { %v4555_v11 = vadd.f32 %v4554_v9, %v4346_v10  ;;  %v6922_v10 = vld [vmem:[#allocation3 + $0x650] sm:$0xff] }
 0x7d5   : > { %v5558_v12 = vadd.f32 %v7981_v54, %v4555_v11  ;;  %4395 = vmatmul.f32.gmra.mxu2 %v6902_v13  ;;  %v3930_v14 = vpop.f32.mrf.mxu0  ;;  %v6923_v13 = vld [vmem:[#allocation3 + $0x658] sm:$0xff] }
 0x7d6   : > { %v4139_v15 = vpop.f32.mrf.mxu1  ;;  %4604 = vmatmul.f32.gmra.mxu3 %v6903_v16  ;;  %v6924_v16 = vld [vmem:[#allocation3 + $0x640] sm:$0xff] }
 0x7d7   : > { %v4140_v17 = vadd.f32 %v4139_v15, %v3930_v14  ;;  %5814 = vst [vmem:[%s7421_s11 + $0x398] sm:$0xff] %v5558_v12 }
 0x7d8   : > { %v4348_v18 = vpop.f32.mrf.mxu2  ;;  %3977 = vmatmul.f32.gmra.mxu0 %v6904_v19 }
 0x7d9   : > { %4186 = vmatmul.f32.gmra.mxu1 %v6905_v20  ;;  %v4557_v21 = vpop.f32.mrf.mxu3  ;;  %v4349_v22 = vadd.f32 %v4348_v18, %v4140_v17  ;;  %v6925_v17 = vld [vmem:[#allocation3 + $0x648] sm:$0xff] }
 0x7db   : > { %v4558_v23 = vadd.f32 %v4557_v21, %v4349_v22  ;;  %v6926_v22 = vld [vmem:[#allocation3 + $0x670] sm:$0xff] }
 0x7dd   : > { %v5562_v24 = vadd.f32 %v7981_v54, %v4558_v23  ;;  %4398 = vmatmul.f32.gmra.mxu2 %v6906_v25  ;;  %v3933_v26 = vpop.f32.mrf.mxu0  ;;  %v6927_v25 = vld [vmem:[#allocation3 + $0x678] sm:$0xff] }
 0x7de   : > { %v4142_v27 = vpop.f32.mrf.mxu1  ;;  %4607 = vmatmul.f32.gmra.mxu3 %v6907_v28  ;;  %v6928_v28 = vld [vmem:[#allocation3 + $0x660] sm:$0xff] }
 0x7df   : > { %v4143_v29 = vadd.f32 %v4142_v27, %v3933_v26  ;;  %5818 = vst [vmem:[%s7421_s11 + $0x3b8] sm:$0xff] %v5562_v24 }
 0x7e0   : > { %v4351_v30 = vpop.f32.mrf.mxu2  ;;  %3980 = vmatmul.f32.gmra.mxu0 %v6908_v31 }
 0x7e1   : > { %4189 = vmatmul.f32.gmra.mxu1 %v6909_v32  ;;  %v4560_v34 = vpop.f32.mrf.mxu3  ;;  %v4352_v35 = vadd.f32 %v4351_v30, %v4143_v29  ;;  %v6929_v29 = vld [vmem:[#allocation3 + $0x668] sm:$0xff] }
 0x7e3   : > { %v4561_v36 = vadd.f32 %v4560_v34, %v4352_v35  ;;  %v6930_v35 = vld [vmem:[#allocation3 + $0x690] sm:$0xff] }
 0x7e5   : > { %v5566_v37 = vadd.f32 %v7981_v54, %v4561_v36  ;;  %4401 = vmatmul.f32.gmra.mxu2 %v6910_v38  ;;  %v3936_v39 = vpop.f32.mrf.mxu0  ;;  %v6931_v38 = vld [vmem:[#allocation3 + $0x698] sm:$0xff] }
 0x7e6   : > { %v4145_v40 = vpop.f32.mrf.mxu1  ;;  %4610 = vmatmul.f32.gmra.mxu3 %v6911_v41  ;;  %v6932_v41 = vld [vmem:[#allocation3 + $0x680] sm:$0xff] }
 0x7e7   : > { %v4146_v42 = vadd.f32 %v4145_v40, %v3936_v39  ;;  %5822 = vst [vmem:[%s7421_s11 + $0x3d8] sm:$0xff] %v5566_v37 }
 0x7e8   : > { %v4354_v43 = vpop.f32.mrf.mxu2  ;;  %3983 = vmatmul.f32.gmra.mxu0 %v6912_v44 }
 0x7e9   : > { %4192 = vmatmul.f32.gmra.mxu1 %v6913_v45  ;;  %v4563_v33 = vpop.f32.mrf.mxu3  ;;  %v4355_v46 = vadd.f32 %v4354_v43, %v4146_v42  ;;  %v6933_v42 = vld [vmem:[#allocation3 + $0x688] sm:$0xff] }
 0x7eb   : > { %v4564_v48 = vadd.f32 %v4563_v33, %v4355_v46  ;;  %v6934_v46 = vld [vmem:[#allocation3 + $0x6b0] sm:$0xff] }
 0x7ed   : > { %v5570_v49 = vadd.f32 %v7981_v54, %v4564_v48  ;;  %4404 = vmatmul.f32.gmra.mxu2 %v6914_v50  ;;  %v3939_v51 = vpop.f32.mrf.mxu0  ;;  %v6935_v50 = vld [vmem:[#allocation3 + $0x6b8] sm:$0xff] }
 0x7ee   : > { %v4148_v52 = vpop.f32.mrf.mxu1  ;;  %4613 = vmatmul.f32.gmra.mxu3 %v6915_v53  ;;  %v6936_v53 = vld [vmem:[#allocation3 + $0x6a0] sm:$0xff] }
 0x7ef   : > { %v4149_v61 = vadd.f32 %v4148_v52, %v3939_v51  ;;  %5826 = vst [vmem:[%s7421_s11 + $0x3f8] sm:$0xff] %v5570_v49 }
 0x7f0   : > { %v4357_v55 = vpop.f32.mrf.mxu2  ;;  %3986 = vmatmul.f32.gmra.mxu0 %v6916_v56 }
 0x7f1   : > { %4195 = vmatmul.f32.gmra.mxu1 %v6917_v57  ;;  %v4566_v58 = vpop.f32.mrf.mxu3  ;;  %v4358_v59 = vadd.f32 %v4357_v55, %v4149_v61  ;;  %v6937_v61 = vld [vmem:[#allocation3 + $0x6a8] sm:$0xff] }
 0x7f3   : > { %v4567_v47 = vadd.f32 %v4566_v58, %v4358_v59  ;;  %v6938_v59 = vld [vmem:[#allocation3 + $0x6d0] sm:$0xff] }
 0x7f5   : > { %v5574_v60 = vadd.f32 %v7981_v54, %v4567_v47  ;;  %4407 = vmatmul.f32.gmra.mxu2 %v6918_v62  ;;  %v3942_v63 = vpop.f32.mrf.mxu0  ;;  %v6939_v62 = vld [vmem:[#allocation3 + $0x6d8] sm:$0xff] }
 0x7f6   : > { %v4151_v0 = vpop.f32.mrf.mxu1  ;;  %4616 = vmatmul.f32.gmra.mxu3 %v6919_v1  ;;  %v6940_v1 = vld [vmem:[#allocation3 + $0x6c0] sm:$0xff] }
 0x7f7   : > { %v4152_v2 = vadd.f32 %v4151_v0, %v3942_v63  ;;  %5830 = vst [vmem:[%s7421_s11 + $0x418] sm:$0xff] %v5574_v60 }
 0x7f8   : > { %v4360_v3 = vpop.f32.mrf.mxu2  ;;  %3989 = vmatmul.f32.gmra.mxu0 %v6920_v4 }
 0x7f9   : > { %4198 = vmatmul.f32.gmra.mxu1 %v6921_v5  ;;  %v4569_v6 = vpop.f32.mrf.mxu3  ;;  %v4361_v7 = vadd.f32 %v4360_v3, %v4152_v2  ;;  %v6941_v2 = vld [vmem:[#allocation3 + $0x6c8] sm:$0xff] }
 0x7fb   : > { %v4570_v8 = vadd.f32 %v4569_v6, %v4361_v7  ;;  %v6942_v7 = vld [vmem:[#allocation3 + $0x6f0] sm:$0xff] }
 0x7fd   : > { %v5578_v9 = vadd.f32 %v7981_v54, %v4570_v8  ;;  %4410 = vmatmul.f32.gmra.mxu2 %v6922_v10  ;;  %v3945_v11 = vpop.f32.mrf.mxu0  ;;  %v6943_v10 = vld [vmem:[#allocation3 + $0x6f8] sm:$0xff] }
 0x7fe   : > { %v4154_v12 = vpop.f32.mrf.mxu1  ;;  %4619 = vmatmul.f32.gmra.mxu3 %v6923_v13  ;;  %v6944_v13 = vld [vmem:[#allocation3 + $0x6e0] sm:$0xff] }
 0x7ff   : > { %v4155_v14 = vadd.f32 %v4154_v12, %v3945_v11  ;;  %5834 = vst [vmem:[%s7421_s11 + $0x438] sm:$0xff] %v5578_v9 }
 0x800   : > { %v4363_v15 = vpop.f32.mrf.mxu2  ;;  %3992 = vmatmul.f32.gmra.mxu0 %v6924_v16 }
 0x801   : > { %4201 = vmatmul.f32.gmra.mxu1 %v6925_v17  ;;  %v4572_v18 = vpop.f32.mrf.mxu3  ;;  %v4364_v19 = vadd.f32 %v4363_v15, %v4155_v14  ;;  %v6945_v14 = vld [vmem:[#allocation3 + $0x6e8] sm:$0xff] }
 0x803   : > { %v4573_v20 = vadd.f32 %v4572_v18, %v4364_v19  ;;  %v6946_v19 = vld [vmem:[#allocation3 + $0x710] sm:$0xff] }
 0x805   : > { %v5582_v21 = vadd.f32 %v7981_v54, %v4573_v20  ;;  %4413 = vmatmul.f32.gmra.mxu2 %v6926_v22  ;;  %v3948_v23 = vpop.f32.mrf.mxu0  ;;  %v6947_v22 = vld [vmem:[#allocation3 + $0x718] sm:$0xff] }
 0x806   : > { %v4157_v24 = vpop.f32.mrf.mxu1  ;;  %4622 = vmatmul.f32.gmra.mxu3 %v6927_v25  ;;  %v6948_v25 = vld [vmem:[#allocation3 + $0x700] sm:$0xff] }
 0x807   : > { %v4158_v26 = vadd.f32 %v4157_v24, %v3948_v23  ;;  %5838 = vst [vmem:[%s7421_s11 + $0x458] sm:$0xff] %v5582_v21 }
 0x808   : > { %v4366_v27 = vpop.f32.mrf.mxu2  ;;  %3995 = vmatmul.f32.gmra.mxu0 %v6928_v28 }
 0x809   : > { %4204 = vmatmul.f32.gmra.mxu1 %v6929_v29  ;;  %v4575_v30 = vpop.f32.mrf.mxu3  ;;  %v4367_v31 = vadd.f32 %v4366_v27, %v4158_v26  ;;  %v6949_v26 = vld [vmem:[#allocation3 + $0x708] sm:$0xff] }
 0x80b   : > { %v4576_v32 = vadd.f32 %v4575_v30, %v4367_v31  ;;  %v6950_v31 = vld [vmem:[#allocation3 + $0x730] sm:$0xff] }
 0x80d   : > { %v5586_v34 = vadd.f32 %v7981_v54, %v4576_v32  ;;  %4416 = vmatmul.f32.gmra.mxu2 %v6930_v35  ;;  %v3951_v36 = vpop.f32.mrf.mxu0  ;;  %v6951_v35 = vld [vmem:[#allocation3 + $0x738] sm:$0xff] }
 0x80e   : > { %v4160_v37 = vpop.f32.mrf.mxu1  ;;  %4625 = vmatmul.f32.gmra.mxu3 %v6931_v38  ;;  %v6952_v38 = vld [vmem:[#allocation3 + $0x720] sm:$0xff] }
 0x80f   : > { %v4161_v39 = vadd.f32 %v4160_v37, %v3951_v36  ;;  %5842 = vst [vmem:[%s7421_s11 + $0x478] sm:$0xff] %v5586_v34 }
 0x810   : > { %v4369_v40 = vpop.f32.mrf.mxu2  ;;  %3998 = vmatmul.f32.gmra.mxu0 %v6932_v41 }
 0x811   : > { %4207 = vmatmul.f32.gmra.mxu1 %v6933_v42  ;;  %v4578_v43 = vpop.f32.mrf.mxu3  ;;  %v4370_v44 = vadd.f32 %v4369_v40, %v4161_v39  ;;  %v6953_v39 = vld [vmem:[#allocation3 + $0x728] sm:$0xff] }
 0x813   : > { %v4579_v45 = vadd.f32 %v4578_v43, %v4370_v44  ;;  %v6954_v44 = vld [vmem:[#allocation3 + $0x750] sm:$0xff] }
 0x815   : > { %v5590_v33 = vadd.f32 %v7981_v54, %v4579_v45  ;;  %4419 = vmatmul.f32.gmra.mxu2 %v6934_v46  ;;  %v3954_v48 = vpop.f32.mrf.mxu0  ;;  %v6955_v46 = vld [vmem:[#allocation3 + $0x758] sm:$0xff] }
 0x816   : > { %v4163_v49 = vpop.f32.mrf.mxu1  ;;  %4628 = vmatmul.f32.gmra.mxu3 %v6935_v50  ;;  %v6956_v50 = vld [vmem:[#allocation3 + $0x740] sm:$0xff] }
 0x817   : > { %v4164_v51 = vadd.f32 %v4163_v49, %v3954_v48  ;;  %5846 = vst [vmem:[%s7421_s11 + $0x498] sm:$0xff] %v5590_v33 }
 0x818   : > { %v4372_v52 = vpop.f32.mrf.mxu2  ;;  %4001 = vmatmul.f32.gmra.mxu0 %v6936_v53 }
 0x819   : > { %4210 = vmatmul.f32.gmra.mxu1 %v6937_v61  ;;  %v4581_v55 = vpop.f32.mrf.mxu3  ;;  %v4373_v56 = vadd.f32 %v4372_v52, %v4164_v51  ;;  %v6957_v51 = vld [vmem:[#allocation3 + $0x748] sm:$0xff] }
 0x81b   : > { %v4582_v57 = vadd.f32 %v4581_v55, %v4373_v56  ;;  %v6958_v56 = vld [vmem:[#allocation3 + $0x770] sm:$0xff] }
 0x81d   : > { %v5594_v58 = vadd.f32 %v7981_v54, %v4582_v57  ;;  %4422 = vmatmul.f32.gmra.mxu2 %v6938_v59  ;;  %v3957_v47 = vpop.f32.mrf.mxu0  ;;  %v6959_v59 = vld [vmem:[#allocation3 + $0x778] sm:$0xff] }
 0x81e   : > { %v4166_v60 = vpop.f32.mrf.mxu1  ;;  %4631 = vmatmul.f32.gmra.mxu3 %v6939_v62  ;;  %v6960_v62 = vld [vmem:[#allocation3 + $0x760] sm:$0xff] }
 0x81f   : > { %v4167_v63 = vadd.f32 %v4166_v60, %v3957_v47  ;;  %5850 = vst [vmem:[%s7421_s11 + $0x4b8] sm:$0xff] %v5594_v58 }
 0x820   : > { %v4375_v0 = vpop.f32.mrf.mxu2  ;;  %4004 = vmatmul.f32.gmra.mxu0 %v6940_v1 }
 0x821   : > { %4213 = vmatmul.f32.gmra.mxu1 %v6941_v2  ;;  %v4584_v3 = vpop.f32.mrf.mxu3  ;;  %v4376_v4 = vadd.f32 %v4375_v0, %v4167_v63  ;;  %v6961_v63 = vld [vmem:[#allocation3 + $0x768] sm:$0xff] }
 0x823   : > { %v4585_v5 = vadd.f32 %v4584_v3, %v4376_v4  ;;  %v6962_v4 = vld [vmem:[#allocation3 + $0x790] sm:$0xff] }
 0x825   : > { %v5598_v6 = vadd.f32 %v7981_v54, %v4585_v5  ;;  %4425 = vmatmul.f32.gmra.mxu2 %v6942_v7  ;;  %v3960_v8 = vpop.f32.mrf.mxu0  ;;  %v6963_v7 = vld [vmem:[#allocation3 + $0x798] sm:$0xff] }
 0x826   : > { %v4169_v9 = vpop.f32.mrf.mxu1  ;;  %4634 = vmatmul.f32.gmra.mxu3 %v6943_v10  ;;  %v6964_v10 = vld [vmem:[#allocation3 + $0x780] sm:$0xff] }
 0x827   : > { %v4170_v11 = vadd.f32 %v4169_v9, %v3960_v8  ;;  %5854 = vst [vmem:[%s7421_s11 + $0x4d8] sm:$0xff] %v5598_v6 }
 0x828   : > { %v4378_v12 = vpop.f32.mrf.mxu2  ;;  %4007 = vmatmul.f32.gmra.mxu0 %v6944_v13 }
 0x829   : > { %4216 = vmatmul.f32.gmra.mxu1 %v6945_v14  ;;  %v4587_v15 = vpop.f32.mrf.mxu3  ;;  %v4379_v16 = vadd.f32 %v4378_v12, %v4170_v11  ;;  %v6965_v11 = vld [vmem:[#allocation3 + $0x788] sm:$0xff] }
 0x82b   : > { %v4588_v17 = vadd.f32 %v4587_v15, %v4379_v16  ;;  %v6966_v16 = vld [vmem:[#allocation3 + $0x7b0] sm:$0xff] }
 0x82d   : > { %v5602_v18 = vadd.f32 %v7981_v54, %v4588_v17  ;;  %4428 = vmatmul.f32.gmra.mxu2 %v6946_v19  ;;  %v3963_v20 = vpop.f32.mrf.mxu0  ;;  %v6967_v19 = vld [vmem:[#allocation3 + $0x7b8] sm:$0xff] }
 0x82e   : > { %v4172_v21 = vpop.f32.mrf.mxu1  ;;  %4637 = vmatmul.f32.gmra.mxu3 %v6947_v22  ;;  %v6968_v22 = vld [vmem:[#allocation3 + $0x7a0] sm:$0xff] }
 0x82f   : > { %v4173_v23 = vadd.f32 %v4172_v21, %v3963_v20  ;;  %5858 = vst [vmem:[%s7421_s11 + $0x4f8] sm:$0xff] %v5602_v18 }
 0x830   : > { %v4381_v24 = vpop.f32.mrf.mxu2  ;;  %4010 = vmatmul.f32.gmra.mxu0 %v6948_v25 }
 0x831   : > { %4219 = vmatmul.f32.gmra.mxu1 %v6949_v26  ;;  %v4590_v27 = vpop.f32.mrf.mxu3  ;;  %v4382_v28 = vadd.f32 %v4381_v24, %v4173_v23  ;;  %v6969_v23 = vld [vmem:[#allocation3 + $0x7a8] sm:$0xff] }
 0x833   : > { %v4591_v29 = vadd.f32 %v4590_v27, %v4382_v28  ;;  %v6970_v28 = vld [vmem:[#allocation3 + $0x7d0] sm:$0xff] }
 0x835   : > { %v5606_v30 = vadd.f32 %v7981_v54, %v4591_v29  ;;  %4431 = vmatmul.f32.gmra.mxu2 %v6950_v31  ;;  %v3966_v32 = vpop.f32.mrf.mxu0  ;;  %v6971_v31 = vld [vmem:[#allocation3 + $0x7d8] sm:$0xff] }
 0x836   : > { %v4175_v34 = vpop.f32.mrf.mxu1  ;;  %4640 = vmatmul.f32.gmra.mxu3 %v6951_v35  ;;  %v6972_v35 = vld [vmem:[#allocation3 + $0x7c0] sm:$0xff] }
 0x837   : > { %v4176_v36 = vadd.f32 %v4175_v34, %v3966_v32  ;;  %5862 = vst [vmem:[%s7421_s11 + $0x518] sm:$0xff] %v5606_v30 }
 0x838   : > { %v4384_v37 = vpop.f32.mrf.mxu2  ;;  %4013 = vmatmul.f32.gmra.mxu0 %v6952_v38 }
 0x839   : > { %4222 = vmatmul.f32.gmra.mxu1 %v6953_v39  ;;  %v4593_v40 = vpop.f32.mrf.mxu3  ;;  %v4385_v41 = vadd.f32 %v4384_v37, %v4176_v36  ;;  %v6973_v36 = vld [vmem:[#allocation3 + $0x7c8] sm:$0xff] }
 0x83b   : > { %v4594_v42 = vadd.f32 %v4593_v40, %v4385_v41  ;;  %v6974_v41 = vld [vmem:[#allocation3 + $0x7f0] sm:$0xff] }
 0x83d   : > { %v5610_v43 = vadd.f32 %v7981_v54, %v4594_v42  ;;  %4434 = vmatmul.f32.gmra.mxu2 %v6954_v44  ;;  %v3969_v45 = vpop.f32.mrf.mxu0  ;;  %v6975_v44 = vld [vmem:[#allocation3 + $0x7f8] sm:$0xff] }
 0x83e   : > { %v4178_v33 = vpop.f32.mrf.mxu1  ;;  %4643 = vmatmul.f32.gmra.mxu3 %v6955_v46  ;;  %v6976_v46 = vld [vmem:[#allocation3 + $0x7e0] sm:$0xff] }
 0x83f   : > { %v4179_v48 = vadd.f32 %v4178_v33, %v3969_v45  ;;  %5866 = vst [vmem:[%s7421_s11 + $0x538] sm:$0xff] %v5610_v43 }
 0x840   : > { %v4387_v49 = vpop.f32.mrf.mxu2  ;;  %4016 = vmatmul.f32.gmra.mxu0 %v6956_v50 }
 0x841   : > { %4225 = vmatmul.f32.gmra.mxu1 %v6957_v51  ;;  %v4596_v52 = vpop.f32.mrf.mxu3  ;;  %v4388_v53 = vadd.f32 %v4387_v49, %v4179_v48  ;;  %v6977_v48 = vld [vmem:[#allocation3 + $0x7e8] sm:$0xff] }
 0x843   : > { %v4597_v61 = vadd.f32 %v4596_v52, %v4388_v53 }
 0x845   : > { %v5614_v55 = vadd.f32 %v7981_v54, %v4597_v61  ;;  %4437 = vmatmul.f32.gmra.mxu2 %v6958_v56  ;;  %v3972_v57 = vpop.f32.mrf.mxu0 }
 0x846   : > { %v4181_v58 = vpop.f32.mrf.mxu1  ;;  %4646 = vmatmul.f32.gmra.mxu3 %v6959_v59 }
 0x847   : > { %v4182_v47 = vadd.f32 %v4181_v58, %v3972_v57  ;;  %5870 = vst [vmem:[%s7421_s11 + $0x558] sm:$0xff] %v5614_v55 }
 0x848   : > { %v4390_v60 = vpop.f32.mrf.mxu2  ;;  %4019 = vmatmul.f32.gmra.mxu0 %v6960_v62 }
 0x849   : > { %4228 = vmatmul.f32.gmra.mxu1 %v6961_v63  ;;  %v4599_v0 = vpop.f32.mrf.mxu3  ;;  %v4391_v1 = vadd.f32 %v4390_v60, %v4182_v47 }
 0x84b   : > { %v4600_v2 = vadd.f32 %v4599_v0, %v4391_v1 }
 0x84d   : > { %v5618_v3 = vadd.f32 %v7981_v54, %v4600_v2  ;;  %4440 = vmatmul.f32.gmra.mxu2 %v6962_v4  ;;  %v3975_v5 = vpop.f32.mrf.mxu0 }
 0x84e   : > { %v4184_v6 = vpop.f32.mrf.mxu1  ;;  %4649 = vmatmul.f32.gmra.mxu3 %v6963_v7 }
 0x84f   : > { %v4185_v8 = vadd.f32 %v4184_v6, %v3975_v5  ;;  %5874 = vst [vmem:[%s7421_s11 + $0x578] sm:$0xff] %v5618_v3 }
 0x850   : > { %v4393_v9 = vpop.f32.mrf.mxu2  ;;  %4022 = vmatmul.f32.gmra.mxu0 %v6964_v10 }
 0x851   : > { %4231 = vmatmul.f32.gmra.mxu1 %v6965_v11  ;;  %v4602_v12 = vpop.f32.mrf.mxu3  ;;  %v4394_v13 = vadd.f32 %v4393_v9, %v4185_v8 }
 0x853   : > { %v4603_v14 = vadd.f32 %v4602_v12, %v4394_v13 }
 0x855   : > { %v5622_v15 = vadd.f32 %v7981_v54, %v4603_v14  ;;  %4443 = vmatmul.f32.gmra.mxu2 %v6966_v16  ;;  %v3978_v17 = vpop.f32.mrf.mxu0 }
 0x856   : > { %v4187_v18 = vpop.f32.mrf.mxu1  ;;  %4652 = vmatmul.f32.gmra.mxu3 %v6967_v19 }
 0x857   : > { %v4188_v20 = vadd.f32 %v4187_v18, %v3978_v17  ;;  %5878 = vst [vmem:[%s7421_s11 + $0x598] sm:$0xff] %v5622_v15 }
 0x858   : > { %v4396_v21 = vpop.f32.mrf.mxu2  ;;  %4025 = vmatmul.f32.gmra.mxu0 %v6968_v22 }
 0x859   : > { %4234 = vmatmul.f32.gmra.mxu1 %v6969_v23  ;;  %v4605_v24 = vpop.f32.mrf.mxu3  ;;  %v4397_v25 = vadd.f32 %v4396_v21, %v4188_v20 }
 0x85b   : > { %v4606_v26 = vadd.f32 %v4605_v24, %v4397_v25 }
 0x85d   : > { %v5626_v27 = vadd.f32 %v7981_v54, %v4606_v26  ;;  %4446 = vmatmul.f32.gmra.mxu2 %v6970_v28  ;;  %v3981_v29 = vpop.f32.mrf.mxu0 }
 0x85e   : > { %v4190_v30 = vpop.f32.mrf.mxu1  ;;  %4655 = vmatmul.f32.gmra.mxu3 %v6971_v31 }
 0x85f   : > { %v4191_v32 = vadd.f32 %v4190_v30, %v3981_v29  ;;  %5882 = vst [vmem:[%s7421_s11 + $0x5b8] sm:$0xff] %v5626_v27 }
 0x860   : > { %v4399_v34 = vpop.f32.mrf.mxu2  ;;  %4028 = vmatmul.f32.gmra.mxu0 %v6972_v35 }
 0x861   : > { %4237 = vmatmul.f32.gmra.mxu1 %v6973_v36  ;;  %v4608_v37 = vpop.f32.mrf.mxu3  ;;  %v4400_v38 = vadd.f32 %v4399_v34, %v4191_v32 }
 0x863   : > { %v4609_v39 = vadd.f32 %v4608_v37, %v4400_v38 }
 0x865   : > { %v5630_v40 = vadd.f32 %v7981_v54, %v4609_v39  ;;  %4449 = vmatmul.f32.gmra.mxu2 %v6974_v41  ;;  %v3984_v42 = vpop.f32.mrf.mxu0 }
 0x866   : > { %v4193_v43 = vpop.f32.mrf.mxu1  ;;  %4658 = vmatmul.f32.gmra.mxu3 %v6975_v44 }
 0x867   : > { %v4194_v45 = vadd.f32 %v4193_v43, %v3984_v42  ;;  %5886 = vst [vmem:[%s7421_s11 + $0x5d8] sm:$0xff] %v5630_v40 }
 0x868   : > { %v4402_v33 = vpop.f32.mrf.mxu2  ;;  %4031 = vmatmul.f32.gmra.mxu0 %v6976_v46 }
 0x869   : > { %4240 = vmatmul.f32.gmra.mxu1 %v6977_v48  ;;  %v4611_v49 = vpop.f32.mrf.mxu3  ;;  %v4403_v50 = vadd.f32 %v4402_v33, %v4194_v45 }
 0x86b   : > { %v4612_v51 = vadd.f32 %v4611_v49, %v4403_v50 }
 0x86d   : > { %v5634_v52 = vadd.f32 %v7981_v54, %v4612_v51  ;;  %v3987_v53 = vpop.f32.mrf.mxu0 }
 0x86e   : > { %v4196_v61 = vpop.f32.mrf.mxu1 }
 0x86f   : > { %v4197_v55 = vadd.f32 %v4196_v61, %v3987_v53  ;;  %5890 = vst [vmem:[%s7421_s11 + $0x5f8] sm:$0xff] %v5634_v52 }
 0x870   : > { %v4405_v56 = vpop.f32.mrf.mxu2 }
 0x871   : > { %v4614_v57 = vpop.f32.mrf.mxu3  ;;  %v4406_v58 = vadd.f32 %v4405_v56, %v4197_v55 }
 0x873   : > { %v4615_v59 = vadd.f32 %v4614_v57, %v4406_v58 }
 0x875   : > { %v5638_v47 = vadd.f32 %v7981_v54, %v4615_v59  ;;  %v3990_v60 = vpop.f32.mrf.mxu0 }
 0x876   : > { %v4199_v62 = vpop.f32.mrf.mxu1 }
 0x877   : > { %v4200_v63 = vadd.f32 %v4199_v62, %v3990_v60  ;;  %5894 = vst [vmem:[%s7421_s11 + $0x618] sm:$0xff] %v5638_v47 }
 0x878   : > { %v4408_v0 = vpop.f32.mrf.mxu2 }
 0x879   : > { %v4617_v1 = vpop.f32.mrf.mxu3  ;;  %v4409_v2 = vadd.f32 %v4408_v0, %v4200_v63 }
 0x87b   : > { %v4618_v3 = vadd.f32 %v4617_v1, %v4409_v2 }
 0x87d   : > { %v5642_v4 = vadd.f32 %v7981_v54, %v4618_v3  ;;  %v3993_v5 = vpop.f32.mrf.mxu0 }
 0x87e   : > { %v4202_v6 = vpop.f32.mrf.mxu1 }
 0x87f   : > { %v4203_v7 = vadd.f32 %v4202_v6, %v3993_v5  ;;  %5898 = vst [vmem:[%s7421_s11 + $0x638] sm:$0xff] %v5642_v4 }
 0x880   : > { %v4411_v8 = vpop.f32.mrf.mxu2 }
 0x881   : > { %v4620_v9 = vpop.f32.mrf.mxu3  ;;  %v4412_v10 = vadd.f32 %v4411_v8, %v4203_v7 }
 0x883   : > { %v4621_v11 = vadd.f32 %v4620_v9, %v4412_v10 }
 0x885   : > { %v5646_v12 = vadd.f32 %v7981_v54, %v4621_v11  ;;  %v3996_v13 = vpop.f32.mrf.mxu0 }
 0x886   : > { %v4205_v14 = vpop.f32.mrf.mxu1 }
 0x887   : > { %v4206_v15 = vadd.f32 %v4205_v14, %v3996_v13  ;;  %5902 = vst [vmem:[%s7421_s11 + $0x658] sm:$0xff] %v5646_v12 }
 0x888   : > { %v4414_v16 = vpop.f32.mrf.mxu2 }
 0x889   : > { %v4623_v17 = vpop.f32.mrf.mxu3  ;;  %v4415_v18 = vadd.f32 %v4414_v16, %v4206_v15 }
 0x88b   : > { %v4624_v19 = vadd.f32 %v4623_v17, %v4415_v18 }
 0x88d   : > { %v5650_v20 = vadd.f32 %v7981_v54, %v4624_v19  ;;  %v3999_v21 = vpop.f32.mrf.mxu0 }
 0x88e   : > { %v4208_v22 = vpop.f32.mrf.mxu1 }
 0x88f   : > { %v4209_v23 = vadd.f32 %v4208_v22, %v3999_v21  ;;  %5906 = vst [vmem:[%s7421_s11 + $0x678] sm:$0xff] %v5650_v20 }
 0x890   : > { %v4417_v24 = vpop.f32.mrf.mxu2 }
 0x891   : > { %v4626_v25 = vpop.f32.mrf.mxu3  ;;  %v4418_v26 = vadd.f32 %v4417_v24, %v4209_v23 }
 0x893   : > { %v4627_v27 = vadd.f32 %v4626_v25, %v4418_v26 }
 0x895   : > { %v5654_v28 = vadd.f32 %v7981_v54, %v4627_v27  ;;  %v4002_v29 = vpop.f32.mrf.mxu0 }
 0x896   : > { %v4211_v30 = vpop.f32.mrf.mxu1 }
 0x897   : > { %v4212_v31 = vadd.f32 %v4211_v30, %v4002_v29  ;;  %5910 = vst [vmem:[%s7421_s11 + $0x698] sm:$0xff] %v5654_v28 }
 0x898   : > { %v4420_v32 = vpop.f32.mrf.mxu2 }
 0x899   : > { %v4629_v34 = vpop.f32.mrf.mxu3  ;;  %v4421_v35 = vadd.f32 %v4420_v32, %v4212_v31 }
 0x89b   : > { %v4630_v36 = vadd.f32 %v4629_v34, %v4421_v35 }
 0x89d   : > { %v5658_v37 = vadd.f32 %v7981_v54, %v4630_v36  ;;  %v4005_v38 = vpop.f32.mrf.mxu0 }
 0x89e   : > { %v4214_v39 = vpop.f32.mrf.mxu1 }
 0x89f   : > { %v4215_v40 = vadd.f32 %v4214_v39, %v4005_v38  ;;  %5914 = vst [vmem:[%s7421_s11 + $0x6b8] sm:$0xff] %v5658_v37 }
 0x8a0   : > { %v4423_v41 = vpop.f32.mrf.mxu2 }
 0x8a1   : > { %v4632_v42 = vpop.f32.mrf.mxu3  ;;  %v4424_v43 = vadd.f32 %v4423_v41, %v4215_v40 }
 0x8a3   : > { %v4633_v44 = vadd.f32 %v4632_v42, %v4424_v43 }
 0x8a5   : > { %v5662_v45 = vadd.f32 %v7981_v54, %v4633_v44  ;;  %v4008_v33 = vpop.f32.mrf.mxu0 }
 0x8a6   : > { %v4217_v46 = vpop.f32.mrf.mxu1 }
 0x8a7   : > { %v4218_v48 = vadd.f32 %v4217_v46, %v4008_v33  ;;  %5918 = vst [vmem:[%s7421_s11 + $0x6d8] sm:$0xff] %v5662_v45 }
 0x8a8   : > { %v4426_v49 = vpop.f32.mrf.mxu2 }
 0x8a9   : > { %v4635_v50 = vpop.f32.mrf.mxu3  ;;  %v4427_v51 = vadd.f32 %v4426_v49, %v4218_v48 }
 0x8ab   : > { %v4636_v52 = vadd.f32 %v4635_v50, %v4427_v51 }
 0x8ad   : > { %v5666_v53 = vadd.f32 %v7981_v54, %v4636_v52  ;;  %v4011_v61 = vpop.f32.mrf.mxu0 }
 0x8ae   : > { %v4220_v55 = vpop.f32.mrf.mxu1 }
 0x8af   : > { %v4221_v56 = vadd.f32 %v4220_v55, %v4011_v61  ;;  %5922 = vst [vmem:[%s7421_s11 + $0x6f8] sm:$0xff] %v5666_v53 }
 0x8b0   : > { %v4429_v57 = vpop.f32.mrf.mxu2 }
 0x8b1   : > { %v4638_v58 = vpop.f32.mrf.mxu3  ;;  %v4430_v59 = vadd.f32 %v4429_v57, %v4221_v56 }
 0x8b3   : > { %v4639_v47 = vadd.f32 %v4638_v58, %v4430_v59 }
 0x8b5   : > { %v5670_v60 = vadd.f32 %v7981_v54, %v4639_v47  ;;  %v4014_v62 = vpop.f32.mrf.mxu0 }
 0x8b6   : > { %v4223_v63 = vpop.f32.mrf.mxu1 }
 0x8b7   : > { %v4224_v0 = vadd.f32 %v4223_v63, %v4014_v62  ;;  %5926 = vst [vmem:[%s7421_s11 + $0x718] sm:$0xff] %v5670_v60 }
 0x8b8   : > { %v4432_v1 = vpop.f32.mrf.mxu2 }
 0x8b9   : > { %v4641_v2 = vpop.f32.mrf.mxu3  ;;  %v4433_v3 = vadd.f32 %v4432_v1, %v4224_v0 }
 0x8bb   : > { %v4642_v4 = vadd.f32 %v4641_v2, %v4433_v3 }
 0x8bd   : > { %v5674_v5 = vadd.f32 %v7981_v54, %v4642_v4  ;;  %v4017_v6 = vpop.f32.mrf.mxu0 }
 0x8be   : > { %v4226_v7 = vpop.f32.mrf.mxu1 }
 0x8bf   : > { %v4227_v8 = vadd.f32 %v4226_v7, %v4017_v6  ;;  %5930 = vst [vmem:[%s7421_s11 + $0x738] sm:$0xff] %v5674_v5 }
 0x8c0   : > { %v4435_v9 = vpop.f32.mrf.mxu2 }
 0x8c1   : > { %v4644_v10 = vpop.f32.mrf.mxu3  ;;  %v4436_v11 = vadd.f32 %v4435_v9, %v4227_v8 }
 0x8c3   : > { %v4645_v12 = vadd.f32 %v4644_v10, %v4436_v11 }
 0x8c5   : > { %v5678_v13 = vadd.f32 %v7981_v54, %v4645_v12  ;;  %v4020_v14 = vpop.f32.mrf.mxu0 }
 0x8c6   : > { %v4229_v15 = vpop.f32.mrf.mxu1 }
 0x8c7   : > { %v4230_v16 = vadd.f32 %v4229_v15, %v4020_v14  ;;  %5934 = vst [vmem:[%s7421_s11 + $0x758] sm:$0xff] %v5678_v13 }
 0x8c8   : > { %v4438_v17 = vpop.f32.mrf.mxu2 }
 0x8c9   : > { %v4647_v18 = vpop.f32.mrf.mxu3  ;;  %v4439_v19 = vadd.f32 %v4438_v17, %v4230_v16 }
 0x8cb   : > { %v4648_v20 = vadd.f32 %v4647_v18, %v4439_v19 }
 0x8cd   : > { %v5682_v21 = vadd.f32 %v7981_v54, %v4648_v20  ;;  %v4023_v22 = vpop.f32.mrf.mxu0 }
 0x8ce   : > { %v4232_v23 = vpop.f32.mrf.mxu1 }
 0x8cf   : > { %v4233_v24 = vadd.f32 %v4232_v23, %v4023_v22  ;;  %5938 = vst [vmem:[%s7421_s11 + $0x778] sm:$0xff] %v5682_v21 }
 0x8d0   : > { %v4441_v25 = vpop.f32.mrf.mxu2 }
 0x8d1   : > { %v4650_v26 = vpop.f32.mrf.mxu3  ;;  %v4442_v27 = vadd.f32 %v4441_v25, %v4233_v24 }
 0x8d3   : > { %v4651_v28 = vadd.f32 %v4650_v26, %v4442_v27 }
 0x8d5   : > { %v5686_v29 = vadd.f32 %v7981_v54, %v4651_v28  ;;  %v4026_v30 = vpop.f32.mrf.mxu0 }
 0x8d6   : > { %v4235_v31 = vpop.f32.mrf.mxu1 }
 0x8d7   : > { %v4236_v32 = vadd.f32 %v4235_v31, %v4026_v30  ;;  %5942 = vst [vmem:[%s7421_s11 + $0x798] sm:$0xff] %v5686_v29 }
 0x8d8   : > { %v4444_v34 = vpop.f32.mrf.mxu2 }
 0x8d9   : > { %v4653_v35 = vpop.f32.mrf.mxu3  ;;  %v4445_v36 = vadd.f32 %v4444_v34, %v4236_v32 }
 0x8db   : > { %v4654_v37 = vadd.f32 %v4653_v35, %v4445_v36 }
 0x8dd   : > { %v5690_v38 = vadd.f32 %v7981_v54, %v4654_v37  ;;  %v4029_v39 = vpop.f32.mrf.mxu0 }
 0x8de   : > { %v4238_v40 = vpop.f32.mrf.mxu1 }
 0x8df   : > { %v4239_v41 = vadd.f32 %v4238_v40, %v4029_v39  ;;  %5946 = vst [vmem:[%s7421_s11 + $0x7b8] sm:$0xff] %v5690_v38 }
 0x8e0   : > { %v4447_v42 = vpop.f32.mrf.mxu2 }
 0x8e1   : > { %v4656_v43 = vpop.f32.mrf.mxu3  ;;  %v4448_v44 = vadd.f32 %v4447_v42, %v4239_v41 }
 0x8e3   : > { %v4657_v45 = vadd.f32 %v4656_v43, %v4448_v44 }
 0x8e5   : > { %v5694_v33 = vadd.f32 %v7981_v54, %v4657_v45  ;;  %v4032_v46 = vpop.f32.mrf.mxu0 }
 0x8e6   : > { %v4241_v48 = vpop.f32.mrf.mxu1 }
 0x8e7   : > { %v4242_v49 = vadd.f32 %v4241_v48, %v4032_v46  ;;  %5950 = vst [vmem:[%s7421_s11 + $0x7d8] sm:$0xff] %v5694_v33 }
 0x8e8   : > { %v4450_v50 = vpop.f32.mrf.mxu2 }
 0x8e9   : > { %v4659_v51 = vpop.f32.mrf.mxu3  ;;  %v4451_v52 = vadd.f32 %v4450_v50, %v4242_v49 }
 0x8eb   : > { %v4660_v53 = vadd.f32 %v4659_v51, %v4451_v52 }
 0x8ed   : > { %v5698_v61 = vadd.f32 %v7981_v54, %v4660_v53 }
 0x8ef   : > { %5954 = vst [vmem:[%s7421_s11 + $0x7f8] sm:$0xff] %v5698_v61 }
 0x8f0   : > { %7095 = shalt.err (!%p7092_p13)
}
 0x8f1   : > { %s7160_s9 = smov 512   ;;  %s7161_s1 = smov 1024  }
 0x8f2   : > { %s7162_s6 = smov 32  }
 0x8f3   : > { %6131 = dma.vmem_to_hbm [thread:$0]  (%p7273_p0), %s5972_s30, 32768, %s5974_s4, %s5956_s15, %s7160_s9, %s7161_s1, %s7162_s6  }
 0x8f4 PF: > { %s5988_s7 = sand.u32 1, %s7134_s12   ;;  %p6145_p3 = pnand %p6105_p4, %p7277_p2 }
 0x8f5   : > { %s5989_s10 = scalar_lea.sflag [#allocation5], %s5988_s7 }
 0x8f6   : > { %p6146_p5 = pneg %p6145_p3 }
 0x8f8   : > { %7129 = dma.done.wait (%p6146_p5), %s5989_s10, 32768  }
 0x8f9   : > { %7131 = vsyncadd (%p6146_p5), %s5989_s10, 4294934528  ;;  %s20_s17 = sadd.s32 1, %s7154_s17   ;;  %s8168_s12 = smov %s7138_s13 }
 0x8fa   : > { %p17_p1 = scmp.ge.s32.totalorder %s20_s17, 4   ;;  %s8169_s13 = smov %s7142_s14 }
 0x8fb   : > { %s8170_s14 = smov %s7234_s24  ;;  %s8171_s15 = smov %s7150_s16 }
 0x8fc   : > { %s8172_s16 = smov %s8174_s18  ;;  %19 = sbr.rel (!%p17_p1) target bundleno = 10 (0xa), region = 102 }
 0x901   :  { %5995 = vsyncpa [#allocation4], 1 }
 0x902   :  { %5997 = vsyncpa [#allocation4 + $0x1], 1 }
 0x903   :  { %5998 = vsyncpa [#allocation7], 1 }
 0x904   :  { %6000 = vsyncpa [#allocation7 + $0x1], 1 }
 0x905   :  { %6001 = vsyncpa [#allocation5], 1 }
 0x906   :  { %6003 = vsyncpa [#allocation5 + $0x1], 1 }

</bundles_post_ra>
